<compile_context>
chip_gen: v5e
topology: v5e:2x2
jax: 0.10.0
libtpu: 0.0.40
codegen_flags: <defaults>
</compile_context>

<pallas_src>
import functools

import jax
import jax.numpy as jnp
from jax.experimental import pallas as pl
from jax.experimental.pallas import tpu as pltpu

LEAKY_SLOPE = 0.01   # PyTorch nn.LeakyReLU() default
BN_EPS = 1e-5        # PyTorch BatchNorm default eps
N_GAUSSIANS = 3

# (kernel_size, stride) for the 5 conv layers of PilotNet
CONV_CFG = ((5, 2), (5, 2), (5, 2), (3, 1), (3, 1))
CONV_CHANNELS = ((3, 24), (24, 36), (36, 48), (48, 64), (64, 64))


def _round_up(x, m):
    return (x + m - 1) // m * m


def _m_tiling(M):
    """Adaptive M tiling: single block for small M; ~1-2K row tiles with at
    least 2 blocks (v7x megacore) for the big im2col matmuls."""
    Ms = _round_up(M, 16)                       # bf16 sublane-pack friendly
    if Ms <= 1024:
        return Ms, 1
    nblk = max(-(-Ms // 2048), 2)
    tm = _round_up(-(-Ms // nblk), 128)
    nblk = -(-Ms // tm)
    return tm, nblk


# ----------------------------------------------------------------------------
# Pallas kernel 1: Y = act(X @ W + b)  -- used by every conv via patch matmul.
# bf16 operands, f32 accumulation, f32 epilogue, bf16 (or f32) store.
# ----------------------------------------------------------------------------
def _matmul_bias_act_kernel(x_ref, w_ref, b_ref, o_ref, *, act):
    acc = jnp.dot(x_ref[...], w_ref[...], preferred_element_type=jnp.float32)
    acc = acc + b_ref[...]                       # (1, N) broadcasts over rows
    if act == "leaky_relu":
        acc = jnp.where(acc >= 0, acc, LEAKY_SLOPE * acc)
    o_ref[...] = acc.astype(o_ref.dtype)


def matmul_bias_act(x, w, b, act="none", out_dtype=jnp.bfloat16):
    """x: (M, K), w: (K, N), b: (N,) -> (M, N) in out_dtype."""
    M, K = x.shape
    _, N = w.shape
    Np = _round_up(N, 128)                       # never below 128 lanes
    tm, nblk = _m_tiling(M)
    Mp = tm * nblk

    xp = x.astype(jnp.bfloat16)
    if Mp != M:
        xp = jnp.pad(xp, ((0, Mp - M), (0, 0)))
    wp = w.astype(jnp.bfloat16)
    if Np != N:
        wp = jnp.pad(wp, ((0, 0), (0, Np - N)))
    bp = jnp.pad(b.astype(jnp.float32), (0, Np - N)).reshape(1, Np)

    out = pl.pallas_call(
        functools.partial(_matmul_bias_act_kernel, act=act),
        out_shape=jax.ShapeDtypeStruct((Mp, Np), out_dtype),
        grid=(nblk,),
        in_specs=[
            pl.BlockSpec((tm, K), lambda i: (i, 0)),    # K = full dim, no HBM pad
            pl.BlockSpec((K, Np), lambda i: (0, 0)),
            pl.BlockSpec((1, Np), lambda i: (0, 0)),
        ],
        out_specs=pl.BlockSpec((tm, Np), lambda i: (i, 0)),
        compiler_params=pltpu.CompilerParams(dimension_semantics=("parallel",)),
    )(xp, wp, bp)
    return out[:M, :N]


# ----------------------------------------------------------------------------
# Pallas kernel 2: fused FC tail + MDN head
#   h -> fc1(BN,LeakyReLU) -> fc2(BN,LeakyReLU) -> fc3(tanh) -> [pi|sigma|mu]
# All weights (~0.5 MB bf16) live in VMEM; one pallas_call, 4 MXU passes.
# ----------------------------------------------------------------------------
def _fc_mdn_kernel(h_ref, w1_ref, b1_ref, w2_ref, b2_ref, w3_ref, b3_ref,
                   wm_ref, bm_ref, pi_ref, sg_ref, mu_ref, *, n_gaussians, gp):
    def leaky(a):
        return jnp.where(a >= 0, a, LEAKY_SLOPE * a)

    a = jnp.dot(h_ref[...], w1_ref[...], preferred_element_type=jnp.float32)
    a = leaky(a + b1_ref[...])
    a = jnp.dot(a.astype(w2_ref.dtype), w2_ref[...],
                preferred_element_type=jnp.float32)
    a = leaky(a + b2_ref[...])
    a = jnp.dot(a.astype(w3_ref.dtype), w3_ref[...],
                preferred_element_type=jnp.float32)
    a = jnp.tanh(a + b3_ref[...])
    z = jnp.dot(a.astype(wm_ref.dtype), wm_ref[...],
                preferred_element_type=jnp.float32) + bm_ref[...]

    # pi: masked softmax over the first n_gaussians lanes of segment 0
    logits = z[:, :gp]
    col = jax.lax.broadcasted_iota(jnp.int32, logits.shape, 1)
    valid = col < n_gaussians
    logits = jnp.where(valid, logits, -1e30)
    m = jnp.max(logits, axis=-1, keepdims=True)
    e = jnp.where(valid, jnp.exp(logits - m), 0.0)
    pi_ref[...] = e / jnp.sum(e, axis=-1, keepdims=True)

    sg_ref[...] = jnp.exp(z[:, gp:2 * gp])        # sigma segment
    mu_ref[...] = z[:, 2 * gp:3 * gp]             # mu segment


def fc_mdn_head(h, fc1, fc2, fc3, mdn_params, n_gaussians):
    """h: (B, 1664) bf16/f32 -> (pi, sigma, mu), each (B, n_gaussians)."""
    B, K = h.shape
    Bp = _round_up(B, 16)
    GP = 128
    N1 = N2 = N3 = 128

    w1, b1, bn1 = fc1
    w2, b2, bn2 = fc2
    w3, b3 = fc3
    wpi, bpi, ws, bs, wm, bm = mdn_params

    w1f, b1f = _fold_bn(w1, b1, bn1)              # (1664, 100)
    w2f, b2f = _fold_bn(w2, b2, bn2)              # (100, 50)

    def pad_w(w, rp, cp):
        r, c = w.shape
        return jnp.pad(w.astype(jnp.bfloat16), ((0, rp - r), (0, cp - c)))

    def pad_b(b, cp):
        return jnp.pad(b.astype(jnp.float32), (0, cp - b.shape[0])).reshape(1, cp)

    w1p, b1p = pad_w(w1f, K, N1), pad_b(b1f, N1)
    w2p, b2p = pad_w(w2f, N1, N2), pad_b(b2f, N2)
    w3p, b3p = pad_w(w3, N2, N3), pad_b(b3, N3)
    # concatenate the three MDN linears into one (128, 384) weight
    wmdn = jnp.concatenate(
        [pad_w(wpi, N3, GP), pad_w(ws, N3, GP), pad_w(wm, N3, GP)], axis=1)
    bmdn = jnp.concatenate([pad_b(bpi, GP), pad_b(bs, GP), pad_b(bm, GP)], axis=1)

    hp = jnp.pad(h.astype(jnp.bfloat16), ((0, Bp - B), (0, 0)))

    full = lambda r, c: pl.BlockSpec((r, c), lambda i: (0, 0))
    pi, sigma, mu = pl.pallas_call(
        functools.partial(_fc_mdn_kernel, n_gaussians=n_gaussians, gp=GP),
        out_shape=(jax.ShapeDtypeStruct((Bp, GP), jnp.float32),) * 3,
        grid=(1,),
        in_specs=[
            full(Bp, K),
            full(K, N1), full(1, N1),
            full(N1, N2), full(1, N2),
            full(N2, N3), full(1, N3),
            full(N3, 3 * GP), full(1, 3 * GP),
        ],
        out_specs=(full(Bp, GP), full(Bp, GP), full(Bp, GP)),
    )(hp, w1p, b1p, w2p, b2p, w3p, b3p, wmdn, bmdn)
    G = n_gaussians
    return pi[:B, :G], sigma[:B, :G], mu[:B, :G]


# ----------------------------------------------------------------------------
# Layer glue: patch extraction, BatchNorm folding
# ----------------------------------------------------------------------------
def _fold_bn(w2d, b, bn):
    """Fold eval-mode BatchNorm (gamma, beta, mean, var) into weight/bias."""
    gamma, beta, mean, var = bn
    s = gamma / jnp.sqrt(var + BN_EPS)
    return w2d * s[None, :], (b - mean) * s + beta


def conv_bn_lrelu(x, w_hwio, b, bn, stride):
    """x: (B, H, W, Cin) bf16 -> (B, OH, OW, Cout) bf16."""
    k = w_hwio.shape[0]
    cout = w_hwio.shape[-1]
    # conv_general_dilated_patches orders the patch features as (cin, kh, kw)
    w2d = jnp.transpose(w_hwio, (2, 0, 1, 3)).reshape(-1, cout)
    w2d, b2 = _fold_bn(w2d, b, bn)
    patches = jax.lax.conv_general_dilated_patches(
        x, (k, k), (stride, stride), "VALID",
        dimension_numbers=("NHWC", "HWIO", "NHWC"))
    B, OH, OW, K = patches.shape
    cols = patches.reshape(B * OH * OW, K)
    y = matmul_bias_act(cols, w2d, b2, act="leaky_relu", out_dtype=jnp.bfloat16)
    return y.reshape(B, OH, OW, cout)


# ----------------------------------------------------------------------------
# Full forward pass
# ----------------------------------------------------------------------------
def pilotnet_mdn_forward(params, x, *, n_gaussians=N_GAUSSIANS):
    # x: NCHW (B, 3, 68, 264) like the PyTorch module.
    h = jnp.transpose(x, (0, 2, 3, 1)).astype(jnp.bfloat16)   # NHWC bf16
    for (k, s), (w, b, bn) in zip(CONV_CFG, params["convs"]):
        h = conv_bn_lrelu(h, w, b, bn, s)

    # nn.Flatten() on an NCHW tensor => flatten in (C, H, W) order.
    B, OH, OW, C = h.shape
    h = jnp.transpose(h, (0, 3, 1, 2)).reshape(B, C * OH * OW)   # (B, 1664)

    pi, sigma, mu = fc_mdn_head(h, params["fc1"], params["fc2"], params["fc3"],
                                params["mdn"], n_gaussians)
    return pi, sigma.reshape(B, n_gaussians, 1), mu.reshape(B, n_gaussians, 1)


# ----------------------------------------------------------------------------
# Deterministic synthetic parameter initialization
# ----------------------------------------------------------------------------
def init_params(key, n_gaussians=N_GAUSSIANS):
    keys = iter(jax.random.split(key, 64))

    def winit(shape, scale=0.05):
        return scale * jax.random.normal(next(keys), shape, dtype=jnp.float32)

    def bn_init(c):
        gamma = 1.0 + 0.1 * jax.random.normal(next(keys), (c,), dtype=jnp.float32)
        beta = 0.1 * jax.random.normal(next(keys), (c,), dtype=jnp.float32)
        mean = 0.1 * jax.random.normal(next(keys), (c,), dtype=jnp.float32)
        var = 1.0 + 0.1 * jnp.abs(jax.random.normal(next(keys), (c,), dtype=jnp.float32))
        return (gamma, beta, mean, var)

    convs = []
    for (k, _), (cin, cout) in zip(CONV_CFG, CONV_CHANNELS):
        convs.append((winit((k, k, cin, cout)), winit((cout,)), bn_init(cout)))

    params = {
        "convs": convs,
        "fc1": (winit((1664, 100)), winit((100,)), bn_init(100)),
        "fc2": (winit((100, 50)), winit((50,)), bn_init(50)),
        "fc3": (winit((50, 10)), winit((10,))),
        "mdn": (winit((10, n_gaussians)), winit((n_gaussians,)),     # pi
                winit((10, n_gaussians)), winit((n_gaussians,)),     # sigma
                winit((10, n_gaussians)), winit((n_gaussians,))),    # mu
    }
    return params


if __name__ == "__main__":
    key = jax.random.PRNGKey(0)
    pkey, xkey = jax.random.split(key)
    params = init_params(pkey, n_gaussians=N_GAUSSIANS)

    # Input size implied by Linear(1664, 100): (B, 3, 68, 264) -> 64*1*26 = 1664
    x = jax.random.normal(xkey, (2, 3, 68, 264), dtype=jnp.float32)

    fwd = jax.jit(functools.partial(pilotnet_mdn_forward, n_gaussians=N_GAUSSIANS))
    pi, sigma, mu = fwd(params, x)
    jax.block_until_ready((pi, sigma, mu))

    assert pi.shape == (2, N_GAUSSIANS)
    assert sigma.shape == (2, N_GAUSSIANS, 1)
    assert mu.shape == (2, N_GAUSSIANS, 1)
    assert bool(jnp.all(jnp.isfinite(pi))) and bool(jnp.all(sigma > 0))
    assert bool(jnp.allclose(jnp.sum(pi, axis=-1), 1.0, atol=1e-5))
    print("KERNEL_OK")
</pallas_src>

<mosaic_0001>
module attributes {stable_mosaic.version = 11 : i64} {
  func.func @_matmul_bias_act_kernel(%arg0: i32, %arg1: memref<1664x75xbf16, #tpu.memory_space<vmem>>, %arg2: memref<75x128xbf16, #tpu.memory_space<vmem>>, %arg3: memref<1x128xf32, #tpu.memory_space<vmem>>, %arg4: memref<1664x128xbf16, #tpu.memory_space<vmem>>) attributes {dimension_semantics = [#tpu.dimension_semantics<parallel>], iteration_bounds = array<i64: 5>, scalar_prefetch = 0 : i64, scratch_operands = 0 : i64, tpu.core_type = #tpu.core_type<tc>, window_params = [{transform_indices = @transform_0, window_bounds = array<i64: 1664, 75>}, {pipeline_mode = #tpu.pipeline_mode<synchronous>, transform_indices = @transform_1, window_bounds = array<i64: 75, 128>}, {pipeline_mode = #tpu.pipeline_mode<synchronous>, transform_indices = @transform_2, window_bounds = array<i64: 1, 128>}, {transform_indices = @transform_3, window_bounds = array<i64: 1664, 128>}]} {
    %c0 = arith.constant 0 : index
    %c0_0 = arith.constant 0 : index
    %0 = vector.load %arg1[%c0, %c0_0] : memref<1664x75xbf16, #tpu.memory_space<vmem>>, vector<1664x75xbf16>
    %c0_1 = arith.constant 0 : index
    %c0_2 = arith.constant 0 : index
    %1 = vector.load %arg2[%c0_1, %c0_2] : memref<75x128xbf16, #tpu.memory_space<vmem>>, vector<75x128xbf16>
    %cst = arith.constant dense<0.000000e+00> : vector<1664x128xf32>
    %2 = tpu.matmul %0, %1, %cst {dimension_numbers = #tpu.dot_dimension_numbers<[1], [0], [0], [1], [0, 0, 1, 1], [], []>} : vector<1664x75xbf16>, vector<75x128xbf16>, vector<1664x128xf32> -> vector<1664x128xf32>
    %c0_3 = arith.constant 0 : index
    %c0_4 = arith.constant 0 : index
    %3 = vector.load %arg3[%c0_3, %c0_4] : memref<1x128xf32, #tpu.memory_space<vmem>>, vector<1x128xf32>
    %4 = vector.broadcast %3 : vector<1x128xf32> to vector<1664x128xf32>
    %5 = arith.addf %2, %4 : vector<1664x128xf32>
    %cst_5 = arith.constant 0.000000e+00 : f32
    %6 = vector.broadcast %cst_5 : f32 to vector<1664x128xf32>
    %7 = arith.cmpf oge, %5, %6 : vector<1664x128xf32>
    %cst_6 = arith.constant 0.00999999977 : f32
    %8 = vector.broadcast %cst_6 : f32 to vector<1664x128xf32>
    %9 = arith.mulf %8, %5 : vector<1664x128xf32>
    %10 = arith.select %7, %5, %9 : vector<1664x128xi1>, vector<1664x128xf32>
    %11 = arith.truncf %10 : vector<1664x128xf32> to vector<1664x128xbf16>
    %c0_7 = arith.constant 0 : index
    %c0_8 = arith.constant 0 : index
    %12 = vector.load %arg4[%c0_7, %c0_8] : memref<1664x128xbf16, #tpu.memory_space<vmem>>, vector<1664x128xbf16>
    tpu.vector_store %arg4[%c0_7, %c0_8], %11 {strides = array<i32>} : memref<1664x128xbf16, #tpu.memory_space<vmem>>, vector<1664x128xbf16>,
    return
  }
  func.func @transform_0(%arg0: i32) -> (i32, i32) {
    %c0_i32 = arith.constant 0 : i32
    %c0_i32_0 = arith.constant 0 : i32
    return %arg0, %c0_i32 : i32, i32
  }
  func.func @transform_1(%arg0: i32) -> (i32, i32) {
    %c0_i32 = arith.constant 0 : i32
    %c0_i32_0 = arith.constant 0 : i32
    %c0_i32_1 = arith.constant 0 : i32
    return %c0_i32, %c0_i32_0 : i32, i32
  }
  func.func @transform_2(%arg0: i32) -> (i32, i32) {
    %c0_i32 = arith.constant 0 : i32
    %c0_i32_0 = arith.constant 0 : i32
    %c0_i32_1 = arith.constant 0 : i32
    return %c0_i32, %c0_i32_0 : i32, i32
  }
  func.func @transform_3(%arg0: i32) -> (i32, i32) {
    %c0_i32 = arith.constant 0 : i32
    %c0_i32_0 = arith.constant 0 : i32
    return %arg0, %c0_i32 : i32, i32
  }
}

module attributes {stable_mosaic.version = 11 : i64} {
  func.func @_matmul_bias_act_kernel(%arg0: i32, %arg1: memref<896x600xbf16, #tpu.memory_space<vmem>>, %arg2: memref<600x128xbf16, #tpu.memory_space<vmem>>, %arg3: memref<1x128xf32, #tpu.memory_space<vmem>>, %arg4: memref<896x128xbf16, #tpu.memory_space<vmem>>) attributes {dimension_semantics = [#tpu.dimension_semantics<parallel>], iteration_bounds = array<i64: 2>, scalar_prefetch = 0 : i64, scratch_operands = 0 : i64, tpu.core_type = #tpu.core_type<tc>, window_params = [{transform_indices = @transform_0, window_bounds = array<i64: 896, 600>}, {pipeline_mode = #tpu.pipeline_mode<synchronous>, transform_indices = @transform_1, window_bounds = array<i64: 600, 128>}, {pipeline_mode = #tpu.pipeline_mode<synchronous>, transform_indices = @transform_2, window_bounds = array<i64: 1, 128>}, {transform_indices = @transform_3, window_bounds = array<i64: 896, 128>}]} {
    %c0 = arith.constant 0 : index
    %c0_0 = arith.constant 0 : index
    %0 = vector.load %arg1[%c0, %c0_0] : memref<896x600xbf16, #tpu.memory_space<vmem>>, vector<896x600xbf16>
    %c0_1 = arith.constant 0 : index
    %c0_2 = arith.constant 0 : index
    %1 = vector.load %arg2[%c0_1, %c0_2] : memref<600x128xbf16, #tpu.memory_space<vmem>>, vector<600x128xbf16>
    %cst = arith.constant dense<0.000000e+00> : vector<896x128xf32>
    %2 = tpu.matmul %0, %1, %cst {dimension_numbers = #tpu.dot_dimension_numbers<[1], [0], [0], [1], [0, 0, 1, 1], [], []>} : vector<896x600xbf16>, vector<600x128xbf16>, vector<896x128xf32> -> vector<896x128xf32>
    %c0_3 = arith.constant 0 : index
    %c0_4 = arith.constant 0 : index
    %3 = vector.load %arg3[%c0_3, %c0_4] : memref<1x128xf32, #tpu.memory_space<vmem>>, vector<1x128xf32>
    %4 = vector.broadcast %3 : vector<1x128xf32> to vector<896x128xf32>
    %5 = arith.addf %2, %4 : vector<896x128xf32>
    %cst_5 = arith.constant 0.000000e+00 : f32
    %6 = vector.broadcast %cst_5 : f32 to vector<896x128xf32>
    %7 = arith.cmpf oge, %5, %6 : vector<896x128xf32>
    %cst_6 = arith.constant 0.00999999977 : f32
    %8 = vector.broadcast %cst_6 : f32 to vector<896x128xf32>
    %9 = arith.mulf %8, %5 : vector<896x128xf32>
    %10 = arith.select %7, %5, %9 : vector<896x128xi1>, vector<896x128xf32>
    %11 = arith.truncf %10 : vector<896x128xf32> to vector<896x128xbf16>
    %c0_7 = arith.constant 0 : index
    %c0_8 = arith.constant 0 : index
    %12 = vector.load %arg4[%c0_7, %c0_8] : memref<896x128xbf16, #tpu.memory_space<vmem>>, vector<896x128xbf16>
    tpu.vector_store %arg4[%c0_7, %c0_8], %11 {strides = array<i32>} : memref<896x128xbf16, #tpu.memory_space<vmem>>, vector<896x128xbf16>,
    return
  }
  func.func @transform_0(%arg0: i32) -> (i32, i32) {
    %c0_i32 = arith.constant 0 : i32
    %c0_i32_0 = arith.constant 0 : i32
    return %arg0, %c0_i32 : i32, i32
  }
  func.func @transform_1(%arg0: i32) -> (i32, i32) {
    %c0_i32 = arith.constant 0 : i32
    %c0_i32_0 = arith.constant 0 : i32
    %c0_i32_1 = arith.constant 0 : i32
    return %c0_i32, %c0_i32_0 : i32, i32
  }
  func.func @transform_2(%arg0: i32) -> (i32, i32) {
    %c0_i32 = arith.constant 0 : i32
    %c0_i32_0 = arith.constant 0 : i32
    %c0_i32_1 = arith.constant 0 : i32
    return %c0_i32, %c0_i32_0 : i32, i32
  }
  func.func @transform_3(%arg0: i32) -> (i32, i32) {
    %c0_i32 = arith.constant 0 : i32
    %c0_i32_0 = arith.constant 0 : i32
    return %arg0, %c0_i32 : i32, i32
  }
}

module attributes {stable_mosaic.version = 11 : i64} {
  func.func @_matmul_bias_act_kernel(%arg0: i32, %arg1: memref<304x900xbf16, #tpu.memory_space<vmem>>, %arg2: memref<900x128xbf16, #tpu.memory_space<vmem>>, %arg3: memref<1x128xf32, #tpu.memory_space<vmem>>, %arg4: memref<304x128xbf16, #tpu.memory_space<vmem>>) attributes {dimension_semantics = [#tpu.dimension_semantics<parallel>], iteration_bounds = array<i64: 1>, scalar_prefetch = 0 : i64, scratch_operands = 0 : i64, tpu.core_type = #tpu.core_type<tc>, window_params = [{transform_indices = @transform_0, window_bounds = array<i64: 304, 900>}, {pipeline_mode = #tpu.pipeline_mode<synchronous>, transform_indices = @transform_1, window_bounds = array<i64: 900, 128>}, {pipeline_mode = #tpu.pipeline_mode<synchronous>, transform_indices = @transform_2, window_bounds = array<i64: 1, 128>}, {transform_indices = @transform_3, window_bounds = array<i64: 304, 128>}]} {
    %c0 = arith.constant 0 : index
    %c0_0 = arith.constant 0 : index
    %0 = vector.load %arg1[%c0, %c0_0] : memref<304x900xbf16, #tpu.memory_space<vmem>>, vector<304x900xbf16>
    %c0_1 = arith.constant 0 : index
    %c0_2 = arith.constant 0 : index
    %1 = vector.load %arg2[%c0_1, %c0_2] : memref<900x128xbf16, #tpu.memory_space<vmem>>, vector<900x128xbf16>
    %cst = arith.constant dense<0.000000e+00> : vector<304x128xf32>
    %2 = tpu.matmul %0, %1, %cst {dimension_numbers = #tpu.dot_dimension_numbers<[1], [0], [0], [1], [0, 0, 1, 1], [], []>} : vector<304x900xbf16>, vector<900x128xbf16>, vector<304x128xf32> -> vector<304x128xf32>
    %c0_3 = arith.constant 0 : index
    %c0_4 = arith.constant 0 : index
    %3 = vector.load %arg3[%c0_3, %c0_4] : memref<1x128xf32, #tpu.memory_space<vmem>>, vector<1x128xf32>
    %4 = vector.broadcast %3 : vector<1x128xf32> to vector<304x128xf32>
    %5 = arith.addf %2, %4 : vector<304x128xf32>
    %cst_5 = arith.constant 0.000000e+00 : f32
    %6 = vector.broadcast %cst_5 : f32 to vector<304x128xf32>
    %7 = arith.cmpf oge, %5, %6 : vector<304x128xf32>
    %cst_6 = arith.constant 0.00999999977 : f32
    %8 = vector.broadcast %cst_6 : f32 to vector<304x128xf32>
    %9 = arith.mulf %8, %5 : vector<304x128xf32>
    %10 = arith.select %7, %5, %9 : vector<304x128xi1>, vector<304x128xf32>
    %11 = arith.truncf %10 : vector<304x128xf32> to vector<304x128xbf16>
    %c0_7 = arith.constant 0 : index
    %c0_8 = arith.constant 0 : index
    %12 = vector.load %arg4[%c0_7, %c0_8] : memref<304x128xbf16, #tpu.memory_space<vmem>>, vector<304x128xbf16>
    tpu.vector_store %arg4[%c0_7, %c0_8], %11 {strides = array<i32>} : memref<304x128xbf16, #tpu.memory_space<vmem>>, vector<304x128xbf16>,
    return
  }
  func.func @transform_0(%arg0: i32) -> (i32, i32) {
    %c0_i32 = arith.constant 0 : i32
    %c0_i32_0 = arith.constant 0 : i32
    return %arg0, %c0_i32 : i32, i32
  }
  func.func @transform_1(%arg0: i32) -> (i32, i32) {
    %c0_i32 = arith.constant 0 : i32
    %c0_i32_0 = arith.constant 0 : i32
    %c0_i32_1 = arith.constant 0 : i32
    return %c0_i32, %c0_i32_0 : i32, i32
  }
  func.func @transform_2(%arg0: i32) -> (i32, i32) {
    %c0_i32 = arith.constant 0 : i32
    %c0_i32_0 = arith.constant 0 : i32
    %c0_i32_1 = arith.constant 0 : i32
    return %c0_i32, %c0_i32_0 : i32, i32
  }
  func.func @transform_3(%arg0: i32) -> (i32, i32) {
    %c0_i32 = arith.constant 0 : i32
    %c0_i32_0 = arith.constant 0 : i32
    return %arg0, %c0_i32 : i32, i32
  }
}

module attributes {stable_mosaic.version = 11 : i64} {
  func.func @_matmul_bias_act_kernel(%arg0: i32, %arg1: memref<176x432xbf16, #tpu.memory_space<vmem>>, %arg2: memref<432x128xbf16, #tpu.memory_space<vmem>>, %arg3: memref<1x128xf32, #tpu.memory_space<vmem>>, %arg4: memref<176x128xbf16, #tpu.memory_space<vmem>>) attributes {dimension_semantics = [#tpu.dimension_semantics<parallel>], iteration_bounds = array<i64: 1>, scalar_prefetch = 0 : i64, scratch_operands = 0 : i64, tpu.core_type = #tpu.core_type<tc>, window_params = [{transform_indices = @transform_0, window_bounds = array<i64: 176, 432>}, {pipeline_mode = #tpu.pipeline_mode<synchronous>, transform_indices = @transform_1, window_bounds = array<i64: 432, 128>}, {pipeline_mode = #tpu.pipeline_mode<synchronous>, transform_indices = @transform_2, window_bounds = array<i64: 1, 128>}, {transform_indices = @transform_3, window_bounds = array<i64: 176, 128>}]} {
    %c0 = arith.constant 0 : index
    %c0_0 = arith.constant 0 : index
    %0 = vector.load %arg1[%c0, %c0_0] : memref<176x432xbf16, #tpu.memory_space<vmem>>, vector<176x432xbf16>
    %c0_1 = arith.constant 0 : index
    %c0_2 = arith.constant 0 : index
    %1 = vector.load %arg2[%c0_1, %c0_2] : memref<432x128xbf16, #tpu.memory_space<vmem>>, vector<432x128xbf16>
    %cst = arith.constant dense<0.000000e+00> : vector<176x128xf32>
    %2 = tpu.matmul %0, %1, %cst {dimension_numbers = #tpu.dot_dimension_numbers<[1], [0], [0], [1], [0, 0, 1, 1], [], []>} : vector<176x432xbf16>, vector<432x128xbf16>, vector<176x128xf32> -> vector<176x128xf32>
    %c0_3 = arith.constant 0 : index
    %c0_4 = arith.constant 0 : index
    %3 = vector.load %arg3[%c0_3, %c0_4] : memref<1x128xf32, #tpu.memory_space<vmem>>, vector<1x128xf32>
    %4 = vector.broadcast %3 : vector<1x128xf32> to vector<176x128xf32>
    %5 = arith.addf %2, %4 : vector<176x128xf32>
    %cst_5 = arith.constant 0.000000e+00 : f32
    %6 = vector.broadcast %cst_5 : f32 to vector<176x128xf32>
    %7 = arith.cmpf oge, %5, %6 : vector<176x128xf32>
    %cst_6 = arith.constant 0.00999999977 : f32
    %8 = vector.broadcast %cst_6 : f32 to vector<176x128xf32>
    %9 = arith.mulf %8, %5 : vector<176x128xf32>
    %10 = arith.select %7, %5, %9 : vector<176x128xi1>, vector<176x128xf32>
    %11 = arith.truncf %10 : vector<176x128xf32> to vector<176x128xbf16>
    %c0_7 = arith.constant 0 : index
    %c0_8 = arith.constant 0 : index
    %12 = vector.load %arg4[%c0_7, %c0_8] : memref<176x128xbf16, #tpu.memory_space<vmem>>, vector<176x128xbf16>
    tpu.vector_store %arg4[%c0_7, %c0_8], %11 {strides = array<i32>} : memref<176x128xbf16, #tpu.memory_space<vmem>>, vector<176x128xbf16>,
    return
  }
  func.func @transform_0(%arg0: i32) -> (i32, i32) {
    %c0_i32 = arith.constant 0 : i32
    %c0_i32_0 = arith.constant 0 : i32
    return %arg0, %c0_i32 : i32, i32
  }
  func.func @transform_1(%arg0: i32) -> (i32, i32) {
    %c0_i32 = arith.constant 0 : i32
    %c0_i32_0 = arith.constant 0 : i32
    %c0_i32_1 = arith.constant 0 : i32
    return %c0_i32, %c0_i32_0 : i32, i32
  }
  func.func @transform_2(%arg0: i32) -> (i32, i32) {
    %c0_i32 = arith.constant 0 : i32
    %c0_i32_0 = arith.constant 0 : i32
    %c0_i32_1 = arith.constant 0 : i32
    return %c0_i32, %c0_i32_0 : i32, i32
  }
  func.func @transform_3(%arg0: i32) -> (i32, i32) {
    %c0_i32 = arith.constant 0 : i32
    %c0_i32_0 = arith.constant 0 : i32
    return %arg0, %c0_i32 : i32, i32
  }
}

module attributes {stable_mosaic.version = 11 : i64} {
  func.func @_matmul_bias_act_kernel(%arg0: i32, %arg1: memref<64x576xbf16, #tpu.memory_space<vmem>>, %arg2: memref<576x128xbf16, #tpu.memory_space<vmem>>, %arg3: memref<1x128xf32, #tpu.memory_space<vmem>>, %arg4: memref<64x128xbf16, #tpu.memory_space<vmem>>) attributes {dimension_semantics = [#tpu.dimension_semantics<parallel>], iteration_bounds = array<i64: 1>, scalar_prefetch = 0 : i64, scratch_operands = 0 : i64, tpu.core_type = #tpu.core_type<tc>, window_params = [{transform_indices = @transform_0, window_bounds = array<i64: 64, 576>}, {pipeline_mode = #tpu.pipeline_mode<synchronous>, transform_indices = @transform_1, window_bounds = array<i64: 576, 128>}, {pipeline_mode = #tpu.pipeline_mode<synchronous>, transform_indices = @transform_2, window_bounds = array<i64: 1, 128>}, {transform_indices = @transform_3, window_bounds = array<i64: 64, 128>}]} {
    %c0 = arith.constant 0 : index
    %c0_0 = arith.constant 0 : index
    %0 = vector.load %arg1[%c0, %c0_0] : memref<64x576xbf16, #tpu.memory_space<vmem>>, vector<64x576xbf16>
    %c0_1 = arith.constant 0 : index
    %c0_2 = arith.constant 0 : index
    %1 = vector.load %arg2[%c0_1, %c0_2] : memref<576x128xbf16, #tpu.memory_space<vmem>>, vector<576x128xbf16>
    %cst = arith.constant dense<0.000000e+00> : vector<64x128xf32>
    %2 = tpu.matmul %0, %1, %cst {dimension_numbers = #tpu.dot_dimension_numbers<[1], [0], [0], [1], [0, 0, 1, 1], [], []>} : vector<64x576xbf16>, vector<576x128xbf16>, vector<64x128xf32> -> vector<64x128xf32>
    %c0_3 = arith.constant 0 : index
    %c0_4 = arith.constant 0 : index
    %3 = vector.load %arg3[%c0_3, %c0_4] : memref<1x128xf32, #tpu.memory_space<vmem>>, vector<1x128xf32>
    %4 = vector.broadcast %3 : vector<1x128xf32> to vector<64x128xf32>
    %5 = arith.addf %2, %4 : vector<64x128xf32>
    %cst_5 = arith.constant 0.000000e+00 : f32
    %6 = vector.broadcast %cst_5 : f32 to vector<64x128xf32>
    %7 = arith.cmpf oge, %5, %6 : vector<64x128xf32>
    %cst_6 = arith.constant 0.00999999977 : f32
    %8 = vector.broadcast %cst_6 : f32 to vector<64x128xf32>
    %9 = arith.mulf %8, %5 : vector<64x128xf32>
    %10 = arith.select %7, %5, %9 : vector<64x128xi1>, vector<64x128xf32>
    %11 = arith.truncf %10 : vector<64x128xf32> to vector<64x128xbf16>
    %c0_7 = arith.constant 0 : index
    %c0_8 = arith.constant 0 : index
    %12 = vector.load %arg4[%c0_7, %c0_8] : memref<64x128xbf16, #tpu.memory_space<vmem>>, vector<64x128xbf16>
    tpu.vector_store %arg4[%c0_7, %c0_8], %11 {strides = array<i32>} : memref<64x128xbf16, #tpu.memory_space<vmem>>, vector<64x128xbf16>,
    return
  }
  func.func @transform_0(%arg0: i32) -> (i32, i32) {
    %c0_i32 = arith.constant 0 : i32
    %c0_i32_0 = arith.constant 0 : i32
    return %arg0, %c0_i32 : i32, i32
  }
  func.func @transform_1(%arg0: i32) -> (i32, i32) {
    %c0_i32 = arith.constant 0 : i32
    %c0_i32_0 = arith.constant 0 : i32
    %c0_i32_1 = arith.constant 0 : i32
    return %c0_i32, %c0_i32_0 : i32, i32
  }
  func.func @transform_2(%arg0: i32) -> (i32, i32) {
    %c0_i32 = arith.constant 0 : i32
    %c0_i32_0 = arith.constant 0 : i32
    %c0_i32_1 = arith.constant 0 : i32
    return %c0_i32, %c0_i32_0 : i32, i32
  }
  func.func @transform_3(%arg0: i32) -> (i32, i32) {
    %c0_i32 = arith.constant 0 : i32
    %c0_i32_0 = arith.constant 0 : i32
    return %arg0, %c0_i32 : i32, i32
  }
}

module attributes {stable_mosaic.version = 11 : i64} {
  func.func @_fc_mdn_kernel(%arg0: i32, %arg1: memref<16x1664xbf16, #tpu.memory_space<vmem>>, %arg2: memref<1664x128xbf16, #tpu.memory_space<vmem>>, %arg3: memref<1x128xf32, #tpu.memory_space<vmem>>, %arg4: memref<128x128xbf16, #tpu.memory_space<vmem>>, %arg5: memref<1x128xf32, #tpu.memory_space<vmem>>, %arg6: memref<128x128xbf16, #tpu.memory_space<vmem>>, %arg7: memref<1x128xf32, #tpu.memory_space<vmem>>, %arg8: memref<128x384xbf16, #tpu.memory_space<vmem>>, %arg9: memref<1x384xf32, #tpu.memory_space<vmem>>, %arg10: memref<16x128xf32, #tpu.memory_space<vmem>>, %arg11: memref<16x128xf32, #tpu.memory_space<vmem>>, %arg12: memref<16x128xf32, #tpu.memory_space<vmem>>) attributes {dimension_semantics = [#tpu.dimension_semantics<arbitrary>], iteration_bounds = array<i64: 1>, scalar_prefetch = 0 : i64, scratch_operands = 0 : i64, tpu.core_type = #tpu.core_type<tc>, window_params = [{pipeline_mode = #tpu.pipeline_mode<synchronous>, transform_indices = @transform_0, window_bounds = array<i64: 16, 1664>}, {pipeline_mode = #tpu.pipeline_mode<synchronous>, transform_indices = @transform_1, window_bounds = array<i64: 1664, 128>}, {pipeline_mode = #tpu.pipeline_mode<synchronous>, transform_indices = @transform_2, window_bounds = array<i64: 1, 128>}, {pipeline_mode = #tpu.pipeline_mode<synchronous>, transform_indices = @transform_3, window_bounds = array<i64: 128, 128>}, {pipeline_mode = #tpu.pipeline_mode<synchronous>, transform_indices = @transform_4, window_bounds = array<i64: 1, 128>}, {pipeline_mode = #tpu.pipeline_mode<synchronous>, transform_indices = @transform_5, window_bounds = array<i64: 128, 128>}, {pipeline_mode = #tpu.pipeline_mode<synchronous>, transform_indices = @transform_6, window_bounds = array<i64: 1, 128>}, {pipeline_mode = #tpu.pipeline_mode<synchronous>, transform_indices = @transform_7, window_bounds = array<i64: 128, 384>}, {pipeline_mode = #tpu.pipeline_mode<synchronous>, transform_indices = @transform_8, window_bounds = array<i64: 1, 384>}, {pipeline_mode = #tpu.pipeline_mode<synchronous>, transform_indices = @transform_9, window_bounds = array<i64: 16, 128>}, {pipeline_mode = #tpu.pipeline_mode<synchronous>, transform_indices = @transform_10, window_bounds = array<i64: 16, 128>}, {pipeline_mode = #tpu.pipeline_mode<synchronous>, transform_indices = @transform_11, window_bounds = array<i64: 16, 128>}]} {
    %c0 = arith.constant 0 : index
    %c0_0 = arith.constant 0 : index
    %0 = vector.load %arg1[%c0, %c0_0] : memref<16x1664xbf16, #tpu.memory_space<vmem>>, vector<16x1664xbf16>
    %c0_1 = arith.constant 0 : index
    %c0_2 = arith.constant 0 : index
    %1 = vector.load %arg2[%c0_1, %c0_2] : memref<1664x128xbf16, #tpu.memory_space<vmem>>, vector<1664x128xbf16>
    %cst = arith.constant dense<0.000000e+00> : vector<16x128xf32>
    %2 = tpu.matmul %0, %1, %cst {dimension_numbers = #tpu.dot_dimension_numbers<[1], [0], [0], [1], [0, 0, 1, 1], [], []>} : vector<16x1664xbf16>, vector<1664x128xbf16>, vector<16x128xf32> -> vector<16x128xf32>
    %c0_3 = arith.constant 0 : index
    %c0_4 = arith.constant 0 : index
    %3 = vector.load %arg3[%c0_3, %c0_4] : memref<1x128xf32, #tpu.memory_space<vmem>>, vector<1x128xf32>
    %4 = vector.broadcast %3 : vector<1x128xf32> to vector<16x128xf32>
    %5 = arith.addf %2, %4 : vector<16x128xf32>
    %cst_5 = arith.constant 0.000000e+00 : f32
    %6 = vector.broadcast %cst_5 : f32 to vector<16x128xf32>
    %7 = arith.cmpf oge, %5, %6 : vector<16x128xf32>
    %cst_6 = arith.constant 0.00999999977 : f32
    %8 = vector.broadcast %cst_6 : f32 to vector<16x128xf32>
    %9 = arith.mulf %8, %5 : vector<16x128xf32>
    %10 = arith.select %7, %5, %9 : vector<16x128xi1>, vector<16x128xf32>
    %11 = arith.truncf %10 : vector<16x128xf32> to vector<16x128xbf16>
    %c0_7 = arith.constant 0 : index
    %c0_8 = arith.constant 0 : index
    %12 = vector.load %arg4[%c0_7, %c0_8] : memref<128x128xbf16, #tpu.memory_space<vmem>>, vector<128x128xbf16>
    %cst_9 = arith.constant dense<0.000000e+00> : vector<16x128xf32>
    %13 = tpu.matmul %11, %12, %cst_9 {dimension_numbers = #tpu.dot_dimension_numbers<[1], [0], [0], [1], [0, 0, 1, 1], [], []>} : vector<16x128xbf16>, vector<128x128xbf16>, vector<16x128xf32> -> vector<16x128xf32>
    %c0_10 = arith.constant 0 : index
    %c0_11 = arith.constant 0 : index
    %14 = vector.load %arg5[%c0_10, %c0_11] : memref<1x128xf32, #tpu.memory_space<vmem>>, vector<1x128xf32>
    %15 = vector.broadcast %14 : vector<1x128xf32> to vector<16x128xf32>
    %16 = arith.addf %13, %15 : vector<16x128xf32>
    %cst_12 = arith.constant 0.000000e+00 : f32
    %17 = vector.broadcast %cst_12 : f32 to vector<16x128xf32>
    %18 = arith.cmpf oge, %16, %17 : vector<16x128xf32>
    %cst_13 = arith.constant 0.00999999977 : f32
    %19 = vector.broadcast %cst_13 : f32 to vector<16x128xf32>
    %20 = arith.mulf %19, %16 : vector<16x128xf32>
    %21 = arith.select %18, %16, %20 : vector<16x128xi1>, vector<16x128xf32>
    %22 = arith.truncf %21 : vector<16x128xf32> to vector<16x128xbf16>
    %c0_14 = arith.constant 0 : index
    %c0_15 = arith.constant 0 : index
    %23 = vector.load %arg6[%c0_14, %c0_15] : memref<128x128xbf16, #tpu.memory_space<vmem>>, vector<128x128xbf16>
    %cst_16 = arith.constant dense<0.000000e+00> : vector<16x128xf32>
    %24 = tpu.matmul %22, %23, %cst_16 {dimension_numbers = #tpu.dot_dimension_numbers<[1], [0], [0], [1], [0, 0, 1, 1], [], []>} : vector<16x128xbf16>, vector<128x128xbf16>, vector<16x128xf32> -> vector<16x128xf32>
    %c0_17 = arith.constant 0 : index
    %c0_18 = arith.constant 0 : index
    %25 = vector.load %arg7[%c0_17, %c0_18] : memref<1x128xf32, #tpu.memory_space<vmem>>, vector<1x128xf32>
    %26 = vector.broadcast %25 : vector<1x128xf32> to vector<16x128xf32>
    %27 = arith.addf %24, %26 : vector<16x128xf32>
    %28 = math.tanh %27 : vector<16x128xf32>
    %29 = arith.truncf %28 : vector<16x128xf32> to vector<16x128xbf16>
    %c0_19 = arith.constant 0 : index
    %c0_20 = arith.constant 0 : index
    %30 = vector.load %arg8[%c0_19, %c0_20] : memref<128x384xbf16, #tpu.memory_space<vmem>>, vector<128x384xbf16>
    %cst_21 = arith.constant dense<0.000000e+00> : vector<16x384xf32>
    %31 = tpu.matmul %29, %30, %cst_21 {dimension_numbers = #tpu.dot_dimension_numbers<[1], [0], [0], [1], [0, 0, 1, 1], [], []>} : vector<16x128xbf16>, vector<128x384xbf16>, vector<16x384xf32> -> vector<16x384xf32>
    %c0_22 = arith.constant 0 : index
    %c0_23 = arith.constant 0 : index
    %32 = vector.load %arg9[%c0_22, %c0_23] : memref<1x384xf32, #tpu.memory_space<vmem>>, vector<1x384xf32>
    %33 = vector.broadcast %32 : vector<1x384xf32> to vector<16x384xf32>
    %34 = arith.addf %31, %33 : vector<16x384xf32>
    %35 = vector.extract_strided_slice %34 {offsets = [0, 0], sizes = [16, 128], strides = [1, 1]} : vector<16x384xf32> to vector<16x128xf32>
    %36 = tpu.iota {dimensions = array<i32: 1>} : vector<16x128xi32>
    %c3_i32 = arith.constant 3 : i32
    %37 = vector.broadcast %c3_i32 : i32 to vector<16x128xi32>
    %38 = arith.cmpi slt, %36, %37 : vector<16x128xi32>
    %cst_24 = arith.constant -1.000000e+30 : f32
    %39 = vector.broadcast %cst_24 : f32 to vector<16x128xf32>
    %40 = arith.select %38, %35, %39 : vector<16x128xi1>, vector<16x128xf32>
    %cst_25 = arith.constant dense<0xFF800000> : vector<16xf32>
    %41 = vector.multi_reduction <maximumf>, %40, %cst_25 [1] : vector<16x128xf32> to vector<16xf32>
    %42 = vector.shape_cast %41 : vector<16xf32> to vector<16x1xf32>
    %43 = vector.broadcast %42 : vector<16x1xf32> to vector<16x128xf32>
    %44 = arith.subf %40, %43 : vector<16x128xf32>
    %45 = math.exp %44 : vector<16x128xf32>
    %cst_26 = arith.constant 0.000000e+00 : f32
    %46 = vector.broadcast %cst_26 : f32 to vector<16x128xf32>
    %47 = arith.select %38, %45, %46 : vector<16x128xi1>, vector<16x128xf32>
    %cst_27 = arith.constant dense<0.000000e+00> : vector<16xf32>
    %48 = vector.multi_reduction <add>, %47, %cst_27 [1] : vector<16x128xf32> to vector<16xf32>
    %49 = vector.shape_cast %48 : vector<16xf32> to vector<16x1xf32>
    %50 = vector.broadcast %49 : vector<16x1xf32> to vector<16x128xf32>
    %51 = arith.divf %47, %50 : vector<16x128xf32>
    %c0_28 = arith.constant 0 : index
    %c0_29 = arith.constant 0 : index
    %52 = vector.load %arg10[%c0_28, %c0_29] : memref<16x128xf32, #tpu.memory_space<vmem>>, vector<16x128xf32>
    tpu.vector_store %arg10[%c0_28, %c0_29], %51 {strides = array<i32>} : memref<16x128xf32, #tpu.memory_space<vmem>>, vector<16x128xf32>,
    %53 = vector.extract_strided_slice %34 {offsets = [0, 128], sizes = [16, 128], strides = [1, 1]} : vector<16x384xf32> to vector<16x128xf32>
    %54 = math.exp %53 : vector<16x128xf32>
    %c0_30 = arith.constant 0 : index
    %c0_31 = arith.constant 0 : index
    %55 = vector.load %arg11[%c0_30, %c0_31] : memref<16x128xf32, #tpu.memory_space<vmem>>, vector<16x128xf32>
    tpu.vector_store %arg11[%c0_30, %c0_31], %54 {strides = array<i32>} : memref<16x128xf32, #tpu.memory_space<vmem>>, vector<16x128xf32>,
    %56 = vector.extract_strided_slice %34 {offsets = [0, 256], sizes = [16, 128], strides = [1, 1]} : vector<16x384xf32> to vector<16x128xf32>
    %c0_32 = arith.constant 0 : index
    %c0_33 = arith.constant 0 : index
    %57 = vector.load %arg12[%c0_32, %c0_33] : memref<16x128xf32, #tpu.memory_space<vmem>>, vector<16x128xf32>
    tpu.vector_store %arg12[%c0_32, %c0_33], %56 {strides = array<i32>} : memref<16x128xf32, #tpu.memory_space<vmem>>, vector<16x128xf32>,
    return
  }
  func.func @transform_0(%arg0: i32) -> (i32, i32) {
    %c0_i32 = arith.constant 0 : i32
    %c0_i32_0 = arith.constant 0 : i32
    %c0_i32_1 = arith.constant 0 : i32
    return %c0_i32, %c0_i32_0 : i32, i32
  }
  func.func @transform_1(%arg0: i32) -> (i32, i32) {
    %c0_i32 = arith.constant 0 : i32
    %c0_i32_0 = arith.constant 0 : i32
    %c0_i32_1 = arith.constant 0 : i32
    return %c0_i32, %c0_i32_0 : i32, i32
  }
  func.func @transform_2(%arg0: i32) -> (i32, i32) {
    %c0_i32 = arith.constant 0 : i32
    %c0_i32_0 = arith.constant 0 : i32
    %c0_i32_1 = arith.constant 0 : i32
    return %c0_i32, %c0_i32_0 : i32, i32
  }
  func.func @transform_3(%arg0: i32) -> (i32, i32) {
    %c0_i32 = arith.constant 0 : i32
    %c0_i32_0 = arith.constant 0 : i32
    %c0_i32_1 = arith.constant 0 : i32
    return %c0_i32, %c0_i32_0 : i32, i32
  }
  func.func @transform_4(%arg0: i32) -> (i32, i32) {
    %c0_i32 = arith.constant 0 : i32
    %c0_i32_0 = arith.constant 0 : i32
    %c0_i32_1 = arith.constant 0 : i32
    return %c0_i32, %c0_i32_0 : i32, i32
  }
  func.func @transform_5(%arg0: i32) -> (i32, i32) {
    %c0_i32 = arith.constant 0 : i32
    %c0_i32_0 = arith.constant 0 : i32
    %c0_i32_1 = arith.constant 0 : i32
    return %c0_i32, %c0_i32_0 : i32, i32
  }
  func.func @transform_6(%arg0: i32) -> (i32, i32) {
    %c0_i32 = arith.constant 0 : i32
    %c0_i32_0 = arith.constant 0 : i32
    %c0_i32_1 = arith.constant 0 : i32
    return %c0_i32, %c0_i32_0 : i32, i32
  }
  func.func @transform_7(%arg0: i32) -> (i32, i32) {
    %c0_i32 = arith.constant 0 : i32
    %c0_i32_0 = arith.constant 0 : i32
    %c0_i32_1 = arith.constant 0 : i32
    return %c0_i32, %c0_i32_0 : i32, i32
  }
  func.func @transform_8(%arg0: i32) -> (i32, i32) {
    %c0_i32 = arith.constant 0 : i32
    %c0_i32_0 = arith.constant 0 : i32
    %c0_i32_1 = arith.constant 0 : i32
    return %c0_i32, %c0_i32_0 : i32, i32
  }
  func.func @transform_9(%arg0: i32) -> (i32, i32) {
    %c0_i32 = arith.constant 0 : i32
    %c0_i32_0 = arith.constant 0 : i32
    %c0_i32_1 = arith.constant 0 : i32
    return %c0_i32, %c0_i32_0 : i32, i32
  }
  func.func @transform_10(%arg0: i32) -> (i32, i32) {
    %c0_i32 = arith.constant 0 : i32
    %c0_i32_0 = arith.constant 0 : i32
    %c0_i32_1 = arith.constant 0 : i32
    return %c0_i32, %c0_i32_0 : i32, i32
  }
  func.func @transform_11(%arg0: i32) -> (i32, i32) {
    %c0_i32 = arith.constant 0 : i32
    %c0_i32_0 = arith.constant 0 : i32
    %c0_i32_1 = arith.constant 0 : i32
    return %c0_i32, %c0_i32_0 : i32, i32
  }
}

</mosaic_0001>

<bundles_post_ra>
// kernel: pilotnet_mdn_forward.6
= control target key start
LH: loop header
LB: loop body
LE: loop exit
PB: predicated region body
PF: predicated region fallthrough
CT: control target
= control target key end

     0   :  { %s4228_s12 = smov 0   ;;  %s4809_s0 = inlined_call_operand.vmem [shape: bf16[8320,75], index: 0, kind: input, shape index: {}]   ;;  %s4810_s1 = inlined_call_operand.vmem [shape: bf16[75,128], index: 1, kind: input, shape index: {}]   ;;  %s4811_s2 = inlined_call_operand.vmem [shape: f32[1,128], index: 2, kind: input, shape index: {}]   ;;  %s4812_s3 = inlined_call_operand.vmem [shape: bf16[8320,128], index: 3, kind: output, shape index: {}]  }
   0x1 LB: > { %s2891_s13 = sadd.s32 4294967295, %s4205_s12   ;;  %p2895_p0 = scmp.ge.s32.totalorder %s4205_s12, 1  ;;  %s4205_s12 = sphi %s4228_s12, %s13_s12  }
   0x2   : > { %p138_p1 = scmp.lt.s32.totalorder %s4205_s12, 6 }
   0x4   : > { %p139_p2 = pnand %p2895_p0, %p138_p1 }
   0x5   : > { %s162_s18 = smul.u32 (!%p139_p2), 208, %s2891_s13 }
   0x6   : > { %142 = sbr.rel (%p139_p2) target bundleno = 586 (0x24a), region = 32 }
   0x7   : > { %p163_p3 = scmp.lt.s32.totalorder (!%p139_p2), %s162_s18, 1039 }
   0xb   : > { %v3332_v0 = vld [vmem:[%s4810_s1 + $0x20] sm:$0xf]  ;;  %v3548_v1 = vld [vmem:[%s4810_s1 + $0x20] sm:$0x30]  ;;  %vm1259_vm0 = vcmask 1044480   ;;  %vm1260_vm1 = vcmask 1045504  }
   0xc   : > { %v3333_v2 = vor.u32 %v3548_v1, %v3332_v0  ;;  %v4207_v3 = vmov 65535   ;;  %v3547_v7 = vld [vmem:[%s4810_s1 + $0x18] sm:$0xff]  ;;  %v3546_v8 = vld [vmem:[%s4810_s1 + $0x10] sm:$0xff]  ;;  %s4814_s18 = smov (!%p163_p3, %s162_s18), 1039  ;;  %v3545_v9 = vld [vmem:[%s4810_s1 + $0x8] sm:$0xff]  ;;  %vm946_vm2 = vcmask 613376  }
   0xd   : > { %v1261_v4 = vsel %vm1259_vm0, 4294967295, %v4207_v3  ;;  %s2896_s25 = sshll.u32 %s4814_s18, 2  ;;  %v3544_v10 = vld [vmem:[%s4810_s1] sm:$0xff] }
   0xe   : > { %v1262_v5 = vsel %vm1260_vm1, %v1261_v4, 0  ;;  %s4262_s30 = scalar_lea.vmem %s4809_s0, %s2896_s25  ;;  %v4335_v49 = vld [vmem:[%s4811_s2] ss:$0 sm:$0xff]  ;;  %s4352_s8 = scalar_lea.vmem %s4812_s3, %s2896_s25 }
   0xf   : > { %v1264_v6 = vand.u32 %v3333_v2, %v1262_v5  ;;  %v3440_v11 = vld [vmem:[%s4262_s30] sm:$0xff]  ;;  %v3466_v12 = vld [vmem:[%s4262_s30 + $0xd0] sm:$0xff]  ;;  %v3441_v15 = vld [vmem:[%s4262_s30 + $0x8] sm:$0xff] }
  0x10   : > { %v3492_v13 = vld [vmem:[%s4262_s30 + $0x1a0] sm:$0xff]  ;;  %v3518_v14 = vld [vmem:[%s4262_s30 + $0x270] sm:$0xff]  ;;  %v3467_v16 = vld [vmem:[%s4262_s30 + $0xd8] sm:$0xff] }
  0x11   : > { %1269 = vmatpush.bf16.msra.mxu0 %v1264_v6  ;;  %4172 = vmatpush.bf16.msra.mxu1 %v1264_v6  ;;  %v3493_v17 = vld [vmem:[%s4262_s30 + $0x1a8] sm:$0xff]  ;;  %v3519_v18 = vld [vmem:[%s4262_s30 + $0x278] sm:$0xff]  ;;  %v3442_v19 = vld [vmem:[%s4262_s30 + $0x10] sm:$0xff] }
  0x12   : > { %4173 = vmatpush.bf16.msra.mxu2 %v1264_v6  ;;  %4174 = vmatpush.bf16.msra.mxu3 %v1264_v6  ;;  %v3468_v20 = vld [vmem:[%s4262_s30 + $0xe0] sm:$0xff]  ;;  %v3494_v21 = vld [vmem:[%s4262_s30 + $0x1b0] sm:$0xff]  ;;  %v3443_v23 = vld [vmem:[%s4262_s30 + $0x18] sm:$0xff] }
  0x13   : > { %v3520_v22 = vld [vmem:[%s4262_s30 + $0x280] sm:$0xff]  ;;  %v3469_v24 = vld [vmem:[%s4262_s30 + $0xe8] sm:$0xff]  ;;  %v3495_v25 = vld [vmem:[%s4262_s30 + $0x1b8] sm:$0xff] }
  0x14   : > { %v3521_v26 = vld [vmem:[%s4262_s30 + $0x288] sm:$0xff]  ;;  %v3444_v27 = vld [vmem:[%s4262_s30 + $0x20] sm:$0xff]  ;;  %v3470_v28 = vld [vmem:[%s4262_s30 + $0xf0] sm:$0xff] }
  0x15   : > { %1270 = vmatpush.bf16.msra.mxu0 %v3547_v7  ;;  %4175 = vmatpush.bf16.msra.mxu1 %v3547_v7  ;;  %v3496_v29 = vld [vmem:[%s4262_s30 + $0x1c0] sm:$0xff]  ;;  %v3522_v30 = vld [vmem:[%s4262_s30 + $0x290] sm:$0xff]  ;;  %v3445_v31 = vld [vmem:[%s4262_s30 + $0x28] sm:$0xff] }
  0x16   : > { %4176 = vmatpush.bf16.msra.mxu2 %v3547_v7  ;;  %4177 = vmatpush.bf16.msra.mxu3 %v3547_v7  ;;  %v3471_v32 = vld [vmem:[%s4262_s30 + $0xf8] sm:$0xff]  ;;  %v3497_v33 = vld [vmem:[%s4262_s30 + $0x1c8] sm:$0xff]  ;;  %v3446_v35 = vld [vmem:[%s4262_s30 + $0x30] sm:$0xff] }
  0x17   : > { %v3523_v34 = vld [vmem:[%s4262_s30 + $0x298] sm:$0xff]  ;;  %v3472_v36 = vld [vmem:[%s4262_s30 + $0x100] sm:$0xff]  ;;  %v3498_v37 = vld [vmem:[%s4262_s30 + $0x1d0] sm:$0xff] }
  0x18   : > { %v3524_v38 = vld [vmem:[%s4262_s30 + $0x2a0] sm:$0xff]  ;;  %v3447_v39 = vld [vmem:[%s4262_s30 + $0x38] sm:$0xff]  ;;  %v3473_v40 = vld [vmem:[%s4262_s30 + $0x108] sm:$0xff] }
  0x19   : > { %1271 = vmatpush.bf16.msra.mxu0 %v3546_v8  ;;  %4178 = vmatpush.bf16.msra.mxu1 %v3546_v8  ;;  %v3499_v41 = vld [vmem:[%s4262_s30 + $0x1d8] sm:$0xff]  ;;  %v3525_v42 = vld [vmem:[%s4262_s30 + $0x2a8] sm:$0xff]  ;;  %v3448_v43 = vld [vmem:[%s4262_s30 + $0x40] sm:$0xff] }
  0x1a   : > { %4179 = vmatpush.bf16.msra.mxu2 %v3546_v8  ;;  %4180 = vmatpush.bf16.msra.mxu3 %v3546_v8  ;;  %v3474_v44 = vld [vmem:[%s4262_s30 + $0x110] sm:$0xff]  ;;  %v3500_v47 = vld [vmem:[%s4262_s30 + $0x1e0] sm:$0xff] }
  0x1b   : > { %v3526_v48 = vld [vmem:[%s4262_s30 + $0x2b0] sm:$0xff] }
  0x1d   : > { %1272 = vmatpush.bf16.msra.mxu0 %v3545_v9  ;;  %4181 = vmatpush.bf16.msra.mxu1 %v3545_v9 }
  0x1e   : > { %4182 = vmatpush.bf16.msra.mxu2 %v3545_v9  ;;  %4183 = vmatpush.bf16.msra.mxu3 %v3545_v9  ;;  %v3449_v9 = vld [vmem:[%s4262_s30 + $0x48] sm:$0xff] }
  0x21   : > { %1273 = vmatpush.bf16.msra.mxu0 %v3544_v10  ;;  %4184 = vmatpush.bf16.msra.mxu1 %v3544_v10 }
  0x22   : > { %4185 = vmatpush.bf16.msra.mxu2 %v3544_v10  ;;  %4186 = vmatpush.bf16.msra.mxu3 %v3544_v10  ;;  %v3475_v10 = vld [vmem:[%s4262_s30 + $0x118] sm:$0xff] }
  0x24   : > { %3334 = vmatmul.msk.bf16.vlgmr.msra.gmra.mxu0 %vm946_vm2, %v3440_v11  ;;  %3360 = vmatmul.msk.bf16.vlgmr.msra.gmra.mxu1 %vm946_vm2, %v3466_v12 }
  0x25   : > { %3386 = vmatmul.msk.bf16.vlgmr.msra.gmra.mxu2 %vm946_vm2, %v3492_v13  ;;  %3412 = vmatmul.msk.bf16.vlgmr.msra.gmra.mxu3 %vm946_vm2, %v3518_v14 }
  0x34   : > { %3335 = vmatmul.msk.bf16.gmra.mxu0 %vm946_vm2, %v3441_v15  ;;  %3361 = vmatmul.msk.bf16.gmra.mxu1 %vm946_vm2, %v3467_v16  ;;  %v3501_v16 = vld [vmem:[%s4262_s30 + $0x1e8] sm:$0xff] }
  0x35   : > { %3387 = vmatmul.msk.bf16.gmra.mxu2 %vm946_vm2, %v3493_v17  ;;  %3413 = vmatmul.msk.bf16.gmra.mxu3 %vm946_vm2, %v3519_v18  ;;  %v3527_v17 = vld [vmem:[%s4262_s30 + $0x2b8] sm:$0xff] }
  0x44   : > { %3336 = vmatmul.msk.bf16.gmra.mxu0 %vm946_vm2, %v3442_v19  ;;  %3362 = vmatmul.msk.bf16.gmra.mxu1 %vm946_vm2, %v3468_v20 }
  0x45   : > { %3388 = vmatmul.msk.bf16.gmra.mxu2 %vm946_vm2, %v3494_v21  ;;  %3414 = vmatmul.msk.bf16.gmra.mxu3 %vm946_vm2, %v3520_v22 }
  0x54   : > { %3337 = vmatmul.msk.bf16.gmra.mxu0 %vm946_vm2, %v3443_v23  ;;  %3363 = vmatmul.msk.bf16.gmra.mxu1 %vm946_vm2, %v3469_v24 }
  0x55   : > { %3389 = vmatmul.msk.bf16.gmra.mxu2 %vm946_vm2, %v3495_v25  ;;  %3415 = vmatmul.msk.bf16.gmra.mxu3 %vm946_vm2, %v3521_v26 }
  0x64   : > { %3338 = vmatmul.msk.bf16.gmra.mxu0 %vm946_vm2, %v3444_v27  ;;  %3364 = vmatmul.msk.bf16.gmra.mxu1 %vm946_vm2, %v3470_v28 }
  0x65   : > { %3390 = vmatmul.msk.bf16.gmra.mxu2 %vm946_vm2, %v3496_v29  ;;  %3416 = vmatmul.msk.bf16.gmra.mxu3 %vm946_vm2, %v3522_v30 }
  0x74   : > { %3339 = vmatmul.msk.bf16.gmra.mxu0 %vm946_vm2, %v3445_v31  ;;  %3365 = vmatmul.msk.bf16.gmra.mxu1 %vm946_vm2, %v3471_v32 }
  0x75   : > { %3391 = vmatmul.msk.bf16.gmra.mxu2 %vm946_vm2, %v3497_v33  ;;  %3417 = vmatmul.msk.bf16.gmra.mxu3 %vm946_vm2, %v3523_v34 }
  0x84   : > { %3340 = vmatmul.msk.bf16.gmra.mxu0 %vm946_vm2, %v3446_v35  ;;  %3366 = vmatmul.msk.bf16.gmra.mxu1 %vm946_vm2, %v3472_v36 }
  0x85   : > { %3392 = vmatmul.msk.bf16.gmra.mxu2 %vm946_vm2, %v3498_v37  ;;  %3418 = vmatmul.msk.bf16.gmra.mxu3 %vm946_vm2, %v3524_v38 }
  0x94   : > { %3341 = vmatmul.msk.bf16.gmra.mxu0 %vm946_vm2, %v3447_v39  ;;  %3367 = vmatmul.msk.bf16.gmra.mxu1 %vm946_vm2, %v3473_v40 }
  0x95   : > { %3393 = vmatmul.msk.bf16.gmra.mxu2 %vm946_vm2, %v3499_v41  ;;  %3419 = vmatmul.msk.bf16.gmra.mxu3 %vm946_vm2, %v3525_v42 }
  0xa1   : > { %v1275_v45 = vpop.f32.mrf.mxu0  ;;  %v1405_v46 = vpop.f32.mrf.mxu1 }
  0xa2   : > { %v1276_v50 = vadd.f32 %v4335_v49, %v1275_v45  ;;  %v1406_v51 = vadd.f32 %v4335_v49, %v1405_v46 }
  0xa4   : > { %3342 = vmatmul.msk.bf16.gmra.mxu0 %vm946_vm2, %v3448_v43  ;;  %3368 = vmatmul.msk.bf16.gmra.mxu1 %vm946_vm2, %v3474_v44  ;;  %v2003_v56 = vmul.f32 0.01, %v1276_v50  ;;  %v2055_v57 = vmul.f32 0.01, %v1406_v51  ;;  %vm1795_vm3 = vcmp.ge.f32.partialorder %v1276_v50, 0.0  ;;  %vm1847_vm4 = vcmp.ge.f32.partialorder %v1406_v51, 0.0 }
  0xa5   : > { %3394 = vmatmul.msk.bf16.gmra.mxu2 %vm946_vm2, %v3500_v47  ;;  %3420 = vmatmul.msk.bf16.gmra.mxu3 %vm946_vm2, %v3526_v48 }
  0xa6   : > { %v2211_v0 = vsel %vm1795_vm3, %v1276_v50, %v2003_v56  ;;  %v2263_v1 = vsel %vm1847_vm4, %v1406_v51, %v2055_v57  ;;  %v3450_v50 = vld [vmem:[%s4262_s30 + $0x50] sm:$0xff]  ;;  %v3476_v51 = vld [vmem:[%s4262_s30 + $0x120] sm:$0xff] }
  0xa7   : > { %v3502_v57 = vld [vmem:[%s4262_s30 + $0x1f0] sm:$0xff] }
  0xa8   : > { %v1535_v52 = vpop.f32.mrf.mxu2  ;;  %v1665_v53 = vpop.f32.mrf.mxu3 }
  0xa9   : > { %v1277_v54 = vpop.f32.mrf.mxu0  ;;  %v1407_v55 = vpop.f32.mrf.mxu1  ;;  %v1536_v60 = vadd.f32 %v4335_v49, %v1535_v52  ;;  %v1666_v63 = vadd.f32 %v4335_v49, %v1665_v53 }
  0xaa   : > { %v1278_v58 = vadd.f32 %v4335_v49, %v1277_v54  ;;  %v1408_v59 = vadd.f32 %v4335_v49, %v1407_v55 }
  0xab   : > { %v2107_v6 = vmul.f32 0.01, %v1536_v60  ;;  %vm1899_vm7 = vcmp.ge.f32.partialorder %v1536_v60, 0.0  ;;  %v2159_v11 = vmul.f32 0.01, %v1666_v63  ;;  %vm1951_vm8 = vcmp.ge.f32.partialorder %v1666_v63, 0.0 }
  0xac   : > { %vm1796_vm5 = vcmp.ge.f32.partialorder %v1278_v58, 0.0  ;;  %v2004_v61 = vmul.f32 0.01, %v1278_v58  ;;  %vm1848_vm6 = vcmp.ge.f32.partialorder %v1408_v59, 0.0  ;;  %v2056_v62 = vmul.f32 0.01, %v1408_v59 }
  0xad   : > { %v2315_v20 = vsel %vm1899_vm7, %v1536_v60, %v2107_v6  ;;  %v2367_v21 = vsel %vm1951_vm8, %v1666_v63, %v2159_v11 }
  0xae   : > { %v2212_v2 = vsel %vm1796_vm5, %v1278_v58, %v2004_v61  ;;  %v2264_v3 = vsel %vm1848_vm6, %v1408_v59, %v2056_v62  ;;  %v3528_v58 = vld [vmem:[%s4262_s30 + $0x2c0] sm:$0xff] }
  0xaf   : > { %v3552_v4 = vpack.c.bf16 %v2212_v2, %v2211_v0  ;;  %v3682_v5 = vpack.c.bf16 %v2264_v3, %v2263_v1 }
  0xb0   : > { %v1537_v7 = vpop.f32.mrf.mxu2  ;;  %v1667_v8 = vpop.f32.mrf.mxu3 }
  0xb1   : > { %3553 = vst [vmem:[%s4352_s8] sm:$0xff] %v3552_v4   ;;  %v1538_v12 = vadd.f32 %v4335_v49, %v1537_v7  ;;  %v1668_v13 = vadd.f32 %v4335_v49, %v1667_v8  ;;  %v1280_v14 = vpop.f32.mrf.mxu0  ;;  %v1410_v15 = vpop.f32.mrf.mxu1 }
  0xb2   : > { %4094 = vst [vmem:[%s4352_s8 + $0xd0] sm:$0xff] %v3682_v5   ;;  %v1281_v26 = vadd.f32 %v4335_v49, %v1280_v14  ;;  %v1411_v27 = vadd.f32 %v4335_v49, %v1410_v15 }
  0xb3   : > { %vm1900_vm9 = vcmp.ge.f32.partialorder %v1538_v12, 0.0  ;;  %v2108_v18 = vmul.f32 0.01, %v1538_v12  ;;  %vm1952_vm10 = vcmp.ge.f32.partialorder %v1668_v13, 0.0  ;;  %v2160_v19 = vmul.f32 0.01, %v1668_v13 }
  0xb4   : > { %3343 = vmatmul.msk.bf16.gmra.mxu0 %vm946_vm2, %v3449_v9  ;;  %3369 = vmatmul.msk.bf16.gmra.mxu1 %vm946_vm2, %v3475_v10  ;;  %v2005_v32 = vmul.f32 0.01, %v1281_v26  ;;  %v2057_v33 = vmul.f32 0.01, %v1411_v27  ;;  %vm1797_vm11 = vcmp.ge.f32.partialorder %v1281_v26, 0.0  ;;  %vm1849_vm12 = vcmp.ge.f32.partialorder %v1411_v27, 0.0 }
  0xb5   : > { %v2316_v22 = vsel %vm1900_vm9, %v1538_v12, %v2108_v18  ;;  %v2368_v23 = vsel %vm1952_vm10, %v1668_v13, %v2160_v19  ;;  %3395 = vmatmul.msk.bf16.gmra.mxu2 %vm946_vm2, %v3501_v16  ;;  %3421 = vmatmul.msk.bf16.gmra.mxu3 %vm946_vm2, %v3527_v17 }
  0xb6   : > { %v3812_v24 = vpack.c.bf16 %v2316_v22, %v2315_v20  ;;  %v3942_v25 = vpack.c.bf16 %v2368_v23, %v2367_v21  ;;  %v2213_v40 = vsel %vm1797_vm11, %v1281_v26, %v2005_v32  ;;  %v2265_v41 = vsel %vm1849_vm12, %v1411_v27, %v2057_v33  ;;  %v3451_v26 = vld [vmem:[%s4262_s30 + $0x58] sm:$0xff]  ;;  %v3477_v27 = vld [vmem:[%s4262_s30 + $0x128] sm:$0xff] }
  0xb7   : > { %v3503_v33 = vld [vmem:[%s4262_s30 + $0x1f8] sm:$0xff] }
  0xb8   : > { %4120 = vst [vmem:[%s4352_s8 + $0x1a0] sm:$0xff] %v3812_v24   ;;  %v1540_v28 = vpop.f32.mrf.mxu2  ;;  %v1670_v29 = vpop.f32.mrf.mxu3 }
  0xb9   : > { %4146 = vst [vmem:[%s4352_s8 + $0x270] sm:$0xff] %v3942_v25   ;;  %v1282_v30 = vpop.f32.mrf.mxu0  ;;  %v1412_v31 = vpop.f32.mrf.mxu1  ;;  %v1541_v36 = vadd.f32 %v4335_v49, %v1540_v28  ;;  %v1671_v39 = vadd.f32 %v4335_v49, %v1670_v29 }
  0xba   : > { %v1283_v34 = vadd.f32 %v4335_v49, %v1282_v30  ;;  %v1413_v35 = vadd.f32 %v4335_v49, %v1412_v31 }
  0xbb   : > { %v2109_v46 = vmul.f32 0.01, %v1541_v36  ;;  %vm1901_vm15 = vcmp.ge.f32.partialorder %v1541_v36, 0.0  ;;  %v2161_v52 = vmul.f32 0.01, %v1671_v39  ;;  %vm1953_vm0 = vcmp.ge.f32.partialorder %v1671_v39, 0.0 }
  0xbc   : > { %vm1798_vm13 = vcmp.ge.f32.partialorder %v1283_v34, 0.0  ;;  %v2006_v37 = vmul.f32 0.01, %v1283_v34  ;;  %vm1850_vm14 = vcmp.ge.f32.partialorder %v1413_v35, 0.0  ;;  %v2058_v38 = vmul.f32 0.01, %v1413_v35 }
  0xbd   : > { %v2317_v61 = vsel %vm1901_vm15, %v1541_v36, %v2109_v46  ;;  %v2369_v62 = vsel %vm1953_vm0, %v1671_v39, %v2161_v52 }
  0xbe   : > { %v2214_v42 = vsel %vm1798_vm13, %v1283_v34, %v2006_v37  ;;  %v2266_v43 = vsel %vm1850_vm14, %v1413_v35, %v2058_v38  ;;  %v3529_v34 = vld [vmem:[%s4262_s30 + $0x2c8] sm:$0xff] }
  0xbf   : > { %v3557_v44 = vpack.c.bf16 %v2214_v42, %v2213_v40  ;;  %v3687_v45 = vpack.c.bf16 %v2266_v43, %v2265_v41 }
  0xc0   : > { %v1542_v47 = vpop.f32.mrf.mxu2  ;;  %v1672_v48 = vpop.f32.mrf.mxu3 }
  0xc1   : > { %4069 = vst [vmem:[%s4352_s8 + $0x8] sm:$0xff] %v3557_v44   ;;  %v1543_v53 = vadd.f32 %v4335_v49, %v1542_v47  ;;  %v1673_v54 = vadd.f32 %v4335_v49, %v1672_v48  ;;  %v1285_v55 = vpop.f32.mrf.mxu0  ;;  %v1415_v56 = vpop.f32.mrf.mxu1 }
  0xc2   : > { %4095 = vst [vmem:[%s4352_s8 + $0xd8] sm:$0xff] %v3687_v45   ;;  %v1286_v3 = vadd.f32 %v4335_v49, %v1285_v55  ;;  %v1416_v4 = vadd.f32 %v4335_v49, %v1415_v56 }
  0xc3   : > { %vm1902_vm1 = vcmp.ge.f32.partialorder %v1543_v53, 0.0  ;;  %v2110_v59 = vmul.f32 0.01, %v1543_v53  ;;  %vm1954_vm3 = vcmp.ge.f32.partialorder %v1673_v54, 0.0  ;;  %v2162_v60 = vmul.f32 0.01, %v1673_v54 }
  0xc4   : > { %3344 = vmatmul.msk.bf16.gmra.mxu0 %vm946_vm2, %v3450_v50  ;;  %3370 = vmatmul.msk.bf16.gmra.mxu1 %vm946_vm2, %v3476_v51  ;;  %v2007_v9 = vmul.f32 0.01, %v1286_v3  ;;  %v2059_v10 = vmul.f32 0.01, %v1416_v4  ;;  %vm1799_vm4 = vcmp.ge.f32.partialorder %v1286_v3, 0.0  ;;  %vm1851_vm5 = vcmp.ge.f32.partialorder %v1416_v4, 0.0 }
  0xc5   : > { %v2318_v63 = vsel %vm1902_vm1, %v1543_v53, %v2110_v59  ;;  %v2370_v0 = vsel %vm1954_vm3, %v1673_v54, %v2162_v60  ;;  %3396 = vmatmul.msk.bf16.gmra.mxu2 %vm946_vm2, %v3502_v57  ;;  %3422 = vmatmul.msk.bf16.gmra.mxu3 %vm946_vm2, %v3528_v58 }
  0xc6   : > { %v3817_v1 = vpack.c.bf16 %v2318_v63, %v2317_v61  ;;  %v3947_v2 = vpack.c.bf16 %v2370_v0, %v2369_v62  ;;  %v2215_v17 = vsel %vm1799_vm4, %v1286_v3, %v2007_v9  ;;  %v2267_v18 = vsel %vm1851_vm5, %v1416_v4, %v2059_v10  ;;  %v3452_v3 = vld [vmem:[%s4262_s30 + $0x60] sm:$0xff]  ;;  %v3478_v4 = vld [vmem:[%s4262_s30 + $0x130] sm:$0xff] }
  0xc7   : > { %v3504_v10 = vld [vmem:[%s4262_s30 + $0x200] sm:$0xff] }
  0xc8   : > { %4121 = vst [vmem:[%s4352_s8 + $0x1a8] sm:$0xff] %v3817_v1   ;;  %v1545_v5 = vpop.f32.mrf.mxu2  ;;  %v1675_v6 = vpop.f32.mrf.mxu3 }
  0xc9   : > { %4147 = vst [vmem:[%s4352_s8 + $0x278] sm:$0xff] %v3947_v2   ;;  %v1287_v7 = vpop.f32.mrf.mxu0  ;;  %v1417_v8 = vpop.f32.mrf.mxu1  ;;  %v1546_v13 = vadd.f32 %v4335_v49, %v1545_v5  ;;  %v1676_v16 = vadd.f32 %v4335_v49, %v1675_v6 }
  0xca   : > { %v1288_v11 = vadd.f32 %v4335_v49, %v1287_v7  ;;  %v1418_v12 = vadd.f32 %v4335_v49, %v1417_v8 }
  0xcb   : > { %v2111_v23 = vmul.f32 0.01, %v1546_v13  ;;  %vm1903_vm8 = vcmp.ge.f32.partialorder %v1546_v13, 0.0  ;;  %v2163_v28 = vmul.f32 0.01, %v1676_v16  ;;  %vm1955_vm9 = vcmp.ge.f32.partialorder %v1676_v16, 0.0 }
  0xcc   : > { %vm1800_vm6 = vcmp.ge.f32.partialorder %v1288_v11, 0.0  ;;  %v2008_v14 = vmul.f32 0.01, %v1288_v11  ;;  %vm1852_vm7 = vcmp.ge.f32.partialorder %v1418_v12, 0.0  ;;  %v2060_v15 = vmul.f32 0.01, %v1418_v12 }
  0xcd   : > { %v2319_v37 = vsel %vm1903_vm8, %v1546_v13, %v2111_v23  ;;  %v2371_v38 = vsel %vm1955_vm9, %v1676_v16, %v2163_v28 }
  0xce   : > { %v2216_v19 = vsel %vm1800_vm6, %v1288_v11, %v2008_v14  ;;  %v2268_v20 = vsel %vm1852_vm7, %v1418_v12, %v2060_v15  ;;  %v3530_v11 = vld [vmem:[%s4262_s30 + $0x2d0] sm:$0xff] }
  0xcf   : > { %v3562_v21 = vpack.c.bf16 %v2216_v19, %v2215_v17  ;;  %v3692_v22 = vpack.c.bf16 %v2268_v20, %v2267_v18 }
  0xd0   : > { %v1547_v24 = vpop.f32.mrf.mxu2  ;;  %v1677_v25 = vpop.f32.mrf.mxu3 }
  0xd1   : > { %4070 = vst [vmem:[%s4352_s8 + $0x10] sm:$0xff] %v3562_v21   ;;  %v1548_v29 = vadd.f32 %v4335_v49, %v1547_v24  ;;  %v1678_v30 = vadd.f32 %v4335_v49, %v1677_v25  ;;  %v1290_v31 = vpop.f32.mrf.mxu0  ;;  %v1420_v32 = vpop.f32.mrf.mxu1 }
  0xd2   : > { %4096 = vst [vmem:[%s4352_s8 + $0xe0] sm:$0xff] %v3692_v22   ;;  %v1291_v43 = vadd.f32 %v4335_v49, %v1290_v31  ;;  %v1421_v44 = vadd.f32 %v4335_v49, %v1420_v32 }
  0xd3   : > { %vm1904_vm10 = vcmp.ge.f32.partialorder %v1548_v29, 0.0  ;;  %v2112_v35 = vmul.f32 0.01, %v1548_v29  ;;  %vm1956_vm11 = vcmp.ge.f32.partialorder %v1678_v30, 0.0  ;;  %v2164_v36 = vmul.f32 0.01, %v1678_v30 }
  0xd4   : > { %3345 = vmatmul.msk.bf16.gmra.mxu0 %vm946_vm2, %v3451_v26  ;;  %3371 = vmatmul.msk.bf16.gmra.mxu1 %vm946_vm2, %v3477_v27  ;;  %v2009_v50 = vmul.f32 0.01, %v1291_v43  ;;  %v2061_v51 = vmul.f32 0.01, %v1421_v44  ;;  %vm1801_vm12 = vcmp.ge.f32.partialorder %v1291_v43, 0.0  ;;  %vm1853_vm13 = vcmp.ge.f32.partialorder %v1421_v44, 0.0 }
  0xd5   : > { %v2320_v39 = vsel %vm1904_vm10, %v1548_v29, %v2112_v35  ;;  %v2372_v40 = vsel %vm1956_vm11, %v1678_v30, %v2164_v36  ;;  %3397 = vmatmul.msk.bf16.gmra.mxu2 %vm946_vm2, %v3503_v33  ;;  %3423 = vmatmul.msk.bf16.gmra.mxu3 %vm946_vm2, %v3529_v34 }
  0xd6   : > { %v3822_v41 = vpack.c.bf16 %v2320_v39, %v2319_v37  ;;  %v3952_v42 = vpack.c.bf16 %v2372_v40, %v2371_v38  ;;  %v2217_v58 = vsel %vm1801_vm12, %v1291_v43, %v2009_v50  ;;  %v2269_v59 = vsel %vm1853_vm13, %v1421_v44, %v2061_v51  ;;  %v3453_v43 = vld [vmem:[%s4262_s30 + $0x68] sm:$0xff]  ;;  %v3479_v44 = vld [vmem:[%s4262_s30 + $0x138] sm:$0xff] }
  0xd7   : > { %v3505_v51 = vld [vmem:[%s4262_s30 + $0x208] sm:$0xff] }
  0xd8   : > { %4122 = vst [vmem:[%s4352_s8 + $0x1b0] sm:$0xff] %v3822_v41   ;;  %v1550_v45 = vpop.f32.mrf.mxu2  ;;  %v1680_v46 = vpop.f32.mrf.mxu3 }
  0xd9   : > { %4148 = vst [vmem:[%s4352_s8 + $0x280] sm:$0xff] %v3952_v42   ;;  %v1292_v47 = vpop.f32.mrf.mxu0  ;;  %v1422_v48 = vpop.f32.mrf.mxu1  ;;  %v1551_v54 = vadd.f32 %v4335_v49, %v1550_v45  ;;  %v1681_v57 = vadd.f32 %v4335_v49, %v1680_v46 }
  0xda   : > { %v1293_v52 = vadd.f32 %v4335_v49, %v1292_v47  ;;  %v1423_v53 = vadd.f32 %v4335_v49, %v1422_v48 }
  0xdb   : > { %v2113_v0 = vmul.f32 0.01, %v1551_v54  ;;  %vm1905_vm0 = vcmp.ge.f32.partialorder %v1551_v54, 0.0  ;;  %v2165_v5 = vmul.f32 0.01, %v1681_v57  ;;  %vm1957_vm1 = vcmp.ge.f32.partialorder %v1681_v57, 0.0 }
  0xdc   : > { %vm1802_vm14 = vcmp.ge.f32.partialorder %v1293_v52, 0.0  ;;  %v2010_v55 = vmul.f32 0.01, %v1293_v52  ;;  %vm1854_vm15 = vcmp.ge.f32.partialorder %v1423_v53, 0.0  ;;  %v2062_v56 = vmul.f32 0.01, %v1423_v53 }
  0xdd   : > { %v2321_v14 = vsel %vm1905_vm0, %v1551_v54, %v2113_v0  ;;  %v2373_v15 = vsel %vm1957_vm1, %v1681_v57, %v2165_v5 }
  0xde   : > { %v2218_v60 = vsel %vm1802_vm14, %v1293_v52, %v2010_v55  ;;  %v2270_v61 = vsel %vm1854_vm15, %v1423_v53, %v2062_v56  ;;  %v3531_v52 = vld [vmem:[%s4262_s30 + $0x2d8] sm:$0xff] }
  0xdf   : > { %v3567_v62 = vpack.c.bf16 %v2218_v60, %v2217_v58  ;;  %v3697_v63 = vpack.c.bf16 %v2270_v61, %v2269_v59 }
  0xe0   : > { %v1552_v1 = vpop.f32.mrf.mxu2  ;;  %v1682_v2 = vpop.f32.mrf.mxu3 }
  0xe1   : > { %4071 = vst [vmem:[%s4352_s8 + $0x18] sm:$0xff] %v3567_v62   ;;  %v1553_v6 = vadd.f32 %v4335_v49, %v1552_v1  ;;  %v1683_v7 = vadd.f32 %v4335_v49, %v1682_v2  ;;  %v1295_v8 = vpop.f32.mrf.mxu0  ;;  %v1425_v9 = vpop.f32.mrf.mxu1 }
  0xe2   : > { %4097 = vst [vmem:[%s4352_s8 + $0xe8] sm:$0xff] %v3697_v63   ;;  %v1296_v20 = vadd.f32 %v4335_v49, %v1295_v8  ;;  %v1426_v21 = vadd.f32 %v4335_v49, %v1425_v9 }
  0xe3   : > { %vm1906_vm3 = vcmp.ge.f32.partialorder %v1553_v6, 0.0  ;;  %v2114_v12 = vmul.f32 0.01, %v1553_v6  ;;  %vm1958_vm4 = vcmp.ge.f32.partialorder %v1683_v7, 0.0  ;;  %v2166_v13 = vmul.f32 0.01, %v1683_v7 }
  0xe4   : > { %3346 = vmatmul.msk.bf16.gmra.mxu0 %vm946_vm2, %v3452_v3  ;;  %3372 = vmatmul.msk.bf16.gmra.mxu1 %vm946_vm2, %v3478_v4  ;;  %v2011_v26 = vmul.f32 0.01, %v1296_v20  ;;  %v2063_v27 = vmul.f32 0.01, %v1426_v21  ;;  %vm1803_vm5 = vcmp.ge.f32.partialorder %v1296_v20, 0.0  ;;  %vm1855_vm6 = vcmp.ge.f32.partialorder %v1426_v21, 0.0 }
  0xe5   : > { %v2322_v16 = vsel %vm1906_vm3, %v1553_v6, %v2114_v12  ;;  %v2374_v17 = vsel %vm1958_vm4, %v1683_v7, %v2166_v13  ;;  %3398 = vmatmul.msk.bf16.gmra.mxu2 %vm946_vm2, %v3504_v10  ;;  %3424 = vmatmul.msk.bf16.gmra.mxu3 %vm946_vm2, %v3530_v11 }
  0xe6   : > { %v3827_v18 = vpack.c.bf16 %v2322_v16, %v2321_v14  ;;  %v3957_v19 = vpack.c.bf16 %v2374_v17, %v2373_v15  ;;  %v2219_v34 = vsel %vm1803_vm5, %v1296_v20, %v2011_v26  ;;  %v2271_v35 = vsel %vm1855_vm6, %v1426_v21, %v2063_v27  ;;  %v3454_v20 = vld [vmem:[%s4262_s30 + $0x70] sm:$0xff]  ;;  %v3480_v21 = vld [vmem:[%s4262_s30 + $0x140] sm:$0xff] }
  0xe7   : > { %v3506_v27 = vld [vmem:[%s4262_s30 + $0x210] sm:$0xff] }
  0xe8   : > { %4123 = vst [vmem:[%s4352_s8 + $0x1b8] sm:$0xff] %v3827_v18   ;;  %v1555_v22 = vpop.f32.mrf.mxu2  ;;  %v1685_v23 = vpop.f32.mrf.mxu3 }
  0xe9   : > { %4149 = vst [vmem:[%s4352_s8 + $0x288] sm:$0xff] %v3957_v19   ;;  %v1297_v24 = vpop.f32.mrf.mxu0  ;;  %v1427_v25 = vpop.f32.mrf.mxu1  ;;  %v1556_v30 = vadd.f32 %v4335_v49, %v1555_v22  ;;  %v1686_v33 = vadd.f32 %v4335_v49, %v1685_v23 }
  0xea   : > { %v1298_v28 = vadd.f32 %v4335_v49, %v1297_v24  ;;  %v1428_v29 = vadd.f32 %v4335_v49, %v1427_v25 }
  0xeb   : > { %v2115_v40 = vmul.f32 0.01, %v1556_v30  ;;  %vm1907_vm9 = vcmp.ge.f32.partialorder %v1556_v30, 0.0  ;;  %v2167_v45 = vmul.f32 0.01, %v1686_v33  ;;  %vm1959_vm10 = vcmp.ge.f32.partialorder %v1686_v33, 0.0 }
  0xec   : > { %vm1804_vm7 = vcmp.ge.f32.partialorder %v1298_v28, 0.0  ;;  %v2012_v31 = vmul.f32 0.01, %v1298_v28  ;;  %vm1856_vm8 = vcmp.ge.f32.partialorder %v1428_v29, 0.0  ;;  %v2064_v32 = vmul.f32 0.01, %v1428_v29 }
  0xed   : > { %v2323_v55 = vsel %vm1907_vm9, %v1556_v30, %v2115_v40  ;;  %v2375_v56 = vsel %vm1959_vm10, %v1686_v33, %v2167_v45 }
  0xee   : > { %v2220_v36 = vsel %vm1804_vm7, %v1298_v28, %v2012_v31  ;;  %v2272_v37 = vsel %vm1856_vm8, %v1428_v29, %v2064_v32  ;;  %v3532_v28 = vld [vmem:[%s4262_s30 + $0x2e0] sm:$0xff] }
  0xef   : > { %v3572_v38 = vpack.c.bf16 %v2220_v36, %v2219_v34  ;;  %v3702_v39 = vpack.c.bf16 %v2272_v37, %v2271_v35 }
  0xf0   : > { %v1557_v41 = vpop.f32.mrf.mxu2  ;;  %v1687_v42 = vpop.f32.mrf.mxu3 }
  0xf1   : > { %4072 = vst [vmem:[%s4352_s8 + $0x20] sm:$0xff] %v3572_v38   ;;  %v1558_v46 = vadd.f32 %v4335_v49, %v1557_v41  ;;  %v1688_v47 = vadd.f32 %v4335_v49, %v1687_v42  ;;  %v1300_v48 = vpop.f32.mrf.mxu0  ;;  %v1430_v50 = vpop.f32.mrf.mxu1 }
  0xf2   : > { %4098 = vst [vmem:[%s4352_s8 + $0xf0] sm:$0xff] %v3702_v39   ;;  %v1301_v61 = vadd.f32 %v4335_v49, %v1300_v48  ;;  %v1431_v62 = vadd.f32 %v4335_v49, %v1430_v50 }
  0xf3   : > { %vm1908_vm11 = vcmp.ge.f32.partialorder %v1558_v46, 0.0  ;;  %v2116_v53 = vmul.f32 0.01, %v1558_v46  ;;  %vm1960_vm12 = vcmp.ge.f32.partialorder %v1688_v47, 0.0  ;;  %v2168_v54 = vmul.f32 0.01, %v1688_v47 }
  0xf4   : > { %3347 = vmatmul.msk.bf16.gmra.mxu0 %vm946_vm2, %v3453_v43  ;;  %3373 = vmatmul.msk.bf16.gmra.mxu1 %vm946_vm2, %v3479_v44  ;;  %v2013_v3 = vmul.f32 0.01, %v1301_v61  ;;  %v2065_v4 = vmul.f32 0.01, %v1431_v62  ;;  %vm1805_vm13 = vcmp.ge.f32.partialorder %v1301_v61, 0.0  ;;  %vm1857_vm14 = vcmp.ge.f32.partialorder %v1431_v62, 0.0 }
  0xf5   : > { %v2324_v57 = vsel %vm1908_vm11, %v1558_v46, %v2116_v53  ;;  %v2376_v58 = vsel %vm1960_vm12, %v1688_v47, %v2168_v54  ;;  %3399 = vmatmul.msk.bf16.gmra.mxu2 %vm946_vm2, %v3505_v51  ;;  %3425 = vmatmul.msk.bf16.gmra.mxu3 %vm946_vm2, %v3531_v52 }
  0xf6   : > { %v3832_v59 = vpack.c.bf16 %v2324_v57, %v2323_v55  ;;  %v3962_v60 = vpack.c.bf16 %v2376_v58, %v2375_v56  ;;  %v2221_v11 = vsel %vm1805_vm13, %v1301_v61, %v2013_v3  ;;  %v2273_v12 = vsel %vm1857_vm14, %v1431_v62, %v2065_v4  ;;  %v3455_v61 = vld [vmem:[%s4262_s30 + $0x78] sm:$0xff]  ;;  %v3481_v62 = vld [vmem:[%s4262_s30 + $0x148] sm:$0xff] }
  0xf7   : > { %v3507_v4 = vld [vmem:[%s4262_s30 + $0x218] sm:$0xff] }
  0xf8   : > { %4124 = vst [vmem:[%s4352_s8 + $0x1c0] sm:$0xff] %v3832_v59   ;;  %v1560_v63 = vpop.f32.mrf.mxu2  ;;  %v1690_v0 = vpop.f32.mrf.mxu3 }
  0xf9   : > { %4150 = vst [vmem:[%s4352_s8 + $0x290] sm:$0xff] %v3962_v60   ;;  %v1302_v1 = vpop.f32.mrf.mxu0  ;;  %v1432_v2 = vpop.f32.mrf.mxu1  ;;  %v1561_v7 = vadd.f32 %v4335_v49, %v1560_v63  ;;  %v1691_v10 = vadd.f32 %v4335_v49, %v1690_v0 }
  0xfa   : > { %v1303_v5 = vadd.f32 %v4335_v49, %v1302_v1  ;;  %v1433_v6 = vadd.f32 %v4335_v49, %v1432_v2 }
  0xfb   : > { %v2117_v17 = vmul.f32 0.01, %v1561_v7  ;;  %vm1909_vm1 = vcmp.ge.f32.partialorder %v1561_v7, 0.0  ;;  %v2169_v22 = vmul.f32 0.01, %v1691_v10  ;;  %vm1961_vm3 = vcmp.ge.f32.partialorder %v1691_v10, 0.0 }
  0xfc   : > { %vm1806_vm15 = vcmp.ge.f32.partialorder %v1303_v5, 0.0  ;;  %v2014_v8 = vmul.f32 0.01, %v1303_v5  ;;  %vm1858_vm0 = vcmp.ge.f32.partialorder %v1433_v6, 0.0  ;;  %v2066_v9 = vmul.f32 0.01, %v1433_v6 }
  0xfd   : > { %v2325_v31 = vsel %vm1909_vm1, %v1561_v7, %v2117_v17  ;;  %v2377_v32 = vsel %vm1961_vm3, %v1691_v10, %v2169_v22 }
  0xfe   : > { %v2222_v13 = vsel %vm1806_vm15, %v1303_v5, %v2014_v8  ;;  %v2274_v14 = vsel %vm1858_vm0, %v1433_v6, %v2066_v9  ;;  %v3533_v5 = vld [vmem:[%s4262_s30 + $0x2e8] sm:$0xff] }
  0xff   : > { %v3577_v15 = vpack.c.bf16 %v2222_v13, %v2221_v11  ;;  %v3707_v16 = vpack.c.bf16 %v2274_v14, %v2273_v12 }
 0x100   : > { %v1562_v18 = vpop.f32.mrf.mxu2  ;;  %v1692_v19 = vpop.f32.mrf.mxu3 }
 0x101   : > { %4073 = vst [vmem:[%s4352_s8 + $0x28] sm:$0xff] %v3577_v15   ;;  %v1563_v23 = vadd.f32 %v4335_v49, %v1562_v18  ;;  %v1693_v24 = vadd.f32 %v4335_v49, %v1692_v19  ;;  %v1305_v25 = vpop.f32.mrf.mxu0  ;;  %v1435_v26 = vpop.f32.mrf.mxu1 }
 0x102   : > { %4099 = vst [vmem:[%s4352_s8 + $0xf8] sm:$0xff] %v3707_v16   ;;  %v1306_v37 = vadd.f32 %v4335_v49, %v1305_v25  ;;  %v1436_v38 = vadd.f32 %v4335_v49, %v1435_v26 }
 0x103   : > { %vm1910_vm4 = vcmp.ge.f32.partialorder %v1563_v23, 0.0  ;;  %v2118_v29 = vmul.f32 0.01, %v1563_v23  ;;  %vm1962_vm5 = vcmp.ge.f32.partialorder %v1693_v24, 0.0  ;;  %v2170_v30 = vmul.f32 0.01, %v1693_v24 }
 0x104   : > { %3348 = vmatmul.msk.bf16.gmra.mxu0 %vm946_vm2, %v3454_v20  ;;  %3374 = vmatmul.msk.bf16.gmra.mxu1 %vm946_vm2, %v3480_v21  ;;  %v2015_v43 = vmul.f32 0.01, %v1306_v37  ;;  %v2067_v44 = vmul.f32 0.01, %v1436_v38  ;;  %vm1807_vm6 = vcmp.ge.f32.partialorder %v1306_v37, 0.0  ;;  %vm1859_vm7 = vcmp.ge.f32.partialorder %v1436_v38, 0.0 }
 0x105   : > { %v2326_v33 = vsel %vm1910_vm4, %v1563_v23, %v2118_v29  ;;  %v2378_v34 = vsel %vm1962_vm5, %v1693_v24, %v2170_v30  ;;  %3400 = vmatmul.msk.bf16.gmra.mxu2 %vm946_vm2, %v3506_v27  ;;  %3426 = vmatmul.msk.bf16.gmra.mxu3 %vm946_vm2, %v3532_v28 }
 0x106   : > { %v3837_v35 = vpack.c.bf16 %v2326_v33, %v2325_v31  ;;  %v3967_v36 = vpack.c.bf16 %v2378_v34, %v2377_v32  ;;  %v2223_v52 = vsel %vm1807_vm6, %v1306_v37, %v2015_v43  ;;  %v2275_v53 = vsel %vm1859_vm7, %v1436_v38, %v2067_v44  ;;  %v3456_v37 = vld [vmem:[%s4262_s30 + $0x80] sm:$0xff]  ;;  %v3482_v38 = vld [vmem:[%s4262_s30 + $0x150] sm:$0xff] }
 0x107   : > { %v3508_v44 = vld [vmem:[%s4262_s30 + $0x220] sm:$0xff] }
 0x108   : > { %4125 = vst [vmem:[%s4352_s8 + $0x1c8] sm:$0xff] %v3837_v35   ;;  %v1565_v39 = vpop.f32.mrf.mxu2  ;;  %v1695_v40 = vpop.f32.mrf.mxu3 }
 0x109   : > { %4151 = vst [vmem:[%s4352_s8 + $0x298] sm:$0xff] %v3967_v36   ;;  %v1307_v41 = vpop.f32.mrf.mxu0  ;;  %v1437_v42 = vpop.f32.mrf.mxu1  ;;  %v1566_v47 = vadd.f32 %v4335_v49, %v1565_v39  ;;  %v1696_v51 = vadd.f32 %v4335_v49, %v1695_v40 }
 0x10a   : > { %v1308_v45 = vadd.f32 %v4335_v49, %v1307_v41  ;;  %v1438_v46 = vadd.f32 %v4335_v49, %v1437_v42 }
 0x10b   : > { %v2119_v58 = vmul.f32 0.01, %v1566_v47  ;;  %vm1911_vm10 = vcmp.ge.f32.partialorder %v1566_v47, 0.0  ;;  %v2171_v63 = vmul.f32 0.01, %v1696_v51  ;;  %vm1963_vm11 = vcmp.ge.f32.partialorder %v1696_v51, 0.0 }
 0x10c   : > { %vm1808_vm8 = vcmp.ge.f32.partialorder %v1308_v45, 0.0  ;;  %v2016_v48 = vmul.f32 0.01, %v1308_v45  ;;  %vm1860_vm9 = vcmp.ge.f32.partialorder %v1438_v46, 0.0  ;;  %v2068_v50 = vmul.f32 0.01, %v1438_v46 }
 0x10d   : > { %v2327_v8 = vsel %vm1911_vm10, %v1566_v47, %v2119_v58  ;;  %v2379_v9 = vsel %vm1963_vm11, %v1696_v51, %v2171_v63 }
 0x10e   : > { %v2224_v54 = vsel %vm1808_vm8, %v1308_v45, %v2016_v48  ;;  %v2276_v55 = vsel %vm1860_vm9, %v1438_v46, %v2068_v50  ;;  %v3534_v45 = vld [vmem:[%s4262_s30 + $0x2f0] sm:$0xff] }
 0x10f   : > { %v3582_v56 = vpack.c.bf16 %v2224_v54, %v2223_v52  ;;  %v3712_v57 = vpack.c.bf16 %v2276_v55, %v2275_v53 }
 0x110   : > { %v1567_v59 = vpop.f32.mrf.mxu2  ;;  %v1697_v60 = vpop.f32.mrf.mxu3 }
 0x111   : > { %4074 = vst [vmem:[%s4352_s8 + $0x30] sm:$0xff] %v3582_v56   ;;  %v1568_v0 = vadd.f32 %v4335_v49, %v1567_v59  ;;  %v1698_v1 = vadd.f32 %v4335_v49, %v1697_v60  ;;  %v1310_v2 = vpop.f32.mrf.mxu0  ;;  %v1440_v3 = vpop.f32.mrf.mxu1 }
 0x112   : > { %4100 = vst [vmem:[%s4352_s8 + $0x100] sm:$0xff] %v3712_v57   ;;  %v1311_v14 = vadd.f32 %v4335_v49, %v1310_v2  ;;  %v1441_v15 = vadd.f32 %v4335_v49, %v1440_v3 }
 0x113   : > { %vm1912_vm12 = vcmp.ge.f32.partialorder %v1568_v0, 0.0  ;;  %v2120_v6 = vmul.f32 0.01, %v1568_v0  ;;  %vm1964_vm13 = vcmp.ge.f32.partialorder %v1698_v1, 0.0  ;;  %v2172_v7 = vmul.f32 0.01, %v1698_v1 }
 0x114   : > { %3349 = vmatmul.msk.bf16.gmra.mxu0 %vm946_vm2, %v3455_v61  ;;  %3375 = vmatmul.msk.bf16.gmra.mxu1 %vm946_vm2, %v3481_v62  ;;  %v2017_v20 = vmul.f32 0.01, %v1311_v14  ;;  %v2069_v21 = vmul.f32 0.01, %v1441_v15  ;;  %vm1809_vm14 = vcmp.ge.f32.partialorder %v1311_v14, 0.0  ;;  %vm1861_vm15 = vcmp.ge.f32.partialorder %v1441_v15, 0.0 }
 0x115   : > { %v2328_v10 = vsel %vm1912_vm12, %v1568_v0, %v2120_v6  ;;  %v2380_v11 = vsel %vm1964_vm13, %v1698_v1, %v2172_v7  ;;  %3401 = vmatmul.msk.bf16.gmra.mxu2 %vm946_vm2, %v3507_v4  ;;  %3427 = vmatmul.msk.bf16.gmra.mxu3 %vm946_vm2, %v3533_v5 }
 0x116   : > { %v3842_v12 = vpack.c.bf16 %v2328_v10, %v2327_v8  ;;  %v3972_v13 = vpack.c.bf16 %v2380_v11, %v2379_v9  ;;  %v2225_v28 = vsel %vm1809_vm14, %v1311_v14, %v2017_v20  ;;  %v2277_v29 = vsel %vm1861_vm15, %v1441_v15, %v2069_v21  ;;  %v3457_v14 = vld [vmem:[%s4262_s30 + $0x88] sm:$0xff]  ;;  %v3483_v15 = vld [vmem:[%s4262_s30 + $0x158] sm:$0xff] }
 0x117   : > { %v3509_v21 = vld [vmem:[%s4262_s30 + $0x228] sm:$0xff] }
 0x118   : > { %4126 = vst [vmem:[%s4352_s8 + $0x1d0] sm:$0xff] %v3842_v12   ;;  %v1570_v16 = vpop.f32.mrf.mxu2  ;;  %v1700_v17 = vpop.f32.mrf.mxu3 }
 0x119   : > { %4152 = vst [vmem:[%s4352_s8 + $0x2a0] sm:$0xff] %v3972_v13   ;;  %v1312_v18 = vpop.f32.mrf.mxu0  ;;  %v1442_v19 = vpop.f32.mrf.mxu1  ;;  %v1571_v24 = vadd.f32 %v4335_v49, %v1570_v16  ;;  %v1701_v27 = vadd.f32 %v4335_v49, %v1700_v17 }
 0x11a   : > { %v1313_v22 = vadd.f32 %v4335_v49, %v1312_v18  ;;  %v1443_v23 = vadd.f32 %v4335_v49, %v1442_v19 }
 0x11b   : > { %v2121_v34 = vmul.f32 0.01, %v1571_v24  ;;  %vm1913_vm3 = vcmp.ge.f32.partialorder %v1571_v24, 0.0  ;;  %v2173_v39 = vmul.f32 0.01, %v1701_v27  ;;  %vm1965_vm4 = vcmp.ge.f32.partialorder %v1701_v27, 0.0 }
 0x11c   : > { %vm1810_vm0 = vcmp.ge.f32.partialorder %v1313_v22, 0.0  ;;  %v2018_v25 = vmul.f32 0.01, %v1313_v22  ;;  %vm1862_vm1 = vcmp.ge.f32.partialorder %v1443_v23, 0.0  ;;  %v2070_v26 = vmul.f32 0.01, %v1443_v23 }
 0x11d   : > { %v2329_v48 = vsel %vm1913_vm3, %v1571_v24, %v2121_v34  ;;  %v2381_v50 = vsel %vm1965_vm4, %v1701_v27, %v2173_v39  ;;  %v4533_v39 = vld [vmem:[%s4811_s2] ss:$0 sm:$0xff] }
 0x11e   : > { %v2226_v30 = vsel %vm1810_vm0, %v1313_v22, %v2018_v25  ;;  %v2278_v31 = vsel %vm1862_vm1, %v1443_v23, %v2070_v26  ;;  %v3535_v22 = vld [vmem:[%s4262_s30 + $0x2f8] sm:$0xff] }
 0x11f   : > { %v3587_v32 = vpack.c.bf16 %v2226_v30, %v2225_v28  ;;  %v3717_v33 = vpack.c.bf16 %v2278_v31, %v2277_v29 }
 0x120   : > { %v1572_v35 = vpop.f32.mrf.mxu2  ;;  %v1702_v36 = vpop.f32.mrf.mxu3 }
 0x121   : > { %4075 = vst [vmem:[%s4352_s8 + $0x38] sm:$0xff] %v3587_v32   ;;  %v1573_v40 = vadd.f32 %v4335_v49, %v1572_v35  ;;  %v1703_v41 = vadd.f32 %v4335_v49, %v1702_v36  ;;  %v1315_v42 = vpop.f32.mrf.mxu0  ;;  %v1445_v43 = vpop.f32.mrf.mxu1 }
 0x122   : > { %4101 = vst [vmem:[%s4352_s8 + $0x108] sm:$0xff] %v3717_v33   ;;  %v1316_v55 = vadd.f32 %v4335_v49, %v1315_v42  ;;  %v1446_v56 = vadd.f32 %v4335_v49, %v1445_v43 }
 0x123   : > { %vm1914_vm5 = vcmp.ge.f32.partialorder %v1573_v40, 0.0  ;;  %v2122_v46 = vmul.f32 0.01, %v1573_v40  ;;  %vm1966_vm6 = vcmp.ge.f32.partialorder %v1703_v41, 0.0  ;;  %v2174_v47 = vmul.f32 0.01, %v1703_v41 }
 0x124   : > { %3350 = vmatmul.msk.bf16.gmra.mxu0 %vm946_vm2, %v3456_v37  ;;  %3376 = vmatmul.msk.bf16.gmra.mxu1 %vm946_vm2, %v3482_v38  ;;  %v2019_v61 = vmul.f32 0.01, %v1316_v55  ;;  %v2071_v62 = vmul.f32 0.01, %v1446_v56  ;;  %vm1811_vm7 = vcmp.ge.f32.partialorder %v1316_v55, 0.0  ;;  %vm1863_vm8 = vcmp.ge.f32.partialorder %v1446_v56, 0.0 }
 0x125   : > { %v2330_v51 = vsel %vm1914_vm5, %v1573_v40, %v2122_v46  ;;  %v2382_v52 = vsel %vm1966_vm6, %v1703_v41, %v2174_v47  ;;  %3402 = vmatmul.msk.bf16.gmra.mxu2 %vm946_vm2, %v3508_v44  ;;  %3428 = vmatmul.msk.bf16.gmra.mxu3 %vm946_vm2, %v3534_v45 }
 0x126   : > { %v3847_v53 = vpack.c.bf16 %v2330_v51, %v2329_v48  ;;  %v3977_v54 = vpack.c.bf16 %v2382_v52, %v2381_v50  ;;  %v2227_v5 = vsel %vm1811_vm7, %v1316_v55, %v2019_v61  ;;  %v2279_v6 = vsel %vm1863_vm8, %v1446_v56, %v2071_v62  ;;  %v3458_v55 = vld [vmem:[%s4262_s30 + $0x90] sm:$0xff]  ;;  %v3484_v56 = vld [vmem:[%s4262_s30 + $0x160] sm:$0xff] }
 0x127   : > { %v3510_v62 = vld [vmem:[%s4262_s30 + $0x230] sm:$0xff] }
 0x128   : > { %4127 = vst [vmem:[%s4352_s8 + $0x1d8] sm:$0xff] %v3847_v53   ;;  %v1575_v57 = vpop.f32.mrf.mxu2  ;;  %v1705_v58 = vpop.f32.mrf.mxu3 }
 0x129   : > { %4153 = vst [vmem:[%s4352_s8 + $0x2a8] sm:$0xff] %v3977_v54   ;;  %v1317_v59 = vpop.f32.mrf.mxu0  ;;  %v1447_v60 = vpop.f32.mrf.mxu1  ;;  %v1576_v1 = vadd.f32 %v4335_v49, %v1575_v57  ;;  %v1706_v4 = vadd.f32 %v4335_v49, %v1705_v58 }
 0x12a   : > { %v1318_v63 = vadd.f32 %v4335_v49, %v1317_v59  ;;  %v1448_v0 = vadd.f32 %v4335_v49, %v1447_v60 }
 0x12b   : > { %v2123_v11 = vmul.f32 0.01, %v1576_v1  ;;  %vm1915_vm11 = vcmp.ge.f32.partialorder %v1576_v1, 0.0  ;;  %v2175_v16 = vmul.f32 0.01, %v1706_v4  ;;  %vm1967_vm12 = vcmp.ge.f32.partialorder %v1706_v4, 0.0 }
 0x12c   : > { %vm1812_vm9 = vcmp.ge.f32.partialorder %v1318_v63, 0.0  ;;  %v2020_v2 = vmul.f32 0.01, %v1318_v63  ;;  %vm1864_vm10 = vcmp.ge.f32.partialorder %v1448_v0, 0.0  ;;  %v2072_v3 = vmul.f32 0.01, %v1448_v0 }
 0x12d   : > { %v2331_v25 = vsel %vm1915_vm11, %v1576_v1, %v2123_v11  ;;  %v2383_v26 = vsel %vm1967_vm12, %v1706_v4, %v2175_v16 }
 0x12e   : > { %v2228_v7 = vsel %vm1812_vm9, %v1318_v63, %v2020_v2  ;;  %v2280_v8 = vsel %vm1864_vm10, %v1448_v0, %v2072_v3  ;;  %v3536_v63 = vld [vmem:[%s4262_s30 + $0x300] sm:$0xff] }
 0x12f   : > { %v3592_v9 = vpack.c.bf16 %v2228_v7, %v2227_v5  ;;  %v3722_v10 = vpack.c.bf16 %v2280_v8, %v2279_v6 }
 0x130   : > { %v1577_v12 = vpop.f32.mrf.mxu2  ;;  %v1707_v13 = vpop.f32.mrf.mxu3 }
 0x131   : > { %4076 = vst [vmem:[%s4352_s8 + $0x40] sm:$0xff] %v3592_v9   ;;  %v1578_v17 = vadd.f32 %v4335_v49, %v1577_v12  ;;  %v1708_v18 = vadd.f32 %v4335_v49, %v1707_v13  ;;  %v1320_v19 = vpop.f32.mrf.mxu0  ;;  %v1450_v20 = vpop.f32.mrf.mxu1 }
 0x132   : > { %4102 = vst [vmem:[%s4352_s8 + $0x110] sm:$0xff] %v3722_v10   ;;  %v1321_v31 = vadd.f32 %v4335_v49, %v1320_v19  ;;  %v1451_v32 = vadd.f32 %v4335_v49, %v1450_v20 }
 0x133   : > { %vm1916_vm13 = vcmp.ge.f32.partialorder %v1578_v17, 0.0  ;;  %v2124_v23 = vmul.f32 0.01, %v1578_v17  ;;  %vm1968_vm14 = vcmp.ge.f32.partialorder %v1708_v18, 0.0  ;;  %v2176_v24 = vmul.f32 0.01, %v1708_v18 }
 0x134   : > { %3351 = vmatmul.msk.bf16.gmra.mxu0 %vm946_vm2, %v3457_v14  ;;  %3377 = vmatmul.msk.bf16.gmra.mxu1 %vm946_vm2, %v3483_v15  ;;  %v2021_v37 = vmul.f32 0.01, %v1321_v31  ;;  %v2073_v38 = vmul.f32 0.01, %v1451_v32  ;;  %vm1813_vm15 = vcmp.ge.f32.partialorder %v1321_v31, 0.0  ;;  %vm1865_vm0 = vcmp.ge.f32.partialorder %v1451_v32, 0.0 }
 0x135   : > { %v2332_v27 = vsel %vm1916_vm13, %v1578_v17, %v2124_v23  ;;  %v2384_v28 = vsel %vm1968_vm14, %v1708_v18, %v2176_v24  ;;  %3403 = vmatmul.msk.bf16.gmra.mxu2 %vm946_vm2, %v3509_v21  ;;  %3429 = vmatmul.msk.bf16.gmra.mxu3 %vm946_vm2, %v3535_v22 }
 0x136   : > { %v3852_v29 = vpack.c.bf16 %v2332_v27, %v2331_v25  ;;  %v3982_v30 = vpack.c.bf16 %v2384_v28, %v2383_v26  ;;  %v2229_v45 = vsel %vm1813_vm15, %v1321_v31, %v2021_v37  ;;  %v2281_v46 = vsel %vm1865_vm0, %v1451_v32, %v2073_v38  ;;  %v3459_v31 = vld [vmem:[%s4262_s30 + $0x98] sm:$0xff]  ;;  %v3485_v32 = vld [vmem:[%s4262_s30 + $0x168] sm:$0xff] }
 0x137   : > { %v3511_v38 = vld [vmem:[%s4262_s30 + $0x238] sm:$0xff] }
 0x138   : > { %4128 = vst [vmem:[%s4352_s8 + $0x1e0] sm:$0xff] %v3852_v29   ;;  %v1580_v33 = vpop.f32.mrf.mxu2  ;;  %v1710_v34 = vpop.f32.mrf.mxu3 }
 0x139   : > { %4154 = vst [vmem:[%s4352_s8 + $0x2b0] sm:$0xff] %v3982_v30   ;;  %v1322_v35 = vpop.f32.mrf.mxu0  ;;  %v1452_v36 = vpop.f32.mrf.mxu1  ;;  %v1581_v49 = vadd.f32 %v4533_v39, %v1580_v33  ;;  %v1711_v44 = vadd.f32 %v4533_v39, %v1710_v34 }
 0x13a   : > { %v1323_v40 = vadd.f32 %v4533_v39, %v1322_v35  ;;  %v1453_v41 = vadd.f32 %v4533_v39, %v1452_v36 }
 0x13b   : > { %v2125_v52 = vmul.f32 0.01, %v1581_v49  ;;  %vm1917_vm4 = vcmp.ge.f32.partialorder %v1581_v49, 0.0  ;;  %v2177_v57 = vmul.f32 0.01, %v1711_v44  ;;  %vm1969_vm5 = vcmp.ge.f32.partialorder %v1711_v44, 0.0 }
 0x13c   : > { %vm1814_vm1 = vcmp.ge.f32.partialorder %v1323_v40, 0.0  ;;  %v2022_v42 = vmul.f32 0.01, %v1323_v40  ;;  %vm1866_vm3 = vcmp.ge.f32.partialorder %v1453_v41, 0.0  ;;  %v2074_v43 = vmul.f32 0.01, %v1453_v41 }
 0x13d   : > { %v2333_v2 = vsel %vm1917_vm4, %v1581_v49, %v2125_v52  ;;  %v2385_v3 = vsel %vm1969_vm5, %v1711_v44, %v2177_v57 }
 0x13e   : > { %v2230_v47 = vsel %vm1814_vm1, %v1323_v40, %v2022_v42  ;;  %v2282_v48 = vsel %vm1866_vm3, %v1453_v41, %v2074_v43  ;;  %v3537_v40 = vld [vmem:[%s4262_s30 + $0x308] sm:$0xff] }
 0x13f   : > { %v3597_v50 = vpack.c.bf16 %v2230_v47, %v2229_v45  ;;  %v3727_v51 = vpack.c.bf16 %v2282_v48, %v2281_v46 }
 0x140   : > { %v1582_v53 = vpop.f32.mrf.mxu2  ;;  %v1712_v54 = vpop.f32.mrf.mxu3 }
 0x141   : > { %4077 = vst [vmem:[%s4352_s8 + $0x48] sm:$0xff] %v3597_v50   ;;  %v1583_v58 = vadd.f32 %v4533_v39, %v1582_v53  ;;  %v1713_v59 = vadd.f32 %v4533_v39, %v1712_v54  ;;  %v1325_v60 = vpop.f32.mrf.mxu0  ;;  %v1455_v61 = vpop.f32.mrf.mxu1 }
 0x142   : > { %4103 = vst [vmem:[%s4352_s8 + $0x118] sm:$0xff] %v3727_v51   ;;  %v1326_v8 = vadd.f32 %v4533_v39, %v1325_v60  ;;  %v1456_v9 = vadd.f32 %v4533_v39, %v1455_v61 }
 0x143   : > { %vm1918_vm6 = vcmp.ge.f32.partialorder %v1583_v58, 0.0  ;;  %v2126_v0 = vmul.f32 0.01, %v1583_v58  ;;  %vm1970_vm7 = vcmp.ge.f32.partialorder %v1713_v59, 0.0  ;;  %v2178_v1 = vmul.f32 0.01, %v1713_v59 }
 0x144   : > { %3352 = vmatmul.msk.bf16.gmra.mxu0 %vm946_vm2, %v3458_v55  ;;  %3378 = vmatmul.msk.bf16.gmra.mxu1 %vm946_vm2, %v3484_v56  ;;  %v2023_v14 = vmul.f32 0.01, %v1326_v8  ;;  %v2075_v15 = vmul.f32 0.01, %v1456_v9  ;;  %vm1815_vm8 = vcmp.ge.f32.partialorder %v1326_v8, 0.0  ;;  %vm1867_vm9 = vcmp.ge.f32.partialorder %v1456_v9, 0.0 }
 0x145   : > { %v2334_v4 = vsel %vm1918_vm6, %v1583_v58, %v2126_v0  ;;  %v2386_v5 = vsel %vm1970_vm7, %v1713_v59, %v2178_v1  ;;  %3404 = vmatmul.msk.bf16.gmra.mxu2 %vm946_vm2, %v3510_v62  ;;  %3430 = vmatmul.msk.bf16.gmra.mxu3 %vm946_vm2, %v3536_v63 }
 0x146   : > { %v3857_v6 = vpack.c.bf16 %v2334_v4, %v2333_v2  ;;  %v3987_v7 = vpack.c.bf16 %v2386_v5, %v2385_v3  ;;  %v2231_v22 = vsel %vm1815_vm8, %v1326_v8, %v2023_v14  ;;  %v2283_v23 = vsel %vm1867_vm9, %v1456_v9, %v2075_v15  ;;  %v3460_v8 = vld [vmem:[%s4262_s30 + $0xa0] sm:$0xff]  ;;  %v3486_v9 = vld [vmem:[%s4262_s30 + $0x170] sm:$0xff] }
 0x147   : > { %v3512_v15 = vld [vmem:[%s4262_s30 + $0x240] sm:$0xff] }
 0x148   : > { %4129 = vst [vmem:[%s4352_s8 + $0x1e8] sm:$0xff] %v3857_v6   ;;  %v1585_v10 = vpop.f32.mrf.mxu2  ;;  %v1715_v11 = vpop.f32.mrf.mxu3 }
 0x149   : > { %4155 = vst [vmem:[%s4352_s8 + $0x2b8] sm:$0xff] %v3987_v7   ;;  %v1327_v12 = vpop.f32.mrf.mxu0  ;;  %v1457_v13 = vpop.f32.mrf.mxu1  ;;  %v1586_v18 = vadd.f32 %v4533_v39, %v1585_v10  ;;  %v1716_v21 = vadd.f32 %v4533_v39, %v1715_v11 }
 0x14a   : > { %v1328_v16 = vadd.f32 %v4533_v39, %v1327_v12  ;;  %v1458_v17 = vadd.f32 %v4533_v39, %v1457_v13 }
 0x14b   : > { %v2127_v28 = vmul.f32 0.01, %v1586_v18  ;;  %vm1919_vm12 = vcmp.ge.f32.partialorder %v1586_v18, 0.0  ;;  %v2179_v33 = vmul.f32 0.01, %v1716_v21  ;;  %vm1971_vm13 = vcmp.ge.f32.partialorder %v1716_v21, 0.0 }
 0x14c   : > { %vm1816_vm10 = vcmp.ge.f32.partialorder %v1328_v16, 0.0  ;;  %v2024_v19 = vmul.f32 0.01, %v1328_v16  ;;  %vm1868_vm11 = vcmp.ge.f32.partialorder %v1458_v17, 0.0  ;;  %v2076_v20 = vmul.f32 0.01, %v1458_v17 }
 0x14d   : > { %v2335_v42 = vsel %vm1919_vm12, %v1586_v18, %v2127_v28  ;;  %v2387_v43 = vsel %vm1971_vm13, %v1716_v21, %v2179_v33 }
 0x14e   : > { %v2232_v24 = vsel %vm1816_vm10, %v1328_v16, %v2024_v19  ;;  %v2284_v25 = vsel %vm1868_vm11, %v1458_v17, %v2076_v20  ;;  %v3538_v16 = vld [vmem:[%s4262_s30 + $0x310] sm:$0xff] }
 0x14f   : > { %v3602_v26 = vpack.c.bf16 %v2232_v24, %v2231_v22  ;;  %v3732_v27 = vpack.c.bf16 %v2284_v25, %v2283_v23 }
 0x150   : > { %v1587_v29 = vpop.f32.mrf.mxu2  ;;  %v1717_v30 = vpop.f32.mrf.mxu3 }
 0x151   : > { %4078 = vst [vmem:[%s4352_s8 + $0x50] sm:$0xff] %v3602_v26   ;;  %v1588_v34 = vadd.f32 %v4533_v39, %v1587_v29  ;;  %v1718_v35 = vadd.f32 %v4533_v39, %v1717_v30  ;;  %v1330_v36 = vpop.f32.mrf.mxu0  ;;  %v1460_v37 = vpop.f32.mrf.mxu1 }
 0x152   : > { %4104 = vst [vmem:[%s4352_s8 + $0x120] sm:$0xff] %v3732_v27   ;;  %v1331_v48 = vadd.f32 %v4533_v39, %v1330_v36  ;;  %v1461_v50 = vadd.f32 %v4533_v39, %v1460_v37 }
 0x153   : > { %vm1920_vm14 = vcmp.ge.f32.partialorder %v1588_v34, 0.0  ;;  %v2128_v41 = vmul.f32 0.01, %v1588_v34  ;;  %vm1972_vm15 = vcmp.ge.f32.partialorder %v1718_v35, 0.0  ;;  %v2180_v49 = vmul.f32 0.01, %v1718_v35 }
 0x154   : > { %3353 = vmatmul.msk.bf16.gmra.mxu0 %vm946_vm2, %v3459_v31  ;;  %3379 = vmatmul.msk.bf16.gmra.mxu1 %vm946_vm2, %v3485_v32  ;;  %v2025_v55 = vmul.f32 0.01, %v1331_v48  ;;  %v2077_v56 = vmul.f32 0.01, %v1461_v50  ;;  %vm1817_vm0 = vcmp.ge.f32.partialorder %v1331_v48, 0.0  ;;  %vm1869_vm1 = vcmp.ge.f32.partialorder %v1461_v50, 0.0 }
 0x155   : > { %v2336_v44 = vsel %vm1920_vm14, %v1588_v34, %v2128_v41  ;;  %v2388_v45 = vsel %vm1972_vm15, %v1718_v35, %v2180_v49  ;;  %3405 = vmatmul.msk.bf16.gmra.mxu2 %vm946_vm2, %v3511_v38  ;;  %3431 = vmatmul.msk.bf16.gmra.mxu3 %vm946_vm2, %v3537_v40 }
 0x156   : > { %v3862_v46 = vpack.c.bf16 %v2336_v44, %v2335_v42  ;;  %v3992_v47 = vpack.c.bf16 %v2388_v45, %v2387_v43  ;;  %v2233_v63 = vsel %vm1817_vm0, %v1331_v48, %v2025_v55  ;;  %v2285_v0 = vsel %vm1869_vm1, %v1461_v50, %v2077_v56  ;;  %v3461_v48 = vld [vmem:[%s4262_s30 + $0xa8] sm:$0xff]  ;;  %v3487_v50 = vld [vmem:[%s4262_s30 + $0x178] sm:$0xff] }
 0x157   : > { %v3513_v56 = vld [vmem:[%s4262_s30 + $0x248] sm:$0xff] }
 0x158   : > { %4130 = vst [vmem:[%s4352_s8 + $0x1f0] sm:$0xff] %v3862_v46   ;;  %v1590_v51 = vpop.f32.mrf.mxu2  ;;  %v1720_v52 = vpop.f32.mrf.mxu3 }
 0x159   : > { %4156 = vst [vmem:[%s4352_s8 + $0x2c0] sm:$0xff] %v3992_v47   ;;  %v1332_v53 = vpop.f32.mrf.mxu0  ;;  %v1462_v54 = vpop.f32.mrf.mxu1  ;;  %v1591_v59 = vadd.f32 %v4533_v39, %v1590_v51  ;;  %v1721_v62 = vadd.f32 %v4533_v39, %v1720_v52 }
 0x15a   : > { %v1333_v57 = vadd.f32 %v4533_v39, %v1332_v53  ;;  %v1463_v58 = vadd.f32 %v4533_v39, %v1462_v54 }
 0x15b   : > { %v2129_v5 = vmul.f32 0.01, %v1591_v59  ;;  %vm1921_vm5 = vcmp.ge.f32.partialorder %v1591_v59, 0.0  ;;  %v2181_v10 = vmul.f32 0.01, %v1721_v62  ;;  %vm1973_vm6 = vcmp.ge.f32.partialorder %v1721_v62, 0.0 }
 0x15c   : > { %vm1818_vm3 = vcmp.ge.f32.partialorder %v1333_v57, 0.0  ;;  %v2026_v60 = vmul.f32 0.01, %v1333_v57  ;;  %vm1870_vm4 = vcmp.ge.f32.partialorder %v1463_v58, 0.0  ;;  %v2078_v61 = vmul.f32 0.01, %v1463_v58 }
 0x15d   : > { %v2337_v19 = vsel %vm1921_vm5, %v1591_v59, %v2129_v5  ;;  %v2389_v20 = vsel %vm1973_vm6, %v1721_v62, %v2181_v10 }
 0x15e   : > { %v2234_v1 = vsel %vm1818_vm3, %v1333_v57, %v2026_v60  ;;  %v2286_v2 = vsel %vm1870_vm4, %v1463_v58, %v2078_v61  ;;  %v3539_v57 = vld [vmem:[%s4262_s30 + $0x318] sm:$0xff] }
 0x15f   : > { %v3607_v3 = vpack.c.bf16 %v2234_v1, %v2233_v63  ;;  %v3737_v4 = vpack.c.bf16 %v2286_v2, %v2285_v0 }
 0x160   : > { %v1592_v6 = vpop.f32.mrf.mxu2  ;;  %v1722_v7 = vpop.f32.mrf.mxu3 }
 0x161   : > { %4079 = vst [vmem:[%s4352_s8 + $0x58] sm:$0xff] %v3607_v3   ;;  %v1593_v11 = vadd.f32 %v4533_v39, %v1592_v6  ;;  %v1723_v12 = vadd.f32 %v4533_v39, %v1722_v7  ;;  %v1335_v13 = vpop.f32.mrf.mxu0  ;;  %v1465_v14 = vpop.f32.mrf.mxu1 }
 0x162   : > { %4105 = vst [vmem:[%s4352_s8 + $0x128] sm:$0xff] %v3737_v4   ;;  %v1336_v25 = vadd.f32 %v4533_v39, %v1335_v13  ;;  %v1466_v26 = vadd.f32 %v4533_v39, %v1465_v14 }
 0x163   : > { %vm1922_vm7 = vcmp.ge.f32.partialorder %v1593_v11, 0.0  ;;  %v2130_v17 = vmul.f32 0.01, %v1593_v11  ;;  %vm1974_vm8 = vcmp.ge.f32.partialorder %v1723_v12, 0.0  ;;  %v2182_v18 = vmul.f32 0.01, %v1723_v12 }
 0x164   : > { %3354 = vmatmul.msk.bf16.gmra.mxu0 %vm946_vm2, %v3460_v8  ;;  %3380 = vmatmul.msk.bf16.gmra.mxu1 %vm946_vm2, %v3486_v9  ;;  %v2027_v31 = vmul.f32 0.01, %v1336_v25  ;;  %v2079_v32 = vmul.f32 0.01, %v1466_v26  ;;  %vm1819_vm9 = vcmp.ge.f32.partialorder %v1336_v25, 0.0  ;;  %vm1871_vm10 = vcmp.ge.f32.partialorder %v1466_v26, 0.0 }
 0x165   : > { %v2338_v21 = vsel %vm1922_vm7, %v1593_v11, %v2130_v17  ;;  %v2390_v22 = vsel %vm1974_vm8, %v1723_v12, %v2182_v18  ;;  %3406 = vmatmul.msk.bf16.gmra.mxu2 %vm946_vm2, %v3512_v15  ;;  %3432 = vmatmul.msk.bf16.gmra.mxu3 %vm946_vm2, %v3538_v16 }
 0x166   : > { %v3867_v23 = vpack.c.bf16 %v2338_v21, %v2337_v19  ;;  %v3997_v24 = vpack.c.bf16 %v2390_v22, %v2389_v20  ;;  %v2235_v40 = vsel %vm1819_vm9, %v1336_v25, %v2027_v31  ;;  %v2287_v41 = vsel %vm1871_vm10, %v1466_v26, %v2079_v32  ;;  %v3462_v25 = vld [vmem:[%s4262_s30 + $0xb0] sm:$0xff]  ;;  %v3488_v26 = vld [vmem:[%s4262_s30 + $0x180] sm:$0xff] }
 0x167   : > { %v3514_v32 = vld [vmem:[%s4262_s30 + $0x250] sm:$0xff] }
 0x168   : > { %4131 = vst [vmem:[%s4352_s8 + $0x1f8] sm:$0xff] %v3867_v23   ;;  %v1595_v27 = vpop.f32.mrf.mxu2  ;;  %v1725_v28 = vpop.f32.mrf.mxu3 }
 0x169   : > { %4157 = vst [vmem:[%s4352_s8 + $0x2c8] sm:$0xff] %v3997_v24   ;;  %v1337_v29 = vpop.f32.mrf.mxu0  ;;  %v1467_v30 = vpop.f32.mrf.mxu1  ;;  %v1596_v35 = vadd.f32 %v4533_v39, %v1595_v27  ;;  %v1726_v38 = vadd.f32 %v4533_v39, %v1725_v28 }
 0x16a   : > { %v1338_v33 = vadd.f32 %v4533_v39, %v1337_v29  ;;  %v1468_v34 = vadd.f32 %v4533_v39, %v1467_v30 }
 0x16b   : > { %v2131_v45 = vmul.f32 0.01, %v1596_v35  ;;  %vm1923_vm13 = vcmp.ge.f32.partialorder %v1596_v35, 0.0  ;;  %v2183_v51 = vmul.f32 0.01, %v1726_v38  ;;  %vm1975_vm14 = vcmp.ge.f32.partialorder %v1726_v38, 0.0 }
 0x16c   : > { %vm1820_vm11 = vcmp.ge.f32.partialorder %v1338_v33, 0.0  ;;  %v2028_v36 = vmul.f32 0.01, %v1338_v33  ;;  %vm1872_vm12 = vcmp.ge.f32.partialorder %v1468_v34, 0.0  ;;  %v2080_v37 = vmul.f32 0.01, %v1468_v34 }
 0x16d   : > { %v2339_v60 = vsel %vm1923_vm13, %v1596_v35, %v2131_v45  ;;  %v2391_v61 = vsel %vm1975_vm14, %v1726_v38, %v2183_v51 }
 0x16e   : > { %v2236_v49 = vsel %vm1820_vm11, %v1338_v33, %v2028_v36  ;;  %v2288_v42 = vsel %vm1872_vm12, %v1468_v34, %v2080_v37  ;;  %v3540_v33 = vld [vmem:[%s4262_s30 + $0x320] sm:$0xff] }
 0x16f   : > { %v3612_v43 = vpack.c.bf16 %v2236_v49, %v2235_v40  ;;  %v3742_v44 = vpack.c.bf16 %v2288_v42, %v2287_v41 }
 0x170   : > { %v1597_v46 = vpop.f32.mrf.mxu2  ;;  %v1727_v47 = vpop.f32.mrf.mxu3 }
 0x171   : > { %4080 = vst [vmem:[%s4352_s8 + $0x60] sm:$0xff] %v3612_v43   ;;  %v1598_v52 = vadd.f32 %v4533_v39, %v1597_v46  ;;  %v1728_v53 = vadd.f32 %v4533_v39, %v1727_v47  ;;  %v1340_v54 = vpop.f32.mrf.mxu0  ;;  %v1470_v55 = vpop.f32.mrf.mxu1 }
 0x172   : > { %4106 = vst [vmem:[%s4352_s8 + $0x130] sm:$0xff] %v3742_v44   ;;  %v1341_v2 = vadd.f32 %v4533_v39, %v1340_v54  ;;  %v1471_v3 = vadd.f32 %v4533_v39, %v1470_v55 }
 0x173   : > { %vm1924_vm15 = vcmp.ge.f32.partialorder %v1598_v52, 0.0  ;;  %v2132_v58 = vmul.f32 0.01, %v1598_v52  ;;  %vm1976_vm0 = vcmp.ge.f32.partialorder %v1728_v53, 0.0  ;;  %v2184_v59 = vmul.f32 0.01, %v1728_v53 }
 0x174   : > { %3355 = vmatmul.msk.bf16.gmra.mxu0 %vm946_vm2, %v3461_v48  ;;  %3381 = vmatmul.msk.bf16.gmra.mxu1 %vm946_vm2, %v3487_v50  ;;  %v2029_v8 = vmul.f32 0.01, %v1341_v2  ;;  %v2081_v9 = vmul.f32 0.01, %v1471_v3  ;;  %vm1821_vm1 = vcmp.ge.f32.partialorder %v1341_v2, 0.0  ;;  %vm1873_vm3 = vcmp.ge.f32.partialorder %v1471_v3, 0.0 }
 0x175   : > { %v2340_v62 = vsel %vm1924_vm15, %v1598_v52, %v2132_v58  ;;  %v2392_v63 = vsel %vm1976_vm0, %v1728_v53, %v2184_v59  ;;  %3407 = vmatmul.msk.bf16.gmra.mxu2 %vm946_vm2, %v3513_v56  ;;  %3433 = vmatmul.msk.bf16.gmra.mxu3 %vm946_vm2, %v3539_v57 }
 0x176   : > { %v3872_v0 = vpack.c.bf16 %v2340_v62, %v2339_v60  ;;  %v4002_v1 = vpack.c.bf16 %v2392_v63, %v2391_v61  ;;  %v2237_v16 = vsel %vm1821_vm1, %v1341_v2, %v2029_v8  ;;  %v2289_v17 = vsel %vm1873_vm3, %v1471_v3, %v2081_v9  ;;  %v3463_v2 = vld [vmem:[%s4262_s30 + $0xb8] sm:$0xff]  ;;  %v3489_v3 = vld [vmem:[%s4262_s30 + $0x188] sm:$0xff] }
 0x177   : > { %v3515_v9 = vld [vmem:[%s4262_s30 + $0x258] sm:$0xff] }
 0x178   : > { %4132 = vst [vmem:[%s4352_s8 + $0x200] sm:$0xff] %v3872_v0   ;;  %v1600_v4 = vpop.f32.mrf.mxu2  ;;  %v1730_v5 = vpop.f32.mrf.mxu3 }
 0x179   : > { %4158 = vst [vmem:[%s4352_s8 + $0x2d0] sm:$0xff] %v4002_v1   ;;  %v1342_v6 = vpop.f32.mrf.mxu0  ;;  %v1472_v7 = vpop.f32.mrf.mxu1  ;;  %v1601_v12 = vadd.f32 %v4533_v39, %v1600_v4  ;;  %v1731_v15 = vadd.f32 %v4533_v39, %v1730_v5 }
 0x17a   : > { %v1343_v10 = vadd.f32 %v4533_v39, %v1342_v6  ;;  %v1473_v11 = vadd.f32 %v4533_v39, %v1472_v7 }
 0x17b   : > { %v2133_v22 = vmul.f32 0.01, %v1601_v12  ;;  %vm1925_vm6 = vcmp.ge.f32.partialorder %v1601_v12, 0.0  ;;  %v2185_v27 = vmul.f32 0.01, %v1731_v15  ;;  %vm1977_vm7 = vcmp.ge.f32.partialorder %v1731_v15, 0.0 }
 0x17c   : > { %vm1822_vm4 = vcmp.ge.f32.partialorder %v1343_v10, 0.0  ;;  %v2030_v13 = vmul.f32 0.01, %v1343_v10  ;;  %vm1874_vm5 = vcmp.ge.f32.partialorder %v1473_v11, 0.0  ;;  %v2082_v14 = vmul.f32 0.01, %v1473_v11 }
 0x17d   : > { %v2341_v36 = vsel %vm1925_vm6, %v1601_v12, %v2133_v22  ;;  %v2393_v37 = vsel %vm1977_vm7, %v1731_v15, %v2185_v27 }
 0x17e   : > { %v2238_v18 = vsel %vm1822_vm4, %v1343_v10, %v2030_v13  ;;  %v2290_v19 = vsel %vm1874_vm5, %v1473_v11, %v2082_v14  ;;  %v3541_v10 = vld [vmem:[%s4262_s30 + $0x328] sm:$0xff] }
 0x17f   : > { %v3617_v20 = vpack.c.bf16 %v2238_v18, %v2237_v16  ;;  %v3747_v21 = vpack.c.bf16 %v2290_v19, %v2289_v17 }
 0x180   : > { %v1602_v23 = vpop.f32.mrf.mxu2  ;;  %v1732_v24 = vpop.f32.mrf.mxu3 }
 0x181   : > { %4081 = vst [vmem:[%s4352_s8 + $0x68] sm:$0xff] %v3617_v20   ;;  %v1603_v28 = vadd.f32 %v4533_v39, %v1602_v23  ;;  %v1733_v29 = vadd.f32 %v4533_v39, %v1732_v24  ;;  %v1345_v30 = vpop.f32.mrf.mxu0  ;;  %v1475_v31 = vpop.f32.mrf.mxu1 }
 0x182   : > { %4107 = vst [vmem:[%s4352_s8 + $0x138] sm:$0xff] %v3747_v21   ;;  %v1346_v42 = vadd.f32 %v4533_v39, %v1345_v30  ;;  %v1476_v43 = vadd.f32 %v4533_v39, %v1475_v31 }
 0x183   : > { %vm1926_vm8 = vcmp.ge.f32.partialorder %v1603_v28, 0.0  ;;  %v2134_v34 = vmul.f32 0.01, %v1603_v28  ;;  %vm1978_vm9 = vcmp.ge.f32.partialorder %v1733_v29, 0.0  ;;  %v2186_v35 = vmul.f32 0.01, %v1733_v29 }
 0x184   : > { %3356 = vmatmul.msk.bf16.gmra.mxu0 %vm946_vm2, %v3462_v25  ;;  %3382 = vmatmul.msk.bf16.gmra.mxu1 %vm946_vm2, %v3488_v26  ;;  %v2031_v48 = vmul.f32 0.01, %v1346_v42  ;;  %v2083_v50 = vmul.f32 0.01, %v1476_v43  ;;  %vm1823_vm10 = vcmp.ge.f32.partialorder %v1346_v42, 0.0  ;;  %vm1875_vm11 = vcmp.ge.f32.partialorder %v1476_v43, 0.0 }
 0x185   : > { %v2342_v38 = vsel %vm1926_vm8, %v1603_v28, %v2134_v34  ;;  %v2394_v40 = vsel %vm1978_vm9, %v1733_v29, %v2186_v35  ;;  %3408 = vmatmul.msk.bf16.gmra.mxu2 %vm946_vm2, %v3514_v32  ;;  %3434 = vmatmul.msk.bf16.gmra.mxu3 %vm946_vm2, %v3540_v33 }
 0x186   : > { %v3877_v41 = vpack.c.bf16 %v2342_v38, %v2341_v36  ;;  %v4007_v49 = vpack.c.bf16 %v2394_v40, %v2393_v37  ;;  %v2239_v57 = vsel %vm1823_vm10, %v1346_v42, %v2031_v48  ;;  %v2291_v58 = vsel %vm1875_vm11, %v1476_v43, %v2083_v50  ;;  %v3464_v42 = vld [vmem:[%s4262_s30 + $0xc0] sm:$0xff]  ;;  %v3490_v43 = vld [vmem:[%s4262_s30 + $0x190] sm:$0xff] }
 0x187   : > { %v3516_v50 = vld [vmem:[%s4262_s30 + $0x260] sm:$0xff] }
 0x188   : > { %4133 = vst [vmem:[%s4352_s8 + $0x208] sm:$0xff] %v3877_v41   ;;  %v1605_v44 = vpop.f32.mrf.mxu2  ;;  %v1735_v45 = vpop.f32.mrf.mxu3 }
 0x189   : > { %4159 = vst [vmem:[%s4352_s8 + $0x2d8] sm:$0xff] %v4007_v49   ;;  %v1347_v46 = vpop.f32.mrf.mxu0  ;;  %v1477_v47 = vpop.f32.mrf.mxu1  ;;  %v1606_v53 = vadd.f32 %v4533_v39, %v1605_v44  ;;  %v1736_v56 = vadd.f32 %v4533_v39, %v1735_v45 }
 0x18a   : > { %v1348_v51 = vadd.f32 %v4533_v39, %v1347_v46  ;;  %v1478_v52 = vadd.f32 %v4533_v39, %v1477_v47 }
 0x18b   : > { %v2135_v63 = vmul.f32 0.01, %v1606_v53  ;;  %vm1927_vm14 = vcmp.ge.f32.partialorder %v1606_v53, 0.0  ;;  %v2187_v4 = vmul.f32 0.01, %v1736_v56  ;;  %vm1979_vm15 = vcmp.ge.f32.partialorder %v1736_v56, 0.0 }
 0x18c   : > { %vm1824_vm12 = vcmp.ge.f32.partialorder %v1348_v51, 0.0  ;;  %v2032_v54 = vmul.f32 0.01, %v1348_v51  ;;  %vm1876_vm13 = vcmp.ge.f32.partialorder %v1478_v52, 0.0  ;;  %v2084_v55 = vmul.f32 0.01, %v1478_v52 }
 0x18d   : > { %v2343_v13 = vsel %vm1927_vm14, %v1606_v53, %v2135_v63  ;;  %v2395_v14 = vsel %vm1979_vm15, %v1736_v56, %v2187_v4 }
 0x18e   : > { %v2240_v59 = vsel %vm1824_vm12, %v1348_v51, %v2032_v54  ;;  %v2292_v60 = vsel %vm1876_vm13, %v1478_v52, %v2084_v55  ;;  %v3542_v51 = vld [vmem:[%s4262_s30 + $0x330] sm:$0xff] }
 0x18f   : > { %v3622_v61 = vpack.c.bf16 %v2240_v59, %v2239_v57  ;;  %v3752_v62 = vpack.c.bf16 %v2292_v60, %v2291_v58 }
 0x190   : > { %v1607_v0 = vpop.f32.mrf.mxu2  ;;  %v1737_v1 = vpop.f32.mrf.mxu3 }
 0x191   : > { %4082 = vst [vmem:[%s4352_s8 + $0x70] sm:$0xff] %v3622_v61   ;;  %v1608_v5 = vadd.f32 %v4533_v39, %v1607_v0  ;;  %v1738_v6 = vadd.f32 %v4533_v39, %v1737_v1  ;;  %v1350_v7 = vpop.f32.mrf.mxu0  ;;  %v1480_v8 = vpop.f32.mrf.mxu1 }
 0x192   : > { %4108 = vst [vmem:[%s4352_s8 + $0x140] sm:$0xff] %v3752_v62   ;;  %v1351_v19 = vadd.f32 %v4533_v39, %v1350_v7  ;;  %v1481_v20 = vadd.f32 %v4533_v39, %v1480_v8 }
 0x193   : > { %vm1928_vm0 = vcmp.ge.f32.partialorder %v1608_v5, 0.0  ;;  %v2136_v11 = vmul.f32 0.01, %v1608_v5  ;;  %vm1980_vm1 = vcmp.ge.f32.partialorder %v1738_v6, 0.0  ;;  %v2188_v12 = vmul.f32 0.01, %v1738_v6 }
 0x194   : > { %3357 = vmatmul.msk.bf16.gmra.mxu0 %vm946_vm2, %v3463_v2  ;;  %3383 = vmatmul.msk.bf16.gmra.mxu1 %vm946_vm2, %v3489_v3  ;;  %v2033_v25 = vmul.f32 0.01, %v1351_v19  ;;  %v2085_v26 = vmul.f32 0.01, %v1481_v20  ;;  %vm1825_vm3 = vcmp.ge.f32.partialorder %v1351_v19, 0.0  ;;  %vm1877_vm4 = vcmp.ge.f32.partialorder %v1481_v20, 0.0 }
 0x195   : > { %v2344_v15 = vsel %vm1928_vm0, %v1608_v5, %v2136_v11  ;;  %v2396_v16 = vsel %vm1980_vm1, %v1738_v6, %v2188_v12  ;;  %3409 = vmatmul.msk.bf16.gmra.mxu2 %vm946_vm2, %v3515_v9  ;;  %3435 = vmatmul.msk.bf16.gmra.mxu3 %vm946_vm2, %v3541_v10 }
 0x196   : > { %v3882_v17 = vpack.c.bf16 %v2344_v15, %v2343_v13  ;;  %v4012_v18 = vpack.c.bf16 %v2396_v16, %v2395_v14  ;;  %v2241_v33 = vsel %vm1825_vm3, %v1351_v19, %v2033_v25  ;;  %v2293_v34 = vsel %vm1877_vm4, %v1481_v20, %v2085_v26  ;;  %v3465_v19 = vld [vmem:[%s4262_s30 + $0xc8] sm:$0xff]  ;;  %v3491_v20 = vld [vmem:[%s4262_s30 + $0x198] sm:$0xff] }
 0x197   : > { %v3517_v26 = vld [vmem:[%s4262_s30 + $0x268] sm:$0xff] }
 0x198   : > { %4134 = vst [vmem:[%s4352_s8 + $0x210] sm:$0xff] %v3882_v17   ;;  %v1610_v21 = vpop.f32.mrf.mxu2  ;;  %v1740_v22 = vpop.f32.mrf.mxu3 }
 0x199   : > { %4160 = vst [vmem:[%s4352_s8 + $0x2e0] sm:$0xff] %v4012_v18   ;;  %v1352_v23 = vpop.f32.mrf.mxu0  ;;  %v1482_v24 = vpop.f32.mrf.mxu1  ;;  %v1611_v29 = vadd.f32 %v4533_v39, %v1610_v21  ;;  %v1741_v32 = vadd.f32 %v4533_v39, %v1740_v22 }
 0x19a   : > { %v1353_v27 = vadd.f32 %v4533_v39, %v1352_v23  ;;  %v1483_v28 = vadd.f32 %v4533_v39, %v1482_v24 }
 0x19b   : > { %v2137_v40 = vmul.f32 0.01, %v1611_v29  ;;  %vm1929_vm7 = vcmp.ge.f32.partialorder %v1611_v29, 0.0  ;;  %v2189_v44 = vmul.f32 0.01, %v1741_v32  ;;  %vm1981_vm8 = vcmp.ge.f32.partialorder %v1741_v32, 0.0 }
 0x19c   : > { %vm1826_vm5 = vcmp.ge.f32.partialorder %v1353_v27, 0.0  ;;  %v2034_v30 = vmul.f32 0.01, %v1353_v27  ;;  %vm1878_vm6 = vcmp.ge.f32.partialorder %v1483_v28, 0.0  ;;  %v2086_v31 = vmul.f32 0.01, %v1483_v28 }
 0x19d   : > { %v2345_v54 = vsel %vm1929_vm7, %v1611_v29, %v2137_v40  ;;  %v2397_v55 = vsel %vm1981_vm8, %v1741_v32, %v2189_v44 }
 0x19e   : > { %v2242_v35 = vsel %vm1826_vm5, %v1353_v27, %v2034_v30  ;;  %v2294_v36 = vsel %vm1878_vm6, %v1483_v28, %v2086_v31  ;;  %v3543_v27 = vld [vmem:[%s4262_s30 + $0x338] sm:$0xff] }
 0x19f   : > { %v3627_v37 = vpack.c.bf16 %v2242_v35, %v2241_v33  ;;  %v3757_v38 = vpack.c.bf16 %v2294_v36, %v2293_v34 }
 0x1a0   : > { %v1612_v41 = vpop.f32.mrf.mxu2  ;;  %v1742_v49 = vpop.f32.mrf.mxu3 }
 0x1a1   : > { %4083 = vst [vmem:[%s4352_s8 + $0x78] sm:$0xff] %v3627_v37   ;;  %v1613_v45 = vadd.f32 %v4533_v39, %v1612_v41  ;;  %v1743_v46 = vadd.f32 %v4533_v39, %v1742_v49  ;;  %v1355_v47 = vpop.f32.mrf.mxu0  ;;  %v1485_v48 = vpop.f32.mrf.mxu1 }
 0x1a2   : > { %4109 = vst [vmem:[%s4352_s8 + $0x148] sm:$0xff] %v3757_v38   ;;  %v1356_v60 = vadd.f32 %v4533_v39, %v1355_v47  ;;  %v1486_v61 = vadd.f32 %v4533_v39, %v1485_v48 }
 0x1a3   : > { %vm1930_vm9 = vcmp.ge.f32.partialorder %v1613_v45, 0.0  ;;  %v2138_v52 = vmul.f32 0.01, %v1613_v45  ;;  %vm1982_vm10 = vcmp.ge.f32.partialorder %v1743_v46, 0.0  ;;  %v2190_v53 = vmul.f32 0.01, %v1743_v46 }
 0x1a4   : > { %3358 = vmatmul.msk.bf16.gmra.mxu0 %vm946_vm2, %v3464_v42  ;;  %3384 = vmatmul.msk.bf16.gmra.mxu1 %vm946_vm2, %v3490_v43  ;;  %v2035_v2 = vmul.f32 0.01, %v1356_v60  ;;  %v2087_v3 = vmul.f32 0.01, %v1486_v61  ;;  %vm1827_vm11 = vcmp.ge.f32.partialorder %v1356_v60, 0.0  ;;  %vm1879_vm12 = vcmp.ge.f32.partialorder %v1486_v61, 0.0 }
 0x1a5   : > { %v2346_v56 = vsel %vm1930_vm9, %v1613_v45, %v2138_v52  ;;  %v2398_v57 = vsel %vm1982_vm10, %v1743_v46, %v2190_v53  ;;  %3410 = vmatmul.msk.bf16.gmra.mxu2 %vm946_vm2, %v3516_v50  ;;  %3436 = vmatmul.msk.bf16.gmra.mxu3 %vm946_vm2, %v3542_v51 }
 0x1a6   : > { %v3887_v58 = vpack.c.bf16 %v2346_v56, %v2345_v54  ;;  %v4017_v59 = vpack.c.bf16 %v2398_v57, %v2397_v55  ;;  %v2243_v10 = vsel %vm1827_vm11, %v1356_v60, %v2035_v2  ;;  %v2295_v11 = vsel %vm1879_vm12, %v1486_v61, %v2087_v3 }
 0x1a8   : > { %4135 = vst [vmem:[%s4352_s8 + $0x218] sm:$0xff] %v3887_v58   ;;  %v1615_v62 = vpop.f32.mrf.mxu2  ;;  %v1745_v63 = vpop.f32.mrf.mxu3 }
 0x1a9   : > { %4161 = vst [vmem:[%s4352_s8 + $0x2e8] sm:$0xff] %v4017_v59   ;;  %v1357_v0 = vpop.f32.mrf.mxu0  ;;  %v1487_v1 = vpop.f32.mrf.mxu1  ;;  %v1616_v6 = vadd.f32 %v4533_v39, %v1615_v62  ;;  %v1746_v9 = vadd.f32 %v4533_v39, %v1745_v63 }
 0x1aa   : > { %v1358_v4 = vadd.f32 %v4533_v39, %v1357_v0  ;;  %v1488_v5 = vadd.f32 %v4533_v39, %v1487_v1 }
 0x1ab   : > { %v2139_v16 = vmul.f32 0.01, %v1616_v6  ;;  %vm1931_vm15 = vcmp.ge.f32.partialorder %v1616_v6, 0.0  ;;  %v2191_v21 = vmul.f32 0.01, %v1746_v9  ;;  %vm1983_vm0 = vcmp.ge.f32.partialorder %v1746_v9, 0.0 }
 0x1ac   : > { %vm1828_vm13 = vcmp.ge.f32.partialorder %v1358_v4, 0.0  ;;  %v2036_v7 = vmul.f32 0.01, %v1358_v4  ;;  %vm1880_vm14 = vcmp.ge.f32.partialorder %v1488_v5, 0.0  ;;  %v2088_v8 = vmul.f32 0.01, %v1488_v5 }
 0x1ad   : > { %v2347_v30 = vsel %vm1931_vm15, %v1616_v6, %v2139_v16  ;;  %v2399_v31 = vsel %vm1983_vm0, %v1746_v9, %v2191_v21 }
 0x1ae   : > { %v2244_v12 = vsel %vm1828_vm13, %v1358_v4, %v2036_v7  ;;  %v2296_v13 = vsel %vm1880_vm14, %v1488_v5, %v2088_v8 }
 0x1af   : > { %v3632_v14 = vpack.c.bf16 %v2244_v12, %v2243_v10  ;;  %v3762_v15 = vpack.c.bf16 %v2296_v13, %v2295_v11 }
 0x1b0   : > { %v1617_v17 = vpop.f32.mrf.mxu2  ;;  %v1747_v18 = vpop.f32.mrf.mxu3 }
 0x1b1   : > { %4084 = vst [vmem:[%s4352_s8 + $0x80] sm:$0xff] %v3632_v14   ;;  %v1618_v22 = vadd.f32 %v4533_v39, %v1617_v17  ;;  %v1748_v23 = vadd.f32 %v4533_v39, %v1747_v18  ;;  %v1360_v24 = vpop.f32.mrf.mxu0  ;;  %v1490_v25 = vpop.f32.mrf.mxu1 }
 0x1b2   : > { %4110 = vst [vmem:[%s4352_s8 + $0x150] sm:$0xff] %v3762_v15   ;;  %v1361_v36 = vadd.f32 %v4533_v39, %v1360_v24  ;;  %v1491_v37 = vadd.f32 %v4533_v39, %v1490_v25 }
 0x1b3   : > { %vm1932_vm1 = vcmp.ge.f32.partialorder %v1618_v22, 0.0  ;;  %v2140_v28 = vmul.f32 0.01, %v1618_v22  ;;  %vm1984_vm3 = vcmp.ge.f32.partialorder %v1748_v23, 0.0  ;;  %v2192_v29 = vmul.f32 0.01, %v1748_v23 }
 0x1b4   : > { %3359 = vmatmul.msk.bf16.gmra.mxu0 %vm946_vm2, %v3465_v19  ;;  %3385 = vmatmul.msk.bf16.gmra.mxu1 %vm946_vm2, %v3491_v20  ;;  %v2037_v42 = vmul.f32 0.01, %v1361_v36  ;;  %v2089_v43 = vmul.f32 0.01, %v1491_v37  ;;  %vm1829_vm4 = vcmp.ge.f32.partialorder %v1361_v36, 0.0 }
 0x1b5   : > { %v2348_v32 = vsel %vm1932_vm1, %v1618_v22, %v2140_v28  ;;  %v2400_v33 = vsel %vm1984_vm3, %v1748_v23, %v2192_v29  ;;  %3411 = vmatmul.msk.bf16.gmra.mxu2 %vm946_vm2, %v3517_v26  ;;  %3437 = vmatmul.msk.bf16.gmra.mxu3 %vm946_vm2, %v3543_v27  ;;  %vm1881_vm2 = vcmp.ge.f32.partialorder %v1491_v37, 0.0 }
 0x1b6   : > { %v3892_v34 = vpack.c.bf16 %v2348_v32, %v2347_v30  ;;  %v4022_v35 = vpack.c.bf16 %v2400_v33, %v2399_v31  ;;  %v2245_v51 = vsel %vm1829_vm4, %v1361_v36, %v2037_v42  ;;  %v2297_v52 = vsel %vm1881_vm2, %v1491_v37, %v2089_v43  ;;  %v4715_v33 = vld [vmem:[%s4811_s2] ss:$0 sm:$0xff] }
 0x1b8   : > { %4136 = vst [vmem:[%s4352_s8 + $0x220] sm:$0xff] %v3892_v34   ;;  %v1620_v38 = vpop.f32.mrf.mxu2  ;;  %v1750_v40 = vpop.f32.mrf.mxu3 }
 0x1b9   : > { %4162 = vst [vmem:[%s4352_s8 + $0x2f0] sm:$0xff] %v4022_v35   ;;  %v1362_v41 = vpop.f32.mrf.mxu0  ;;  %v1492_v49 = vpop.f32.mrf.mxu1  ;;  %v1621_v48 = vadd.f32 %v4533_v39, %v1620_v38  ;;  %v1751_v50 = vadd.f32 %v4533_v39, %v1750_v40 }
 0x1ba   : > { %v1363_v44 = vadd.f32 %v4533_v39, %v1362_v41  ;;  %v1493_v45 = vadd.f32 %v4533_v39, %v1492_v49 }
 0x1bb   : > { %v2141_v59 = vmul.f32 0.01, %v1621_v48  ;;  %v2193_v60 = vmul.f32 0.01, %v1751_v50  ;;  %vm1933_vm7 = vcmp.ge.f32.partialorder %v1621_v48, 0.0  ;;  %vm1985_vm8 = vcmp.ge.f32.partialorder %v1751_v50, 0.0 }
 0x1bc   : > { %vm1830_vm5 = vcmp.ge.f32.partialorder %v1363_v44, 0.0  ;;  %v2038_v46 = vmul.f32 0.01, %v1363_v44  ;;  %vm1882_vm6 = vcmp.ge.f32.partialorder %v1493_v45, 0.0  ;;  %v2090_v47 = vmul.f32 0.01, %v1493_v45 }
 0x1bd   : > { %v2349_v3 = vsel %vm1933_vm7, %v1621_v48, %v2141_v59  ;;  %v2401_v4 = vsel %vm1985_vm8, %v1751_v50, %v2193_v60 }
 0x1be   : > { %v2246_v53 = vsel %vm1830_vm5, %v1363_v44, %v2038_v46  ;;  %v2298_v54 = vsel %vm1882_vm6, %v1493_v45, %v2090_v47 }
 0x1bf   : > { %v3637_v55 = vpack.c.bf16 %v2246_v53, %v2245_v51  ;;  %v3767_v56 = vpack.c.bf16 %v2298_v54, %v2297_v52 }
 0x1c0   : > { %v1622_v57 = vpop.f32.mrf.mxu2  ;;  %v1752_v58 = vpop.f32.mrf.mxu3 }
 0x1c1   : > { %4085 = vst [vmem:[%s4352_s8 + $0x88] sm:$0xff] %v3637_v55   ;;  %v1623_v61 = vadd.f32 %v4533_v39, %v1622_v57  ;;  %v1753_v62 = vadd.f32 %v4533_v39, %v1752_v58  ;;  %v1365_v63 = vpop.f32.mrf.mxu0  ;;  %v1495_v0 = vpop.f32.mrf.mxu1 }
 0x1c2   : > { %4111 = vst [vmem:[%s4352_s8 + $0x158] sm:$0xff] %v3767_v56   ;;  %v1366_v9 = vadd.f32 %v4533_v39, %v1365_v63  ;;  %v1496_v10 = vadd.f32 %v4533_v39, %v1495_v0 }
 0x1c3   : > { %vm1934_vm9 = vcmp.ge.f32.partialorder %v1623_v61, 0.0  ;;  %v2142_v1 = vmul.f32 0.01, %v1623_v61  ;;  %vm1986_vm10 = vcmp.ge.f32.partialorder %v1753_v62, 0.0  ;;  %v2194_v2 = vmul.f32 0.01, %v1753_v62 }
 0x1c4   : > { %v2039_v15 = vmul.f32 0.01, %v1366_v9  ;;  %v2091_v16 = vmul.f32 0.01, %v1496_v10  ;;  %vm1831_vm11 = vcmp.ge.f32.partialorder %v1366_v9, 0.0  ;;  %vm1883_vm12 = vcmp.ge.f32.partialorder %v1496_v10, 0.0 }
 0x1c5   : > { %v2350_v5 = vsel %vm1934_vm9, %v1623_v61, %v2142_v1  ;;  %v2402_v6 = vsel %vm1986_vm10, %v1753_v62, %v2194_v2 }
 0x1c6   : > { %v3897_v7 = vpack.c.bf16 %v2350_v5, %v2349_v3  ;;  %v4027_v8 = vpack.c.bf16 %v2402_v6, %v2401_v4  ;;  %v2247_v23 = vsel %vm1831_vm11, %v1366_v9, %v2039_v15  ;;  %v2299_v24 = vsel %vm1883_vm12, %v1496_v10, %v2091_v16 }
 0x1c8   : > { %4137 = vst [vmem:[%s4352_s8 + $0x228] sm:$0xff] %v3897_v7   ;;  %v1625_v11 = vpop.f32.mrf.mxu2  ;;  %v1755_v12 = vpop.f32.mrf.mxu3 }
 0x1c9   : > { %4163 = vst [vmem:[%s4352_s8 + $0x2f8] sm:$0xff] %v4027_v8   ;;  %v1367_v13 = vpop.f32.mrf.mxu0  ;;  %v1497_v14 = vpop.f32.mrf.mxu1  ;;  %v1626_v21 = vadd.f32 %v4533_v39, %v1625_v11  ;;  %v1756_v22 = vadd.f32 %v4533_v39, %v1755_v12 }
 0x1ca   : > { %v1368_v17 = vadd.f32 %v4533_v39, %v1367_v13  ;;  %v1498_v18 = vadd.f32 %v4533_v39, %v1497_v14 }
 0x1cb   : > { %v2143_v31 = vmul.f32 0.01, %v1626_v21  ;;  %v2195_v32 = vmul.f32 0.01, %v1756_v22  ;;  %vm1935_vm15 = vcmp.ge.f32.partialorder %v1626_v21, 0.0  ;;  %vm1987_vm0 = vcmp.ge.f32.partialorder %v1756_v22, 0.0 }
 0x1cc   : > { %vm1832_vm13 = vcmp.ge.f32.partialorder %v1368_v17, 0.0  ;;  %v2040_v19 = vmul.f32 0.01, %v1368_v17  ;;  %vm1884_vm14 = vcmp.ge.f32.partialorder %v1498_v18, 0.0  ;;  %v2092_v20 = vmul.f32 0.01, %v1498_v18 }
 0x1cd   : > { %v2351_v40 = vsel %vm1935_vm15, %v1626_v21, %v2143_v31  ;;  %v2403_v41 = vsel %vm1987_vm0, %v1756_v22, %v2195_v32 }
 0x1ce   : > { %v2248_v25 = vsel %vm1832_vm13, %v1368_v17, %v2040_v19  ;;  %v2300_v26 = vsel %vm1884_vm14, %v1498_v18, %v2092_v20 }
 0x1cf   : > { %v3642_v27 = vpack.c.bf16 %v2248_v25, %v2247_v23  ;;  %v3772_v28 = vpack.c.bf16 %v2300_v26, %v2299_v24 }
 0x1d0   : > { %v1627_v29 = vpop.f32.mrf.mxu2  ;;  %v1757_v30 = vpop.f32.mrf.mxu3 }
 0x1d1   : > { %4086 = vst [vmem:[%s4352_s8 + $0x90] sm:$0xff] %v3642_v27   ;;  %v1628_v34 = vadd.f32 %v4715_v33, %v1627_v29  ;;  %v1758_v39 = vadd.f32 %v4715_v33, %v1757_v30  ;;  %v1370_v35 = vpop.f32.mrf.mxu0  ;;  %v1500_v36 = vpop.f32.mrf.mxu1 }
 0x1d2   : > { %4112 = vst [vmem:[%s4352_s8 + $0x160] sm:$0xff] %v3772_v28   ;;  %v1371_v45 = vadd.f32 %v4715_v33, %v1370_v35  ;;  %v1501_v46 = vadd.f32 %v4715_v33, %v1500_v36 }
 0x1d3   : > { %vm1936_vm1 = vcmp.ge.f32.partialorder %v1628_v34, 0.0  ;;  %v2144_v37 = vmul.f32 0.01, %v1628_v34  ;;  %vm1988_vm3 = vcmp.ge.f32.partialorder %v1758_v39, 0.0  ;;  %v2196_v38 = vmul.f32 0.01, %v1758_v39 }
 0x1d4   : > { %v2041_v52 = vmul.f32 0.01, %v1371_v45  ;;  %v2093_v53 = vmul.f32 0.01, %v1501_v46  ;;  %vm1833_vm4 = vcmp.ge.f32.partialorder %v1371_v45, 0.0  ;;  %vm1885_vm2 = vcmp.ge.f32.partialorder %v1501_v46, 0.0 }
 0x1d5   : > { %v2352_v49 = vsel %vm1936_vm1, %v1628_v34, %v2144_v37  ;;  %v2404_v42 = vsel %vm1988_vm3, %v1758_v39, %v2196_v38 }
 0x1d6   : > { %v3902_v43 = vpack.c.bf16 %v2352_v49, %v2351_v40  ;;  %v4032_v44 = vpack.c.bf16 %v2404_v42, %v2403_v41  ;;  %v2249_v60 = vsel %vm1833_vm4, %v1371_v45, %v2041_v52  ;;  %v2301_v61 = vsel %vm1885_vm2, %v1501_v46, %v2093_v53 }
 0x1d8   : > { %4138 = vst [vmem:[%s4352_s8 + $0x230] sm:$0xff] %v3902_v43   ;;  %v1630_v47 = vpop.f32.mrf.mxu2  ;;  %v1760_v48 = vpop.f32.mrf.mxu3 }
 0x1d9   : > { %4164 = vst [vmem:[%s4352_s8 + $0x300] sm:$0xff] %v4032_v44   ;;  %v1372_v50 = vpop.f32.mrf.mxu0  ;;  %v1502_v51 = vpop.f32.mrf.mxu1  ;;  %v1631_v58 = vadd.f32 %v4715_v33, %v1630_v47  ;;  %v1761_v59 = vadd.f32 %v4715_v33, %v1760_v48 }
 0x1da   : > { %v1373_v54 = vadd.f32 %v4715_v33, %v1372_v50  ;;  %v1503_v55 = vadd.f32 %v4715_v33, %v1502_v51 }
 0x1db   : > { %v2145_v4 = vmul.f32 0.01, %v1631_v58  ;;  %v2197_v5 = vmul.f32 0.01, %v1761_v59  ;;  %vm1937_vm7 = vcmp.ge.f32.partialorder %v1631_v58, 0.0  ;;  %vm1989_vm8 = vcmp.ge.f32.partialorder %v1761_v59, 0.0 }
 0x1dc   : > { %vm1834_vm5 = vcmp.ge.f32.partialorder %v1373_v54, 0.0  ;;  %v2042_v56 = vmul.f32 0.01, %v1373_v54  ;;  %vm1886_vm6 = vcmp.ge.f32.partialorder %v1503_v55, 0.0  ;;  %v2094_v57 = vmul.f32 0.01, %v1503_v55 }
 0x1dd   : > { %v2353_v12 = vsel %vm1937_vm7, %v1631_v58, %v2145_v4  ;;  %v2405_v13 = vsel %vm1989_vm8, %v1761_v59, %v2197_v5 }
 0x1de   : > { %v2250_v62 = vsel %vm1834_vm5, %v1373_v54, %v2042_v56  ;;  %v2302_v63 = vsel %vm1886_vm6, %v1503_v55, %v2094_v57 }
 0x1df   : > { %v3647_v0 = vpack.c.bf16 %v2250_v62, %v2249_v60  ;;  %v3777_v1 = vpack.c.bf16 %v2302_v63, %v2301_v61 }
 0x1e0   : > { %v1632_v2 = vpop.f32.mrf.mxu2  ;;  %v1762_v3 = vpop.f32.mrf.mxu3 }
 0x1e1   : > { %4087 = vst [vmem:[%s4352_s8 + $0x98] sm:$0xff] %v3647_v0   ;;  %v1633_v6 = vadd.f32 %v4715_v33, %v1632_v2  ;;  %v1763_v7 = vadd.f32 %v4715_v33, %v1762_v3  ;;  %v1375_v8 = vpop.f32.mrf.mxu0  ;;  %v1505_v9 = vpop.f32.mrf.mxu1 }
 0x1e2   : > { %4113 = vst [vmem:[%s4352_s8 + $0x168] sm:$0xff] %v3777_v1   ;;  %v1376_v18 = vadd.f32 %v4715_v33, %v1375_v8  ;;  %v1506_v19 = vadd.f32 %v4715_v33, %v1505_v9 }
 0x1e3   : > { %vm1938_vm9 = vcmp.ge.f32.partialorder %v1633_v6, 0.0  ;;  %v2146_v10 = vmul.f32 0.01, %v1633_v6  ;;  %vm1990_vm10 = vcmp.ge.f32.partialorder %v1763_v7, 0.0  ;;  %v2198_v11 = vmul.f32 0.01, %v1763_v7 }
 0x1e4   : > { %v2043_v24 = vmul.f32 0.01, %v1376_v18  ;;  %v2095_v25 = vmul.f32 0.01, %v1506_v19  ;;  %vm1835_vm11 = vcmp.ge.f32.partialorder %v1376_v18, 0.0  ;;  %vm1887_vm12 = vcmp.ge.f32.partialorder %v1506_v19, 0.0 }
 0x1e5   : > { %v2354_v14 = vsel %vm1938_vm9, %v1633_v6, %v2146_v10  ;;  %v2406_v15 = vsel %vm1990_vm10, %v1763_v7, %v2198_v11 }
 0x1e6   : > { %v3907_v16 = vpack.c.bf16 %v2354_v14, %v2353_v12  ;;  %v4037_v17 = vpack.c.bf16 %v2406_v15, %v2405_v13  ;;  %v2251_v32 = vsel %vm1835_vm11, %v1376_v18, %v2043_v24  ;;  %v2303_v34 = vsel %vm1887_vm12, %v1506_v19, %v2095_v25 }
 0x1e8   : > { %4139 = vst [vmem:[%s4352_s8 + $0x238] sm:$0xff] %v3907_v16   ;;  %v1635_v20 = vpop.f32.mrf.mxu2  ;;  %v1765_v21 = vpop.f32.mrf.mxu3 }
 0x1e9   : > { %4165 = vst [vmem:[%s4352_s8 + $0x308] sm:$0xff] %v4037_v17   ;;  %v1377_v22 = vpop.f32.mrf.mxu0  ;;  %v1507_v23 = vpop.f32.mrf.mxu1  ;;  %v1636_v30 = vadd.f32 %v4715_v33, %v1635_v20  ;;  %v1766_v31 = vadd.f32 %v4715_v33, %v1765_v21 }
 0x1ea   : > { %v1378_v26 = vadd.f32 %v4715_v33, %v1377_v22  ;;  %v1508_v27 = vadd.f32 %v4715_v33, %v1507_v23 }
 0x1eb   : > { %v2147_v41 = vmul.f32 0.01, %v1636_v30  ;;  %v2199_v49 = vmul.f32 0.01, %v1766_v31  ;;  %vm1939_vm15 = vcmp.ge.f32.partialorder %v1636_v30, 0.0  ;;  %vm1991_vm0 = vcmp.ge.f32.partialorder %v1766_v31, 0.0 }
 0x1ec   : > { %vm1836_vm13 = vcmp.ge.f32.partialorder %v1378_v26, 0.0  ;;  %v2044_v28 = vmul.f32 0.01, %v1378_v26  ;;  %vm1888_vm14 = vcmp.ge.f32.partialorder %v1508_v27, 0.0  ;;  %v2096_v29 = vmul.f32 0.01, %v1508_v27 }
 0x1ed   : > { %v2355_v48 = vsel %vm1939_vm15, %v1636_v30, %v2147_v41  ;;  %v2407_v50 = vsel %vm1991_vm0, %v1766_v31, %v2199_v49 }
 0x1ee   : > { %v2252_v39 = vsel %vm1836_vm13, %v1378_v26, %v2044_v28  ;;  %v2304_v35 = vsel %vm1888_vm14, %v1508_v27, %v2096_v29 }
 0x1ef   : > { %v3652_v36 = vpack.c.bf16 %v2252_v39, %v2251_v32  ;;  %v3782_v37 = vpack.c.bf16 %v2304_v35, %v2303_v34 }
 0x1f0   : > { %v1637_v38 = vpop.f32.mrf.mxu2  ;;  %v1767_v40 = vpop.f32.mrf.mxu3 }
 0x1f1   : > { %4088 = vst [vmem:[%s4352_s8 + $0xa0] sm:$0xff] %v3652_v36   ;;  %v1638_v42 = vadd.f32 %v4715_v33, %v1637_v38  ;;  %v1768_v43 = vadd.f32 %v4715_v33, %v1767_v40  ;;  %v1380_v44 = vpop.f32.mrf.mxu0  ;;  %v1510_v45 = vpop.f32.mrf.mxu1 }
 0x1f2   : > { %4114 = vst [vmem:[%s4352_s8 + $0x170] sm:$0xff] %v3782_v37   ;;  %v1381_v55 = vadd.f32 %v4715_v33, %v1380_v44  ;;  %v1511_v56 = vadd.f32 %v4715_v33, %v1510_v45 }
 0x1f3   : > { %vm1940_vm1 = vcmp.ge.f32.partialorder %v1638_v42, 0.0  ;;  %v2148_v46 = vmul.f32 0.01, %v1638_v42  ;;  %vm1992_vm3 = vcmp.ge.f32.partialorder %v1768_v43, 0.0  ;;  %v2200_v47 = vmul.f32 0.01, %v1768_v43 }
 0x1f4   : > { %v2045_v61 = vmul.f32 0.01, %v1381_v55  ;;  %v2097_v62 = vmul.f32 0.01, %v1511_v56  ;;  %vm1837_vm4 = vcmp.ge.f32.partialorder %v1381_v55, 0.0  ;;  %vm1889_vm2 = vcmp.ge.f32.partialorder %v1511_v56, 0.0 }
 0x1f5   : > { %v2356_v51 = vsel %vm1940_vm1, %v1638_v42, %v2148_v46  ;;  %v2408_v52 = vsel %vm1992_vm3, %v1768_v43, %v2200_v47 }
 0x1f6   : > { %v3912_v53 = vpack.c.bf16 %v2356_v51, %v2355_v48  ;;  %v4042_v54 = vpack.c.bf16 %v2408_v52, %v2407_v50  ;;  %v2253_v5 = vsel %vm1837_vm4, %v1381_v55, %v2045_v61  ;;  %v2305_v6 = vsel %vm1889_vm2, %v1511_v56, %v2097_v62 }
 0x1f8   : > { %4140 = vst [vmem:[%s4352_s8 + $0x240] sm:$0xff] %v3912_v53   ;;  %v1640_v57 = vpop.f32.mrf.mxu2  ;;  %v1770_v58 = vpop.f32.mrf.mxu3 }
 0x1f9   : > { %4166 = vst [vmem:[%s4352_s8 + $0x310] sm:$0xff] %v4042_v54   ;;  %v1382_v59 = vpop.f32.mrf.mxu0  ;;  %v1512_v60 = vpop.f32.mrf.mxu1  ;;  %v1641_v3 = vadd.f32 %v4715_v33, %v1640_v57  ;;  %v1771_v4 = vadd.f32 %v4715_v33, %v1770_v58 }
 0x1fa   : > { %v1383_v63 = vadd.f32 %v4715_v33, %v1382_v59  ;;  %v1513_v0 = vadd.f32 %v4715_v33, %v1512_v60 }
 0x1fb   : > { %v2149_v13 = vmul.f32 0.01, %v1641_v3  ;;  %v2201_v14 = vmul.f32 0.01, %v1771_v4  ;;  %vm1941_vm7 = vcmp.ge.f32.partialorder %v1641_v3, 0.0  ;;  %vm1993_vm8 = vcmp.ge.f32.partialorder %v1771_v4, 0.0 }
 0x1fc   : > { %vm1838_vm5 = vcmp.ge.f32.partialorder %v1383_v63, 0.0  ;;  %v2046_v1 = vmul.f32 0.01, %v1383_v63  ;;  %vm1890_vm6 = vcmp.ge.f32.partialorder %v1513_v0, 0.0  ;;  %v2098_v2 = vmul.f32 0.01, %v1513_v0 }
 0x1fd   : > { %v2357_v21 = vsel %vm1941_vm7, %v1641_v3, %v2149_v13  ;;  %v2409_v22 = vsel %vm1993_vm8, %v1771_v4, %v2201_v14 }
 0x1fe   : > { %v2254_v7 = vsel %vm1838_vm5, %v1383_v63, %v2046_v1  ;;  %v2306_v8 = vsel %vm1890_vm6, %v1513_v0, %v2098_v2 }
 0x1ff   : > { %v3657_v9 = vpack.c.bf16 %v2254_v7, %v2253_v5  ;;  %v3787_v10 = vpack.c.bf16 %v2306_v8, %v2305_v6 }
 0x200   : > { %v1642_v11 = vpop.f32.mrf.mxu2  ;;  %v1772_v12 = vpop.f32.mrf.mxu3 }
 0x201   : > { %4089 = vst [vmem:[%s4352_s8 + $0xa8] sm:$0xff] %v3657_v9   ;;  %v1643_v15 = vadd.f32 %v4715_v33, %v1642_v11  ;;  %v1773_v16 = vadd.f32 %v4715_v33, %v1772_v12  ;;  %v1385_v17 = vpop.f32.mrf.mxu0  ;;  %v1515_v18 = vpop.f32.mrf.mxu1 }
 0x202   : > { %4115 = vst [vmem:[%s4352_s8 + $0x178] sm:$0xff] %v3787_v10   ;;  %v1386_v27 = vadd.f32 %v4715_v33, %v1385_v17  ;;  %v1516_v28 = vadd.f32 %v4715_v33, %v1515_v18 }
 0x203   : > { %vm1942_vm9 = vcmp.ge.f32.partialorder %v1643_v15, 0.0  ;;  %v2150_v19 = vmul.f32 0.01, %v1643_v15  ;;  %vm1994_vm10 = vcmp.ge.f32.partialorder %v1773_v16, 0.0  ;;  %v2202_v20 = vmul.f32 0.01, %v1773_v16 }
 0x204   : > { %v2047_v34 = vmul.f32 0.01, %v1386_v27  ;;  %v2099_v39 = vmul.f32 0.01, %v1516_v28  ;;  %vm1839_vm11 = vcmp.ge.f32.partialorder %v1386_v27, 0.0  ;;  %vm1891_vm12 = vcmp.ge.f32.partialorder %v1516_v28, 0.0 }
 0x205   : > { %v2358_v23 = vsel %vm1942_vm9, %v1643_v15, %v2150_v19  ;;  %v2410_v24 = vsel %vm1994_vm10, %v1773_v16, %v2202_v20 }
 0x206   : > { %v3917_v25 = vpack.c.bf16 %v2358_v23, %v2357_v21  ;;  %v4047_v26 = vpack.c.bf16 %v2410_v24, %v2409_v22  ;;  %v2255_v49 = vsel %vm1839_vm11, %v1386_v27, %v2047_v34  ;;  %v2307_v42 = vsel %vm1891_vm12, %v1516_v28, %v2099_v39 }
 0x208   : > { %4141 = vst [vmem:[%s4352_s8 + $0x248] sm:$0xff] %v3917_v25   ;;  %v1645_v29 = vpop.f32.mrf.mxu2  ;;  %v1775_v30 = vpop.f32.mrf.mxu3 }
 0x209   : > { %4167 = vst [vmem:[%s4352_s8 + $0x318] sm:$0xff] %v4047_v26   ;;  %v1387_v31 = vpop.f32.mrf.mxu0  ;;  %v1517_v32 = vpop.f32.mrf.mxu1  ;;  %v1646_v40 = vadd.f32 %v4715_v33, %v1645_v29  ;;  %v1776_v41 = vadd.f32 %v4715_v33, %v1775_v30 }
 0x20a   : > { %v1388_v35 = vadd.f32 %v4715_v33, %v1387_v31  ;;  %v1518_v36 = vadd.f32 %v4715_v33, %v1517_v32 }
 0x20b   : > { %v2151_v50 = vmul.f32 0.01, %v1646_v40  ;;  %v2203_v51 = vmul.f32 0.01, %v1776_v41  ;;  %vm1943_vm15 = vcmp.ge.f32.partialorder %v1646_v40, 0.0  ;;  %vm1995_vm0 = vcmp.ge.f32.partialorder %v1776_v41, 0.0 }
 0x20c   : > { %vm1840_vm13 = vcmp.ge.f32.partialorder %v1388_v35, 0.0  ;;  %v2048_v37 = vmul.f32 0.01, %v1388_v35  ;;  %vm1892_vm14 = vcmp.ge.f32.partialorder %v1518_v36, 0.0  ;;  %v2100_v38 = vmul.f32 0.01, %v1518_v36 }
 0x20d   : > { %v2359_v58 = vsel %vm1943_vm15, %v1646_v40, %v2151_v50  ;;  %v2411_v59 = vsel %vm1995_vm0, %v1776_v41, %v2203_v51 }
 0x20e   : > { %v2256_v43 = vsel %vm1840_vm13, %v1388_v35, %v2048_v37  ;;  %v2308_v44 = vsel %vm1892_vm14, %v1518_v36, %v2100_v38 }
 0x20f   : > { %v3662_v45 = vpack.c.bf16 %v2256_v43, %v2255_v49  ;;  %v3792_v46 = vpack.c.bf16 %v2308_v44, %v2307_v42 }
 0x210   : > { %v1647_v47 = vpop.f32.mrf.mxu2  ;;  %v1777_v48 = vpop.f32.mrf.mxu3 }
 0x211   : > { %4090 = vst [vmem:[%s4352_s8 + $0xb0] sm:$0xff] %v3662_v45   ;;  %v1648_v52 = vadd.f32 %v4715_v33, %v1647_v47  ;;  %v1778_v53 = vadd.f32 %v4715_v33, %v1777_v48  ;;  %v1390_v54 = vpop.f32.mrf.mxu0  ;;  %v1520_v55 = vpop.f32.mrf.mxu1 }
 0x212   : > { %4116 = vst [vmem:[%s4352_s8 + $0x180] sm:$0xff] %v3792_v46   ;;  %v1391_v0 = vadd.f32 %v4715_v33, %v1390_v54  ;;  %v1521_v1 = vadd.f32 %v4715_v33, %v1520_v55 }
 0x213   : > { %vm1944_vm1 = vcmp.ge.f32.partialorder %v1648_v52, 0.0  ;;  %v2152_v56 = vmul.f32 0.01, %v1648_v52  ;;  %vm1996_vm3 = vcmp.ge.f32.partialorder %v1778_v53, 0.0  ;;  %v2204_v57 = vmul.f32 0.01, %v1778_v53 }
 0x214   : > { %v2049_v6 = vmul.f32 0.01, %v1391_v0  ;;  %v2101_v7 = vmul.f32 0.01, %v1521_v1  ;;  %vm1841_vm4 = vcmp.ge.f32.partialorder %v1391_v0, 0.0  ;;  %vm1893_vm2 = vcmp.ge.f32.partialorder %v1521_v1, 0.0 }
 0x215   : > { %v2360_v60 = vsel %vm1944_vm1, %v1648_v52, %v2152_v56  ;;  %v2412_v61 = vsel %vm1996_vm3, %v1778_v53, %v2204_v57 }
 0x216   : > { %v3922_v62 = vpack.c.bf16 %v2360_v60, %v2359_v58  ;;  %v4052_v63 = vpack.c.bf16 %v2412_v61, %v2411_v59  ;;  %v2257_v14 = vsel %vm1841_vm4, %v1391_v0, %v2049_v6  ;;  %v2309_v15 = vsel %vm1893_vm2, %v1521_v1, %v2101_v7 }
 0x218   : > { %4142 = vst [vmem:[%s4352_s8 + $0x250] sm:$0xff] %v3922_v62   ;;  %v1650_v2 = vpop.f32.mrf.mxu2  ;;  %v1780_v3 = vpop.f32.mrf.mxu3 }
 0x219   : > { %4168 = vst [vmem:[%s4352_s8 + $0x320] sm:$0xff] %v4052_v63   ;;  %v1392_v4 = vpop.f32.mrf.mxu0  ;;  %v1522_v5 = vpop.f32.mrf.mxu1  ;;  %v1651_v12 = vadd.f32 %v4715_v33, %v1650_v2  ;;  %v1781_v13 = vadd.f32 %v4715_v33, %v1780_v3 }
 0x21a   : > { %v1393_v8 = vadd.f32 %v4715_v33, %v1392_v4  ;;  %v1523_v9 = vadd.f32 %v4715_v33, %v1522_v5 }
 0x21b   : > { %v2153_v22 = vmul.f32 0.01, %v1651_v12  ;;  %v2205_v23 = vmul.f32 0.01, %v1781_v13  ;;  %vm1945_vm7 = vcmp.ge.f32.partialorder %v1651_v12, 0.0  ;;  %vm1997_vm8 = vcmp.ge.f32.partialorder %v1781_v13, 0.0 }
 0x21c   : > { %vm1842_vm5 = vcmp.ge.f32.partialorder %v1393_v8, 0.0  ;;  %v2050_v10 = vmul.f32 0.01, %v1393_v8  ;;  %vm1894_vm6 = vcmp.ge.f32.partialorder %v1523_v9, 0.0  ;;  %v2102_v11 = vmul.f32 0.01, %v1523_v9 }
 0x21d   : > { %v2361_v30 = vsel %vm1945_vm7, %v1651_v12, %v2153_v22  ;;  %v2413_v31 = vsel %vm1997_vm8, %v1781_v13, %v2205_v23 }
 0x21e   : > { %v2258_v16 = vsel %vm1842_vm5, %v1393_v8, %v2050_v10  ;;  %v2310_v17 = vsel %vm1894_vm6, %v1523_v9, %v2102_v11 }
 0x21f   : > { %v3667_v18 = vpack.c.bf16 %v2258_v16, %v2257_v14  ;;  %v3797_v19 = vpack.c.bf16 %v2310_v17, %v2309_v15 }
 0x220   : > { %v1652_v20 = vpop.f32.mrf.mxu2  ;;  %v1782_v21 = vpop.f32.mrf.mxu3 }
 0x221   : > { %4091 = vst [vmem:[%s4352_s8 + $0xb8] sm:$0xff] %v3667_v18   ;;  %v1653_v24 = vadd.f32 %v4715_v33, %v1652_v20  ;;  %v1783_v25 = vadd.f32 %v4715_v33, %v1782_v21  ;;  %v1395_v26 = vpop.f32.mrf.mxu0  ;;  %v1525_v27 = vpop.f32.mrf.mxu1 }
 0x222   : > { %4117 = vst [vmem:[%s4352_s8 + $0x188] sm:$0xff] %v3797_v19   ;;  %v1396_v36 = vadd.f32 %v4715_v33, %v1395_v26  ;;  %v1526_v37 = vadd.f32 %v4715_v33, %v1525_v27 }
 0x223   : > { %vm1946_vm9 = vcmp.ge.f32.partialorder %v1653_v24, 0.0  ;;  %v2154_v28 = vmul.f32 0.01, %v1653_v24  ;;  %vm1998_vm10 = vcmp.ge.f32.partialorder %v1783_v25, 0.0  ;;  %v2206_v29 = vmul.f32 0.01, %v1783_v25 }
 0x224   : > { %v2051_v42 = vmul.f32 0.01, %v1396_v36  ;;  %v2103_v43 = vmul.f32 0.01, %v1526_v37  ;;  %vm1843_vm11 = vcmp.ge.f32.partialorder %v1396_v36, 0.0  ;;  %vm1895_vm12 = vcmp.ge.f32.partialorder %v1526_v37, 0.0 }
 0x225   : > { %v2362_v32 = vsel %vm1946_vm9, %v1653_v24, %v2154_v28  ;;  %v2414_v34 = vsel %vm1998_vm10, %v1783_v25, %v2206_v29 }
 0x226   : > { %v3927_v39 = vpack.c.bf16 %v2362_v32, %v2361_v30  ;;  %v4057_v35 = vpack.c.bf16 %v2414_v34, %v2413_v31  ;;  %v2259_v51 = vsel %vm1843_vm11, %v1396_v36, %v2051_v42  ;;  %v2311_v52 = vsel %vm1895_vm12, %v1526_v37, %v2103_v43 }
 0x228   : > { %4143 = vst [vmem:[%s4352_s8 + $0x258] sm:$0xff] %v3927_v39   ;;  %v1655_v38 = vpop.f32.mrf.mxu2  ;;  %v1785_v40 = vpop.f32.mrf.mxu3 }
 0x229   : > { %4169 = vst [vmem:[%s4352_s8 + $0x328] sm:$0xff] %v4057_v35   ;;  %v1397_v41 = vpop.f32.mrf.mxu0  ;;  %v1527_v49 = vpop.f32.mrf.mxu1  ;;  %v1656_v48 = vadd.f32 %v4715_v33, %v1655_v38  ;;  %v1786_v50 = vadd.f32 %v4715_v33, %v1785_v40 }
 0x22a   : > { %v1398_v44 = vadd.f32 %v4715_v33, %v1397_v41  ;;  %v1528_v45 = vadd.f32 %v4715_v33, %v1527_v49 }
 0x22b   : > { %v2155_v59 = vmul.f32 0.01, %v1656_v48  ;;  %v2207_v60 = vmul.f32 0.01, %v1786_v50  ;;  %vm1947_vm15 = vcmp.ge.f32.partialorder %v1656_v48, 0.0  ;;  %vm1999_vm0 = vcmp.ge.f32.partialorder %v1786_v50, 0.0 }
 0x22c   : > { %vm1844_vm13 = vcmp.ge.f32.partialorder %v1398_v44, 0.0  ;;  %v2052_v46 = vmul.f32 0.01, %v1398_v44  ;;  %vm1896_vm14 = vcmp.ge.f32.partialorder %v1528_v45, 0.0  ;;  %v2104_v47 = vmul.f32 0.01, %v1528_v45 }
 0x22d   : > { %v2363_v3 = vsel %vm1947_vm15, %v1656_v48, %v2155_v59  ;;  %v2415_v4 = vsel %vm1999_vm0, %v1786_v50, %v2207_v60 }
 0x22e   : > { %v2260_v53 = vsel %vm1844_vm13, %v1398_v44, %v2052_v46  ;;  %v2312_v54 = vsel %vm1896_vm14, %v1528_v45, %v2104_v47 }
 0x22f   : > { %v3672_v55 = vpack.c.bf16 %v2260_v53, %v2259_v51  ;;  %v3802_v56 = vpack.c.bf16 %v2312_v54, %v2311_v52 }
 0x230   : > { %v1657_v57 = vpop.f32.mrf.mxu2  ;;  %v1787_v58 = vpop.f32.mrf.mxu3 }
 0x231   : > { %4092 = vst [vmem:[%s4352_s8 + $0xc0] sm:$0xff] %v3672_v55   ;;  %v1658_v61 = vadd.f32 %v4715_v33, %v1657_v57  ;;  %v1788_v62 = vadd.f32 %v4715_v33, %v1787_v58  ;;  %v1400_v63 = vpop.f32.mrf.mxu0  ;;  %v1530_v0 = vpop.f32.mrf.mxu1 }
 0x232   : > { %4118 = vst [vmem:[%s4352_s8 + $0x190] sm:$0xff] %v3802_v56   ;;  %v1401_v9 = vadd.f32 %v4715_v33, %v1400_v63  ;;  %v1531_v10 = vadd.f32 %v4715_v33, %v1530_v0 }
 0x233   : > { %vm1948_vm1 = vcmp.ge.f32.partialorder %v1658_v61, 0.0  ;;  %v2156_v1 = vmul.f32 0.01, %v1658_v61  ;;  %vm2000_vm3 = vcmp.ge.f32.partialorder %v1788_v62, 0.0  ;;  %v2208_v2 = vmul.f32 0.01, %v1788_v62 }
 0x234   : > { %v2053_v15 = vmul.f32 0.01, %v1401_v9  ;;  %v2105_v16 = vmul.f32 0.01, %v1531_v10  ;;  %vm1845_vm4 = vcmp.ge.f32.partialorder %v1401_v9, 0.0  ;;  %vm1897_vm2 = vcmp.ge.f32.partialorder %v1531_v10, 0.0 }
 0x235   : > { %v2364_v5 = vsel %vm1948_vm1, %v1658_v61, %v2156_v1  ;;  %v2416_v6 = vsel %vm2000_vm3, %v1788_v62, %v2208_v2 }
 0x236   : > { %v3932_v7 = vpack.c.bf16 %v2364_v5, %v2363_v3  ;;  %v4062_v8 = vpack.c.bf16 %v2416_v6, %v2415_v4  ;;  %v2261_v23 = vsel %vm1845_vm4, %v1401_v9, %v2053_v15  ;;  %v2313_v24 = vsel %vm1897_vm2, %v1531_v10, %v2105_v16 }
 0x238   : > { %4144 = vst [vmem:[%s4352_s8 + $0x260] sm:$0xff] %v3932_v7   ;;  %v1660_v11 = vpop.f32.mrf.mxu2  ;;  %v1790_v12 = vpop.f32.mrf.mxu3 }
 0x239   : > { %4170 = vst [vmem:[%s4352_s8 + $0x330] sm:$0xff] %v4062_v8   ;;  %v1402_v13 = vpop.f32.mrf.mxu0  ;;  %v1532_v14 = vpop.f32.mrf.mxu1  ;;  %v1661_v21 = vadd.f32 %v4715_v33, %v1660_v11  ;;  %v1791_v22 = vadd.f32 %v4715_v33, %v1790_v12 }
 0x23a   : > { %v1403_v17 = vadd.f32 %v4715_v33, %v1402_v13  ;;  %v1533_v18 = vadd.f32 %v4715_v33, %v1532_v14 }
 0x23b   : > { %v2157_v31 = vmul.f32 0.01, %v1661_v21  ;;  %v2209_v32 = vmul.f32 0.01, %v1791_v22  ;;  %vm1949_vm7 = vcmp.ge.f32.partialorder %v1661_v21, 0.0  ;;  %vm2001_vm8 = vcmp.ge.f32.partialorder %v1791_v22, 0.0 }
 0x23c   : > { %vm1846_vm5 = vcmp.ge.f32.partialorder %v1403_v17, 0.0  ;;  %v2054_v19 = vmul.f32 0.01, %v1403_v17  ;;  %vm1898_vm6 = vcmp.ge.f32.partialorder %v1533_v18, 0.0  ;;  %v2106_v20 = vmul.f32 0.01, %v1533_v18 }
 0x23d   : > { %v2365_v37 = vsel %vm1949_vm7, %v1661_v21, %v2157_v31  ;;  %v2417_v38 = vsel %vm2001_vm8, %v1791_v22, %v2209_v32 }
 0x23e   : > { %v2262_v25 = vsel %vm1846_vm5, %v1403_v17, %v2054_v19  ;;  %v2314_v26 = vsel %vm1898_vm6, %v1533_v18, %v2106_v20 }
 0x23f   : > { %v3677_v27 = vpack.c.bf16 %v2262_v25, %v2261_v23  ;;  %v3807_v28 = vpack.c.bf16 %v2314_v26, %v2313_v24 }
 0x240   : > { %v1662_v29 = vpop.f32.mrf.mxu2  ;;  %v1792_v30 = vpop.f32.mrf.mxu3 }
 0x241   : > { %4093 = vst [vmem:[%s4352_s8 + $0xc8] sm:$0xff] %v3677_v27   ;;  %v1663_v34 = vadd.f32 %v4715_v33, %v1662_v29  ;;  %v1793_v39 = vadd.f32 %v4715_v33, %v1792_v30 }
 0x242   : > { %4119 = vst [vmem:[%s4352_s8 + $0x198] sm:$0xff] %v3807_v28  }
 0x243   : > { %vm1950_vm9 = vcmp.ge.f32.partialorder %v1663_v34, 0.0  ;;  %v2158_v35 = vmul.f32 0.01, %v1663_v34  ;;  %vm2002_vm10 = vcmp.ge.f32.partialorder %v1793_v39, 0.0  ;;  %v2210_v36 = vmul.f32 0.01, %v1793_v39 }
 0x245   : > { %v2366_v40 = vsel %vm1950_vm9, %v1663_v34, %v2158_v35  ;;  %v2418_v41 = vsel %vm2002_vm10, %v1793_v39, %v2210_v36 }
 0x246   : > { %v3937_v49 = vpack.c.bf16 %v2366_v40, %v2365_v37  ;;  %v4067_v42 = vpack.c.bf16 %v2418_v41, %v2417_v38 }
 0x248   : > { %4145 = vst [vmem:[%s4352_s8 + $0x268] sm:$0xff] %v3937_v49  }
 0x249   : > { %4171 = vst [vmem:[%s4352_s8 + $0x338] sm:$0xff] %v4067_v42  }
 0x24a PF: > { %s13_s12 = sadd.s32 1, %s4205_s12  }
 0x24b   : > { %p10_p4 = scmp.ge.s32.totalorder %s13_s12, 7  }
 0x24d   :  { %12 = sbr.rel (!%p10_p4) target bundleno = 1 (0x1), region = 62 }

// kernel: pilotnet_mdn_forward.7
= control target key start
LH: loop header
LB: loop body
LE: loop exit
PB: predicated region body
PF: predicated region fallthrough
CT: control target
= control target key end

     0   :  { %s6503_s12 = smov 0   ;;  %s7787_s0 = inlined_call_operand.vmem [shape: bf16[1792,600], index: 0, kind: input, shape index: {}]   ;;  %s7788_s1 = inlined_call_operand.vmem [shape: bf16[600,128], index: 1, kind: input, shape index: {}]   ;;  %s7789_s2 = inlined_call_operand.vmem [shape: f32[1,128], index: 2, kind: input, shape index: {}]   ;;  %s7790_s3 = inlined_call_operand.vmem [shape: bf16[1792,128], index: 3, kind: output, shape index: {}]  }
   0x1 LB: > { %s4452_s13 = sadd.s32 4294967295, %s6481_s12   ;;  %p4456_p0 = scmp.ge.s32.totalorder %s6481_s12, 1  ;;  %s6481_s12 = sphi %s6503_s12, %s13_s12  }
   0x2   : > { %p139_p1 = scmp.lt.s32.totalorder %s6481_s12, 3 }
   0x4   : > { %p140_p2 = pnand %p4456_p0, %p139_p1 }
   0x6   : > { %143 = sbr.rel (%p140_p2) target bundleno = 1299 (0x513), region = 32 }
   0xb   : > { %v6072_v0 = vld [vmem:[%s7788_s1 + $0x38] sm:$0xff]  ;;  %v6071_v1 = vld [vmem:[%s7788_s1 + $0x30] sm:$0xff]  ;;  %v6070_v2 = vld [vmem:[%s7788_s1 + $0x28] sm:$0xff]  ;;  %s164_s20 = smul.u32 112, %s4452_s13  ;;  %vm2387_vm0 = vcmask 1043456   ;;  %vm2218_vm1 = vcmask 719872  }
   0xc   : > { %6437 = vmatpush.bf16.msra.mxu1 %v6072_v0  ;;  %6438 = vmatpush.bf16.msra.mxu2 %v6072_v0  ;;  %v6069_v3 = vld [vmem:[%s7788_s1 + $0x20] sm:$0xff]  ;;  %v6068_v4 = vld [vmem:[%s7788_s1 + $0x18] sm:$0xff]  ;;  %v6067_v5 = vld [vmem:[%s7788_s1 + $0x10] sm:$0xff] }
   0xd   : > { %6439 = vmatpush.bf16.msra.mxu3 %v6072_v0  ;;  %2391 = vmatpush.bf16.msra.mxu0 %v6072_v0  ;;  %p165_p3 = scmp.lt.s32.totalorder %s164_s20, 223  ;;  %v588_v6 = vld [vmem:[%s7788_s1 + $0x128] sm:$0xf]  ;;  %v6065_v9 = vld [vmem:[%s7788_s1] sm:$0xff]  ;;  %v6088_v18 = vld [vmem:[%s7788_s1 + $0xb8] sm:$0xff] }
   0xe   : > { %v6066_v7 = vld [vmem:[%s7788_s1 + $0x8] sm:$0xff]  ;;  %v2142_v8 = vunpack.c.l.b16 %v588_v6  ;;  %v6096_v19 = vld [vmem:[%s7788_s1 + $0xf8] sm:$0xff]  ;;  %v6087_v27 = vld [vmem:[%s7788_s1 + $0xb0] sm:$0xff] }
   0xf   : > { %s7940_s20 = smov (!%p165_p3, %s164_s20), 223  ;;  %v6080_v25 = vld [vmem:[%s7788_s1 + $0x78] sm:$0xff]  ;;  %v6095_v28 = vld [vmem:[%s7788_s1 + $0xf0] sm:$0xff]  ;;  %v6101_v42 = vld [vmem:[%s7788_s1 + $0x120] sm:$0xff] }
  0x10   : > { %6440 = vmatpush.bf16.msra.mxu1 %v6071_v1  ;;  %6441 = vmatpush.bf16.msra.mxu2 %v6071_v1  ;;  %s6461_s27 = smul.u32 20, %s7940_s20  ;;  %v2180_v20 = vpack.c.b16 %v2142_v8, %v2142_v8  ;;  %v6079_v29 = vld [vmem:[%s7788_s1 + $0x70] sm:$0xff]  ;;  %v6086_v43 = vld [vmem:[%s7788_s1 + $0xa8] sm:$0xff]  ;;  %v6085_v6 = vld [vmem:[%s7788_s1 + $0xa0] sm:$0xff]  ;;  %s4458_s24 = sshll.u32 %s7940_s20, 2 }
  0x11   : > { %6442 = vmatpush.bf16.msra.mxu3 %v6071_v1  ;;  %2392 = vmatpush.bf16.msra.mxu0 %v6071_v1  ;;  %v6094_v44 = vld [vmem:[%s7788_s1 + $0xe8] sm:$0xff]  ;;  %v6093_v8 = vld [vmem:[%s7788_s1 + $0xe0] sm:$0xff] }
  0x12   : > { %s6541_s7 = scalar_lea.vmem %s7787_s0, %s6461_s27  ;;  %v2389_v26 = vsel %vm2387_vm0, %v2180_v20, 0  ;;  %v6078_v45 = vld [vmem:[%s7788_s1 + $0x68] sm:$0xff]  ;;  %s7074_s27 = scalar_lea.vmem %s7790_s3, %s4458_s24 }
  0x13   : > { %v4741_v10 = vld [vmem:[%s6541_s7 + $0x230] sm:$0xf]  ;;  %v5857_v11 = vld [vmem:[%s6541_s7 + $0x240] sm:$0xf0]  ;;  %v5021_v12 = vld [vmem:[%s6541_s7 + $0x460] sm:$0xf] }
  0x14   : > { %6443 = vmatpush.bf16.msra.mxu1 %v6070_v2  ;;  %6444 = vmatpush.bf16.msra.mxu2 %v6070_v2  ;;  %v5927_v13 = vld [vmem:[%s6541_s7 + $0x470] sm:$0xf0]  ;;  %v5301_v14 = vld [vmem:[%s6541_s7 + $0x690] sm:$0xf]  ;;  %v5997_v15 = vld [vmem:[%s6541_s7 + $0x6a0] sm:$0xf0]  ;;  %v4742_v21 = vor.u32 %v5857_v11, %v4741_v10 }
  0x15   : > { %6445 = vmatpush.bf16.msra.mxu3 %v6070_v2  ;;  %2393 = vmatpush.bf16.msra.mxu0 %v6070_v2  ;;  %v4461_v16 = vld [vmem:[%s6541_s7] sm:$0xf]  ;;  %v5787_v17 = vld [vmem:[%s6541_s7 + $0x10] sm:$0xf0]  ;;  %v5022_v22 = vor.u32 %v5927_v13, %v5021_v12  ;;  %v5302_v23 = vor.u32 %v5997_v15, %v5301_v14  ;;  %v4761_v30 = vld [vmem:[%s6541_s7 + $0x258] sm:$0xf] }
  0x16   : > { %v4462_v24 = vor.u32 %v5787_v17, %v4461_v16  ;;  %v5862_v31 = vld [vmem:[%s6541_s7 + $0x268] sm:$0xf0]  ;;  %v5041_v32 = vld [vmem:[%s6541_s7 + $0x488] sm:$0xf]  ;;  %v5932_v33 = vld [vmem:[%s6541_s7 + $0x498] sm:$0xf0] }
  0x17   : > { %v5321_v34 = vld [vmem:[%s6541_s7 + $0x6b8] sm:$0xf]  ;;  %v6002_v35 = vld [vmem:[%s6541_s7 + $0x6c8] sm:$0xf0]  ;;  %v4481_v36 = vld [vmem:[%s6541_s7 + $0x28] sm:$0xf]  ;;  %v4762_v38 = vor.u32 %v5862_v31, %v4761_v30  ;;  %v5042_v39 = vor.u32 %v5932_v33, %v5041_v32 }
  0x18   : > { %6446 = vmatpush.bf16.msra.mxu1 %v6069_v3  ;;  %6447 = vmatpush.bf16.msra.mxu2 %v6069_v3  ;;  %v5792_v37 = vld [vmem:[%s6541_s7 + $0x38] sm:$0xf0]  ;;  %v5322_v40 = vor.u32 %v6002_v35, %v5321_v34  ;;  %v4781_v46 = vld [vmem:[%s6541_s7 + $0x280] sm:$0xf]  ;;  %v5867_v47 = vld [vmem:[%s6541_s7 + $0x290] sm:$0xf0] }
  0x19   : > { %6448 = vmatpush.bf16.msra.mxu3 %v6069_v3  ;;  %2394 = vmatpush.bf16.msra.mxu0 %v6069_v3  ;;  %v4482_v41 = vor.u32 %v5792_v37, %v4481_v36  ;;  %v5061_v48 = vld [vmem:[%s6541_s7 + $0x4b0] sm:$0xf]  ;;  %v5937_v49 = vld [vmem:[%s6541_s7 + $0x4c0] sm:$0xf0]  ;;  %v5341_v50 = vld [vmem:[%s6541_s7 + $0x6e0] sm:$0xf]  ;;  %v4782_v54 = vor.u32 %v5867_v47, %v4781_v46 }
  0x1a   : > { %v6007_v51 = vld [vmem:[%s6541_s7 + $0x6f0] sm:$0xf0]  ;;  %v4501_v52 = vld [vmem:[%s6541_s7 + $0x50] sm:$0xf]  ;;  %v5797_v53 = vld [vmem:[%s6541_s7 + $0x60] sm:$0xf0]  ;;  %v5062_v55 = vor.u32 %v5937_v49, %v5061_v48 }
  0x1b   : > { %v5342_v56 = vor.u32 %v6007_v51, %v5341_v50  ;;  %v4502_v57 = vor.u32 %v5797_v53, %v4501_v52  ;;  %v4801_v58 = vld [vmem:[%s6541_s7 + $0x2a8] sm:$0xf]  ;;  %v5872_v59 = vld [vmem:[%s6541_s7 + $0x2b8] sm:$0xf0]  ;;  %v5081_v60 = vld [vmem:[%s6541_s7 + $0x4d8] sm:$0xf] }
  0x1c   : > { %6449 = vmatpush.bf16.msra.mxu1 %v6068_v4  ;;  %6450 = vmatpush.bf16.msra.mxu2 %v6068_v4  ;;  %v5942_v61 = vld [vmem:[%s6541_s7 + $0x4e8] sm:$0xf0]  ;;  %v5361_v62 = vld [vmem:[%s6541_s7 + $0x708] sm:$0xf]  ;;  %v6012_v63 = vld [vmem:[%s6541_s7 + $0x718] sm:$0xf0]  ;;  %v4802_v2 = vor.u32 %v5872_v59, %v4801_v58 }
  0x1d   : > { %6451 = vmatpush.bf16.msra.mxu3 %v6068_v4  ;;  %2395 = vmatpush.bf16.msra.mxu0 %v6068_v4  ;;  %v4521_v0 = vld [vmem:[%s6541_s7 + $0x78] sm:$0xf]  ;;  %v5802_v1 = vld [vmem:[%s6541_s7 + $0x88] sm:$0xf0]  ;;  %v5082_v3 = vor.u32 %v5942_v61, %v5081_v60  ;;  %v5362_v4 = vor.u32 %v6012_v63, %v5361_v62  ;;  %v4821_v10 = vld [vmem:[%s6541_s7 + $0x2d0] sm:$0xf] }
  0x1e   : > { %v5877_v11 = vld [vmem:[%s6541_s7 + $0x2e0] sm:$0xf0]  ;;  %v5101_v12 = vld [vmem:[%s6541_s7 + $0x500] sm:$0xf]  ;;  %v5947_v13 = vld [vmem:[%s6541_s7 + $0x510] sm:$0xf0] }
  0x1f   : > { %v5381_v14 = vld [vmem:[%s6541_s7 + $0x730] sm:$0xf]  ;;  %v6017_v15 = vld [vmem:[%s6541_s7 + $0x740] sm:$0xf0]  ;;  %v4541_v16 = vld [vmem:[%s6541_s7 + $0xa0] sm:$0xf] }
  0x20   : > { %6452 = vmatpush.bf16.msra.mxu1 %v6067_v5  ;;  %6453 = vmatpush.bf16.msra.mxu2 %v6067_v5  ;;  %v5807_v17 = vld [vmem:[%s6541_s7 + $0xb0] sm:$0xf0]  ;;  %v5382_v20 = vor.u32 %v6017_v15, %v5381_v14  ;;  %v6084_v34 = vld [vmem:[%s7788_s1 + $0x98] sm:$0xff]  ;;  %v4881_v50 = vld [vmem:[%s6541_s7 + $0x348] sm:$0xf] }
  0x21   : > { %6454 = vmatpush.bf16.msra.mxu3 %v6067_v5  ;;  %2396 = vmatpush.bf16.msra.mxu0 %v6067_v5  ;;  %v4522_v5 = vor.u32 %v5802_v1, %v4521_v0  ;;  %v6092_v35 = vld [vmem:[%s7788_s1 + $0xd8] sm:$0xff]  ;;  %v6099_v37 = vld [vmem:[%s7788_s1 + $0x110] sm:$0xff]  ;;  %v5962_v53 = vld [vmem:[%s6541_s7 + $0x588] sm:$0xf0] }
  0x22   : > { %v6076_v36 = vld [vmem:[%s7788_s1 + $0x58] sm:$0xff]  ;;  %v6083_v62 = vld [vmem:[%s7788_s1 + $0x90] sm:$0xff]  ;;  %v6098_v15 = vld [vmem:[%s7788_s1 + $0x108] sm:$0xff] }
  0x23   : > { %v5892_v51 = vld [vmem:[%s6541_s7 + $0x358] sm:$0xf0]  ;;  %v5161_v52 = vld [vmem:[%s6541_s7 + $0x578] sm:$0xf]  ;;  %v6091_v63 = vld [vmem:[%s7788_s1 + $0xd0] sm:$0xff] }
  0x24   : > { %6455 = vmatpush.bf16.msra.mxu1 %v6066_v7  ;;  %6456 = vmatpush.bf16.msra.mxu2 %v6066_v7  ;;  %v4882_v58 = vor.u32 %v5892_v51, %v4881_v50  ;;  %v5162_v59 = vor.u32 %v5962_v53, %v5161_v52  ;;  %v6075_v0 = vld [vmem:[%s7788_s1 + $0x50] sm:$0xff]  ;;  %v5837_v50 = vld [vmem:[%s6541_s7 + $0x1a0] sm:$0xf0] }
  0x25   : > { %6457 = vmatpush.bf16.msra.mxu3 %v6066_v7  ;;  %2397 = vmatpush.bf16.msra.mxu0 %v6066_v7  ;;  %v6100_v7 = vld [vmem:[%s7788_s1 + $0x118] sm:$0xff]  ;;  %v4901_v1 = vld [vmem:[%s6541_s7 + $0x370] sm:$0xf] }
  0x28   : > { %6458 = vmatpush.bf16.msra.mxu1 %v6065_v9  ;;  %6459 = vmatpush.bf16.msra.mxu2 %v6065_v9 }
  0x29   : > { %6460 = vmatpush.bf16.msra.mxu3 %v6065_v9  ;;  %2398 = vmatpush.bf16.msra.mxu0 %v6065_v9  ;;  %v6077_v9 = vld [vmem:[%s7788_s1 + $0x60] sm:$0xff] }
  0x2b   : > { %2469 = vmatmul.bf16.vlgmr.msra.gmra.mxu1 %v4742_v21  ;;  %2539 = vmatmul.bf16.vlgmr.msra.gmra.mxu2 %v5022_v22  ;;  %v4542_v21 = vor.u32 %v5807_v17, %v4541_v16  ;;  %v4841_v22 = vld [vmem:[%s6541_s7 + $0x2f8] sm:$0xf] }
  0x2c   : > { %2969 = vmatpush.bf16.msrb.mxu2 %v6088_v18  ;;  %2609 = vmatmul.bf16.vlgmr.msra.gmra.mxu3 %v5302_v23  ;;  %v4822_v18 = vor.u32 %v5877_v11, %v4821_v10  ;;  %v5882_v23 = vld [vmem:[%s6541_s7 + $0x308] sm:$0xf0] }
  0x2d   : > { %3258 = vmatpush.bf16.msrb.mxu3 %v6096_v19  ;;  %2399 = vmatmul.bf16.vlgmr.msra.gmra.mxu0 %v4462_v24  ;;  %v5102_v19 = vor.u32 %v5947_v13, %v5101_v12  ;;  %v5121_v24 = vld [vmem:[%s6541_s7 + $0x528] sm:$0xf]  ;;  %v4842_v30 = vor.u32 %v5882_v23, %v4841_v22  ;;  %v4921_v22 = vld [vmem:[%s6541_s7 + $0x398] sm:$0xf]  ;;  %v5902_v23 = vld [vmem:[%s6541_s7 + $0x3a8] sm:$0xf0] }
  0x2e   : > { %2680 = vmatpush.bf16.msrb.mxu1 %v6080_v25  ;;  %3549 = vmatpush.bf16.msrb.mxu0 %v2389_v26  ;;  %v5952_v25 = vld [vmem:[%s6541_s7 + $0x538] sm:$0xf0]  ;;  %v5401_v26 = vld [vmem:[%s6541_s7 + $0x758] sm:$0xf] }
  0x2f   : > { %v5122_v31 = vor.u32 %v5952_v25, %v5121_v24  ;;  %v5201_v24 = vld [vmem:[%s6541_s7 + $0x5c8] sm:$0xf]  ;;  %v5972_v25 = vld [vmem:[%s6541_s7 + $0x5d8] sm:$0xf0] }
  0x30   : > { %2970 = vmatpush.bf16.msrb.mxu2 %v6087_v27  ;;  %v6022_v27 = vld [vmem:[%s6541_s7 + $0x768] sm:$0xf0] }
  0x31   : > { %3259 = vmatpush.bf16.msrb.mxu3 %v6095_v28  ;;  %v4561_v28 = vld [vmem:[%s6541_s7 + $0xc8] sm:$0xf]  ;;  %v5402_v32 = vor.u32 %v6022_v27, %v5401_v26  ;;  %v5481_v26 = vld [vmem:[%s6541_s7 + $0x7f8] sm:$0xf]  ;;  %v6042_v27 = vld [vmem:[%s6541_s7 + $0x808] sm:$0xf0] }
  0x32   : > { %2681 = vmatpush.bf16.msrb.mxu1 %v6079_v29  ;;  %3550 = vmatpush.bf16.msrb.mxu0 %v6101_v42  ;;  %v5812_v29 = vld [vmem:[%s6541_s7 + $0xd8] sm:$0xf0]  ;;  %v5421_v42 = vld [vmem:[%s6541_s7 + $0x780] sm:$0xf] }
  0x33   : > { %v4562_v33 = vor.u32 %v5812_v29, %v4561_v28  ;;  %v4641_v28 = vld [vmem:[%s6541_s7 + $0x168] sm:$0xf]  ;;  %v5832_v29 = vld [vmem:[%s6541_s7 + $0x178] sm:$0xf0] }
  0x34   : > { %2971 = vmatpush.bf16.msrb.mxu2 %v6086_v43  ;;  %v6027_v43 = vld [vmem:[%s6541_s7 + $0x790] sm:$0xf0] }
  0x35   : > { %3260 = vmatpush.bf16.msrb.mxu3 %v6094_v44  ;;  %v4581_v44 = vld [vmem:[%s6541_s7 + $0xf0] sm:$0xf]  ;;  %v5422_v48 = vor.u32 %v6027_v43, %v5421_v42  ;;  %v4941_v43 = vld [vmem:[%s6541_s7 + $0x3c0] sm:$0xf] }
  0x36   : > { %2682 = vmatpush.bf16.msrb.mxu1 %v6078_v45  ;;  %3551 = vmatpush.bf16.msrb.mxu0 %v6100_v7  ;;  %v5817_v45 = vld [vmem:[%s6541_s7 + $0x100] sm:$0xf0]  ;;  %v4621_v7 = vld [vmem:[%s6541_s7 + $0x140] sm:$0xf] }
  0x37   : > { %v4582_v49 = vor.u32 %v5817_v45, %v4581_v44  ;;  %v5907_v44 = vld [vmem:[%s6541_s7 + $0x3d0] sm:$0xf0]  ;;  %v5221_v45 = vld [vmem:[%s6541_s7 + $0x5f0] sm:$0xf] }
  0x38   : > { %2972 = vmatpush.bf16.msrb.mxu2 %v6085_v6  ;;  %v6037_v6 = vld [vmem:[%s6541_s7 + $0x7e0] sm:$0xf0]  ;;  %v4942_v53 = vor.u32 %v5907_v44, %v4941_v43  ;;  %v4701_v43 = vld [vmem:[%s6541_s7 + $0x1e0] sm:$0xf]  ;;  %v5847_v44 = vld [vmem:[%s6541_s7 + $0x1f0] sm:$0xf0] }
  0x39   : > { %3261 = vmatpush.bf16.msrb.mxu3 %v6093_v8  ;;  %v5827_v8 = vld [vmem:[%s6541_s7 + $0x150] sm:$0xf0] }
  0x3a   : > { %2683 = vmatpush.bf16.msrb.mxu1 %v6077_v9  ;;  %3552 = vmatpush.bf16.msrb.mxu0 %v6099_v37  ;;  %v4622_v13 = vor.u32 %v5827_v8, %v4621_v7  ;;  %v6074_v37 = vld [vmem:[%s7788_s1 + $0x48] sm:$0xff]  ;;  %v6052_v8 = vld [vmem:[%s6541_s7 + $0x858] sm:$0xf0] }
  0x3b   : > { %2474 = vmatmul.bf16.gmra.mxu1 %v4762_v38  ;;  %2544 = vmatmul.bf16.gmra.mxu2 %v5042_v39  ;;  %v4861_v38 = vld [vmem:[%s6541_s7 + $0x320] sm:$0xf]  ;;  %v5887_v39 = vld [vmem:[%s6541_s7 + $0x330] sm:$0xf0]  ;;  %v5521_v7 = vld [vmem:[%s6541_s7 + $0x848] sm:$0xf] }
  0x3c   : > { %2614 = vmatmul.bf16.gmra.mxu3 %v5322_v40  ;;  %2973 = vmatpush.bf16.msrb.mxu2 %v6084_v34  ;;  %v5141_v40 = vld [vmem:[%s6541_s7 + $0x550] sm:$0xf]  ;;  %v4862_v46 = vor.u32 %v5887_v39, %v4861_v38 }
  0x3d   : > { %2404 = vmatmul.bf16.gmra.mxu0 %v4482_v41  ;;  %3262 = vmatpush.bf16.msrb.mxu3 %v6092_v35  ;;  %v5957_v41 = vld [vmem:[%s6541_s7 + $0x560] sm:$0xf0]  ;;  %v5482_v35 = vor.u32 %v6042_v27, %v5481_v26 }
  0x3e   : > { %2684 = vmatpush.bf16.msrb.mxu1 %v6076_v36  ;;  %v5142_v47 = vor.u32 %v5957_v41, %v5141_v40  ;;  %3553 = vmatpush.bf16.msrb.mxu0 %v6098_v15  ;;  %v4642_v36 = vor.u32 %v5832_v29, %v4641_v28  ;;  %v4981_v29 = vld [vmem:[%s6541_s7 + $0x410] sm:$0xf] }
  0x40   : > { %2974 = vmatpush.bf16.msrb.mxu2 %v6083_v62  ;;  %v6081_v62 = vld [vmem:[%s7788_s1 + $0x80] sm:$0xff] }
  0x41   : > { %3263 = vmatpush.bf16.msrb.mxu3 %v6091_v63 }
  0x42   : > { %2685 = vmatpush.bf16.msrb.mxu1 %v6075_v0  ;;  %v6097_v0 = vld [vmem:[%s7788_s1 + $0x100] sm:$0xff] }
  0x43   : > { %3554 = vmatpush.bf16.msrb.mxu0 %v6097_v0 }
  0x46   : > { %2686 = vmatpush.bf16.msrb.mxu1 %v6074_v37  ;;  %v6057_v37 = vld [vmem:[%s6541_s7 + $0x880] sm:$0xf0] }
  0x4b   : > { %2479 = vmatmul.bf16.gmra.mxu1 %v4782_v54  ;;  %2549 = vmatmul.bf16.gmra.mxu2 %v5062_v55  ;;  %v5441_v54 = vld [vmem:[%s6541_s7 + $0x7a8] sm:$0xf]  ;;  %v6032_v55 = vld [vmem:[%s6541_s7 + $0x7b8] sm:$0xf0] }
  0x4c   : > { %2619 = vmatmul.bf16.gmra.mxu3 %v5342_v56  ;;  %v4601_v56 = vld [vmem:[%s6541_s7 + $0x118] sm:$0xf]  ;;  %v5442_v60 = vor.u32 %v6032_v55, %v5441_v54 }
  0x4d   : > { %2409 = vmatmul.bf16.gmra.mxu0 %v4502_v57  ;;  %v5822_v57 = vld [vmem:[%s6541_s7 + $0x128] sm:$0xf0] }
  0x4e   : > { %v4602_v61 = vor.u32 %v5822_v57, %v4601_v56 }
  0x5b   : > { %2484 = vmatmul.bf16.gmra.mxu1 %v4802_v2  ;;  %2554 = vmatmul.bf16.gmra.mxu2 %v5082_v3  ;;  %v5897_v2 = vld [vmem:[%s6541_s7 + $0x380] sm:$0xf0]  ;;  %v5181_v3 = vld [vmem:[%s6541_s7 + $0x5a0] sm:$0xf] }
  0x5c   : > { %2624 = vmatmul.bf16.gmra.mxu3 %v5362_v4  ;;  %v5967_v4 = vld [vmem:[%s6541_s7 + $0x5b0] sm:$0xf0]  ;;  %v4902_v9 = vor.u32 %v5897_v2, %v4901_v1  ;;  %v6089_v1 = vld [vmem:[%s7788_s1 + $0xc0] sm:$0xff] }
  0x5d   : > { %2414 = vmatmul.bf16.gmra.mxu0 %v4522_v5  ;;  %v5461_v5 = vld [vmem:[%s6541_s7 + $0x7d0] sm:$0xf]  ;;  %v5182_v10 = vor.u32 %v5967_v4, %v5181_v3  ;;  %v6073_v2 = vld [vmem:[%s7788_s1 + $0x40] sm:$0xff]  ;;  %v4961_v3 = vld [vmem:[%s6541_s7 + $0x3e8] sm:$0xf] }
  0x5e   : > { %v5462_v12 = vor.u32 %v6037_v6, %v5461_v5  ;;  %v5912_v4 = vld [vmem:[%s6541_s7 + $0x3f8] sm:$0xf0]  ;;  %v5241_v5 = vld [vmem:[%s6541_s7 + $0x618] sm:$0xf]  ;;  %v5982_v6 = vld [vmem:[%s6541_s7 + $0x628] sm:$0xf0]  ;;  %2687 = vmatpush.bf16.msrb.mxu1 %v6073_v2 }
  0x5f   : > { %v4962_v15 = vor.u32 %v5912_v4, %v4961_v3  ;;  %v5922_v2 = vld [vmem:[%s6541_s7 + $0x448] sm:$0xf0]  ;;  %v5281_v3 = vld [vmem:[%s6541_s7 + $0x668] sm:$0xf]  ;;  %v5992_v4 = vld [vmem:[%s6541_s7 + $0x678] sm:$0xf0] }
  0x6b   : > { %2489 = vmatmul.bf16.gmra.mxu1 %v4822_v18  ;;  %2559 = vmatmul.bf16.gmra.mxu2 %v5102_v19 }
  0x6c   : > { %2629 = vmatmul.bf16.gmra.mxu3 %v5382_v20  ;;  %v6082_v20 = vld [vmem:[%s7788_s1 + $0x88] sm:$0xff] }
  0x6d   : > { %2419 = vmatmul.bf16.gmra.mxu0 %v4542_v21  ;;  %v6090_v21 = vld [vmem:[%s7788_s1 + $0xc8] sm:$0xff]  ;;  %2975 = vmatpush.bf16.msrb.mxu2 %v6082_v20  ;;  %v5242_v20 = vor.u32 %v5982_v6, %v5241_v5  ;;  %v5561_v5 = vld [vmem:[%s6541_s7 + $0x898] sm:$0xf] }
  0x6e   : > { %3264 = vmatpush.bf16.msrb.mxu3 %v6090_v21  ;;  %v6062_v6 = vld [vmem:[%s6541_s7 + $0x8a8] sm:$0xf0] }
  0x71   : > { %2976 = vmatpush.bf16.msrb.mxu2 %v6081_v62 }
  0x72   : > { %3265 = vmatpush.bf16.msrb.mxu3 %v6089_v1  ;;  %v5001_v1 = vld [vmem:[%s6541_s7 + $0x438] sm:$0xf] }
  0x7b   : > { %2494 = vmatmul.bf16.gmra.mxu1 %v4842_v30  ;;  %2564 = vmatmul.bf16.gmra.mxu2 %v5122_v31 }
  0x7c   : > { %2634 = vmatmul.bf16.gmra.mxu3 %v5402_v32  ;;  %v4922_v32 = vor.u32 %v5902_v23, %v4921_v22  ;;  %v5522_v22 = vor.u32 %v6052_v8, %v5521_v7  ;;  %v4721_v7 = vld [vmem:[%s6541_s7 + $0x208] sm:$0xf]  ;;  %v5852_v8 = vld [vmem:[%s6541_s7 + $0x218] sm:$0xf0] }
  0x7d   : > { %2424 = vmatmul.bf16.gmra.mxu0 %v4562_v33  ;;  %v5202_v33 = vor.u32 %v5972_v25, %v5201_v24 }
  0x8b   : > { %2499 = vmatmul.bf16.gmra.mxu1 %v4862_v46  ;;  %2569 = vmatmul.bf16.gmra.mxu2 %v5142_v47  ;;  %v5977_v46 = vld [vmem:[%s6541_s7 + $0x600] sm:$0xf0]  ;;  %v5501_v47 = vld [vmem:[%s6541_s7 + $0x820] sm:$0xf] }
  0x8c   : > { %2639 = vmatmul.bf16.gmra.mxu3 %v5422_v48  ;;  %v6047_v48 = vld [vmem:[%s6541_s7 + $0x830] sm:$0xf0]  ;;  %v5222_v54 = vor.u32 %v5977_v46, %v5221_v45 }
  0x8d   : > { %2429 = vmatmul.bf16.gmra.mxu0 %v4582_v49  ;;  %v4661_v49 = vld [vmem:[%s6541_s7 + $0x190] sm:$0xf]  ;;  %v5502_v56 = vor.u32 %v6047_v48, %v5501_v47 }
  0x8e   : > { %v4662_v57 = vor.u32 %v5837_v50, %v4661_v49 }
  0x9b   : > { %2504 = vmatmul.bf16.gmra.mxu1 %v4882_v58  ;;  %2574 = vmatmul.bf16.gmra.mxu2 %v5162_v59 }
  0x9c   : > { %2644 = vmatmul.bf16.gmra.mxu3 %v5442_v60 }
  0x9d   : > { %2434 = vmatmul.bf16.gmra.mxu0 %v4602_v61 }
  0xa8   : > { %v6681_v11 = vpop.f32.mrf.mxu1 }
  0xaa   : > { %v6683_v14 = vpop.f32.mrf.mxu0 }
  0xab   : > { %2509 = vmatmul.bf16.gmra.mxu1 %v4902_v9  ;;  %2579 = vmatmul.bf16.gmra.mxu2 %v5182_v10  ;;  %v4681_v9 = vld [vmem:[%s6541_s7 + $0x1b8] sm:$0xf]  ;;  %v5842_v10 = vld [vmem:[%s6541_s7 + $0x1c8] sm:$0xf0] }
  0xac   : > { %2649 = vmatmul.bf16.gmra.mxu3 %v5462_v12  ;;  %v4682_v23 = vor.u32 %v5842_v10, %v4681_v9 }
  0xad   : > { %2439 = vmatmul.bf16.gmra.mxu0 %v4622_v13 }
  0xae   : > { %v6688_v16 = vpop.f32.mrf.mxu2 }
  0xaf   : > { %7791 = vst [vmem:[#allocation2_spill] sm:$0xff] %v6688_v16  ;;  %v6690_v17 = vpop.f32.mrf.mxu3 }
  0xb0   : > { %7792 = vst [vmem:[#allocation3_spill] sm:$0xff] %v6690_v17  ;;  %v6692_v18 = vpop.f32.mrf.mxu1  ;;  %v4531_v17 = vld [vmem:[%s6541_s7 + $0x94] sm:$0xf0] }
  0xb2   : > { %v6694_v19 = vpop.f32.mrf.mxu0 }
  0xb6   : > { %v6710_v30 = vpop.f32.mrf.mxu2 }
  0xb7   : > { %7793 = vst [vmem:[#allocation4_spill] sm:$0xff] %v6710_v30  ;;  %v6712_v31 = vpop.f32.mrf.mxu3 }
  0xb8   : > { %7794 = vst [vmem:[#allocation5_spill] sm:$0xff] %v6712_v31  ;;  %v6714_v34 = vpop.f32.mrf.mxu1 }
  0xba   : > { %v6719_v38 = vpop.f32.mrf.mxu0 }
  0xbb   : > { %2514 = vmatmul.bf16.gmra.mxu1 %v4922_v32  ;;  %2584 = vmatmul.bf16.gmra.mxu2 %v5202_v33  ;;  %v5917_v32 = vld [vmem:[%s6541_s7 + $0x420] sm:$0xf0]  ;;  %v5261_v33 = vld [vmem:[%s6541_s7 + $0x640] sm:$0xf] }
  0xbc   : > { %2654 = vmatmul.bf16.gmra.mxu3 %v5482_v35  ;;  %v5987_v35 = vld [vmem:[%s6541_s7 + $0x650] sm:$0xf0]  ;;  %v4982_v47 = vor.u32 %v5917_v32, %v4981_v29  ;;  %v4722_v29 = vor.u32 %v5852_v8, %v4721_v7 }
  0xbd   : > { %2444 = vmatmul.bf16.gmra.mxu0 %v4642_v36  ;;  %v5541_v36 = vld [vmem:[%s6541_s7 + $0x870] sm:$0xf]  ;;  %v5262_v48 = vor.u32 %v5987_v35, %v5261_v33 }
  0xbe   : > { %v6721_v39 = vpop.f32.mrf.mxu2  ;;  %v5542_v50 = vor.u32 %v6057_v37, %v5541_v36 }
  0xbf   : > { %7795 = vst [vmem:[#allocation6_spill] sm:$0xff] %v6721_v39  ;;  %v6723_v40 = vpop.f32.mrf.mxu3 }
  0xc0   : > { %7796 = vst [vmem:[#allocation7_spill] sm:$0xff] %v6723_v40  ;;  %v6725_v41 = vpop.f32.mrf.mxu1 }
  0xc2   : > { %v6727_v42 = vpop.f32.mrf.mxu0 }
  0xc6   : > { %v6737_v51 = vpop.f32.mrf.mxu2 }
  0xc7   : > { %7797 = vst [vmem:[#allocation8_spill] sm:$0xff] %v6737_v51  ;;  %v6739_v52 = vpop.f32.mrf.mxu3  ;;  %v4597_v51 = vld [vmem:[%s6541_s7 + $0x100] sm:$0xf] }
  0xc8   : > { %7798 = vst [vmem:[#allocation9_spill] sm:$0xff] %v6739_v52  ;;  %v6741_v55 = vpop.f32.mrf.mxu1 }
  0xca   : > { %v6743_v58 = vpop.f32.mrf.mxu0 }
  0xcb   : > { %2519 = vmatmul.bf16.gmra.mxu1 %v4942_v53  ;;  %2589 = vmatmul.bf16.gmra.mxu2 %v5222_v54  ;;  %v4702_v53 = vor.u32 %v5847_v44, %v4701_v43  ;;  %v5785_v43 = vld [vmem:[%s6541_s7 + $0x4] sm:$0xf]  ;;  %v4463_v44 = vld [vmem:[%s6541_s7 + $0x14] sm:$0xf0] }
  0xcc   : > { %2659 = vmatmul.bf16.gmra.mxu3 %v5502_v56 }
  0xcd   : > { %2449 = vmatmul.bf16.gmra.mxu0 %v4662_v57 }
  0xce   : > { %v6745_v59 = vpop.f32.mrf.mxu2 }
  0xcf   : > { %7799 = vst [vmem:[#allocation10_spill] sm:$0xff] %v6745_v59  ;;  %v6747_v60 = vpop.f32.mrf.mxu3 }
  0xd0   : > { %7800 = vst [vmem:[#allocation11_spill] sm:$0xff] %v6747_v60  ;;  %v6749_v61 = vpop.f32.mrf.mxu1 }
  0xd2   : > { %v6754_v63 = vpop.f32.mrf.mxu0 }
  0xd6   : > { %v6773_v12 = vpop.f32.mrf.mxu2 }
  0xd7   : > { %7801 = vst [vmem:[#allocation12_spill] sm:$0xff] %v6773_v12  ;;  %v6775_v13 = vpop.f32.mrf.mxu3 }
  0xd8   : > { %7802 = vst [vmem:[#allocation13_spill] sm:$0xff] %v6775_v13  ;;  %v6777_v21 = vpop.f32.mrf.mxu1  ;;  %v4517_v13 = vld [vmem:[%s6541_s7 + $0x60] sm:$0xf] }
  0xda   : > { %v6779_v24 = vpop.f32.mrf.mxu0 }
  0xdb   : > { %2524 = vmatmul.bf16.gmra.mxu1 %v4962_v15  ;;  %2594 = vmatmul.bf16.gmra.mxu2 %v5242_v20  ;;  %v5002_v15 = vor.u32 %v5922_v2, %v5001_v1  ;;  %v5282_v20 = vor.u32 %v5992_v4, %v5281_v3  ;;  %v4477_v1 = vld [vmem:[%s6541_s7 + $0x10] sm:$0xf]  ;;  %v5789_v2 = vld [vmem:[%s6541_s7 + $0x20] sm:$0xf0] }
  0xdc   : > { %2664 = vmatmul.bf16.gmra.mxu3 %v5522_v22 }
  0xdd   : > { %2454 = vmatmul.bf16.gmra.mxu0 %v4682_v23  ;;  %v5562_v23 = vor.u32 %v6062_v6, %v5561_v5  ;;  %v4466_v5 = vor.u32 %v5785_v43, %v4463_v44 }
  0xde   : > { %v6781_v25 = vpop.f32.mrf.mxu2 }
  0xdf   : > { %7803 = vst [vmem:[#allocation14_spill] sm:$0xff] %v6781_v25  ;;  %v6783_v26 = vpop.f32.mrf.mxu3 }
  0xe0   : > { %7804 = vst [vmem:[#allocation15_spill] sm:$0xff] %v6783_v26  ;;  %v6785_v27 = vpop.f32.mrf.mxu1  ;;  %v4511_v26 = vld [vmem:[%s6541_s7 + $0x6c] sm:$0xf0] }
  0xe2   : > { %v6787_v28 = vpop.f32.mrf.mxu0 }
  0xe6   : > { %v6797_v45 = vpop.f32.mrf.mxu2 }
  0xe7   : > { %7805 = vst [vmem:[#allocation16_spill] sm:$0xff] %v6797_v45  ;;  %v6799_v46 = vpop.f32.mrf.mxu3  ;;  %v4577_v45 = vld [vmem:[%s6541_s7 + $0xd8] sm:$0xf] }
  0xe8   : > { %7806 = vst [vmem:[#allocation17_spill] sm:$0xff] %v6799_v46  ;;  %v6801_v49 = vpop.f32.mrf.mxu1 }
  0xea   : > { %v6803_v54 = vpop.f32.mrf.mxu0 }
  0xeb   : > { %2529 = vmatmul.bf16.gmra.mxu1 %v4982_v47  ;;  %2599 = vmatmul.bf16.gmra.mxu2 %v5262_v48  ;;  %v4469_v47 = vld [vmem:[%s6541_s7 + $0x8] sm:$0xf]  ;;  %v5788_v48 = vld [vmem:[%s6541_s7 + $0x18] sm:$0xf0] }
  0xec   : > { %2669 = vmatmul.bf16.gmra.mxu3 %v5542_v50  ;;  %v5786_v50 = vld [vmem:[%s6541_s7 + $0xc] sm:$0xf]  ;;  %v4470_v6 = vor.u32 %v5788_v48, %v4469_v47  ;;  %v4483_v48 = vld [vmem:[%s6541_s7 + $0x3c] sm:$0xf0] }
  0xed   : > { %2459 = vmatmul.bf16.gmra.mxu0 %v4702_v53  ;;  %v4471_v53 = vld [vmem:[%s6541_s7 + $0x1c] sm:$0xf0]  ;;  %v5790_v47 = vld [vmem:[%s6541_s7 + $0x2c] sm:$0xf] }
  0xee   : > { %v6805_v56 = vpop.f32.mrf.mxu2  ;;  %v4474_v8 = vor.u32 %v5786_v50, %v4471_v53  ;;  %v4489_v50 = vld [vmem:[%s6541_s7 + $0x30] sm:$0xf]  ;;  %v5793_v53 = vld [vmem:[%s6541_s7 + $0x40] sm:$0xf0] }
  0xef   : > { %7807 = vst [vmem:[#allocation18_spill] sm:$0xff] %v6805_v56  ;;  %v6807_v57 = vpop.f32.mrf.mxu3 }
  0xf0   : > { %7808 = vst [vmem:[#allocation19_spill] sm:$0xff] %v6807_v57  ;;  %v6809_v62 = vpop.f32.mrf.mxu1 }
  0xf2   : > { %v6811_v0 = vpop.f32.mrf.mxu0 }
  0xf6   : > { %v6821_v9 = vpop.f32.mrf.mxu2 }
  0xf7   : > { %7809 = vst [vmem:[#allocation20_spill] sm:$0xff] %v6821_v9  ;;  %v6823_v10 = vpop.f32.mrf.mxu3 }
  0xf8   : > { %7810 = vst [vmem:[#allocation21_spill] sm:$0xff] %v6823_v10  ;;  %v6825_v22 = vpop.f32.mrf.mxu1 }
  0xf9   : > { %7811 = vst [vmem:[#allocation22_spill] sm:$0xff] %v6825_v22 }
  0xfa   : > { %v6827_v32 = vpop.f32.mrf.mxu0 }
  0xfb   : > { %2534 = vmatmul.bf16.gmra.mxu1 %v5002_v15  ;;  %2604 = vmatmul.bf16.gmra.mxu2 %v5282_v20  ;;  %v4478_v15 = vor.u32 %v5789_v2, %v4477_v1  ;;  %v5791_v1 = vld [vmem:[%s6541_s7 + $0x34] sm:$0xf]  ;;  %v4491_v2 = vld [vmem:[%s6541_s7 + $0x44] sm:$0xf0] }
  0xfc   : > { %2674 = vmatmul.bf16.gmra.mxu3 %v5562_v23  ;;  %v4494_v10 = vor.u32 %v5791_v1, %v4491_v2  ;;  %v4503_v1 = vld [vmem:[%s6541_s7 + $0x64] sm:$0xf0]  ;;  %v5798_v2 = vld [vmem:[%s6541_s7 + $0x68] sm:$0xf0] }
  0xfd   : > { %2464 = vmatmul.bf16.gmra.mxu0 %v4722_v29 }
  0xfe   : > { %v6829_v33 = vpop.f32.mrf.mxu2 }
  0xff   : > { %7812 = vst [vmem:[#allocation23_spill] sm:$0xff] %v6829_v33  ;;  %v6831_v35 = vpop.f32.mrf.mxu3 }
 0x100   : > { %7813 = vst [vmem:[#allocation24_spill] sm:$0xff] %v6831_v35  ;;  %v6833_v36 = vpop.f32.mrf.mxu1 }
 0x101   : > { %7814 = vst [vmem:[#allocation25_spill] sm:$0xff] %v6833_v36 }
 0x102   : > { %v6835_v37 = vpop.f32.mrf.mxu0 }
 0x106   : > { %v6845_v3 = vpop.f32.mrf.mxu2 }
 0x107   : > { %7815 = vst [vmem:[#allocation26_spill] sm:$0xff] %v6845_v3  ;;  %v6847_v4 = vpop.f32.mrf.mxu3  ;;  %v4557_v3 = vld [vmem:[%s6541_s7 + $0xb0] sm:$0xf] }
 0x108   : > { %7816 = vst [vmem:[#allocation27_spill] sm:$0xff] %v6847_v4  ;;  %v6849_v7 = vpop.f32.mrf.mxu1  ;;  %v4497_v4 = vld [vmem:[%s6541_s7 + $0x38] sm:$0xf] }
 0x109   : > { %7817 = vst [vmem:[#allocation28_spill] sm:$0xff] %v6849_v7 }
 0x10a   : > { %v6851_v20 = vpop.f32.mrf.mxu0 }
 0x10b   : > { %2688 = vmatmul.bf16.vlgmr.msrb.gmra.mxu1 %v4466_v5  ;;  %2977 = vmatmul.bf16.vlgmr.msrb.gmra.mxu2 %v4470_v6  ;;  %v5794_v5 = vld [vmem:[%s6541_s7 + $0x48] sm:$0xf0] }
 0x10c   : > { %3266 = vmatmul.bf16.vlgmr.msrb.gmra.mxu3 %v4474_v8  ;;  %v4498_v57 = vor.u32 %v5794_v5, %v4497_v4  ;;  %v4509_v4 = vld [vmem:[%s6541_s7 + $0x58] sm:$0xf]  ;;  %v5796_v5 = vld [vmem:[%s6541_s7 + $0x5c] sm:$0xf] }
 0x10d   : > { %5727 = vmatmul.msk.bf16.vlgmr.msrb.gmra.mxu0 %vm2218_vm1, %v4478_v15  ;;  %v4486_v15 = vor.u32 %v5790_v47, %v4483_v48  ;;  %v4514_v52 = vor.u32 %v5796_v5, %v4511_v26  ;;  %v5800_v26 = vld [vmem:[%s6541_s7 + $0x7c] sm:$0xf]  ;;  %v5803_v5 = vld [vmem:[%s6541_s7 + $0x90] sm:$0xf0] }
 0x10e   : > { %v6854_v23 = vpop.f32.mrf.mxu2 }
 0x10f   : > { %7818 = vst [vmem:[#allocation29_spill] sm:$0xff] %v6854_v23  ;;  %v6856_v29 = vpop.f32.mrf.mxu3 }
 0x110   : > { %7819 = vst [vmem:[#allocation30_spill] sm:$0xff] %v6856_v29  ;;  %v6858_v43 = vpop.f32.mrf.mxu1  ;;  %v4490_v29 = vor.u32 %v5793_v53, %v4489_v50  ;;  %v5795_v53 = vld [vmem:[%s6541_s7 + $0x54] sm:$0xf] }
 0x111   : > { %7820 = vst [vmem:[#allocation31_spill] sm:$0xff] %v6858_v43 }
 0x112   : > { %v6860_v44 = vpop.f32.mrf.mxu0 }
 0x116   : > { %v6870_v6 = vpop.f32.mrf.mxu2 }
 0x117   : > { %7821 = vst [vmem:[#allocation32_spill] sm:$0xff] %v6870_v6  ;;  %v6872_v8 = vpop.f32.mrf.mxu3 }
 0x118   : > { %7822 = vst [vmem:[#allocation33_spill] sm:$0xff] %v6872_v8  ;;  %v6874_v35 = vpop.f32.mrf.mxu1 }
 0x119   : > { %7823 = vst [vmem:[#allocation34_spill] sm:$0xff] %v6874_v35 }
 0x11a   : > { %v6876_v46 = vpop.f32.mrf.mxu0 }
 0x11b   : > { %2693 = vmatmul.bf16.gmra.mxu1 %v4486_v15  ;;  %2982 = vmatmul.bf16.gmra.mxu2 %v4490_v29  ;;  %v5799_v15 = vld [vmem:[%s6541_s7 + $0x70] sm:$0xf0] }
 0x11c   : > { %3271 = vmatmul.bf16.gmra.mxu3 %v4494_v10  ;;  %v4506_v10 = vor.u32 %v5795_v53, %v4503_v1  ;;  %v4518_v40 = vor.u32 %v5799_v15, %v4517_v13  ;;  %v4529_v13 = vld [vmem:[%s6541_s7 + $0x80] sm:$0xf]  ;;  %v5801_v15 = vld [vmem:[%s6541_s7 + $0x84] sm:$0xf] }
 0x11d   : > { %5728 = vmatmul.msk.bf16.gmra.mxu0 %vm2218_vm1, %v4498_v57 }
 0x11e   : > { %v6879_v8 = vpop.f32.mrf.mxu2 }
 0x11f   : > { %7824 = vst [vmem:[#allocation35_spill] sm:$0xff] %v6879_v8  ;;  %v6881_v47 = vpop.f32.mrf.mxu3  ;;  %v4534_v8 = vor.u32 %v5801_v15, %v4531_v17  ;;  %v5805_v17 = vld [vmem:[%s6541_s7 + $0xa4] sm:$0xf]  ;;  %v5808_v15 = vld [vmem:[%s6541_s7 + $0xb8] sm:$0xf0] }
 0x120   : > { %7825 = vst [vmem:[#allocation36_spill] sm:$0xff] %v6881_v47  ;;  %v6883_v48 = vpop.f32.mrf.mxu1  ;;  %v4510_v47 = vor.u32 %v5798_v2, %v4509_v4  ;;  %v4523_v2 = vld [vmem:[%s6541_s7 + $0x8c] sm:$0xf0] }
 0x121   : > { %7826 = vst [vmem:[#allocation37_spill] sm:$0xff] %v6883_v48 }
 0x122   : > { %v6885_v50 = vpop.f32.mrf.mxu0 }
 0x126   : > { %v6895_v29 = vpop.f32.mrf.mxu2 }
 0x127   : > { %7827 = vst [vmem:[#allocation38_spill] sm:$0xff] %v6895_v29  ;;  %v6897_v57 = vpop.f32.mrf.mxu3  ;;  %v4537_v29 = vld [vmem:[%s6541_s7 + $0x88] sm:$0xf] }
 0x128   : > { %7828 = vst [vmem:[#allocation39_spill] sm:$0xff] %v6897_v57  ;;  %v6899_v60 = vpop.f32.mrf.mxu1 }
 0x129   : > { %7829 = vst [vmem:[#allocation40_spill] sm:$0xff] %v6899_v60  ;;  %v5834_v60 = vld [vmem:[%s6541_s7 + $0x188] sm:$0xf0] }
 0x12a   : > { %v6901_v31 = vpop.f32.mrf.mxu0 }
 0x12b   : > { %2698 = vmatmul.bf16.gmra.mxu1 %v4506_v10  ;;  %2987 = vmatmul.bf16.gmra.mxu2 %v4510_v47  ;;  %v5804_v10 = vld [vmem:[%s6541_s7 + $0x98] sm:$0xf0] }
 0x12c   : > { %3276 = vmatmul.bf16.gmra.mxu3 %v4514_v52  ;;  %v4526_v52 = vor.u32 %v5800_v26, %v4523_v2  ;;  %v4538_v6 = vor.u32 %v5804_v10, %v4537_v29  ;;  %v4549_v29 = vld [vmem:[%s6541_s7 + $0xa8] sm:$0xf]  ;;  %v5806_v10 = vld [vmem:[%s6541_s7 + $0xac] sm:$0xf] }
 0x12d   : > { %5729 = vmatmul.msk.bf16.gmra.mxu0 %vm2218_vm1, %v4518_v40 }
 0x12e   : > { %v6904_v57 = vpop.f32.mrf.mxu2 }
 0x12f   : > { %7830 = vst [vmem:[#allocation41_spill] sm:$0xff] %v6904_v57  ;;  %v6906_v53 = vpop.f32.mrf.mxu3 }
 0x130   : > { %7831 = vst [vmem:[#allocation42_spill] sm:$0xff] %v6906_v53  ;;  %v6908_v1 = vpop.f32.mrf.mxu1  ;;  %v4530_v53 = vor.u32 %v5803_v5, %v4529_v13  ;;  %v4543_v5 = vld [vmem:[%s6541_s7 + $0xb4] sm:$0xf0] }
 0x131   : > { %7832 = vst [vmem:[#allocation43_spill] sm:$0xff] %v6908_v1  ;;  %v4651_v1 = vld [vmem:[%s6541_s7 + $0x184] sm:$0xf0] }
 0x132   : > { %v6910_v4 = vpop.f32.mrf.mxu0 }
 0x136   : > { %v6920_v47 = vpop.f32.mrf.mxu2 }
 0x137   : > { %7833 = vst [vmem:[#allocation44_spill] sm:$0xff] %v6920_v47  ;;  %v6922_v40 = vpop.f32.mrf.mxu3  ;;  %v4551_v47 = vld [vmem:[%s6541_s7 + $0xbc] sm:$0xf0] }
 0x138   : > { %7834 = vst [vmem:[#allocation45_spill] sm:$0xff] %v6922_v40  ;;  %v6924_v57 = vpop.f32.mrf.mxu1  ;;  %v4554_v33 = vor.u32 %v5806_v10, %v4551_v47  ;;  %v5810_v47 = vld [vmem:[%s6541_s7 + $0xcc] sm:$0xf]  ;;  %v5813_v10 = vld [vmem:[%s6541_s7 + $0xe0] sm:$0xf0] }
 0x139   : > { %7835 = vst [vmem:[#allocation46_spill] sm:$0xff] %v6924_v57 }
 0x13a   : > { %v6926_v23 = vpop.f32.mrf.mxu0 }
 0x13b   : > { %2703 = vmatmul.bf16.gmra.mxu1 %v4526_v52  ;;  %2992 = vmatmul.bf16.gmra.mxu2 %v4530_v53  ;;  %v5809_v52 = vld [vmem:[%s6541_s7 + $0xc0] sm:$0xf0] }
 0x13c   : > { %3281 = vmatmul.bf16.gmra.mxu3 %v4534_v8  ;;  %v4546_v8 = vor.u32 %v5805_v17, %v4543_v5  ;;  %v4558_v9 = vor.u32 %v5809_v52, %v4557_v3  ;;  %v4569_v3 = vld [vmem:[%s6541_s7 + $0xd0] sm:$0xf]  ;;  %v5811_v52 = vld [vmem:[%s6541_s7 + $0xd4] sm:$0xf] }
 0x13d   : > { %5730 = vmatmul.msk.bf16.gmra.mxu0 %vm2218_vm1, %v4538_v6 }
 0x13e   : > { %v6929_v40 = vpop.f32.mrf.mxu2 }
 0x13f   : > { %7836 = vst [vmem:[#allocation47_spill] sm:$0xff] %v6929_v40  ;;  %v6931_v26 = vpop.f32.mrf.mxu3 }
 0x140   : > { %7837 = vst [vmem:[#allocation48_spill] sm:$0xff] %v6931_v26  ;;  %v6933_v2 = vpop.f32.mrf.mxu1  ;;  %v4550_v26 = vor.u32 %v5808_v15, %v4549_v29  ;;  %v4563_v15 = vld [vmem:[%s6541_s7 + $0xdc] sm:$0xf0] }
 0x141   : > { %7838 = vst [vmem:[#allocation49_spill] sm:$0xff] %v6933_v2 }
 0x142   : > { %v6935_v13 = vpop.f32.mrf.mxu0 }
 0x146   : > { %v6945_v53 = vpop.f32.mrf.mxu2 }
 0x147   : > { %7839 = vst [vmem:[#allocation50_spill] sm:$0xff] %v6945_v53  ;;  %v6947_v6 = vpop.f32.mrf.mxu3  ;;  %v4571_v53 = vld [vmem:[%s6541_s7 + $0xe4] sm:$0xf0] }
 0x148   : > { %7840 = vst [vmem:[#allocation51_spill] sm:$0xff] %v6947_v6  ;;  %v6949_v40 = vpop.f32.mrf.mxu1  ;;  %v4574_v25 = vor.u32 %v5811_v52, %v4571_v53  ;;  %v5815_v53 = vld [vmem:[%s6541_s7 + $0xf4] sm:$0xf]  ;;  %v5818_v52 = vld [vmem:[%s6541_s7 + $0x108] sm:$0xf0] }
 0x149   : > { %7841 = vst [vmem:[#allocation52_spill] sm:$0xff] %v6949_v40 }
 0x14a   : > { %v6951_v56 = vpop.f32.mrf.mxu0 }
 0x14b   : > { %2708 = vmatmul.bf16.gmra.mxu1 %v4546_v8  ;;  %2997 = vmatmul.bf16.gmra.mxu2 %v4550_v26  ;;  %v5814_v8 = vld [vmem:[%s6541_s7 + $0xe8] sm:$0xf0] }
 0x14c   : > { %3286 = vmatmul.bf16.gmra.mxu3 %v4554_v33  ;;  %v4566_v33 = vor.u32 %v5810_v47, %v4563_v15  ;;  %v4578_v12 = vor.u32 %v5814_v8, %v4577_v45  ;;  %v4589_v45 = vld [vmem:[%s6541_s7 + $0xf8] sm:$0xf]  ;;  %v5816_v8 = vld [vmem:[%s6541_s7 + $0xfc] sm:$0xf] }
 0x14d   : > { %5731 = vmatmul.msk.bf16.gmra.mxu0 %vm2218_vm1, %v4558_v9 }
 0x14e   : > { %v6954_v6 = vpop.f32.mrf.mxu2 }
 0x14f   : > { %7842 = vst [vmem:[#allocation53_spill] sm:$0xff] %v6954_v6  ;;  %v6956_v17 = vpop.f32.mrf.mxu3 }
 0x150   : > { %7843 = vst [vmem:[#allocation54_spill] sm:$0xff] %v6956_v17  ;;  %v6958_v5 = vpop.f32.mrf.mxu1  ;;  %v4570_v17 = vor.u32 %v5813_v10, %v4569_v3  ;;  %v4583_v10 = vld [vmem:[%s6541_s7 + $0x104] sm:$0xf0] }
 0x151   : > { %7844 = vst [vmem:[#allocation55_spill] sm:$0xff] %v6958_v5 }
 0x152   : > { %v6960_v29 = vpop.f32.mrf.mxu0 }
 0x156   : > { %v6970_v26 = vpop.f32.mrf.mxu2 }
 0x157   : > { %7845 = vst [vmem:[#allocation56_spill] sm:$0xff] %v6970_v26  ;;  %v6972_v9 = vpop.f32.mrf.mxu3  ;;  %v4591_v26 = vld [vmem:[%s6541_s7 + $0x10c] sm:$0xf0] }
 0x158   : > { %7846 = vst [vmem:[#allocation57_spill] sm:$0xff] %v6972_v9  ;;  %v6974_v6 = vpop.f32.mrf.mxu1  ;;  %v4594_v39 = vor.u32 %v5816_v8, %v4591_v26  ;;  %v5820_v26 = vld [vmem:[%s6541_s7 + $0x11c] sm:$0xf]  ;;  %v5823_v8 = vld [vmem:[%s6541_s7 + $0x130] sm:$0xf0] }
 0x159   : > { %7847 = vst [vmem:[#allocation58_spill] sm:$0xff] %v6974_v6 }
 0x15a   : > { %v6976_v59 = vpop.f32.mrf.mxu0 }
 0x15b   : > { %2713 = vmatmul.bf16.gmra.mxu1 %v4566_v33  ;;  %3002 = vmatmul.bf16.gmra.mxu2 %v4570_v17  ;;  %v5819_v33 = vld [vmem:[%s6541_s7 + $0x110] sm:$0xf0] }
 0x15c   : > { %3291 = vmatmul.bf16.gmra.mxu3 %v4574_v25  ;;  %v4586_v25 = vor.u32 %v5815_v53, %v4583_v10  ;;  %v4598_v30 = vor.u32 %v5819_v33, %v4597_v51  ;;  %v4609_v51 = vld [vmem:[%s6541_s7 + $0x120] sm:$0xf]  ;;  %v5821_v33 = vld [vmem:[%s6541_s7 + $0x124] sm:$0xf] }
 0x15d   : > { %5732 = vmatmul.msk.bf16.gmra.mxu0 %vm2218_vm1, %v4578_v12 }
 0x15e   : > { %v6979_v9 = vpop.f32.mrf.mxu2 }
 0x15f   : > { %7848 = vst [vmem:[#allocation59_spill] sm:$0xff] %v6979_v9  ;;  %v6981_v47 = vpop.f32.mrf.mxu3 }
 0x160   : > { %7849 = vst [vmem:[#allocation60_spill] sm:$0xff] %v6981_v47  ;;  %v6983_v15 = vpop.f32.mrf.mxu1  ;;  %v4590_v47 = vor.u32 %v5818_v52, %v4589_v45  ;;  %v4603_v52 = vld [vmem:[%s6541_s7 + $0x12c] sm:$0xf0] }
 0x161   : > { %7850 = vst [vmem:[#allocation61_spill] sm:$0xff] %v6983_v15 }
 0x162   : > { %v6985_v3 = vpop.f32.mrf.mxu0 }
 0x166   : > { %v6995_v17 = vpop.f32.mrf.mxu2 }
 0x167   : > { %7851 = vst [vmem:[#allocation62_spill] sm:$0xff] %v6995_v17  ;;  %v6997_v12 = vpop.f32.mrf.mxu3  ;;  %v4611_v17 = vld [vmem:[%s6541_s7 + $0x134] sm:$0xf0] }
 0x168   : > { %7852 = vst [vmem:[#allocation63_spill] sm:$0xff] %v6997_v12  ;;  %v6999_v9 = vpop.f32.mrf.mxu1 }
 0x169   : > { %7853 = vst [vmem:[#allocation64_spill] sm:$0xff] %v6999_v9  ;;  %v4617_v9 = vld [vmem:[%s6541_s7 + $0x128] sm:$0xf] }
 0x16a   : > { %v7001_v16 = vpop.f32.mrf.mxu0 }
 0x16b   : > { %2718 = vmatmul.bf16.gmra.mxu1 %v4586_v25  ;;  %3007 = vmatmul.bf16.gmra.mxu2 %v4590_v47  ;;  %v5824_v25 = vld [vmem:[%s6541_s7 + $0x138] sm:$0xf0] }
 0x16c   : > { %3296 = vmatmul.bf16.gmra.mxu3 %v4594_v39  ;;  %v4606_v39 = vor.u32 %v5820_v26, %v4603_v52  ;;  %v4618_v15 = vor.u32 %v5824_v25, %v4617_v9  ;;  %v4629_v9 = vld [vmem:[%s6541_s7 + $0x148] sm:$0xf]  ;;  %v5826_v25 = vld [vmem:[%s6541_s7 + $0x14c] sm:$0xf] }
 0x16d   : > { %5733 = vmatmul.msk.bf16.gmra.mxu0 %vm2218_vm1, %v4598_v30 }
 0x16e   : > { %v7004_v12 = vpop.f32.mrf.mxu2 }
 0x16f   : > { %7854 = vst [vmem:[#allocation65_spill] sm:$0xff] %v7004_v12  ;;  %v7006_v53 = vpop.f32.mrf.mxu3 }
 0x170   : > { %7855 = vst [vmem:[#allocation66_spill] sm:$0xff] %v7006_v53  ;;  %v7008_v10 = vpop.f32.mrf.mxu1  ;;  %v4610_v53 = vor.u32 %v5823_v8, %v4609_v51  ;;  %v4623_v8 = vld [vmem:[%s6541_s7 + $0x154] sm:$0xf0] }
 0x171   : > { %7856 = vst [vmem:[#allocation67_spill] sm:$0xff] %v7008_v10  ;;  %v4614_v10 = vor.u32 %v5821_v33, %v4611_v17  ;;  %v5825_v17 = vld [vmem:[%s6541_s7 + $0x144] sm:$0xf]  ;;  %v5828_v33 = vld [vmem:[%s6541_s7 + $0x158] sm:$0xf0] }
 0x172   : > { %v7010_v45 = vpop.f32.mrf.mxu0 }
 0x176   : > { %v7020_v47 = vpop.f32.mrf.mxu2 }
 0x177   : > { %7857 = vst [vmem:[#allocation68_spill] sm:$0xff] %v7020_v47  ;;  %v7022_v30 = vpop.f32.mrf.mxu3  ;;  %v4631_v47 = vld [vmem:[%s6541_s7 + $0x15c] sm:$0xf0] }
 0x178   : > { %7858 = vst [vmem:[#allocation69_spill] sm:$0xff] %v7022_v30  ;;  %v7024_v12 = vpop.f32.mrf.mxu1 }
 0x179   : > { %7859 = vst [vmem:[#allocation70_spill] sm:$0xff] %v7024_v12  ;;  %v4637_v12 = vld [vmem:[%s6541_s7 + $0x150] sm:$0xf] }
 0x17a   : > { %v7026_v6 = vpop.f32.mrf.mxu0 }
 0x17b   : > { %2723 = vmatmul.bf16.gmra.mxu1 %v4606_v39  ;;  %3012 = vmatmul.bf16.gmra.mxu2 %v4610_v53  ;;  %v5829_v39 = vld [vmem:[%s6541_s7 + $0x160] sm:$0xf0] }
 0x17c   : > { %3301 = vmatmul.bf16.gmra.mxu3 %v4614_v10  ;;  %v4638_v40 = vor.u32 %v5829_v39, %v4637_v12  ;;  %v5830_v39 = vld [vmem:[%s6541_s7 + $0x16c] sm:$0xf] }
 0x17d   : > { %5734 = vmatmul.msk.bf16.gmra.mxu0 %vm2218_vm1, %v4618_v15  ;;  %v4626_v15 = vor.u32 %v5825_v17, %v4623_v8 }
 0x17e   : > { %v7029_v30 = vpop.f32.mrf.mxu2 }
 0x17f   : > { %7860 = vst [vmem:[#allocation71_spill] sm:$0xff] %v7029_v30  ;;  %v7031_v26 = vpop.f32.mrf.mxu3  ;;  %v4630_v30 = vor.u32 %v5828_v33, %v4629_v9 }
 0x180   : > { %7861 = vst [vmem:[#allocation72_spill] sm:$0xff] %v7031_v26  ;;  %v7033_v52 = vpop.f32.mrf.mxu1  ;;  %v4634_v26 = vor.u32 %v5826_v25, %v4631_v47 }
 0x181   : > { %7862 = vst [vmem:[#allocation73_spill] sm:$0xff] %v7033_v52  ;;  %v7052_v52 = vld [vmem:[%s7789_s2] ss:$0 sm:$0xff] }
 0x182   : > { %v7035_v51 = vpop.f32.mrf.mxu0  ;;  %v2401_v57 = vadd.f32 %v7052_v52, %v6683_v14  ;;  %v2403_v25 = vadd.f32 %v7052_v52, %v6694_v19  ;;  %v2406_v36 = vadd.f32 %v7052_v52, %v6719_v38 }
 0x186   : > { %v7045_v53 = vpop.f32.mrf.mxu2 }
 0x187   : > { %7863 = vst [vmem:[#allocation74_spill] sm:$0xff] %v7045_v53  ;;  %v7047_v10 = vpop.f32.mrf.mxu3 }
 0x188   : > { %7864 = vst [vmem:[#allocation75_spill] sm:$0xff] %v7047_v10  ;;  %v2689_v5 = vpop.f32.mrf.mxu1  ;;  %v4649_v10 = vld [vmem:[%s6541_s7 + $0x170] sm:$0xf] }
 0x189   : > { %v2690_v12 = vadd.f32 %v2689_v5, %v2401_v57 }
 0x18a   : > { %v3556_v2 = vpop.f32.mrf.mxu0 }
 0x18b   : > { %2728 = vmatmul.bf16.gmra.mxu1 %v4626_v15  ;;  %3017 = vmatmul.bf16.gmra.mxu2 %v4630_v30  ;;  %v4643_v15 = vld [vmem:[%s6541_s7 + $0x17c] sm:$0xf0]  ;;  %v5833_v30 = vld [vmem:[%s6541_s7 + $0x180] sm:$0xf0] }
 0x18c   : > { %3306 = vmatmul.bf16.gmra.mxu3 %v4634_v26  ;;  %v5831_v26 = vld [vmem:[%s6541_s7 + $0x174] sm:$0xf]  ;;  %v4646_v48 = vor.u32 %v5830_v39, %v4643_v15  ;;  %v4650_v35 = vor.u32 %v5833_v30, %v4649_v10  ;;  %v5838_v39 = vld [vmem:[%s6541_s7 + $0x1a8] sm:$0xf0]  ;;  %v5836_v15 = vld [vmem:[%s6541_s7 + $0x19c] sm:$0xf] }
 0x18d   : > { %5735 = vmatmul.msk.bf16.gmra.mxu0 %vm2218_vm1, %v4638_v40  ;;  %v4657_v40 = vld [vmem:[%s6541_s7 + $0x178] sm:$0xf]  ;;  %v4654_v7 = vor.u32 %v5831_v26, %v4651_v1  ;;  %v4671_v26 = vld [vmem:[%s6541_s7 + $0x1ac] sm:$0xf0] }
 0x18e   : > { %v2978_v47 = vpop.f32.mrf.mxu2  ;;  %v4658_v19 = vor.u32 %v5834_v60, %v4657_v40  ;;  %v4677_v40 = vld [vmem:[%s6541_s7 + $0x1a0] sm:$0xf] }
 0x18f   : > { %v2979_v17 = vadd.f32 %v2978_v47, %v2690_v12  ;;  %v3267_v8 = vpop.f32.mrf.mxu3 }
 0x190   : > { %v2691_v9 = vpop.f32.mrf.mxu1 }
 0x191   : > { %v3268_v14 = vadd.f32 %v3267_v8, %v2979_v17  ;;  %v2692_v53 = vadd.f32 %v2691_v9, %v2403_v25  ;;  %v4663_v25 = vld [vmem:[%s6541_s7 + $0x1a4] sm:$0xf0] }
 0x192   : > { %v3558_v33 = vpop.f32.mrf.mxu0 }
 0x193   : > { %v3557_v5 = vadd.f32 %v3556_v2, %v3268_v14  ;;  %v4669_v14 = vld [vmem:[%s6541_s7 + $0x198] sm:$0xf] }
 0x195   : > { %v3948_v22 = vmul.f32 0.01, %v3557_v5  ;;  %vm3836_vm2 = vcmp.ge.f32.partialorder %v3557_v5, 0.0 }
 0x196   : > { %v2980_v57 = vpop.f32.mrf.mxu2 }
 0x197   : > { %v2981_v12 = vadd.f32 %v2980_v57, %v2692_v53  ;;  %v3269_v47 = vpop.f32.mrf.mxu3  ;;  %v4060_v53 = vsel %vm3836_vm2, %v3557_v5, %v3948_v22  ;;  %v5839_v57 = vld [vmem:[%s6541_s7 + $0x1b0] sm:$0xf0] }
 0x198   : > { %v2694_v43 = vpop.f32.mrf.mxu1 }
 0x199   : > { %v3270_v17 = vadd.f32 %v3269_v47, %v2981_v12  ;;  %v2695_v60 = vadd.f32 %v2694_v43, %v2406_v36  ;;  %v2408_v36 = vadd.f32 %v7052_v52, %v6727_v42  ;;  %v5835_v43 = vld [vmem:[%s6541_s7 + $0x194] sm:$0xf] }
 0x19a   : > { %v3561_v8 = vpop.f32.mrf.mxu0 }
 0x19b   : > { %v3559_v9 = vadd.f32 %v3558_v33, %v3270_v17  ;;  %2733 = vmatmul.bf16.gmra.mxu1 %v4646_v48  ;;  %3022 = vmatmul.bf16.gmra.mxu2 %v4650_v35  ;;  %v4666_v17 = vor.u32 %v5835_v43, %v4663_v25 }
 0x19c   : > { %3311 = vmatmul.bf16.gmra.mxu3 %v4654_v7 }
 0x19d   : > { %5736 = vmatmul.msk.bf16.gmra.mxu0 %vm2218_vm1, %v4658_v19  ;;  %vm3837_vm3 = vcmp.ge.f32.partialorder %v3559_v9, 0.0  ;;  %v3949_v2 = vmul.f32 0.01, %v3559_v9 }
 0x19e   : > { %v2983_v1 = vpop.f32.mrf.mxu2 }
 0x19f   : > { %v4061_v38 = vsel %vm3837_vm3, %v3559_v9, %v3949_v2  ;;  %v2984_v35 = vadd.f32 %v2983_v1, %v2695_v60  ;;  %v3272_v7 = vpop.f32.mrf.mxu3  ;;  %v4670_v9 = vor.u32 %v5838_v39, %v4669_v14  ;;  %v4674_v60 = vor.u32 %v5836_v15, %v4671_v26  ;;  %v4683_v26 = vld [vmem:[%s6541_s7 + $0x1cc] sm:$0xf0] }
 0x1a0   : > { %v6105_v48 = vpack.c.bf16 %v4061_v38, %v4060_v53  ;;  %v2696_v10 = vpop.f32.mrf.mxu1  ;;  %v4678_v1 = vor.u32 %v5839_v57, %v4677_v40  ;;  %v2411_v38 = vadd.f32 %v7052_v52, %v6743_v58  ;;  %v2413_v39 = vadd.f32 %v7052_v52, %v6754_v63  ;;  %v4689_v40 = vld [vmem:[%s6541_s7 + $0x1c0] sm:$0xf]  ;;  %v5843_v57 = vld [vmem:[%s6541_s7 + $0x1d0] sm:$0xf0] }
 0x1a1   : > { %v3273_v22 = vadd.f32 %v3272_v7, %v2984_v35  ;;  %v2697_v30 = vadd.f32 %v2696_v10, %v2408_v36 }
 0x1a2   : > { %v3563_v33 = vpop.f32.mrf.mxu0  ;;  %6106 = vst [vmem:[%s7074_s27] sm:$0xff] %v6105_v48  }
 0x1a3   : > { %v3562_v12 = vadd.f32 %v3561_v8, %v3273_v22 }
 0x1a5   : > { %v3950_v35 = vmul.f32 0.01, %v3562_v12  ;;  %vm3838_vm4 = vcmp.ge.f32.partialorder %v3562_v12, 0.0 }
 0x1a6   : > { %v2985_v5 = vpop.f32.mrf.mxu2 }
 0x1a7   : > { %v2986_v47 = vadd.f32 %v2985_v5, %v2697_v30  ;;  %v3274_v19 = vpop.f32.mrf.mxu3  ;;  %v4062_v36 = vsel %vm3838_vm4, %v3562_v12, %v3950_v35  ;;  %v5840_v30 = vld [vmem:[%s6541_s7 + $0x1bc] sm:$0xf]  ;;  %v5841_v5 = vld [vmem:[%s6541_s7 + $0x1c4] sm:$0xf] }
 0x1a8   : > { %v2699_v2 = vpop.f32.mrf.mxu1 }
 0x1a9   : > { %v3275_v42 = vadd.f32 %v3274_v19, %v2986_v47  ;;  %v2700_v48 = vadd.f32 %v2699_v2, %v2411_v38  ;;  %v4691_v47 = vld [vmem:[%s6541_s7 + $0x1d4] sm:$0xf0]  ;;  %v4697_v19 = vld [vmem:[%s6541_s7 + $0x1c8] sm:$0xf]  ;;  %v4690_v38 = vor.u32 %v5843_v57, %v4689_v40  ;;  %v5845_v57 = vld [vmem:[%s6541_s7 + $0x1e4] sm:$0xf] }
 0x1aa   : > { %v3566_v53 = vpop.f32.mrf.mxu0 }
 0x1ab   : > { %v3564_v7 = vadd.f32 %v3563_v33, %v3275_v42  ;;  %2738 = vmatmul.bf16.gmra.mxu1 %v4666_v17  ;;  %3027 = vmatmul.bf16.gmra.mxu2 %v4670_v9  ;;  %v5844_v17 = vld [vmem:[%s6541_s7 + $0x1d8] sm:$0xf0]  ;;  %v4686_v42 = vor.u32 %v5840_v30, %v4683_v26  ;;  %v2418_v26 = vadd.f32 %v7052_v52, %v6787_v28 }
 0x1ac   : > { %3316 = vmatmul.bf16.gmra.mxu3 %v4674_v60 }
 0x1ad   : > { %5737 = vmatmul.msk.bf16.gmra.mxu0 %vm2218_vm1, %v4678_v1  ;;  %vm3839_vm5 = vcmp.ge.f32.partialorder %v3564_v7, 0.0  ;;  %v3951_v8 = vmul.f32 0.01, %v3564_v7 }
 0x1ae   : > { %v2988_v10 = vpop.f32.mrf.mxu2 }
 0x1af   : > { %v4063_v58 = vsel %vm3839_vm5, %v3564_v7, %v3951_v8  ;;  %v2989_v33 = vadd.f32 %v2988_v10, %v2700_v48  ;;  %v3277_v22 = vpop.f32.mrf.mxu3  ;;  %v4694_v7 = vor.u32 %v5841_v5, %v4691_v47  ;;  %v4698_v8 = vor.u32 %v5844_v17, %v4697_v19  ;;  %v4703_v5 = vld [vmem:[%s6541_s7 + $0x1f4] sm:$0xf0]  ;;  %v5848_v47 = vld [vmem:[%s6541_s7 + $0x1f8] sm:$0xf0]  ;;  %v5846_v19 = vld [vmem:[%s6541_s7 + $0x1ec] sm:$0xf] }
 0x1b0   : > { %v6110_v43 = vpack.c.bf16 %v4063_v58, %v4062_v36  ;;  %v2701_v25 = vpop.f32.mrf.mxu1  ;;  %v2416_v10 = vadd.f32 %v7052_v52, %v6779_v24 }
 0x1b1   : > { %v3278_v15 = vadd.f32 %v3277_v22, %v2989_v33  ;;  %v2702_v12 = vadd.f32 %v2701_v25, %v2413_v39 }
 0x1b2   : > { %v3568_v14 = vpop.f32.mrf.mxu0  ;;  %6382 = vst [vmem:[%s7074_s27 + $0x8] sm:$0xff] %v6110_v43  }
 0x1b3   : > { %v3567_v2 = vadd.f32 %v3566_v53, %v3278_v15 }
 0x1b5   : > { %v3952_v36 = vmul.f32 0.01, %v3567_v2  ;;  %vm3840_vm6 = vcmp.ge.f32.partialorder %v3567_v2, 0.0 }
 0x1b6   : > { %v2990_v9 = vpop.f32.mrf.mxu2 }
 0x1b7   : > { %v2991_v60 = vadd.f32 %v2990_v9, %v2702_v12  ;;  %v3279_v1 = vpop.f32.mrf.mxu3  ;;  %v4064_v43 = vsel %vm3840_vm6, %v3567_v2, %v3952_v36  ;;  %v4709_v12 = vld [vmem:[%s6541_s7 + $0x1e8] sm:$0xf]  ;;  %v4711_v9 = vld [vmem:[%s6541_s7 + $0x1fc] sm:$0xf0]  ;;  %v4717_v2 = vld [vmem:[%s6541_s7 + $0x1f0] sm:$0xf] }
 0x1b8   : > { %v2704_v35 = vpop.f32.mrf.mxu1 }
 0x1b9   : > { %v3280_v63 = vadd.f32 %v3279_v1, %v2991_v60  ;;  %v2705_v33 = vadd.f32 %v2704_v35, %v2416_v10  ;;  %v5849_v60 = vld [vmem:[%s6541_s7 + $0x200] sm:$0xf0]  ;;  %v4714_v10 = vor.u32 %v5846_v19, %v4711_v9 }
 0x1ba   : > { %v3571_v48 = vpop.f32.mrf.mxu0  ;;  %v4718_v36 = vor.u32 %v5849_v60, %v4717_v2  ;;  %v5853_v19 = vld [vmem:[%s6541_s7 + $0x220] sm:$0xf0]  ;;  %v4731_v2 = vld [vmem:[%s6541_s7 + $0x224] sm:$0xf0]  ;;  %v4737_v60 = vld [vmem:[%s6541_s7 + $0x218] sm:$0xf] }
 0x1bb   : > { %v3569_v58 = vadd.f32 %v3568_v14, %v3280_v63  ;;  %2743 = vmatmul.bf16.gmra.mxu1 %v4686_v42  ;;  %3032 = vmatmul.bf16.gmra.mxu2 %v4690_v38 }
 0x1bc   : > { %3321 = vmatmul.bf16.gmra.mxu3 %v4694_v7  ;;  %v4706_v7 = vor.u32 %v5845_v57, %v4703_v5  ;;  %v5850_v5 = vld [vmem:[%s6541_s7 + $0x20c] sm:$0xf] }
 0x1bd   : > { %5738 = vmatmul.msk.bf16.gmra.mxu0 %vm2218_vm1, %v4698_v8  ;;  %vm3841_vm7 = vcmp.ge.f32.partialorder %v3569_v58, 0.0  ;;  %v3953_v53 = vmul.f32 0.01, %v3569_v58  ;;  %v4710_v8 = vor.u32 %v5848_v47, %v4709_v12  ;;  %v4723_v12 = vld [vmem:[%s6541_s7 + $0x21c] sm:$0xf0] }
 0x1be   : > { %v2993_v22 = vpop.f32.mrf.mxu2  ;;  %v4729_v47 = vld [vmem:[%s6541_s7 + $0x210] sm:$0xf] }
 0x1bf   : > { %v4065_v24 = vsel %vm3841_vm7, %v3569_v58, %v3953_v53  ;;  %v2994_v25 = vadd.f32 %v2993_v22, %v2705_v33  ;;  %v3282_v14 = vpop.f32.mrf.mxu3  ;;  %v2421_v53 = vadd.f32 %v7052_v52, %v6803_v54 }
 0x1c0   : > { %v6115_v39 = vpack.c.bf16 %v4065_v24, %v4064_v43  ;;  %v2706_v15 = vpop.f32.mrf.mxu1 }
 0x1c1   : > { %v3283_v40 = vadd.f32 %v3282_v14, %v2994_v25  ;;  %v2707_v17 = vadd.f32 %v2706_v15, %v2418_v26 }
 0x1c2   : > { %v3573_v30 = vpop.f32.mrf.mxu0  ;;  %6383 = vst [vmem:[%s7074_s27 + $0x10] sm:$0xff] %v6115_v39  }
 0x1c3   : > { %v3572_v42 = vadd.f32 %v3571_v48, %v3283_v40  ;;  %v2423_v40 = vadd.f32 %v7052_v52, %v6811_v0 }
 0x1c5   : > { %v3954_v33 = vmul.f32 0.01, %v3572_v42  ;;  %vm3842_vm8 = vcmp.ge.f32.partialorder %v3572_v42, 0.0 }
 0x1c6   : > { %v2995_v1 = vpop.f32.mrf.mxu2 }
 0x1c7   : > { %v2996_v38 = vadd.f32 %v2995_v1, %v2707_v17  ;;  %v3284_v35 = vpop.f32.mrf.mxu3  ;;  %v4066_v25 = vsel %vm3842_vm8, %v3572_v42, %v3954_v33  ;;  %v5851_v17 = vld [vmem:[%s6541_s7 + $0x214] sm:$0xf]  ;;  %v5854_v1 = vld [vmem:[%s6541_s7 + $0x228] sm:$0xf0]  ;;  %v2426_v33 = vadd.f32 %v7052_v52, %v6827_v32 }
 0x1c8   : > { %v2709_v63 = vpop.f32.mrf.mxu1 }
 0x1c9   : > { %v3285_v28 = vadd.f32 %v3284_v35, %v2996_v38  ;;  %v2710_v43 = vadd.f32 %v2709_v63, %v2421_v53  ;;  %v4730_v63 = vor.u32 %v5853_v19, %v4729_v47  ;;  %v5858_v47 = vld [vmem:[%s6541_s7 + $0x248] sm:$0xf0]  ;;  %v5856_v19 = vld [vmem:[%s6541_s7 + $0x23c] sm:$0xf] }
 0x1ca   : > { %v3576_v58 = vpop.f32.mrf.mxu0 }
 0x1cb   : > { %v3574_v22 = vadd.f32 %v3573_v30, %v3285_v28  ;;  %2748 = vmatmul.bf16.gmra.mxu1 %v4706_v7  ;;  %3037 = vmatmul.bf16.gmra.mxu2 %v4710_v8  ;;  %v4726_v8 = vor.u32 %v5850_v5, %v4723_v12  ;;  %v4738_v28 = vor.u32 %v5854_v1, %v4737_v60  ;;  %v4743_v5 = vld [vmem:[%s6541_s7 + $0x244] sm:$0xf0]  ;;  %v4749_v12 = vld [vmem:[%s6541_s7 + $0x238] sm:$0xf]  ;;  %v5859_v60 = vld [vmem:[%s6541_s7 + $0x250] sm:$0xf0] }
 0x1cc   : > { %3326 = vmatmul.bf16.gmra.mxu3 %v4714_v10 }
 0x1cd   : > { %5739 = vmatmul.msk.bf16.gmra.mxu0 %vm2218_vm1, %v4718_v36  ;;  %vm3843_vm9 = vcmp.ge.f32.partialorder %v3574_v22, 0.0  ;;  %v3955_v48 = vmul.f32 0.01, %v3574_v22  ;;  %v4734_v36 = vor.u32 %v5851_v17, %v4731_v2  ;;  %v4757_v2 = vld [vmem:[%s6541_s7 + $0x240] sm:$0xf] }
 0x1ce   : > { %v2998_v24 = vpop.f32.mrf.mxu2 }
 0x1cf   : > { %v4067_v54 = vsel %vm3843_vm9, %v3574_v22, %v3955_v48  ;;  %v2999_v14 = vadd.f32 %v2998_v24, %v2710_v43  ;;  %v3287_v39 = vpop.f32.mrf.mxu3 }
 0x1d0   : > { %v6120_v15 = vpack.c.bf16 %v4067_v54, %v4066_v25  ;;  %v2711_v30 = vpop.f32.mrf.mxu1 }
 0x1d1   : > { %v3288_v57 = vadd.f32 %v3287_v39, %v2999_v14  ;;  %v2712_v9 = vadd.f32 %v2711_v30, %v2423_v40 }
 0x1d2   : > { %v3578_v26 = vpop.f32.mrf.mxu0  ;;  %6384 = vst [vmem:[%s7074_s27 + $0x18] sm:$0xff] %v6120_v15  }
 0x1d3   : > { %v3577_v38 = vadd.f32 %v3576_v58, %v3288_v57  ;;  %v5855_v57 = vld [vmem:[%s6541_s7 + $0x234] sm:$0xf] }
 0x1d5   : > { %v3956_v22 = vmul.f32 0.01, %v3577_v38  ;;  %vm3844_vm10 = vcmp.ge.f32.partialorder %v3577_v38, 0.0 }
 0x1d6   : > { %v3000_v42 = vpop.f32.mrf.mxu2 }
 0x1d7   : > { %v3001_v35 = vadd.f32 %v3000_v42, %v2712_v9  ;;  %v3289_v7 = vpop.f32.mrf.mxu3  ;;  %v4068_v25 = vsel %vm3844_vm10, %v3577_v38, %v3956_v22  ;;  %v4751_v9 = vld [vmem:[%s6541_s7 + $0x24c] sm:$0xf0] }
 0x1d8   : > { %v2714_v10 = vpop.f32.mrf.mxu1 }
 0x1d9   : > { %v3290_v0 = vadd.f32 %v3289_v7, %v3001_v35  ;;  %v2715_v43 = vadd.f32 %v2714_v10, %v2426_v33  ;;  %v4746_v7 = vor.u32 %v5855_v57, %v4743_v5  ;;  %v4754_v10 = vor.u32 %v5856_v19, %v4751_v9  ;;  %v5863_v57 = vld [vmem:[%s6541_s7 + $0x270] sm:$0xf0]  ;;  %v5861_v5 = vld [vmem:[%s6541_s7 + $0x264] sm:$0xf]  ;;  %v4777_v19 = vld [vmem:[%s6541_s7 + $0x268] sm:$0xf] }
 0x1da   : > { %v3581_v53 = vpop.f32.mrf.mxu0 }
 0x1db   : > { %v3579_v48 = vadd.f32 %v3578_v26, %v3290_v0  ;;  %2753 = vmatmul.bf16.gmra.mxu1 %v4726_v8  ;;  %3042 = vmatmul.bf16.gmra.mxu2 %v4730_v63  ;;  %v2428_v26 = vadd.f32 %v7052_v52, %v6835_v37  ;;  %v4750_v8 = vor.u32 %v5858_v47, %v4749_v12  ;;  %v4771_v47 = vld [vmem:[%s6541_s7 + $0x274] sm:$0xf0] }
 0x1dc   : > { %3331 = vmatmul.bf16.gmra.mxu3 %v4734_v36  ;;  %v4758_v36 = vor.u32 %v5859_v60, %v4757_v2  ;;  %v2431_v0 = vadd.f32 %v7052_v52, %v6851_v20 }
 0x1dd   : > { %5740 = vmatmul.msk.bf16.gmra.mxu0 %vm2218_vm1, %v4738_v28  ;;  %vm3845_vm11 = vcmp.ge.f32.partialorder %v3579_v48, 0.0  ;;  %v3957_v58 = vmul.f32 0.01, %v3579_v48 }
 0x1de   : > { %v3003_v24 = vpop.f32.mrf.mxu2 }
 0x1df   : > { %v4069_v32 = vsel %vm3845_vm11, %v3579_v48, %v3957_v58  ;;  %v3004_v54 = vadd.f32 %v3003_v24, %v2715_v43  ;;  %v3292_v14 = vpop.f32.mrf.mxu3 }
 0x1e0   : > { %v6125_v39 = vpack.c.bf16 %v4069_v32, %v4068_v25  ;;  %v2716_v15 = vpop.f32.mrf.mxu1 }
 0x1e1   : > { %v3293_v40 = vadd.f32 %v3292_v14, %v3004_v54  ;;  %v2717_v17 = vadd.f32 %v2716_v15, %v2428_v26  ;;  %v4763_v26 = vld [vmem:[%s6541_s7 + $0x26c] sm:$0xf0] }
 0x1e2   : > { %v3583_v30 = vpop.f32.mrf.mxu0  ;;  %6385 = vst [vmem:[%s7074_s27 + $0x20] sm:$0xff] %v6125_v39   ;;  %v2433_v39 = vadd.f32 %v7052_v52, %v6860_v44 }
 0x1e3   : > { %v3582_v42 = vadd.f32 %v3581_v53, %v3293_v40  ;;  %v4769_v40 = vld [vmem:[%s6541_s7 + $0x260] sm:$0xf] }
 0x1e5   : > { %v3958_v33 = vmul.f32 0.01, %v3582_v42  ;;  %vm3846_vm12 = vcmp.ge.f32.partialorder %v3582_v42, 0.0 }
 0x1e6   : > { %v3005_v1 = vpop.f32.mrf.mxu2 }
 0x1e7   : > { %v3006_v38 = vadd.f32 %v3005_v1, %v2717_v17  ;;  %v3294_v35 = vpop.f32.mrf.mxu3  ;;  %v4070_v43 = vsel %vm3846_vm12, %v3582_v42, %v3958_v33  ;;  %v5864_v17 = vld [vmem:[%s6541_s7 + $0x278] sm:$0xf0] }
 0x1e8   : > { %v2719_v63 = vpop.f32.mrf.mxu1 }
 0x1e9   : > { %v3295_v37 = vadd.f32 %v3294_v35, %v3006_v38  ;;  %v2720_v48 = vadd.f32 %v2719_v63, %v2431_v0  ;;  %v4770_v38 = vor.u32 %v5863_v57, %v4769_v40  ;;  %v4797_v40 = vld [vmem:[%s6541_s7 + $0x290] sm:$0xf]  ;;  %v5869_v57 = vld [vmem:[%s6541_s7 + $0x2a0] sm:$0xf0] }
 0x1ea   : > { %v3586_v28 = vpop.f32.mrf.mxu0 }
 0x1eb   : > { %v3584_v22 = vadd.f32 %v3583_v30, %v3295_v37  ;;  %2758 = vmatmul.bf16.gmra.mxu1 %v4746_v7  ;;  %3047 = vmatmul.bf16.gmra.mxu2 %v4750_v8  ;;  %v5860_v30 = vld [vmem:[%s6541_s7 + $0x25c] sm:$0xf]  ;;  %v4774_v7 = vor.u32 %v5861_v5, %v4771_v47  ;;  %v4778_v8 = vor.u32 %v5864_v17, %v4777_v19 }
 0x1ec   : > { %3336 = vmatmul.bf16.gmra.mxu3 %v4754_v10  ;;  %v4766_v42 = vor.u32 %v5860_v30, %v4763_v26  ;;  %v2436_v10 = vadd.f32 %v7052_v52, %v6876_v46  ;;  %v4791_v26 = vld [vmem:[%s6541_s7 + $0x29c] sm:$0xf0] }
 0x1ed   : > { %5741 = vmatmul.msk.bf16.gmra.mxu0 %vm2218_vm1, %v4758_v36  ;;  %vm3847_vm13 = vcmp.ge.f32.partialorder %v3584_v22, 0.0  ;;  %v3959_v53 = vmul.f32 0.01, %v3584_v22 }
 0x1ee   : > { %v3008_v58 = vpop.f32.mrf.mxu2 }
 0x1ef   : > { %v4071_v20 = vsel %vm3847_vm13, %v3584_v22, %v3959_v53  ;;  %v3009_v24 = vadd.f32 %v3008_v58, %v2720_v48  ;;  %v3297_v25 = vpop.f32.mrf.mxu3 }
 0x1f0   : > { %v6130_v32 = vpack.c.bf16 %v4071_v20, %v4070_v43  ;;  %v2721_v54 = vpop.f32.mrf.mxu1 }
 0x1f1   : > { %v3298_v15 = vadd.f32 %v3297_v25, %v3009_v24  ;;  %v2722_v12 = vadd.f32 %v2721_v54, %v2433_v39  ;;  %v2438_v24 = vadd.f32 %v7052_v52, %v6885_v50  ;;  %v4783_v54 = vld [vmem:[%s6541_s7 + $0x294] sm:$0xf0]  ;;  %v5868_v39 = vld [vmem:[%s6541_s7 + $0x298] sm:$0xf0] }
 0x1f2   : > { %v3588_v14 = vpop.f32.mrf.mxu0  ;;  %6386 = vst [vmem:[%s7074_s27 + $0x28] sm:$0xff] %v6130_v32   ;;  %v5865_v32 = vld [vmem:[%s6541_s7 + $0x284] sm:$0xf] }
 0x1f3   : > { %v3587_v2 = vadd.f32 %v3586_v28, %v3298_v15  ;;  %v5866_v15 = vld [vmem:[%s6541_s7 + $0x28c] sm:$0xf]  ;;  %v4786_v17 = vor.u32 %v5865_v32, %v4783_v54  ;;  %v4817_v32 = vld [vmem:[%s6541_s7 + $0x2b8] sm:$0xf] }
 0x1f4   : > { %v5874_v54 = vld [vmem:[%s6541_s7 + $0x2c8] sm:$0xf0] }
 0x1f5   : > { %v3960_v36 = vmul.f32 0.01, %v3587_v2  ;;  %vm3848_vm14 = vcmp.ge.f32.partialorder %v3587_v2, 0.0 }
 0x1f6   : > { %v3010_v9 = vpop.f32.mrf.mxu2 }
 0x1f7   : > { %v3011_v60 = vadd.f32 %v3010_v9, %v2722_v12  ;;  %v3299_v1 = vpop.f32.mrf.mxu3  ;;  %v4072_v22 = vsel %vm3848_vm14, %v3587_v2, %v3960_v36 }
 0x1f8   : > { %v2724_v35 = vpop.f32.mrf.mxu1 }
 0x1f9   : > { %v3300_v44 = vadd.f32 %v3299_v1, %v3011_v60  ;;  %v2725_v0 = vadd.f32 %v2724_v35, %v2436_v10  ;;  %v4794_v60 = vor.u32 %v5866_v15, %v4791_v26  ;;  %v4798_v1 = vor.u32 %v5869_v57, %v4797_v40 }
 0x1fa   : > { %v3591_v63 = vpop.f32.mrf.mxu0 }
 0x1fb   : > { %v3589_v37 = vadd.f32 %v3588_v14, %v3300_v44  ;;  %2763 = vmatmul.bf16.gmra.mxu1 %v4766_v42  ;;  %3052 = vmatmul.bf16.gmra.mxu2 %v4770_v38  ;;  %v4789_v14 = vld [vmem:[%s6541_s7 + $0x288] sm:$0xf]  ;;  %v2441_v38 = vadd.f32 %v7052_v52, %v6901_v31 }
 0x1fc   : > { %3341 = vmatmul.bf16.gmra.mxu3 %v4774_v7  ;;  %v4790_v9 = vor.u32 %v5868_v39, %v4789_v14 }
 0x1fd   : > { %5742 = vmatmul.msk.bf16.gmra.mxu0 %vm2218_vm1, %v4778_v8  ;;  %vm3849_vm15 = vcmp.ge.f32.partialorder %v3589_v37, 0.0  ;;  %v3961_v28 = vmul.f32 0.01, %v3589_v37 }
 0x1fe   : > { %v3013_v33 = vpop.f32.mrf.mxu2 }
 0x1ff   : > { %v4073_v46 = vsel %vm3849_vm15, %v3589_v37, %v3961_v28  ;;  %v3014_v53 = vadd.f32 %v3013_v33, %v2725_v0  ;;  %v3302_v48 = vpop.f32.mrf.mxu3 }
 0x200   : > { %v6135_v58 = vpack.c.bf16 %v4073_v46, %v4072_v22  ;;  %v2726_v43 = vpop.f32.mrf.mxu1  ;;  %v2443_v22 = vadd.f32 %v7052_v52, %v6910_v4 }
 0x201   : > { %v3303_v25 = vadd.f32 %v3302_v48, %v3014_v53  ;;  %v2727_v30 = vadd.f32 %v2726_v43, %v2438_v24  ;;  %v5870_v53 = vld [vmem:[%s6541_s7 + $0x2ac] sm:$0xf]  ;;  %v4803_v48 = vld [vmem:[%s6541_s7 + $0x2bc] sm:$0xf0]  ;;  %v5873_v43 = vld [vmem:[%s6541_s7 + $0x2c0] sm:$0xf0] }
 0x202   : > { %v3593_v20 = vpop.f32.mrf.mxu0  ;;  %6387 = vst [vmem:[%s7074_s27 + $0x30] sm:$0xff] %v6135_v58   ;;  %v4809_v58 = vld [vmem:[%s6541_s7 + $0x2b0] sm:$0xf]  ;;  %v4806_v26 = vor.u32 %v5870_v53, %v4803_v48 }
 0x203   : > { %v3592_v12 = vadd.f32 %v3591_v63, %v3303_v25  ;;  %v4811_v25 = vld [vmem:[%s6541_s7 + $0x2c4] sm:$0xf0]  ;;  %v4810_v40 = vor.u32 %v5873_v43, %v4809_v58 }
 0x205   : > { %v3962_v35 = vmul.f32 0.01, %v3592_v12  ;;  %vm3850_vm0 = vcmp.ge.f32.partialorder %v3592_v12, 0.0 }
 0x206   : > { %v3015_v5 = vpop.f32.mrf.mxu2 }
 0x207   : > { %v3016_v47 = vadd.f32 %v3015_v5, %v2727_v30  ;;  %v3304_v19 = vpop.f32.mrf.mxu3  ;;  %v4074_v10 = vsel %vm3850_vm0, %v3592_v12, %v3962_v35  ;;  %v4818_v12 = vor.u32 %v5874_v54, %v4817_v32 }
 0x208   : > { %v2729_v2 = vpop.f32.mrf.mxu1 }
 0x209   : > { %v3305_v50 = vadd.f32 %v3304_v19, %v3016_v47  ;;  %v2730_v44 = vadd.f32 %v2729_v2, %v2441_v38  ;;  %v2446_v19 = vadd.f32 %v7052_v52, %v6926_v23 }
 0x20a   : > { %v3596_v42 = vpop.f32.mrf.mxu0 }
 0x20b   : > { %v3594_v7 = vadd.f32 %v3593_v20, %v3305_v50  ;;  %2768 = vmatmul.bf16.gmra.mxu1 %v4786_v17  ;;  %3057 = vmatmul.bf16.gmra.mxu2 %v4790_v9  ;;  %v5871_v20 = vld [vmem:[%s6541_s7 + $0x2b4] sm:$0xf] }
 0x20c   : > { %3346 = vmatmul.bf16.gmra.mxu3 %v4794_v60  ;;  %v4814_v5 = vor.u32 %v5871_v20, %v4811_v25 }
 0x20d   : > { %5743 = vmatmul.msk.bf16.gmra.mxu0 %vm2218_vm1, %v4798_v1  ;;  %vm3851_vm2 = vcmp.ge.f32.partialorder %v3594_v7, 0.0  ;;  %v3963_v8 = vmul.f32 0.01, %v3594_v7 }
 0x20e   : > { %v3018_v63 = vpop.f32.mrf.mxu2 }
 0x20f   : > { %v4075_v31 = vsel %vm3851_vm2, %v3594_v7, %v3963_v8  ;;  %v3019_v36 = vadd.f32 %v3018_v63, %v2730_v44  ;;  %v3307_v37 = vpop.f32.mrf.mxu3  ;;  %v2448_v44 = vadd.f32 %v7052_v52, %v6935_v13 }
 0x210   : > { %v6140_v28 = vpack.c.bf16 %v4075_v31, %v4074_v10  ;;  %v2731_v0 = vpop.f32.mrf.mxu1  ;;  %v5875_v10 = vld [vmem:[%s6541_s7 + $0x2d4] sm:$0xf]  ;;  %v4823_v31 = vld [vmem:[%s6541_s7 + $0x2e4] sm:$0xf0] }
 0x211   : > { %v3308_v46 = vadd.f32 %v3307_v37, %v3019_v36  ;;  %v2732_v24 = vadd.f32 %v2731_v0, %v2443_v22  ;;  %v4829_v36 = vld [vmem:[%s6541_s7 + $0x2d8] sm:$0xf]  ;;  %v5878_v37 = vld [vmem:[%s6541_s7 + $0x2e8] sm:$0xf0]  ;;  %v4837_v22 = vld [vmem:[%s6541_s7 + $0x2e0] sm:$0xf]  ;;  %v4826_v20 = vor.u32 %v5875_v10, %v4823_v31 }
 0x212   : > { %v3598_v33 = vpop.f32.mrf.mxu0  ;;  %6388 = vst [vmem:[%s7074_s27 + $0x38] sm:$0xff] %v6140_v28   ;;  %v5876_v28 = vld [vmem:[%s6541_s7 + $0x2dc] sm:$0xf] }
 0x213   : > { %v3597_v39 = vadd.f32 %v3596_v42, %v3308_v46  ;;  %v5879_v46 = vld [vmem:[%s6541_s7 + $0x2f0] sm:$0xf0] }
 0x214   : > { %v4838_v54 = vor.u32 %v5879_v46, %v4837_v22  ;;  %v2456_v46 = vadd.f32 %v7052_v52, %v6976_v59 }
 0x215   : > { %v3964_v17 = vmul.f32 0.01, %v3597_v39  ;;  %vm3852_vm3 = vcmp.ge.f32.partialorder %v3597_v39, 0.0 }
 0x216   : > { %v3020_v14 = vpop.f32.mrf.mxu2 }
 0x217   : > { %v3021_v15 = vadd.f32 %v3020_v14, %v2732_v24  ;;  %v3309_v30 = vpop.f32.mrf.mxu3  ;;  %v4076_v50 = vsel %vm3852_vm3, %v3597_v39, %v3964_v17  ;;  %v4830_v24 = vor.u32 %v5878_v37, %v4829_v36  ;;  %v2451_v39 = vadd.f32 %v7052_v52, %v6951_v56 }
 0x218   : > { %v2734_v57 = vpop.f32.mrf.mxu1 }
 0x219   : > { %v3310_v4 = vadd.f32 %v3309_v30, %v3021_v15  ;;  %v2735_v60 = vadd.f32 %v2734_v57, %v2446_v19 }
 0x21a   : > { %v3601_v47 = vpop.f32.mrf.mxu0 }
 0x21b   : > { %v3599_v9 = vadd.f32 %v3598_v33, %v3310_v4  ;;  %2773 = vmatmul.bf16.gmra.mxu1 %v4806_v26  ;;  %3062 = vmatmul.bf16.gmra.mxu2 %v4810_v40  ;;  %v4831_v33 = vld [vmem:[%s6541_s7 + $0x2ec] sm:$0xf0] }
 0x21c   : > { %3351 = vmatmul.bf16.gmra.mxu3 %v4814_v5  ;;  %v4834_v32 = vor.u32 %v5876_v28, %v4831_v33 }
 0x21d   : > { %5744 = vmatmul.msk.bf16.gmra.mxu0 %vm2218_vm1, %v4818_v12  ;;  %vm3853_vm4 = vcmp.ge.f32.partialorder %v3599_v9, 0.0  ;;  %v3965_v2 = vmul.f32 0.01, %v3599_v9 }
 0x21e   : > { %v3023_v1 = vpop.f32.mrf.mxu2 }
 0x21f   : > { %v4077_v23 = vsel %vm3853_vm4, %v3599_v9, %v3965_v2  ;;  %v3024_v42 = vadd.f32 %v3023_v1, %v2735_v60  ;;  %v3312_v38 = vpop.f32.mrf.mxu3  ;;  %v2453_v9 = vadd.f32 %v7052_v52, %v6960_v29  ;;  %v5880_v60 = vld [vmem:[%s6541_s7 + $0x2fc] sm:$0xf]  ;;  %v4843_v1 = vld [vmem:[%s6541_s7 + $0x30c] sm:$0xf0] }
 0x220   : > { %v6145_v35 = vpack.c.bf16 %v4077_v23, %v4076_v50  ;;  %v2736_v7 = vpop.f32.mrf.mxu1  ;;  %v4849_v50 = vld [vmem:[%s6541_s7 + $0x300] sm:$0xf]  ;;  %v5883_v23 = vld [vmem:[%s6541_s7 + $0x310] sm:$0xf0]  ;;  %v4846_v36 = vor.u32 %v5880_v60, %v4843_v1 }
 0x221   : > { %v3313_v63 = vadd.f32 %v3312_v38, %v3024_v42  ;;  %v2737_v0 = vadd.f32 %v2736_v7, %v2448_v44  ;;  %v5881_v42 = vld [vmem:[%s6541_s7 + $0x304] sm:$0xf]  ;;  %v4857_v7 = vld [vmem:[%s6541_s7 + $0x308] sm:$0xf]  ;;  %v4850_v37 = vor.u32 %v5883_v23, %v4849_v50 }
 0x222   : > { %v3603_v8 = vpop.f32.mrf.mxu0  ;;  %6389 = vst [vmem:[%s7074_s27 + $0x40] sm:$0xff] %v6145_v35   ;;  %v4851_v35 = vld [vmem:[%s6541_s7 + $0x314] sm:$0xf0] }
 0x223   : > { %v3602_v48 = vadd.f32 %v3601_v47, %v3313_v63 }
 0x225   : > { %v3966_v15 = vmul.f32 0.01, %v3602_v48  ;;  %vm3854_vm5 = vcmp.ge.f32.partialorder %v3602_v48, 0.0 }
 0x226   : > { %v3025_v53 = vpop.f32.mrf.mxu2 }
 0x227   : > { %v3026_v58 = vadd.f32 %v3025_v53, %v2737_v0  ;;  %v3314_v43 = vpop.f32.mrf.mxu3  ;;  %v4078_v5 = vsel %vm3854_vm5, %v3602_v48, %v3966_v15  ;;  %v4854_v0 = vor.u32 %v5881_v42, %v4851_v35  ;;  %v2461_v35 = vadd.f32 %v7052_v52, %v7001_v16 }
 0x228   : > { %v2739_v25 = vpop.f32.mrf.mxu1 }
 0x229   : > { %v3315_v13 = vadd.f32 %v3314_v43, %v3026_v58  ;;  %v2740_v40 = vadd.f32 %v2739_v25, %v2451_v39  ;;  %v2458_v39 = vadd.f32 %v7052_v52, %v6985_v3 }
 0x22a   : > { %v3606_v14 = vpop.f32.mrf.mxu0 }
 0x22b   : > { %v3604_v30 = vadd.f32 %v3603_v8, %v3315_v13  ;;  %2778 = vmatmul.bf16.gmra.mxu1 %v4826_v20  ;;  %3067 = vmatmul.bf16.gmra.mxu2 %v4830_v24  ;;  %v5884_v8 = vld [vmem:[%s6541_s7 + $0x318] sm:$0xf0] }
 0x22c   : > { %3356 = vmatmul.bf16.gmra.mxu3 %v4834_v32  ;;  %v4858_v33 = vor.u32 %v5884_v8, %v4857_v7 }
 0x22d   : > { %5745 = vmatmul.msk.bf16.gmra.mxu0 %vm2218_vm1, %v4838_v54  ;;  %vm3855_vm6 = vcmp.ge.f32.partialorder %v3604_v30, 0.0  ;;  %v3967_v26 = vmul.f32 0.01, %v3604_v30 }
 0x22e   : > { %v3028_v57 = vpop.f32.mrf.mxu2 }
 0x22f   : > { %v4079_v56 = vsel %vm3855_vm6, %v3604_v30, %v3967_v26  ;;  %v3029_v12 = vadd.f32 %v3028_v57, %v2740_v40  ;;  %v3317_v4 = vpop.f32.mrf.mxu3  ;;  %v5885_v30 = vld [vmem:[%s6541_s7 + $0x324] sm:$0xf]  ;;  %v4863_v26 = vld [vmem:[%s6541_s7 + $0x334] sm:$0xf0]  ;;  %v4869_v40 = vld [vmem:[%s6541_s7 + $0x328] sm:$0xf] }
 0x230   : > { %v6150_v47 = vpack.c.bf16 %v4079_v56, %v4078_v5  ;;  %v2741_v19 = vpop.f32.mrf.mxu1  ;;  %v5888_v57 = vld [vmem:[%s6541_s7 + $0x338] sm:$0xf0]  ;;  %v5886_v5 = vld [vmem:[%s6541_s7 + $0x32c] sm:$0xf]  ;;  %v4866_v60 = vor.u32 %v5885_v30, %v4863_v26 }
 0x231   : > { %v3318_v2 = vadd.f32 %v3317_v4, %v3029_v12  ;;  %v2742_v38 = vadd.f32 %v2741_v19, %v2453_v9  ;;  %v4871_v12 = vld [vmem:[%s6541_s7 + $0x33c] sm:$0xf0]  ;;  %v4877_v4 = vld [vmem:[%s6541_s7 + $0x330] sm:$0xf]  ;;  %v4870_v1 = vor.u32 %v5888_v57, %v4869_v40 }
 0x232   : > { %v3608_v17 = vpop.f32.mrf.mxu0  ;;  %6390 = vst [vmem:[%s7074_s27 + $0x48] sm:$0xff] %v6150_v47   ;;  %v5889_v47 = vld [vmem:[%s6541_s7 + $0x340] sm:$0xf0]  ;;  %v4874_v23 = vor.u32 %v5886_v5, %v4871_v12 }
 0x233   : > { %v3607_v63 = vadd.f32 %v3606_v14, %v3318_v2  ;;  %v4878_v42 = vor.u32 %v5889_v47, %v4877_v4 }
 0x235   : > { %v3968_v53 = vmul.f32 0.01, %v3607_v63  ;;  %vm3856_vm7 = vcmp.ge.f32.partialorder %v3607_v63, 0.0 }
 0x236   : > { %v3030_v44 = vpop.f32.mrf.mxu2 }
 0x237   : > { %v3031_v10 = vadd.f32 %v3030_v44, %v2742_v38  ;;  %v3319_v31 = vpop.f32.mrf.mxu3  ;;  %v4080_v24 = vsel %vm3856_vm7, %v3607_v63, %v3968_v53  ;;  %v4883_v53 = vld [vmem:[%s6541_s7 + $0x35c] sm:$0xf0] }
 0x238   : > { %v2744_v28 = vpop.f32.mrf.mxu1 }
 0x239   : > { %v3320_v29 = vadd.f32 %v3319_v31, %v3031_v10  ;;  %v2745_v43 = vadd.f32 %v2744_v28, %v2456_v46  ;;  %v5890_v46 = vld [vmem:[%s6541_s7 + $0x34c] sm:$0xf] }
 0x23a   : > { %v3611_v22 = vpop.f32.mrf.mxu0 }
 0x23b   : > { %v3609_v48 = vadd.f32 %v3608_v17, %v3320_v29  ;;  %2783 = vmatmul.bf16.gmra.mxu1 %v4846_v36  ;;  %3072 = vmatmul.bf16.gmra.mxu2 %v4850_v37 }
 0x23c   : > { %3361 = vmatmul.bf16.gmra.mxu3 %v4854_v0 }
 0x23d   : > { %5746 = vmatmul.msk.bf16.gmra.mxu0 %vm2218_vm1, %v4858_v33  ;;  %vm3857_vm8 = vcmp.ge.f32.partialorder %v3609_v48, 0.0  ;;  %v3969_v58 = vmul.f32 0.01, %v3609_v48  ;;  %v7234_v33 = vld [vmem:[%s7789_s2] ss:$0 sm:$0xff] }
 0x23e   : > { %v3033_v20 = vpop.f32.mrf.mxu2  ;;  %v2463_v29 = vadd.f32 %v7234_v33, %v7010_v45  ;;  %v2466_v5 = vadd.f32 %v7234_v33, %v7026_v6 }
 0x23f   : > { %v4081_v59 = vsel %vm3857_vm8, %v3609_v48, %v3969_v58  ;;  %v3034_v25 = vadd.f32 %v3033_v20, %v2745_v43  ;;  %v3322_v32 = vpop.f32.mrf.mxu3  ;;  %v4889_v48 = vld [vmem:[%s6541_s7 + $0x350] sm:$0xf]  ;;  %v5893_v58 = vld [vmem:[%s6541_s7 + $0x360] sm:$0xf0]  ;;  %v5891_v43 = vld [vmem:[%s6541_s7 + $0x354] sm:$0xf] }
 0x240   : > { %v6155_v54 = vpack.c.bf16 %v4081_v59, %v4080_v24  ;;  %v2746_v13 = vpop.f32.mrf.mxu1  ;;  %v4891_v24 = vld [vmem:[%s6541_s7 + $0x364] sm:$0xf0]  ;;  %v4897_v59 = vld [vmem:[%s6541_s7 + $0x358] sm:$0xf] }
 0x241   : > { %v3323_v15 = vadd.f32 %v3322_v32, %v3034_v25  ;;  %v2747_v56 = vadd.f32 %v2746_v13, %v2458_v39  ;;  %v5894_v25 = vld [vmem:[%s6541_s7 + $0x368] sm:$0xf0]  ;;  %v4886_v39 = vor.u32 %v5890_v46, %v4883_v53  ;;  %v4894_v26 = vor.u32 %v5891_v43, %v4891_v24 }
 0x242   : > { %v3613_v14 = vpop.f32.mrf.mxu0  ;;  %6391 = vst [vmem:[%s7074_s27 + $0x50] sm:$0xff] %v6155_v54   ;;  %v4898_v40 = vor.u32 %v5894_v25, %v4897_v59 }
 0x243   : > { %v3612_v17 = vadd.f32 %v3611_v22, %v3323_v15  ;;  %v4890_v15 = vor.u32 %v5893_v58, %v4889_v48  ;;  %v2471_v48 = vadd.f32 %v7234_v33, %v6681_v11 }
 0x245   : > { %v3970_v7 = vmul.f32 0.01, %v3612_v17  ;;  %vm3858_vm9 = vcmp.ge.f32.partialorder %v3612_v17, 0.0 }
 0x246   : > { %v3035_v19 = vpop.f32.mrf.mxu2 }
 0x247   : > { %v3036_v9 = vadd.f32 %v3035_v19, %v2747_v56  ;;  %v3324_v2 = vpop.f32.mrf.mxu3  ;;  %v4082_v31 = vsel %vm3858_vm9, %v3612_v17, %v3970_v7  ;;  %v5898_v7 = vld [vmem:[%s6541_s7 + $0x388] sm:$0xf0] }
 0x248   : > { %v2749_v50 = vpop.f32.mrf.mxu1 }
 0x249   : > { %v3325_v3 = vadd.f32 %v3324_v2, %v3036_v9  ;;  %v2750_v63 = vadd.f32 %v2749_v50, %v2461_v35  ;;  %v4909_v35 = vld [vmem:[%s6541_s7 + $0x378] sm:$0xf] }
 0x24a   : > { %v3616_v38 = vpop.f32.mrf.mxu0 }
 0x24b   : > { %v3614_v8 = vadd.f32 %v3613_v14, %v3325_v3  ;;  %2788 = vmatmul.bf16.gmra.mxu1 %v4866_v60  ;;  %3077 = vmatmul.bf16.gmra.mxu2 %v4870_v1  ;;  %v5895_v3 = vld [vmem:[%s6541_s7 + $0x374] sm:$0xf] }
 0x24c   : > { %3366 = vmatmul.bf16.gmra.mxu3 %v4874_v23  ;;  %v2468_v23 = vadd.f32 %v7234_v33, %v7035_v51 }
 0x24d   : > { %5747 = vmatmul.msk.bf16.gmra.mxu0 %vm2218_vm1, %v4878_v42  ;;  %vm3859_vm10 = vcmp.ge.f32.partialorder %v3614_v8, 0.0  ;;  %v3971_v44 = vmul.f32 0.01, %v3614_v8 }
 0x24e   : > { %v3038_v10 = vpop.f32.mrf.mxu2 }
 0x24f   : > { %v4083_v16 = vsel %vm3859_vm10, %v3614_v8, %v3971_v44  ;;  %v3039_v52 = vadd.f32 %v3038_v10, %v2750_v63  ;;  %v3327_v36 = vpop.f32.mrf.mxu3  ;;  %v5896_v8 = vld [vmem:[%s6541_s7 + $0x37c] sm:$0xf]  ;;  %v4911_v63 = vld [vmem:[%s6541_s7 + $0x38c] sm:$0xf0]  ;;  %v4917_v10 = vld [vmem:[%s6541_s7 + $0x380] sm:$0xf] }
 0x250   : > { %v6160_v37 = vpack.c.bf16 %v4083_v16, %v4082_v31  ;;  %v2751_v28 = vpop.f32.mrf.mxu1  ;;  %v5899_v31 = vld [vmem:[%s6541_s7 + $0x390] sm:$0xf0] }
 0x251   : > { %v3328_v22 = vadd.f32 %v3327_v36, %v3039_v52  ;;  %v2752_v20 = vadd.f32 %v2751_v28, %v2463_v29  ;;  %v4918_v46 = vor.u32 %v5899_v31, %v4917_v10 }
 0x252   : > { %v3618_v0 = vpop.f32.mrf.mxu0  ;;  %6392 = vst [vmem:[%s7074_s27 + $0x58] sm:$0xff] %v6160_v37  }
 0x253   : > { %v3617_v54 = vadd.f32 %v3616_v38, %v3328_v22  ;;  %v4903_v38 = vld [vmem:[%s6541_s7 + $0x384] sm:$0xf0]  ;;  %v4914_v22 = vor.u32 %v5896_v8, %v4911_v63 }
 0x254   : > { %v4906_v28 = vor.u32 %v5895_v3, %v4903_v38  ;;  %v2476_v3 = vadd.f32 %v7234_v33, %v6714_v34 }
 0x255   : > { %v3972_v56 = vmul.f32 0.01, %v3617_v54  ;;  %vm3860_vm11 = vcmp.ge.f32.partialorder %v3617_v54, 0.0 }
 0x256   : > { %v3040_v32 = vpop.f32.mrf.mxu2 }
 0x257   : > { %v3041_v13 = vadd.f32 %v3040_v32, %v2752_v20  ;;  %v3329_v14 = vpop.f32.mrf.mxu3  ;;  %v4084_v17 = vsel %vm3860_vm11, %v3617_v54, %v3972_v56 }
 0x258   : > { %v2754_v30 = vpop.f32.mrf.mxu1 }
 0x259   : > { %v3330_v45 = vadd.f32 %v3329_v14, %v3041_v13  ;;  %v2755_v47 = vadd.f32 %v2754_v30, %v2466_v5  ;;  %v5901_v5 = vld [vmem:[%s6541_s7 + $0x3a4] sm:$0xf] }
 0x25a   : > { %v3621_v57 = vpop.f32.mrf.mxu0 }
 0x25b   : > { %v3619_v12 = vadd.f32 %v3618_v0, %v3330_v45  ;;  %2793 = vmatmul.bf16.gmra.mxu1 %v4886_v39  ;;  %3082 = vmatmul.bf16.gmra.mxu2 %v4890_v15  ;;  %v4910_v0 = vor.u32 %v5898_v7, %v4909_v35  ;;  %v2473_v15 = vadd.f32 %v7234_v33, %v6692_v18  ;;  %v4929_v45 = vld [vmem:[%s6541_s7 + $0x3a0] sm:$0xf] }
 0x25c   : > { %3371 = vmatmul.bf16.gmra.mxu3 %v4894_v26  ;;  %v5900_v26 = vld [vmem:[%s6541_s7 + $0x39c] sm:$0xf] }
 0x25d   : > { %5748 = vmatmul.msk.bf16.gmra.mxu0 %vm2218_vm1, %v4898_v40  ;;  %vm3861_vm12 = vcmp.ge.f32.partialorder %v3619_v12, 0.0  ;;  %v3973_v4 = vmul.f32 0.01, %v3619_v12  ;;  %v4923_v40 = vld [vmem:[%s6541_s7 + $0x3ac] sm:$0xf0] }
 0x25e   : > { %v3043_v19 = vpop.f32.mrf.mxu2 }
 0x25f   : > { %v4085_v6 = vsel %vm3861_vm12, %v3619_v12, %v3973_v4  ;;  %v3044_v9 = vadd.f32 %v3043_v19, %v2755_v47  ;;  %v3332_v2 = vpop.f32.mrf.mxu3  ;;  %v4931_v12 = vld [vmem:[%s6541_s7 + $0x3b4] sm:$0xf0]  ;;  %v4937_v4 = vld [vmem:[%s6541_s7 + $0x3a8] sm:$0xf]  ;;  %v5904_v47 = vld [vmem:[%s6541_s7 + $0x3b8] sm:$0xf0] }
 0x260   : > { %v6165_v60 = vpack.c.bf16 %v4085_v6, %v4084_v17  ;;  %v2756_v1 = vpop.f32.mrf.mxu1 }
 0x261   : > { %v3333_v42 = vadd.f32 %v3332_v2, %v3044_v9  ;;  %v2757_v44 = vadd.f32 %v2756_v1, %v2468_v23  ;;  %v4926_v2 = vor.u32 %v5900_v26, %v4923_v40  ;;  %v4938_v23 = vor.u32 %v5904_v47, %v4937_v4 }
 0x262   : > { %v3623_v50 = vpop.f32.mrf.mxu0  ;;  %6393 = vst [vmem:[%s7074_s27 + $0x60] sm:$0xff] %v6165_v60  }
 0x263   : > { %v3622_v52 = vadd.f32 %v3621_v57, %v3333_v42  ;;  %v5903_v57 = vld [vmem:[%s6541_s7 + $0x3b0] sm:$0xf0] }
 0x264   : > { %v4930_v60 = vor.u32 %v5903_v57, %v4929_v45 }
 0x265   : > { %v3974_v58 = vmul.f32 0.01, %v3622_v52  ;;  %vm3862_vm13 = vcmp.ge.f32.partialorder %v3622_v52, 0.0 }
 0x266   : > { %v3045_v16 = vpop.f32.mrf.mxu2 }
 0x267   : > { %v3046_v36 = vadd.f32 %v3045_v16, %v2757_v44  ;;  %v3334_v37 = vpop.f32.mrf.mxu3  ;;  %v4086_v25 = vsel %vm3862_vm13, %v3622_v52, %v3974_v58  ;;  %v4957_v58 = vld [vmem:[%s6541_s7 + $0x3d0] sm:$0xf] }
 0x268   : > { %v2759_v29 = vpop.f32.mrf.mxu1 }
 0x269   : > { %v3335_v51 = vadd.f32 %v3334_v37, %v3046_v36  ;;  %v2760_v24 = vadd.f32 %v2759_v29, %v2471_v48  ;;  %v2478_v37 = vadd.f32 %v7234_v33, %v6725_v41  ;;  %v4943_v29 = vld [vmem:[%s6541_s7 + $0x3d4] sm:$0xf0]  ;;  %v4951_v48 = vld [vmem:[%s6541_s7 + $0x3dc] sm:$0xf0] }
 0x26a   : > { %v3626_v53 = vpop.f32.mrf.mxu0 }
 0x26b   : > { %v3624_v43 = vadd.f32 %v3623_v50, %v3335_v51  ;;  %2798 = vmatmul.bf16.gmra.mxu1 %v4906_v28  ;;  %3087 = vmatmul.bf16.gmra.mxu2 %v4910_v0  ;;  %v4934_v50 = vor.u32 %v5901_v5, %v4931_v12  ;;  %v5905_v0 = vld [vmem:[%s6541_s7 + $0x3c4] sm:$0xf]  ;;  %v5906_v51 = vld [vmem:[%s6541_s7 + $0x3cc] sm:$0xf] }
 0x26c   : > { %3376 = vmatmul.bf16.gmra.mxu3 %v4914_v22  ;;  %v4949_v22 = vld [vmem:[%s6541_s7 + $0x3c8] sm:$0xf] }
 0x26d   : > { %5749 = vmatmul.msk.bf16.gmra.mxu0 %vm2218_vm1, %v4918_v46  ;;  %vm3863_vm14 = vcmp.ge.f32.partialorder %v3624_v43, 0.0  ;;  %v3975_v20 = vmul.f32 0.01, %v3624_v43  ;;  %v5908_v46 = vld [vmem:[%s6541_s7 + $0x3d8] sm:$0xf0] }
 0x26e   : > { %v3048_v59 = vpop.f32.mrf.mxu2 }
 0x26f   : > { %v4087_v11 = vsel %vm3863_vm14, %v3624_v43, %v3975_v20  ;;  %v3049_v32 = vadd.f32 %v3048_v59, %v2760_v24  ;;  %v3337_v54 = vpop.f32.mrf.mxu3  ;;  %v5909_v43 = vld [vmem:[%s6541_s7 + $0x3e0] sm:$0xf0] }
 0x270   : > { %v6170_v13 = vpack.c.bf16 %v4087_v11, %v4086_v25  ;;  %v2761_v14 = vpop.f32.mrf.mxu1  ;;  %v4946_v11 = vor.u32 %v5905_v0, %v4943_v29 }
 0x271   : > { %v3338_v30 = vadd.f32 %v3337_v54, %v3049_v32  ;;  %v2762_v56 = vadd.f32 %v2761_v14, %v2473_v15  ;;  %v4950_v32 = vor.u32 %v5908_v46, %v4949_v22  ;;  %v4958_v14 = vor.u32 %v5909_v43, %v4957_v58 }
 0x272   : > { %v3628_v39 = vpop.f32.mrf.mxu0  ;;  %6394 = vst [vmem:[%s7074_s27 + $0x68] sm:$0xff] %v6170_v13   ;;  %v4954_v13 = vor.u32 %v5906_v51, %v4951_v48  ;;  %v2481_v15 = vadd.f32 %v7234_v33, %v6741_v55  ;;  %v2488_v43 = vadd.f32 %v7234_v33, %v6785_v27 }
 0x273   : > { %v3627_v17 = vadd.f32 %v3626_v53, %v3338_v30 }
 0x275   : > { %v3976_v38 = vmul.f32 0.01, %v3627_v17  ;;  %vm3864_vm15 = vcmp.ge.f32.partialorder %v3627_v17, 0.0 }
 0x276   : > { %v3050_v19 = vpop.f32.mrf.mxu2 }
 0x277   : > { %v3051_v6 = vadd.f32 %v3050_v19, %v2762_v56  ;;  %v3339_v9 = vpop.f32.mrf.mxu3  ;;  %v4088_v63 = vsel %vm3864_vm15, %v3627_v17, %v3976_v38  ;;  %v2483_v17 = vadd.f32 %v7234_v33, %v6749_v61 }
 0x278   : > { %v2764_v1 = vpop.f32.mrf.mxu1 }
 0x279   : > { %v3340_v18 = vadd.f32 %v3339_v9, %v3051_v6  ;;  %v2765_v8 = vadd.f32 %v2764_v1, %v2476_v3  ;;  %v5910_v9 = vld [vmem:[%s6541_s7 + $0x3ec] sm:$0xf]  ;;  %v5913_v1 = vld [vmem:[%s6541_s7 + $0x400] sm:$0xf0] }
 0x27a   : > { %v3631_v42 = vpop.f32.mrf.mxu0  ;;  %v5914_v3 = vld [vmem:[%s6541_s7 + $0x408] sm:$0xf0] }
 0x27b   : > { %v3629_v35 = vadd.f32 %v3628_v39, %v3340_v18  ;;  %2803 = vmatmul.bf16.gmra.mxu1 %v4926_v2  ;;  %3092 = vmatmul.bf16.gmra.mxu2 %v4930_v60  ;;  %v4963_v2 = vld [vmem:[%s6541_s7 + $0x3fc] sm:$0xf0]  ;;  %v4969_v60 = vld [vmem:[%s6541_s7 + $0x3f0] sm:$0xf]  ;;  %v4971_v18 = vld [vmem:[%s6541_s7 + $0x404] sm:$0xf0] }
 0x27c   : > { %3381 = vmatmul.bf16.gmra.mxu3 %v4934_v50  ;;  %v5911_v50 = vld [vmem:[%s6541_s7 + $0x3f4] sm:$0xf] }
 0x27d   : > { %5750 = vmatmul.msk.bf16.gmra.mxu0 %vm2218_vm1, %v4938_v23  ;;  %vm3865_vm0 = vcmp.ge.f32.partialorder %v3629_v35, 0.0  ;;  %v3977_v7 = vmul.f32 0.01, %v3629_v35 }
 0x27e   : > { %v3053_v44 = vpop.f32.mrf.mxu2 }
 0x27f   : > { %v4089_v34 = vsel %vm3865_vm0, %v3629_v35, %v3977_v7  ;;  %v3054_v10 = vadd.f32 %v3053_v44, %v2765_v8  ;;  %v3342_v31 = vpop.f32.mrf.mxu3  ;;  %v4966_v44 = vor.u32 %v5910_v9, %v4963_v2 }
 0x280   : > { %v6175_v16 = vpack.c.bf16 %v4089_v34, %v4088_v63  ;;  %v2766_v52 = vpop.f32.mrf.mxu1  ;;  %v4970_v63 = vor.u32 %v5913_v1, %v4969_v60 }
 0x281   : > { %v3343_v28 = vadd.f32 %v3342_v31, %v3054_v10  ;;  %v2767_v53 = vadd.f32 %v2766_v52, %v2478_v37  ;;  %v4974_v10 = vor.u32 %v5911_v50, %v4971_v18  ;;  %v2486_v52 = vadd.f32 %v7234_v33, %v6777_v21 }
 0x282   : > { %v3633_v36 = vpop.f32.mrf.mxu0  ;;  %6395 = vst [vmem:[%s7074_s27 + $0x70] sm:$0xff] %v6175_v16   ;;  %v2493_v18 = vadd.f32 %v7234_v33, %v6809_v62 }
 0x283   : > { %v3632_v24 = vadd.f32 %v3631_v42, %v3343_v28  ;;  %v4977_v42 = vld [vmem:[%s6541_s7 + $0x3f8] sm:$0xf] }
 0x284   : > { %v4978_v31 = vor.u32 %v5914_v3, %v4977_v42  ;;  %v5920_v3 = vld [vmem:[%s6541_s7 + $0x43c] sm:$0xf] }
 0x285   : > { %v3978_v30 = vmul.f32 0.01, %v3632_v24  ;;  %vm3866_vm2 = vcmp.ge.f32.partialorder %v3632_v24, 0.0 }
 0x286   : > { %v3055_v20 = vpop.f32.mrf.mxu2 }
 0x287   : > { %v3056_v59 = vadd.f32 %v3055_v20, %v2767_v53  ;;  %v3344_v25 = vpop.f32.mrf.mxu3  ;;  %v4090_v5 = vsel %vm3866_vm2, %v3632_v24, %v3978_v30  ;;  %v5915_v24 = vld [vmem:[%s6541_s7 + $0x414] sm:$0xf] }
 0x288   : > { %v2769_v54 = vpop.f32.mrf.mxu1 }
 0x289   : > { %v3345_v41 = vadd.f32 %v3344_v25, %v3056_v59  ;;  %v2770_v45 = vadd.f32 %v2769_v54, %v2481_v15  ;;  %v4983_v59 = vld [vmem:[%s6541_s7 + $0x424] sm:$0xf0]  ;;  %v4989_v25 = vld [vmem:[%s6541_s7 + $0x418] sm:$0xf] }
 0x28a   : > { %v3636_v39 = vpop.f32.mrf.mxu0 }
 0x28b   : > { %v3634_v26 = vadd.f32 %v3633_v36, %v3345_v41  ;;  %2808 = vmatmul.bf16.gmra.mxu1 %v4946_v11  ;;  %3097 = vmatmul.bf16.gmra.mxu2 %v4950_v32  ;;  %v5918_v11 = vld [vmem:[%s6541_s7 + $0x428] sm:$0xf0]  ;;  %v5916_v32 = vld [vmem:[%s6541_s7 + $0x41c] sm:$0xf]  ;;  %v5919_v41 = vld [vmem:[%s6541_s7 + $0x430] sm:$0xf0] }
 0x28c   : > { %3386 = vmatmul.bf16.gmra.mxu3 %v4954_v13  ;;  %v4991_v13 = vld [vmem:[%s6541_s7 + $0x42c] sm:$0xf0] }
 0x28d   : > { %5751 = vmatmul.msk.bf16.gmra.mxu0 %vm2218_vm1, %v4958_v14  ;;  %vm3867_vm3 = vcmp.ge.f32.partialorder %v3634_v26, 0.0  ;;  %v3979_v40 = vmul.f32 0.01, %v3634_v26  ;;  %v4997_v14 = vld [vmem:[%s6541_s7 + $0x420] sm:$0xf] }
 0x28e   : > { %v3058_v57 = vpop.f32.mrf.mxu2 }
 0x28f   : > { %v4091_v55 = vsel %vm3867_vm3, %v3634_v26, %v3979_v40  ;;  %v3059_v56 = vadd.f32 %v3058_v57, %v2770_v45  ;;  %v3347_v12 = vpop.f32.mrf.mxu3  ;;  %v4986_v40 = vor.u32 %v5915_v24, %v4983_v59  ;;  %v4990_v45 = vor.u32 %v5918_v11, %v4989_v25 }
 0x290   : > { %v6180_v4 = vpack.c.bf16 %v4091_v55, %v4090_v5  ;;  %v2771_v47 = vpop.f32.mrf.mxu1  ;;  %v4994_v5 = vor.u32 %v5916_v32, %v4991_v13  ;;  %v4998_v55 = vor.u32 %v5919_v41, %v4997_v14  ;;  %v7866_v13 = vld [vmem:[#allocation25_spill] sm:$0xff] }
 0x291   : > { %v3348_v6 = vadd.f32 %v3347_v12, %v3059_v56  ;;  %v2772_v23 = vadd.f32 %v2771_v47, %v2483_v17  ;;  %v2491_v12 = vadd.f32 %v7234_v33, %v6801_v49  ;;  %v2498_v14 = vadd.f32 %v7234_v33, %v7866_v13 }
 0x292   : > { %v3638_v19 = vpop.f32.mrf.mxu0  ;;  %6396 = vst [vmem:[%s7074_s27 + $0x78] sm:$0xff] %v6180_v4  }
 0x293   : > { %v3637_v35 = vadd.f32 %v3636_v39, %v3348_v6 }
 0x295   : > { %v3980_v36 = vmul.f32 0.01, %v3637_v35  ;;  %vm3868_vm4 = vcmp.ge.f32.partialorder %v3637_v35, 0.0 }
 0x296   : > { %v3060_v38 = vpop.f32.mrf.mxu2 }
 0x297   : > { %v3061_v7 = vadd.f32 %v3060_v38, %v2772_v23  ;;  %v3349_v8 = vpop.f32.mrf.mxu3  ;;  %v4092_v22 = vsel %vm3868_vm4, %v3637_v35, %v3980_v36  ;;  %v5003_v38 = vld [vmem:[%s6541_s7 + $0x44c] sm:$0xf0]  ;;  %v5009_v35 = vld [vmem:[%s6541_s7 + $0x440] sm:$0xf] }
 0x298   : > { %v2774_v34 = vpop.f32.mrf.mxu1  ;;  %v5006_v36 = vor.u32 %v5920_v3, %v5003_v38 }
 0x299   : > { %v3350_v61 = vadd.f32 %v3349_v8, %v3061_v7  ;;  %v2775_v0 = vadd.f32 %v2774_v34, %v2486_v52  ;;  %v5923_v7 = vld [vmem:[%s6541_s7 + $0x450] sm:$0xf0]  ;;  %v5921_v8 = vld [vmem:[%s6541_s7 + $0x444] sm:$0xf]  ;;  %v5017_v34 = vld [vmem:[%s6541_s7 + $0x448] sm:$0xf] }
 0x29a   : > { %v3641_v16 = vpop.f32.mrf.mxu0 }
 0x29b   : > { %v3639_v37 = vadd.f32 %v3638_v19, %v3350_v61  ;;  %2813 = vmatmul.bf16.gmra.mxu1 %v4966_v44  ;;  %3102 = vmatmul.bf16.gmra.mxu2 %v4970_v63  ;;  %v5011_v63 = vld [vmem:[%s6541_s7 + $0x454] sm:$0xf0] }
 0x29c   : > { %3391 = vmatmul.bf16.gmra.mxu3 %v4974_v10  ;;  %v5924_v10 = vld [vmem:[%s6541_s7 + $0x458] sm:$0xf0] }
 0x29d   : > { %5752 = vmatmul.msk.bf16.gmra.mxu0 %vm2218_vm1, %v4978_v31  ;;  %vm3869_vm5 = vcmp.ge.f32.partialorder %v3639_v37, 0.0  ;;  %v3981_v28 = vmul.f32 0.01, %v3639_v37 }
 0x29e   : > { %v3063_v29 = vpop.f32.mrf.mxu2 }
 0x29f   : > { %v4093_v21 = vsel %vm3869_vm5, %v3639_v37, %v3981_v28  ;;  %v3064_v46 = vadd.f32 %v3063_v29, %v2775_v0  ;;  %v3352_v51 = vpop.f32.mrf.mxu3  ;;  %v5010_v37 = vor.u32 %v5923_v7, %v5009_v35  ;;  %v5014_v0 = vor.u32 %v5921_v8, %v5011_v63 }
 0x2a0   : > { %v6185_v53 = vpack.c.bf16 %v4093_v21, %v4092_v22  ;;  %v2776_v48 = vpop.f32.mrf.mxu1  ;;  %v5018_v29 = vor.u32 %v5924_v10, %v5017_v34  ;;  %v7865_v21 = vld [vmem:[#allocation22_spill] sm:$0xff]  ;;  %v7868_v10 = vld [vmem:[#allocation31_spill] sm:$0xff] }
 0x2a1   : > { %v3353_v20 = vadd.f32 %v3352_v51, %v3064_v46  ;;  %v2777_v54 = vadd.f32 %v2776_v48, %v2488_v43  ;;  %v2496_v46 = vadd.f32 %v7234_v33, %v7865_v21 }
 0x2a2   : > { %v3643_v58 = vpop.f32.mrf.mxu0  ;;  %6397 = vst [vmem:[%s7074_s27 + $0x80] sm:$0xff] %v6185_v53  }
 0x2a3   : > { %v3642_v15 = vadd.f32 %v3641_v16, %v3353_v20 }
 0x2a5   : > { %v3982_v4 = vmul.f32 0.01, %v3642_v15  ;;  %vm3870_vm6 = vcmp.ge.f32.partialorder %v3642_v15, 0.0 }
 0x2a6   : > { %v3065_v39 = vpop.f32.mrf.mxu2 }
 0x2a7   : > { %v3066_v30 = vadd.f32 %v3065_v39, %v2777_v54  ;;  %v3354_v26 = vpop.f32.mrf.mxu3  ;;  %v4094_v9 = vsel %vm3870_vm6, %v3642_v15, %v3982_v4  ;;  %v5925_v39 = vld [vmem:[%s6541_s7 + $0x464] sm:$0xf]  ;;  %v5023_v15 = vld [vmem:[%s6541_s7 + $0x474] sm:$0xf0] }
 0x2a8   : > { %v2779_v57 = vpop.f32.mrf.mxu1 }
 0x2a9   : > { %v3355_v27 = vadd.f32 %v3354_v26, %v3066_v30  ;;  %v2780_v17 = vadd.f32 %v2779_v57, %v2491_v12  ;;  %v5029_v30 = vld [vmem:[%s6541_s7 + $0x468] sm:$0xf]  ;;  %v5928_v26 = vld [vmem:[%s6541_s7 + $0x478] sm:$0xf0]  ;;  %v5031_v57 = vld [vmem:[%s6541_s7 + $0x47c] sm:$0xf0] }
 0x2aa   : > { %v3646_v56 = vpop.f32.mrf.mxu0 }
 0x2ab   : > { %v3644_v47 = vadd.f32 %v3643_v58, %v3355_v27  ;;  %2818 = vmatmul.bf16.gmra.mxu1 %v4986_v40  ;;  %3107 = vmatmul.bf16.gmra.mxu2 %v4990_v45  ;;  %v5926_v40 = vld [vmem:[%s6541_s7 + $0x46c] sm:$0xf] }
 0x2ac   : > { %3396 = vmatmul.bf16.gmra.mxu3 %v4994_v5  ;;  %v5037_v5 = vld [vmem:[%s6541_s7 + $0x470] sm:$0xf] }
 0x2ad   : > { %5753 = vmatmul.msk.bf16.gmra.mxu0 %vm2218_vm1, %v4998_v55  ;;  %vm3871_vm7 = vcmp.ge.f32.partialorder %v3644_v47, 0.0  ;;  %v3983_v19 = vmul.f32 0.01, %v3644_v47  ;;  %v5929_v55 = vld [vmem:[%s6541_s7 + $0x480] sm:$0xf0] }
 0x2ae   : > { %v3068_v6 = vpop.f32.mrf.mxu2 }
 0x2af   : > { %v4095_v49 = vsel %vm3871_vm7, %v3644_v47, %v3983_v19  ;;  %v3069_v2 = vadd.f32 %v3068_v6, %v2780_v17  ;;  %v3357_v60 = vpop.f32.mrf.mxu3  ;;  %v5026_v47 = vor.u32 %v5925_v39, %v5023_v15  ;;  %v5030_v19 = vor.u32 %v5928_v26, %v5029_v30 }
 0x2b0   : > { %v6190_v1 = vpack.c.bf16 %v4095_v49, %v4094_v9  ;;  %v2781_v50 = vpop.f32.mrf.mxu1  ;;  %v5034_v6 = vor.u32 %v5926_v40, %v5031_v57  ;;  %v5038_v9 = vor.u32 %v5929_v55, %v5037_v5  ;;  %v7870_v55 = vld [vmem:[#allocation37_spill] sm:$0xff] }
 0x2b1   : > { %v3358_v42 = vadd.f32 %v3357_v60, %v3069_v2  ;;  %v2782_v44 = vadd.f32 %v2781_v50, %v2493_v18  ;;  %v7867_v60 = vld [vmem:[#allocation28_spill] sm:$0xff] }
 0x2b2   : > { %v3648_v23 = vpop.f32.mrf.mxu0  ;;  %6398 = vst [vmem:[%s7074_s27 + $0x88] sm:$0xff] %v6190_v1   ;;  %v2501_v1 = vadd.f32 %v7234_v33, %v7867_v60 }
 0x2b3   : > { %v3647_v61 = vadd.f32 %v3646_v56, %v3358_v42 }
 0x2b5   : > { %v3984_v51 = vmul.f32 0.01, %v3647_v61  ;;  %vm3872_vm8 = vcmp.ge.f32.partialorder %v3647_v61, 0.0 }
 0x2b6   : > { %v3070_v31 = vpop.f32.mrf.mxu2 }
 0x2b7   : > { %v3071_v16 = vadd.f32 %v3070_v31, %v2782_v44  ;;  %v3359_v52 = vpop.f32.mrf.mxu3  ;;  %v4096_v20 = vsel %vm3872_vm8, %v3647_v61, %v3984_v51  ;;  %v2503_v31 = vadd.f32 %v7234_v33, %v7868_v10 }
 0x2b8   : > { %v2784_v28 = vpop.f32.mrf.mxu1 }
 0x2b9   : > { %v3360_v62 = vadd.f32 %v3359_v52, %v3071_v16  ;;  %v2785_v58 = vadd.f32 %v2784_v28, %v2496_v46  ;;  %v5930_v16 = vld [vmem:[%s6541_s7 + $0x48c] sm:$0xf]  ;;  %v5043_v52 = vld [vmem:[%s6541_s7 + $0x49c] sm:$0xf0]  ;;  %v5931_v28 = vld [vmem:[%s6541_s7 + $0x494] sm:$0xf] }
 0x2ba   : > { %v3651_v22 = vpop.f32.mrf.mxu0 }
 0x2bb   : > { %v3649_v53 = vadd.f32 %v3648_v23, %v3360_v62  ;;  %2823 = vmatmul.bf16.gmra.mxu1 %v5006_v36  ;;  %3112 = vmatmul.bf16.gmra.mxu2 %v5010_v37  ;;  %v5049_v36 = vld [vmem:[%s6541_s7 + $0x490] sm:$0xf]  ;;  %v5933_v37 = vld [vmem:[%s6541_s7 + $0x4a0] sm:$0xf0]  ;;  %v5057_v62 = vld [vmem:[%s6541_s7 + $0x498] sm:$0xf] }
 0x2bc   : > { %3401 = vmatmul.bf16.gmra.mxu3 %v5014_v0 }
 0x2bd   : > { %5754 = vmatmul.msk.bf16.gmra.mxu0 %vm2218_vm1, %v5018_v29  ;;  %vm3873_vm9 = vcmp.ge.f32.partialorder %v3649_v53, 0.0  ;;  %v3985_v48 = vmul.f32 0.01, %v3649_v53  ;;  %v5051_v29 = vld [vmem:[%s6541_s7 + $0x4a4] sm:$0xf0] }
 0x2be   : > { %v3073_v43 = vpop.f32.mrf.mxu2 }
 0x2bf   : > { %v4097_v24 = vsel %vm3873_vm9, %v3649_v53, %v3985_v48  ;;  %v3074_v59 = vadd.f32 %v3073_v43, %v2785_v58  ;;  %v3362_v25 = vpop.f32.mrf.mxu3  ;;  %v5046_v48 = vor.u32 %v5930_v16, %v5043_v52  ;;  %v5050_v58 = vor.u32 %v5933_v37, %v5049_v36 }
 0x2c0   : > { %v6195_v11 = vpack.c.bf16 %v4097_v24, %v4096_v20  ;;  %v2786_v32 = vpop.f32.mrf.mxu1  ;;  %v5054_v20 = vor.u32 %v5931_v28, %v5051_v29 }
 0x2c1   : > { %v3363_v41 = vadd.f32 %v3362_v25, %v3074_v59  ;;  %v2787_v45 = vadd.f32 %v2786_v32, %v2498_v14 }
 0x2c2   : > { %v3653_v54 = vpop.f32.mrf.mxu0  ;;  %6399 = vst [vmem:[%s7074_s27 + $0x90] sm:$0xff] %v6195_v11   ;;  %v7869_v11 = vld [vmem:[#allocation34_spill] sm:$0xff] }
 0x2c3   : > { %v3652_v56 = vadd.f32 %v3651_v22, %v3363_v41  ;;  %v5934_v22 = vld [vmem:[%s6541_s7 + $0x4a8] sm:$0xf0]  ;;  %v2506_v32 = vadd.f32 %v7234_v33, %v7869_v11 }
 0x2c4   : > { %v5058_v24 = vor.u32 %v5934_v22, %v5057_v62  ;;  %v7872_v22 = vld [vmem:[#allocation43_spill] sm:$0xff] }
 0x2c5   : > { %v3986_v50 = vmul.f32 0.01, %v3652_v56  ;;  %vm3874_vm10 = vcmp.ge.f32.partialorder %v3652_v56, 0.0 }
 0x2c6   : > { %v3075_v27 = vpop.f32.mrf.mxu2 }
 0x2c7   : > { %v3076_v12 = vadd.f32 %v3075_v27, %v2787_v45  ;;  %v3364_v4 = vpop.f32.mrf.mxu3  ;;  %v4098_v38 = vsel %vm3874_vm10, %v3652_v56, %v3986_v50  ;;  %v2508_v27 = vadd.f32 %v7234_v33, %v7870_v55 }
 0x2c8   : > { %v2789_v17 = vpop.f32.mrf.mxu1 }
 0x2c9   : > { %v3365_v49 = vadd.f32 %v3364_v4, %v3076_v12  ;;  %v2790_v42 = vadd.f32 %v2789_v17, %v2501_v1  ;;  %v5935_v12 = vld [vmem:[%s6541_s7 + $0x4b4] sm:$0xf]  ;;  %v5063_v4 = vld [vmem:[%s6541_s7 + $0x4c4] sm:$0xf0]  ;;  %v5936_v17 = vld [vmem:[%s6541_s7 + $0x4bc] sm:$0xf] }
 0x2ca   : > { %v3656_v2 = vpop.f32.mrf.mxu0 }
 0x2cb   : > { %v3654_v23 = vadd.f32 %v3653_v54, %v3365_v49  ;;  %2828 = vmatmul.bf16.gmra.mxu1 %v5026_v47  ;;  %3117 = vmatmul.bf16.gmra.mxu2 %v5030_v19  ;;  %v5069_v47 = vld [vmem:[%s6541_s7 + $0x4b8] sm:$0xf]  ;;  %v5938_v19 = vld [vmem:[%s6541_s7 + $0x4c8] sm:$0xf0]  ;;  %v5077_v49 = vld [vmem:[%s6541_s7 + $0x4c0] sm:$0xf] }
 0x2cc   : > { %3406 = vmatmul.bf16.gmra.mxu3 %v5034_v6 }
 0x2cd   : > { %5755 = vmatmul.msk.bf16.gmra.mxu0 %vm2218_vm1, %v5038_v9  ;;  %vm3875_vm11 = vcmp.ge.f32.partialorder %v3654_v23, 0.0  ;;  %v3987_v18 = vmul.f32 0.01, %v3654_v23  ;;  %v5071_v9 = vld [vmem:[%s6541_s7 + $0x4cc] sm:$0xf0] }
 0x2ce   : > { %v3078_v3 = vpop.f32.mrf.mxu2 }
 0x2cf   : > { %v4099_v35 = vsel %vm3875_vm11, %v3654_v23, %v3987_v18  ;;  %v3079_v7 = vadd.f32 %v3078_v3, %v2790_v42  ;;  %v3367_v8 = vpop.f32.mrf.mxu3  ;;  %v5066_v18 = vor.u32 %v5935_v12, %v5063_v4  ;;  %v5070_v42 = vor.u32 %v5938_v19, %v5069_v47 }
 0x2d0   : > { %v6200_v44 = vpack.c.bf16 %v4099_v35, %v4098_v38  ;;  %v2791_v63 = vpop.f32.mrf.mxu1  ;;  %v5074_v38 = vor.u32 %v5936_v17, %v5071_v9 }
 0x2d1   : > { %v3368_v61 = vadd.f32 %v3367_v8, %v3079_v7  ;;  %v2792_v0 = vadd.f32 %v2791_v63, %v2503_v31 }
 0x2d2   : > { %v3658_v34 = vpop.f32.mrf.mxu0  ;;  %6400 = vst [vmem:[%s7074_s27 + $0x98] sm:$0xff] %v6200_v44   ;;  %v7871_v44 = vld [vmem:[#allocation40_spill] sm:$0xff] }
 0x2d3   : > { %v3657_v46 = vadd.f32 %v3656_v2, %v3368_v61  ;;  %v5939_v2 = vld [vmem:[%s6541_s7 + $0x4d0] sm:$0xf0]  ;;  %v2511_v63 = vadd.f32 %v7234_v33, %v7871_v44 }
 0x2d4   : > { %v5078_v35 = vor.u32 %v5939_v2, %v5077_v49  ;;  %v7874_v2 = vld [vmem:[#allocation49_spill] sm:$0xff] }
 0x2d5   : > { %v3988_v54 = vmul.f32 0.01, %v3657_v46  ;;  %vm3876_vm12 = vcmp.ge.f32.partialorder %v3657_v46, 0.0 }
 0x2d6   : > { %v3080_v21 = vpop.f32.mrf.mxu2 }
 0x2d7   : > { %v3081_v51 = vadd.f32 %v3080_v21, %v2792_v0  ;;  %v3369_v53 = vpop.f32.mrf.mxu3  ;;  %v4100_v15 = vsel %vm3876_vm12, %v3657_v46, %v3988_v54  ;;  %v2513_v21 = vadd.f32 %v7234_v33, %v7872_v22 }
 0x2d8   : > { %v2794_v43 = vpop.f32.mrf.mxu1 }
 0x2d9   : > { %v3370_v59 = vadd.f32 %v3369_v53, %v3081_v51  ;;  %v2795_v41 = vadd.f32 %v2794_v43, %v2506_v32  ;;  %v5940_v51 = vld [vmem:[%s6541_s7 + $0x4dc] sm:$0xf]  ;;  %v5083_v53 = vld [vmem:[%s6541_s7 + $0x4ec] sm:$0xf0]  ;;  %v5941_v43 = vld [vmem:[%s6541_s7 + $0x4e4] sm:$0xf] }
 0x2da   : > { %v3661_v25 = vpop.f32.mrf.mxu0 }
 0x2db   : > { %v3659_v13 = vadd.f32 %v3658_v34, %v3370_v59  ;;  %2833 = vmatmul.bf16.gmra.mxu1 %v5046_v48  ;;  %3122 = vmatmul.bf16.gmra.mxu2 %v5050_v58  ;;  %v5089_v48 = vld [vmem:[%s6541_s7 + $0x4e0] sm:$0xf]  ;;  %v5943_v58 = vld [vmem:[%s6541_s7 + $0x4f0] sm:$0xf0]  ;;  %v5097_v59 = vld [vmem:[%s6541_s7 + $0x4e8] sm:$0xf] }
 0x2dc   : > { %3411 = vmatmul.bf16.gmra.mxu3 %v5054_v20 }
 0x2dd   : > { %5756 = vmatmul.msk.bf16.gmra.mxu0 %vm2218_vm1, %v5058_v24  ;;  %vm3877_vm13 = vcmp.ge.f32.partialorder %v3659_v13, 0.0  ;;  %v3989_v14 = vmul.f32 0.01, %v3659_v13  ;;  %v5091_v24 = vld [vmem:[%s6541_s7 + $0x4f4] sm:$0xf0] }
 0x2de   : > { %v3083_v39 = vpop.f32.mrf.mxu2 }
 0x2df   : > { %v4101_v30 = vsel %vm3877_vm13, %v3659_v13, %v3989_v14  ;;  %v3084_v26 = vadd.f32 %v3083_v39, %v2795_v41  ;;  %v3372_v40 = vpop.f32.mrf.mxu3  ;;  %v5086_v14 = vor.u32 %v5940_v51, %v5083_v53  ;;  %v5090_v41 = vor.u32 %v5943_v58, %v5089_v48 }
 0x2e0   : > { %v6205_v45 = vpack.c.bf16 %v4101_v30, %v4100_v15  ;;  %v2796_v57 = vpop.f32.mrf.mxu1  ;;  %v5094_v15 = vor.u32 %v5941_v43, %v5091_v24 }
 0x2e1   : > { %v3373_v56 = vadd.f32 %v3372_v40, %v3084_v26  ;;  %v2797_v6 = vadd.f32 %v2796_v57, %v2508_v27 }
 0x2e2   : > { %v3663_v5 = vpop.f32.mrf.mxu0  ;;  %6401 = vst [vmem:[%s7074_s27 + $0xa0] sm:$0xff] %v6205_v45   ;;  %v7873_v45 = vld [vmem:[#allocation46_spill] sm:$0xff] }
 0x2e3   : > { %v3662_v1 = vadd.f32 %v3661_v25, %v3373_v56  ;;  %v5944_v25 = vld [vmem:[%s6541_s7 + $0x4f8] sm:$0xf0]  ;;  %v2516_v57 = vadd.f32 %v7234_v33, %v7873_v45 }
 0x2e4   : > { %v5098_v30 = vor.u32 %v5944_v25, %v5097_v59  ;;  %v7876_v25 = vld [vmem:[#allocation55_spill] sm:$0xff] }
 0x2e5   : > { %v3990_v34 = vmul.f32 0.01, %v3662_v1  ;;  %vm3878_vm14 = vcmp.ge.f32.partialorder %v3662_v1, 0.0 }
 0x2e6   : > { %v3085_v60 = vpop.f32.mrf.mxu2 }
 0x2e7   : > { %v3086_v50 = vadd.f32 %v3085_v60, %v2797_v6  ;;  %v3374_v23 = vpop.f32.mrf.mxu3  ;;  %v4102_v52 = vsel %vm3878_vm14, %v3662_v1, %v3990_v34  ;;  %v2518_v60 = vadd.f32 %v7234_v33, %v7874_v2 }
 0x2e8   : > { %v2799_v3 = vpop.f32.mrf.mxu1 }
 0x2e9   : > { %v3375_v7 = vadd.f32 %v3374_v23, %v3086_v50  ;;  %v2800_v61 = vadd.f32 %v2799_v3, %v2511_v63  ;;  %v5945_v50 = vld [vmem:[%s6541_s7 + $0x504] sm:$0xf]  ;;  %v5103_v23 = vld [vmem:[%s6541_s7 + $0x514] sm:$0xf0]  ;;  %v5946_v3 = vld [vmem:[%s6541_s7 + $0x50c] sm:$0xf] }
 0x2ea   : > { %v3666_v8 = vpop.f32.mrf.mxu0 }
 0x2eb   : > { %v3664_v10 = vadd.f32 %v3663_v5, %v3375_v7  ;;  %2838 = vmatmul.bf16.gmra.mxu1 %v5066_v18  ;;  %3127 = vmatmul.bf16.gmra.mxu2 %v5070_v42  ;;  %v5109_v18 = vld [vmem:[%s6541_s7 + $0x508] sm:$0xf]  ;;  %v5948_v42 = vld [vmem:[%s6541_s7 + $0x518] sm:$0xf0]  ;;  %v5117_v7 = vld [vmem:[%s6541_s7 + $0x510] sm:$0xf] }
 0x2ec   : > { %3416 = vmatmul.bf16.gmra.mxu3 %v5074_v38 }
 0x2ed   : > { %5757 = vmatmul.msk.bf16.gmra.mxu0 %vm2218_vm1, %v5078_v35  ;;  %vm3879_vm15 = vcmp.ge.f32.partialorder %v3664_v10, 0.0  ;;  %v3991_v31 = vmul.f32 0.01, %v3664_v10  ;;  %v5111_v35 = vld [vmem:[%s6541_s7 + $0x51c] sm:$0xf0] }
 0x2ee   : > { %v3088_v16 = vpop.f32.mrf.mxu2 }
 0x2ef   : > { %v4103_v36 = vsel %vm3879_vm15, %v3664_v10, %v3991_v31  ;;  %v3089_v37 = vadd.f32 %v3088_v16, %v2800_v61  ;;  %v3377_v28 = vpop.f32.mrf.mxu3  ;;  %v5106_v31 = vor.u32 %v5945_v50, %v5103_v23  ;;  %v5110_v61 = vor.u32 %v5948_v42, %v5109_v18 }
 0x2f0   : > { %v6210_v0 = vpack.c.bf16 %v4103_v36, %v4102_v52  ;;  %v2801_v29 = vpop.f32.mrf.mxu1  ;;  %v5114_v52 = vor.u32 %v5946_v3, %v5111_v35 }
 0x2f1   : > { %v3378_v46 = vadd.f32 %v3377_v28, %v3089_v37  ;;  %v2802_v20 = vadd.f32 %v2801_v29, %v2513_v21 }
 0x2f2   : > { %v3668_v62 = vpop.f32.mrf.mxu0  ;;  %6402 = vst [vmem:[%s7074_s27 + $0xa8] sm:$0xff] %v6210_v0   ;;  %v7875_v0 = vld [vmem:[#allocation52_spill] sm:$0xff] }
 0x2f3   : > { %v3667_v32 = vadd.f32 %v3666_v8, %v3378_v46  ;;  %v5949_v8 = vld [vmem:[%s6541_s7 + $0x520] sm:$0xf0]  ;;  %v2521_v29 = vadd.f32 %v7234_v33, %v7875_v0 }
 0x2f4   : > { %v5118_v36 = vor.u32 %v5949_v8, %v5117_v7  ;;  %v7878_v8 = vld [vmem:[#allocation61_spill] sm:$0xff] }
 0x2f5   : > { %v3992_v5 = vmul.f32 0.01, %v3667_v32  ;;  %vm3880_vm0 = vcmp.ge.f32.partialorder %v3667_v32, 0.0 }
 0x2f6   : > { %v3090_v11 = vpop.f32.mrf.mxu2 }
 0x2f7   : > { %v3091_v54 = vadd.f32 %v3090_v11, %v2802_v20  ;;  %v3379_v13 = vpop.f32.mrf.mxu3  ;;  %v4104_v4 = vsel %vm3880_vm0, %v3667_v32, %v3992_v5  ;;  %v2523_v11 = vadd.f32 %v7234_v33, %v7876_v25 }
 0x2f8   : > { %v2804_v39 = vpop.f32.mrf.mxu1 }
 0x2f9   : > { %v3380_v26 = vadd.f32 %v3379_v13, %v3091_v54  ;;  %v2805_v56 = vadd.f32 %v2804_v39, %v2516_v57  ;;  %v5950_v54 = vld [vmem:[%s6541_s7 + $0x52c] sm:$0xf]  ;;  %v5123_v13 = vld [vmem:[%s6541_s7 + $0x53c] sm:$0xf0]  ;;  %v5951_v39 = vld [vmem:[%s6541_s7 + $0x534] sm:$0xf] }
 0x2fa   : > { %v3671_v40 = vpop.f32.mrf.mxu0 }
 0x2fb   : > { %v3669_v55 = vadd.f32 %v3668_v62, %v3380_v26  ;;  %2843 = vmatmul.bf16.gmra.mxu1 %v5086_v14  ;;  %3132 = vmatmul.bf16.gmra.mxu2 %v5090_v41  ;;  %v5129_v14 = vld [vmem:[%s6541_s7 + $0x530] sm:$0xf]  ;;  %v5953_v41 = vld [vmem:[%s6541_s7 + $0x540] sm:$0xf0]  ;;  %v5137_v26 = vld [vmem:[%s6541_s7 + $0x538] sm:$0xf] }
 0x2fc   : > { %3421 = vmatmul.bf16.gmra.mxu3 %v5094_v15 }
 0x2fd   : > { %5758 = vmatmul.msk.bf16.gmra.mxu0 %vm2218_vm1, %v5098_v30  ;;  %vm3881_vm2 = vcmp.ge.f32.partialorder %v3669_v55, 0.0  ;;  %v3993_v27 = vmul.f32 0.01, %v3669_v55  ;;  %v5131_v30 = vld [vmem:[%s6541_s7 + $0x544] sm:$0xf0] }
 0x2fe   : > { %v3093_v12 = vpop.f32.mrf.mxu2 }
 0x2ff   : > { %v4105_v47 = vsel %vm3881_vm2, %v3669_v55, %v3993_v27  ;;  %v3094_v19 = vadd.f32 %v3093_v12, %v2805_v56  ;;  %v3382_v17 = vpop.f32.mrf.mxu3  ;;  %v5126_v27 = vor.u32 %v5950_v54, %v5123_v13  ;;  %v5130_v56 = vor.u32 %v5953_v41, %v5129_v14 }
 0x300   : > { %v6215_v6 = vpack.c.bf16 %v4105_v47, %v4104_v4  ;;  %v2806_v9 = vpop.f32.mrf.mxu1  ;;  %v5134_v4 = vor.u32 %v5951_v39, %v5131_v30 }
 0x301   : > { %v3383_v1 = vadd.f32 %v3382_v17, %v3094_v19  ;;  %v2807_v38 = vadd.f32 %v2806_v9, %v2518_v60  ;;  %v7417_v17 = vld [vmem:[%s7789_s2] ss:$0 sm:$0xff] }
 0x302   : > { %v3673_v49 = vpop.f32.mrf.mxu0  ;;  %6403 = vst [vmem:[%s7074_s27 + $0xb0] sm:$0xff] %v6215_v6   ;;  %v7877_v6 = vld [vmem:[#allocation58_spill] sm:$0xff] }
 0x303   : > { %v3672_v63 = vadd.f32 %v3671_v40, %v3383_v1  ;;  %v5954_v40 = vld [vmem:[%s6541_s7 + $0x548] sm:$0xf0]  ;;  %v2526_v9 = vadd.f32 %v7417_v17, %v7877_v6 }
 0x304   : > { %v5138_v47 = vor.u32 %v5954_v40, %v5137_v26  ;;  %v7880_v40 = vld [vmem:[#allocation67_spill] sm:$0xff] }
 0x305   : > { %v3994_v62 = vmul.f32 0.01, %v3672_v63  ;;  %vm3882_vm3 = vcmp.ge.f32.partialorder %v3672_v63, 0.0 }
 0x306   : > { %v3095_v44 = vpop.f32.mrf.mxu2 }
 0x307   : > { %v3096_v34 = vadd.f32 %v3095_v44, %v2807_v38  ;;  %v3384_v10 = vpop.f32.mrf.mxu3  ;;  %v4106_v53 = vsel %vm3882_vm3, %v3672_v63, %v3994_v62  ;;  %v2528_v44 = vadd.f32 %v7417_v17, %v7878_v8 }
 0x308   : > { %v2809_v16 = vpop.f32.mrf.mxu1 }
 0x309   : > { %v3385_v37 = vadd.f32 %v3384_v10, %v3096_v34  ;;  %v2810_v46 = vadd.f32 %v2809_v16, %v2521_v29  ;;  %v5955_v34 = vld [vmem:[%s6541_s7 + $0x554] sm:$0xf]  ;;  %v5143_v10 = vld [vmem:[%s6541_s7 + $0x564] sm:$0xf0]  ;;  %v5956_v16 = vld [vmem:[%s6541_s7 + $0x55c] sm:$0xf] }
 0x30a   : > { %v3676_v28 = vpop.f32.mrf.mxu0 }
 0x30b   : > { %v3674_v22 = vadd.f32 %v3673_v49, %v3385_v37  ;;  %2848 = vmatmul.bf16.gmra.mxu1 %v5106_v31  ;;  %3137 = vmatmul.bf16.gmra.mxu2 %v5110_v61  ;;  %v5149_v31 = vld [vmem:[%s6541_s7 + $0x558] sm:$0xf]  ;;  %v5958_v61 = vld [vmem:[%s6541_s7 + $0x568] sm:$0xf0]  ;;  %v5157_v37 = vld [vmem:[%s6541_s7 + $0x560] sm:$0xf] }
 0x30c   : > { %3426 = vmatmul.bf16.gmra.mxu3 %v5114_v52 }
 0x30d   : > { %5759 = vmatmul.msk.bf16.gmra.mxu0 %vm2218_vm1, %v5118_v36  ;;  %vm3883_vm4 = vcmp.ge.f32.partialorder %v3674_v22, 0.0  ;;  %v3995_v21 = vmul.f32 0.01, %v3674_v22  ;;  %v5151_v36 = vld [vmem:[%s6541_s7 + $0x56c] sm:$0xf0] }
 0x30e   : > { %v3098_v51 = vpop.f32.mrf.mxu2 }
 0x30f   : > { %v4107_v48 = vsel %vm3883_vm4, %v3674_v22, %v3995_v21  ;;  %v3099_v58 = vadd.f32 %v3098_v51, %v2810_v46  ;;  %v3387_v43 = vpop.f32.mrf.mxu3  ;;  %v5146_v21 = vor.u32 %v5955_v34, %v5143_v10  ;;  %v5150_v46 = vor.u32 %v5958_v61, %v5149_v31 }
 0x310   : > { %v6220_v20 = vpack.c.bf16 %v4107_v48, %v4106_v53  ;;  %v2811_v24 = vpop.f32.mrf.mxu1  ;;  %v5154_v53 = vor.u32 %v5956_v16, %v5151_v36 }
 0x311   : > { %v3388_v32 = vadd.f32 %v3387_v43, %v3099_v58  ;;  %v2812_v15 = vadd.f32 %v2811_v24, %v2523_v11 }
 0x312   : > { %v3678_v59 = vpop.f32.mrf.mxu0  ;;  %6404 = vst [vmem:[%s7074_s27 + $0xb8] sm:$0xff] %v6220_v20   ;;  %v7879_v20 = vld [vmem:[#allocation64_spill] sm:$0xff] }
 0x313   : > { %v3677_v57 = vadd.f32 %v3676_v28, %v3388_v32  ;;  %v5959_v28 = vld [vmem:[%s6541_s7 + $0x570] sm:$0xf0]  ;;  %v2531_v24 = vadd.f32 %v7417_v17, %v7879_v20 }
 0x314   : > { %v5158_v48 = vor.u32 %v5959_v28, %v5157_v37  ;;  %v7882_v28 = vld [vmem:[#allocation73_spill] sm:$0xff] }
 0x315   : > { %v3996_v49 = vmul.f32 0.01, %v3677_v57  ;;  %vm3884_vm5 = vcmp.ge.f32.partialorder %v3677_v57, 0.0 }
 0x316   : > { %v3100_v45 = vpop.f32.mrf.mxu2 }
 0x317   : > { %v3101_v5 = vadd.f32 %v3100_v45, %v2812_v15  ;;  %v3389_v55 = vpop.f32.mrf.mxu3  ;;  %v4108_v23 = vsel %vm3884_vm5, %v3677_v57, %v3996_v49  ;;  %v2533_v45 = vadd.f32 %v7417_v17, %v7880_v40 }
 0x318   : > { %v2814_v12 = vpop.f32.mrf.mxu1 }
 0x319   : > { %v3390_v33 = vadd.f32 %v3389_v55, %v3101_v5  ;;  %v2815_v1 = vadd.f32 %v2814_v12, %v2526_v9  ;;  %v5960_v5 = vld [vmem:[%s6541_s7 + $0x57c] sm:$0xf]  ;;  %v5163_v55 = vld [vmem:[%s6541_s7 + $0x58c] sm:$0xf0]  ;;  %v5961_v12 = vld [vmem:[%s6541_s7 + $0x584] sm:$0xf] }
 0x31a   : > { %v3681_v19 = vpop.f32.mrf.mxu0 }
 0x31b   : > { %v3679_v2 = vadd.f32 %v3678_v59, %v3390_v33  ;;  %2853 = vmatmul.bf16.gmra.mxu1 %v5126_v27  ;;  %3142 = vmatmul.bf16.gmra.mxu2 %v5130_v56  ;;  %v5169_v27 = vld [vmem:[%s6541_s7 + $0x580] sm:$0xf]  ;;  %v5963_v56 = vld [vmem:[%s6541_s7 + $0x590] sm:$0xf0]  ;;  %v5177_v33 = vld [vmem:[%s6541_s7 + $0x588] sm:$0xf] }
 0x31c   : > { %3431 = vmatmul.bf16.gmra.mxu3 %v5134_v4 }
 0x31d   : > { %5760 = vmatmul.msk.bf16.gmra.mxu0 %vm2218_vm1, %v5138_v47  ;;  %vm3885_vm6 = vcmp.ge.f32.partialorder %v3679_v2, 0.0  ;;  %v3997_v60 = vmul.f32 0.01, %v3679_v2  ;;  %v5171_v47 = vld [vmem:[%s6541_s7 + $0x594] sm:$0xf0] }
 0x31e   : > { %v3103_v50 = vpop.f32.mrf.mxu2 }
 0x31f   : > { %v4109_v18 = vsel %vm3885_vm6, %v3679_v2, %v3997_v60  ;;  %v3104_v42 = vadd.f32 %v3103_v50, %v2815_v1  ;;  %v3392_v3 = vpop.f32.mrf.mxu3  ;;  %v5166_v60 = vor.u32 %v5960_v5, %v5163_v55  ;;  %v5170_v1 = vor.u32 %v5963_v56, %v5169_v27 }
 0x320   : > { %v6225_v38 = vpack.c.bf16 %v4109_v18, %v4108_v23  ;;  %v2816_v35 = vpop.f32.mrf.mxu1  ;;  %v5174_v23 = vor.u32 %v5961_v12, %v5171_v47 }
 0x321   : > { %v3393_v63 = vadd.f32 %v3392_v3, %v3104_v42  ;;  %v2817_v52 = vadd.f32 %v2816_v35, %v2528_v44 }
 0x322   : > { %v3683_v7 = vpop.f32.mrf.mxu0  ;;  %6405 = vst [vmem:[%s7074_s27 + $0xc0] sm:$0xff] %v6225_v38   ;;  %v7881_v38 = vld [vmem:[#allocation70_spill] sm:$0xff] }
 0x323   : > { %v3682_v29 = vadd.f32 %v3681_v19, %v3393_v63  ;;  %v5964_v19 = vld [vmem:[%s6541_s7 + $0x598] sm:$0xf0]  ;;  %v2536_v35 = vadd.f32 %v7417_v17, %v7881_v38 }
 0x324   : > { %v5178_v18 = vor.u32 %v5964_v19, %v5177_v33  ;;  %v7884_v19 = vld [vmem:[#allocation4_spill] sm:$0xff] }
 0x325   : > { %v3998_v59 = vmul.f32 0.01, %v3682_v29  ;;  %vm3886_vm7 = vcmp.ge.f32.partialorder %v3682_v29, 0.0 }
 0x326   : > { %v3105_v0 = vpop.f32.mrf.mxu2 }
 0x327   : > { %v3106_v62 = vadd.f32 %v3105_v0, %v2817_v52  ;;  %v3394_v22 = vpop.f32.mrf.mxu3  ;;  %v4110_v13 = vsel %vm3886_vm7, %v3682_v29, %v3998_v59  ;;  %v2538_v0 = vadd.f32 %v7417_v17, %v7882_v28 }
 0x328   : > { %v2819_v51 = vpop.f32.mrf.mxu1 }
 0x329   : > { %v3395_v58 = vadd.f32 %v3394_v22, %v3106_v62  ;;  %v2820_v32 = vadd.f32 %v2819_v51, %v2531_v24  ;;  %v5965_v62 = vld [vmem:[%s6541_s7 + $0x5a4] sm:$0xf]  ;;  %v5183_v22 = vld [vmem:[%s6541_s7 + $0x5b4] sm:$0xf0]  ;;  %v5966_v51 = vld [vmem:[%s6541_s7 + $0x5ac] sm:$0xf] }
 0x32a   : > { %v3686_v43 = vpop.f32.mrf.mxu0 }
 0x32b   : > { %v3684_v25 = vadd.f32 %v3683_v7, %v3395_v58  ;;  %2858 = vmatmul.bf16.gmra.mxu1 %v5146_v21  ;;  %3147 = vmatmul.bf16.gmra.mxu2 %v5150_v46  ;;  %v5189_v21 = vld [vmem:[%s6541_s7 + $0x5a8] sm:$0xf]  ;;  %v5968_v46 = vld [vmem:[%s6541_s7 + $0x5b8] sm:$0xf0]  ;;  %v5197_v58 = vld [vmem:[%s6541_s7 + $0x5b0] sm:$0xf] }
 0x32c   : > { %3436 = vmatmul.bf16.gmra.mxu3 %v5154_v53 }
 0x32d   : > { %5761 = vmatmul.msk.bf16.gmra.mxu0 %vm2218_vm1, %v5158_v48  ;;  %vm3887_vm8 = vcmp.ge.f32.partialorder %v3684_v25, 0.0  ;;  %v3999_v11 = vmul.f32 0.01, %v3684_v25  ;;  %v5191_v48 = vld [vmem:[%s6541_s7 + $0x5bc] sm:$0xf0] }
 0x32e   : > { %v3108_v54 = vpop.f32.mrf.mxu2 }
 0x32f   : > { %v4111_v14 = vsel %vm3887_vm8, %v3684_v25, %v3999_v11  ;;  %v3109_v41 = vadd.f32 %v3108_v54, %v2820_v32  ;;  %v3397_v39 = vpop.f32.mrf.mxu3  ;;  %v5186_v11 = vor.u32 %v5965_v62, %v5183_v22  ;;  %v5190_v32 = vor.u32 %v5968_v46, %v5189_v21 }
 0x330   : > { %v6230_v15 = vpack.c.bf16 %v4111_v14, %v4110_v13  ;;  %v2821_v30 = vpop.f32.mrf.mxu1  ;;  %v5194_v13 = vor.u32 %v5966_v51, %v5191_v48 }
 0x331   : > { %v3398_v57 = vadd.f32 %v3397_v39, %v3109_v41  ;;  %v2822_v4 = vadd.f32 %v2821_v30, %v2533_v45 }
 0x332   : > { %v3688_v26 = vpop.f32.mrf.mxu0  ;;  %6406 = vst [vmem:[%s7074_s27 + $0xc8] sm:$0xff] %v6230_v15   ;;  %v7883_v15 = vld [vmem:[#allocation2_spill] sm:$0xff] }
 0x333   : > { %v3687_v9 = vadd.f32 %v3686_v43, %v3398_v57  ;;  %v5969_v43 = vld [vmem:[%s6541_s7 + $0x5c0] sm:$0xf0]  ;;  %v2541_v30 = vadd.f32 %v7417_v17, %v7883_v15 }
 0x334   : > { %v5198_v14 = vor.u32 %v5969_v43, %v5197_v58  ;;  %v7886_v43 = vld [vmem:[#allocation8_spill] sm:$0xff] }
 0x335   : > { %v4000_v7 = vmul.f32 0.01, %v3687_v9  ;;  %vm3888_vm9 = vcmp.ge.f32.partialorder %v3687_v9, 0.0 }
 0x336   : > { %v3110_v6 = vpop.f32.mrf.mxu2 }
 0x337   : > { %v3111_v49 = vadd.f32 %v3110_v6, %v2822_v4  ;;  %v3399_v2 = vpop.f32.mrf.mxu3  ;;  %v4112_v10 = vsel %vm3888_vm9, %v3687_v9, %v4000_v7  ;;  %v2543_v6 = vadd.f32 %v7417_v17, %v7884_v19 }
 0x338   : > { %v2824_v50 = vpop.f32.mrf.mxu1 }
 0x339   : > { %v3400_v42 = vadd.f32 %v3399_v2, %v3111_v49  ;;  %v2825_v63 = vadd.f32 %v2824_v50, %v2536_v35  ;;  %v5970_v49 = vld [vmem:[%s6541_s7 + $0x5cc] sm:$0xf]  ;;  %v5203_v2 = vld [vmem:[%s6541_s7 + $0x5dc] sm:$0xf0]  ;;  %v5971_v50 = vld [vmem:[%s6541_s7 + $0x5d4] sm:$0xf] }
 0x33a   : > { %v3691_v3 = vpop.f32.mrf.mxu0 }
 0x33b   : > { %v3689_v8 = vadd.f32 %v3688_v26, %v3400_v42  ;;  %2863 = vmatmul.bf16.gmra.mxu1 %v5166_v60  ;;  %3152 = vmatmul.bf16.gmra.mxu2 %v5170_v1  ;;  %v5209_v60 = vld [vmem:[%s6541_s7 + $0x5d0] sm:$0xf]  ;;  %v5973_v1 = vld [vmem:[%s6541_s7 + $0x5e0] sm:$0xf0]  ;;  %v5217_v42 = vld [vmem:[%s6541_s7 + $0x5d8] sm:$0xf] }
 0x33c   : > { %3441 = vmatmul.bf16.gmra.mxu3 %v5174_v23 }
 0x33d   : > { %5762 = vmatmul.msk.bf16.gmra.mxu0 %vm2218_vm1, %v5178_v18  ;;  %vm3889_vm10 = vcmp.ge.f32.partialorder %v3689_v8, 0.0  ;;  %v4001_v44 = vmul.f32 0.01, %v3689_v8  ;;  %v5211_v18 = vld [vmem:[%s6541_s7 + $0x5e4] sm:$0xf0] }
 0x33e   : > { %v3113_v34 = vpop.f32.mrf.mxu2 }
 0x33f   : > { %v4113_v31 = vsel %vm3889_vm10, %v3689_v8, %v4001_v44  ;;  %v3114_v61 = vadd.f32 %v3113_v34, %v2825_v63  ;;  %v3402_v16 = vpop.f32.mrf.mxu3  ;;  %v5206_v44 = vor.u32 %v5970_v49, %v5203_v2  ;;  %v5210_v63 = vor.u32 %v5973_v1, %v5209_v60 }
 0x340   : > { %v6235_v52 = vpack.c.bf16 %v4113_v31, %v4112_v10  ;;  %v2826_v36 = vpop.f32.mrf.mxu1  ;;  %v5214_v10 = vor.u32 %v5971_v50, %v5211_v18 }
 0x341   : > { %v3403_v29 = vadd.f32 %v3402_v16, %v3114_v61  ;;  %v2827_v53 = vadd.f32 %v2826_v36, %v2538_v0 }
 0x342   : > { %v3693_v37 = vpop.f32.mrf.mxu0  ;;  %6407 = vst [vmem:[%s7074_s27 + $0xd0] sm:$0xff] %v6235_v52   ;;  %v7885_v52 = vld [vmem:[#allocation6_spill] sm:$0xff] }
 0x343   : > { %v3692_v24 = vadd.f32 %v3691_v3, %v3403_v29  ;;  %v5974_v3 = vld [vmem:[%s6541_s7 + $0x5e8] sm:$0xf0]  ;;  %v2546_v36 = vadd.f32 %v7417_v17, %v7885_v52 }
 0x344   : > { %v5218_v31 = vor.u32 %v5974_v3, %v5217_v42  ;;  %v7888_v3 = vld [vmem:[#allocation12_spill] sm:$0xff] }
 0x345   : > { %v4002_v26 = vmul.f32 0.01, %v3692_v24  ;;  %vm3890_vm11 = vcmp.ge.f32.partialorder %v3692_v24, 0.0 }
 0x346   : > { %v3115_v20 = vpop.f32.mrf.mxu2 }
 0x347   : > { %v3116_v59 = vadd.f32 %v3115_v20, %v2827_v53  ;;  %v3404_v25 = vpop.f32.mrf.mxu3  ;;  %v4114_v55 = vsel %vm3890_vm11, %v3692_v24, %v4002_v26  ;;  %v2548_v20 = vadd.f32 %v7417_v17, %v7886_v43 }
 0x348   : > { %v2829_v54 = vpop.f32.mrf.mxu1 }
 0x349   : > { %v3405_v41 = vadd.f32 %v3404_v25, %v3116_v59  ;;  %v2830_v57 = vadd.f32 %v2829_v54, %v2541_v30  ;;  %v5975_v59 = vld [vmem:[%s6541_s7 + $0x5f4] sm:$0xf]  ;;  %v5223_v25 = vld [vmem:[%s6541_s7 + $0x604] sm:$0xf0]  ;;  %v5976_v54 = vld [vmem:[%s6541_s7 + $0x5fc] sm:$0xf] }
 0x34a   : > { %v3696_v39 = vpop.f32.mrf.mxu0 }
 0x34b   : > { %v3694_v40 = vadd.f32 %v3693_v37, %v3405_v41  ;;  %2868 = vmatmul.bf16.gmra.mxu1 %v5186_v11  ;;  %3157 = vmatmul.bf16.gmra.mxu2 %v5190_v32  ;;  %v5229_v11 = vld [vmem:[%s6541_s7 + $0x5f8] sm:$0xf]  ;;  %v5978_v32 = vld [vmem:[%s6541_s7 + $0x608] sm:$0xf0]  ;;  %v5237_v41 = vld [vmem:[%s6541_s7 + $0x600] sm:$0xf] }
 0x34c   : > { %3446 = vmatmul.bf16.gmra.mxu3 %v5194_v13 }
 0x34d   : > { %5763 = vmatmul.msk.bf16.gmra.mxu0 %vm2218_vm1, %v5198_v14  ;;  %vm3891_vm12 = vcmp.ge.f32.partialorder %v3694_v40, 0.0  ;;  %v4003_v45 = vmul.f32 0.01, %v3694_v40  ;;  %v5231_v14 = vld [vmem:[%s6541_s7 + $0x60c] sm:$0xf0] }
 0x34e   : > { %v3118_v5 = vpop.f32.mrf.mxu2 }
 0x34f   : > { %v4115_v27 = vsel %vm3891_vm12, %v3694_v40, %v4003_v45  ;;  %v3119_v56 = vadd.f32 %v3118_v5, %v2830_v57  ;;  %v3407_v12 = vpop.f32.mrf.mxu3  ;;  %v5226_v45 = vor.u32 %v5975_v59, %v5223_v25  ;;  %v5230_v57 = vor.u32 %v5978_v32, %v5229_v11 }
 0x350   : > { %v6240_v4 = vpack.c.bf16 %v4115_v27, %v4114_v55  ;;  %v2831_v47 = vpop.f32.mrf.mxu1  ;;  %v5234_v55 = vor.u32 %v5976_v54, %v5231_v14 }
 0x351   : > { %v3408_v9 = vadd.f32 %v3407_v12, %v3119_v56  ;;  %v2832_v23 = vadd.f32 %v2831_v47, %v2543_v6 }
 0x352   : > { %v3698_v33 = vpop.f32.mrf.mxu0  ;;  %6408 = vst [vmem:[%s7074_s27 + $0xd8] sm:$0xff] %v6240_v4   ;;  %v7887_v4 = vld [vmem:[#allocation10_spill] sm:$0xff] }
 0x353   : > { %v3697_v35 = vadd.f32 %v3696_v39, %v3408_v9  ;;  %v5979_v39 = vld [vmem:[%s6541_s7 + $0x610] sm:$0xf0]  ;;  %v2551_v47 = vadd.f32 %v7417_v17, %v7887_v4 }
 0x354   : > { %v5238_v27 = vor.u32 %v5979_v39, %v5237_v41  ;;  %v7890_v39 = vld [vmem:[#allocation16_spill] sm:$0xff] }
 0x355   : > { %v4004_v37 = vmul.f32 0.01, %v3697_v35  ;;  %vm3892_vm13 = vcmp.ge.f32.partialorder %v3697_v35, 0.0 }
 0x356   : > { %v3120_v38 = vpop.f32.mrf.mxu2 }
 0x357   : > { %v3121_v7 = vadd.f32 %v3120_v38, %v2832_v23  ;;  %v3409_v8 = vpop.f32.mrf.mxu3  ;;  %v4116_v22 = vsel %vm3892_vm13, %v3697_v35, %v4004_v37  ;;  %v2553_v38 = vadd.f32 %v7417_v17, %v7888_v3 }
 0x358   : > { %v2834_v34 = vpop.f32.mrf.mxu1 }
 0x359   : > { %v3410_v61 = vadd.f32 %v3409_v8, %v3121_v7  ;;  %v2835_v29 = vadd.f32 %v2834_v34, %v2546_v36  ;;  %v5980_v7 = vld [vmem:[%s6541_s7 + $0x61c] sm:$0xf]  ;;  %v5243_v8 = vld [vmem:[%s6541_s7 + $0x62c] sm:$0xf0]  ;;  %v5981_v34 = vld [vmem:[%s6541_s7 + $0x624] sm:$0xf] }
 0x35a   : > { %v3701_v16 = vpop.f32.mrf.mxu0 }
 0x35b   : > { %v3699_v28 = vadd.f32 %v3698_v33, %v3410_v61  ;;  %2873 = vmatmul.bf16.gmra.mxu1 %v5206_v44  ;;  %3162 = vmatmul.bf16.gmra.mxu2 %v5210_v63  ;;  %v5249_v44 = vld [vmem:[%s6541_s7 + $0x620] sm:$0xf]  ;;  %v5983_v63 = vld [vmem:[%s6541_s7 + $0x630] sm:$0xf0]  ;;  %v5257_v61 = vld [vmem:[%s6541_s7 + $0x628] sm:$0xf] }
 0x35c   : > { %3451 = vmatmul.bf16.gmra.mxu3 %v5214_v10 }
 0x35d   : > { %5764 = vmatmul.msk.bf16.gmra.mxu0 %vm2218_vm1, %v5218_v31  ;;  %vm3893_vm14 = vcmp.ge.f32.partialorder %v3699_v28, 0.0  ;;  %v4005_v0 = vmul.f32 0.01, %v3699_v28  ;;  %v5251_v31 = vld [vmem:[%s6541_s7 + $0x634] sm:$0xf0] }
 0x35e   : > { %v3123_v62 = vpop.f32.mrf.mxu2 }
 0x35f   : > { %v4117_v21 = vsel %vm3893_vm14, %v3699_v28, %v4005_v0  ;;  %v3124_v46 = vadd.f32 %v3123_v62, %v2835_v29  ;;  %v3412_v51 = vpop.f32.mrf.mxu3  ;;  %v5246_v0 = vor.u32 %v5980_v7, %v5243_v8  ;;  %v5250_v29 = vor.u32 %v5983_v63, %v5249_v44 }
 0x360   : > { %v6245_v53 = vpack.c.bf16 %v4117_v21, %v4116_v22  ;;  %v2836_v48 = vpop.f32.mrf.mxu1  ;;  %v5254_v22 = vor.u32 %v5981_v34, %v5251_v31 }
 0x361   : > { %v3413_v24 = vadd.f32 %v3412_v51, %v3124_v46  ;;  %v2837_v13 = vadd.f32 %v2836_v48, %v2548_v20 }
 0x362   : > { %v3703_v58 = vpop.f32.mrf.mxu0  ;;  %6409 = vst [vmem:[%s7074_s27 + $0xe0] sm:$0xff] %v6245_v53   ;;  %v7889_v53 = vld [vmem:[#allocation14_spill] sm:$0xff] }
 0x363   : > { %v3702_v30 = vadd.f32 %v3701_v16, %v3413_v24  ;;  %v5984_v16 = vld [vmem:[%s6541_s7 + $0x638] sm:$0xf0]  ;;  %v2556_v48 = vadd.f32 %v7417_v17, %v7889_v53 }
 0x364   : > { %v5258_v21 = vor.u32 %v5984_v16, %v5257_v61  ;;  %v7892_v16 = vld [vmem:[#allocation20_spill] sm:$0xff] }
 0x365   : > { %v4006_v33 = vmul.f32 0.01, %v3702_v30  ;;  %vm3894_vm15 = vcmp.ge.f32.partialorder %v3702_v30, 0.0 }
 0x366   : > { %v3125_v15 = vpop.f32.mrf.mxu2 }
 0x367   : > { %v3126_v26 = vadd.f32 %v3125_v15, %v2837_v13  ;;  %v3414_v40 = vpop.f32.mrf.mxu3  ;;  %v4118_v2 = vsel %vm3894_vm15, %v3702_v30, %v4006_v33  ;;  %v2558_v15 = vadd.f32 %v7417_v17, %v7890_v39 }
 0x368   : > { %v2839_v5 = vpop.f32.mrf.mxu1 }
 0x369   : > { %v3415_v56 = vadd.f32 %v3414_v40, %v3126_v26  ;;  %v2840_v9 = vadd.f32 %v2839_v5, %v2551_v47  ;;  %v5985_v26 = vld [vmem:[%s6541_s7 + $0x644] sm:$0xf]  ;;  %v5263_v40 = vld [vmem:[%s6541_s7 + $0x654] sm:$0xf0]  ;;  %v5986_v5 = vld [vmem:[%s6541_s7 + $0x64c] sm:$0xf] }
 0x36a   : > { %v3706_v12 = vpop.f32.mrf.mxu0 }
 0x36b   : > { %v3704_v19 = vadd.f32 %v3703_v58, %v3415_v56  ;;  %2878 = vmatmul.bf16.gmra.mxu1 %v5226_v45  ;;  %3167 = vmatmul.bf16.gmra.mxu2 %v5230_v57  ;;  %v5269_v45 = vld [vmem:[%s6541_s7 + $0x648] sm:$0xf]  ;;  %v5988_v57 = vld [vmem:[%s6541_s7 + $0x658] sm:$0xf0]  ;;  %v5277_v56 = vld [vmem:[%s6541_s7 + $0x650] sm:$0xf] }
 0x36c   : > { %3456 = vmatmul.bf16.gmra.mxu3 %v5234_v55 }
 0x36d   : > { %5765 = vmatmul.msk.bf16.gmra.mxu0 %vm2218_vm1, %v5238_v27  ;;  %vm3895_vm0 = vcmp.ge.f32.partialorder %v3704_v19, 0.0  ;;  %v4007_v6 = vmul.f32 0.01, %v3704_v19  ;;  %v5271_v27 = vld [vmem:[%s6541_s7 + $0x65c] sm:$0xf0] }
 0x36e   : > { %v3128_v49 = vpop.f32.mrf.mxu2 }
 0x36f   : > { %v4119_v60 = vsel %vm3895_vm0, %v3704_v19, %v4007_v6  ;;  %v3129_v1 = vadd.f32 %v3128_v49, %v2840_v9  ;;  %v3417_v50 = vpop.f32.mrf.mxu3  ;;  %v5266_v6 = vor.u32 %v5985_v26, %v5263_v40  ;;  %v5270_v9 = vor.u32 %v5988_v57, %v5269_v45 }
 0x370   : > { %v6250_v23 = vpack.c.bf16 %v4119_v60, %v4118_v2  ;;  %v2841_v18 = vpop.f32.mrf.mxu1  ;;  %v5274_v2 = vor.u32 %v5986_v5, %v5271_v27 }
 0x371   : > { %v3418_v35 = vadd.f32 %v3417_v50, %v3129_v1  ;;  %v2842_v10 = vadd.f32 %v2841_v18, %v2553_v38 }
 0x372   : > { %v3708_v42 = vpop.f32.mrf.mxu0  ;;  %6410 = vst [vmem:[%s7074_s27 + $0xe8] sm:$0xff] %v6250_v23   ;;  %v7891_v23 = vld [vmem:[#allocation18_spill] sm:$0xff] }
 0x373   : > { %v3707_v36 = vadd.f32 %v3706_v12, %v3418_v35  ;;  %v5989_v12 = vld [vmem:[%s6541_s7 + $0x660] sm:$0xf0]  ;;  %v2561_v18 = vadd.f32 %v7417_v17, %v7891_v23 }
 0x374   : > { %v5278_v60 = vor.u32 %v5989_v12, %v5277_v56  ;;  %v7894_v12 = vld [vmem:[#allocation26_spill] sm:$0xff] }
 0x375   : > { %v4008_v58 = vmul.f32 0.01, %v3707_v36  ;;  %vm3896_vm2 = vcmp.ge.f32.partialorder %v3707_v36, 0.0 }
 0x376   : > { %v3130_v52 = vpop.f32.mrf.mxu2 }
 0x377   : > { %v3131_v37 = vadd.f32 %v3130_v52, %v2842_v10  ;;  %v3419_v28 = vpop.f32.mrf.mxu3  ;;  %v4120_v25 = vsel %vm3896_vm2, %v3707_v36, %v4008_v58  ;;  %v2563_v52 = vadd.f32 %v7417_v17, %v7892_v16 }
 0x378   : > { %v2844_v62 = vpop.f32.mrf.mxu1 }
 0x379   : > { %v3420_v46 = vadd.f32 %v3419_v28, %v3131_v37  ;;  %v2845_v24 = vadd.f32 %v2844_v62, %v2556_v48  ;;  %v5990_v37 = vld [vmem:[%s6541_s7 + $0x66c] sm:$0xf]  ;;  %v5283_v28 = vld [vmem:[%s6541_s7 + $0x67c] sm:$0xf0]  ;;  %v5991_v62 = vld [vmem:[%s6541_s7 + $0x674] sm:$0xf] }
 0x37a   : > { %v3711_v51 = vpop.f32.mrf.mxu0 }
 0x37b   : > { %v3709_v43 = vadd.f32 %v3708_v42, %v3420_v46  ;;  %2883 = vmatmul.bf16.gmra.mxu1 %v5246_v0  ;;  %3172 = vmatmul.bf16.gmra.mxu2 %v5250_v29  ;;  %v5289_v0 = vld [vmem:[%s6541_s7 + $0x670] sm:$0xf]  ;;  %v5993_v29 = vld [vmem:[%s6541_s7 + $0x680] sm:$0xf0]  ;;  %v5297_v46 = vld [vmem:[%s6541_s7 + $0x678] sm:$0xf] }
 0x37c   : > { %3461 = vmatmul.bf16.gmra.mxu3 %v5254_v22 }
 0x37d   : > { %5766 = vmatmul.msk.bf16.gmra.mxu0 %vm2218_vm1, %v5258_v21  ;;  %vm3897_vm3 = vcmp.ge.f32.partialorder %v3709_v43, 0.0  ;;  %v4009_v20 = vmul.f32 0.01, %v3709_v43  ;;  %v5291_v21 = vld [vmem:[%s6541_s7 + $0x684] sm:$0xf0] }
 0x37e   : > { %v3133_v59 = vpop.f32.mrf.mxu2 }
 0x37f   : > { %v4121_v11 = vsel %vm3897_vm3, %v3709_v43, %v4009_v20  ;;  %v3134_v32 = vadd.f32 %v3133_v59, %v2845_v24  ;;  %v3422_v54 = vpop.f32.mrf.mxu3  ;;  %v5286_v20 = vor.u32 %v5990_v37, %v5283_v28  ;;  %v5290_v24 = vor.u32 %v5993_v29, %v5289_v0 }
 0x380   : > { %v6255_v13 = vpack.c.bf16 %v4121_v11, %v4120_v25  ;;  %v2846_v14 = vpop.f32.mrf.mxu1  ;;  %v5294_v25 = vor.u32 %v5991_v62, %v5291_v21 }
 0x381   : > { %v3423_v30 = vadd.f32 %v3422_v54, %v3134_v32  ;;  %v2847_v55 = vadd.f32 %v2846_v14, %v2558_v15 }
 0x382   : > { %v3713_v41 = vpop.f32.mrf.mxu0  ;;  %6411 = vst [vmem:[%s7074_s27 + $0xf0] sm:$0xff] %v6255_v13   ;;  %v7893_v13 = vld [vmem:[#allocation23_spill] sm:$0xff] }
 0x383   : > { %v3712_v47 = vadd.f32 %v3711_v51, %v3423_v30  ;;  %v5994_v51 = vld [vmem:[%s6541_s7 + $0x688] sm:$0xf0]  ;;  %v2566_v14 = vadd.f32 %v7417_v17, %v7893_v13 }
 0x384   : > { %v5298_v11 = vor.u32 %v5994_v51, %v5297_v46  ;;  %v7896_v51 = vld [vmem:[#allocation32_spill] sm:$0xff] }
 0x385   : > { %v4010_v42 = vmul.f32 0.01, %v3712_v47  ;;  %vm3898_vm4 = vcmp.ge.f32.partialorder %v3712_v47, 0.0 }
 0x386   : > { %v3135_v4 = vpop.f32.mrf.mxu2 }
 0x387   : > { %v3136_v33 = vadd.f32 %v3135_v4, %v2847_v55  ;;  %v3424_v19 = vpop.f32.mrf.mxu3  ;;  %v4122_v8 = vsel %vm3898_vm4, %v3712_v47, %v4010_v42  ;;  %v2568_v4 = vadd.f32 %v7417_v17, %v7894_v12 }
 0x388   : > { %v2849_v49 = vpop.f32.mrf.mxu1 }
 0x389   : > { %v3425_v1 = vadd.f32 %v3424_v19, %v3136_v33  ;;  %v2850_v35 = vadd.f32 %v2849_v49, %v2561_v18  ;;  %v5995_v33 = vld [vmem:[%s6541_s7 + $0x694] sm:$0xf]  ;;  %v5303_v19 = vld [vmem:[%s6541_s7 + $0x6a4] sm:$0xf0]  ;;  %v5996_v49 = vld [vmem:[%s6541_s7 + $0x69c] sm:$0xf] }
 0x38a   : > { %v3716_v50 = vpop.f32.mrf.mxu0 }
 0x38b   : > { %v3714_v3 = vadd.f32 %v3713_v41, %v3425_v1  ;;  %2888 = vmatmul.bf16.gmra.mxu1 %v5266_v6  ;;  %3177 = vmatmul.bf16.gmra.mxu2 %v5270_v9  ;;  %v5309_v6 = vld [vmem:[%s6541_s7 + $0x698] sm:$0xf]  ;;  %v5998_v9 = vld [vmem:[%s6541_s7 + $0x6a8] sm:$0xf0]  ;;  %v5317_v1 = vld [vmem:[%s6541_s7 + $0x6a0] sm:$0xf] }
 0x38c   : > { %3466 = vmatmul.bf16.gmra.mxu3 %v5274_v2 }
 0x38d   : > { %5767 = vmatmul.msk.bf16.gmra.mxu0 %vm2218_vm1, %v5278_v60  ;;  %vm3899_vm5 = vcmp.ge.f32.partialorder %v3714_v3, 0.0  ;;  %v4011_v38 = vmul.f32 0.01, %v3714_v3  ;;  %v5311_v60 = vld [vmem:[%s6541_s7 + $0x6ac] sm:$0xf0] }
 0x38e   : > { %v3138_v7 = vpop.f32.mrf.mxu2 }
 0x38f   : > { %v4123_v44 = vsel %vm3899_vm5, %v3714_v3, %v4011_v38  ;;  %v3139_v63 = vadd.f32 %v3138_v7, %v2850_v35  ;;  %v3427_v34 = vpop.f32.mrf.mxu3  ;;  %v5306_v38 = vor.u32 %v5995_v33, %v5303_v19  ;;  %v5310_v35 = vor.u32 %v5998_v9, %v5309_v6 }
 0x390   : > { %v6260_v10 = vpack.c.bf16 %v4123_v44, %v4122_v8  ;;  %v2851_v31 = vpop.f32.mrf.mxu1  ;;  %v5314_v8 = vor.u32 %v5996_v49, %v5311_v60 }
 0x391   : > { %v3428_v36 = vadd.f32 %v3427_v34, %v3139_v63  ;;  %v2852_v22 = vadd.f32 %v2851_v31, %v2563_v52 }
 0x392   : > { %v3718_v61 = vpop.f32.mrf.mxu0  ;;  %6412 = vst [vmem:[%s7074_s27 + $0xf8] sm:$0xff] %v6260_v10   ;;  %v7895_v10 = vld [vmem:[#allocation29_spill] sm:$0xff] }
 0x393   : > { %v3717_v48 = vadd.f32 %v3716_v50, %v3428_v36  ;;  %v5999_v50 = vld [vmem:[%s6541_s7 + $0x6b0] sm:$0xf0]  ;;  %v2571_v31 = vadd.f32 %v7417_v17, %v7895_v10 }
 0x394   : > { %v5318_v44 = vor.u32 %v5999_v50, %v5317_v1  ;;  %v7898_v50 = vld [vmem:[#allocation38_spill] sm:$0xff] }
 0x395   : > { %v4012_v41 = vmul.f32 0.01, %v3717_v48  ;;  %vm3900_vm6 = vcmp.ge.f32.partialorder %v3717_v48, 0.0 }
 0x396   : > { %v3140_v53 = vpop.f32.mrf.mxu2 }
 0x397   : > { %v3141_v58 = vadd.f32 %v3140_v53, %v2852_v22  ;;  %v3429_v43 = vpop.f32.mrf.mxu3  ;;  %v4124_v40 = vsel %vm3900_vm6, %v3717_v48, %v4012_v41  ;;  %v2573_v53 = vadd.f32 %v7417_v17, %v7896_v51 }
 0x398   : > { %v2854_v59 = vpop.f32.mrf.mxu1 }
 0x399   : > { %v3430_v32 = vadd.f32 %v3429_v43, %v3141_v58  ;;  %v2855_v30 = vadd.f32 %v2854_v59, %v2566_v14  ;;  %v6000_v58 = vld [vmem:[%s6541_s7 + $0x6bc] sm:$0xf]  ;;  %v5323_v43 = vld [vmem:[%s6541_s7 + $0x6cc] sm:$0xf0]  ;;  %v6001_v59 = vld [vmem:[%s6541_s7 + $0x6c4] sm:$0xf] }
 0x39a   : > { %v3721_v54 = vpop.f32.mrf.mxu0 }
 0x39b   : > { %v3719_v39 = vadd.f32 %v3718_v61, %v3430_v32  ;;  %2893 = vmatmul.bf16.gmra.mxu1 %v5286_v20  ;;  %3182 = vmatmul.bf16.gmra.mxu2 %v5290_v24  ;;  %v5329_v20 = vld [vmem:[%s6541_s7 + $0x6c0] sm:$0xf]  ;;  %v6003_v24 = vld [vmem:[%s6541_s7 + $0x6d0] sm:$0xf0]  ;;  %v5337_v32 = vld [vmem:[%s6541_s7 + $0x6c8] sm:$0xf] }
 0x39c   : > { %3471 = vmatmul.bf16.gmra.mxu3 %v5294_v25 }
 0x39d   : > { %5768 = vmatmul.msk.bf16.gmra.mxu0 %vm2218_vm1, %v5298_v11  ;;  %vm3901_vm7 = vcmp.ge.f32.partialorder %v3719_v39, 0.0  ;;  %v4013_v15 = vmul.f32 0.01, %v3719_v39  ;;  %v5331_v11 = vld [vmem:[%s6541_s7 + $0x6d4] sm:$0xf0] }
 0x39e   : > { %v3143_v26 = vpop.f32.mrf.mxu2 }
 0x39f   : > { %v4125_v45 = vsel %vm3901_vm7, %v3719_v39, %v4013_v15  ;;  %v3144_v57 = vadd.f32 %v3143_v26, %v2855_v30  ;;  %v3432_v5 = vpop.f32.mrf.mxu3  ;;  %v5326_v15 = vor.u32 %v6000_v58, %v5323_v43  ;;  %v5330_v30 = vor.u32 %v6003_v24, %v5329_v20 }
 0x3a0   : > { %v6265_v55 = vpack.c.bf16 %v4125_v45, %v4124_v40  ;;  %v2856_v27 = vpop.f32.mrf.mxu1  ;;  %v5334_v40 = vor.u32 %v6001_v59, %v5331_v11 }
 0x3a1   : > { %v3433_v47 = vadd.f32 %v3432_v5, %v3144_v57  ;;  %v2857_v2 = vadd.f32 %v2856_v27, %v2568_v4 }
 0x3a2   : > { %v3723_v56 = vpop.f32.mrf.mxu0  ;;  %6413 = vst [vmem:[%s7074_s27 + $0x100] sm:$0xff] %v6265_v55   ;;  %v7897_v55 = vld [vmem:[#allocation35_spill] sm:$0xff] }
 0x3a3   : > { %v3722_v18 = vadd.f32 %v3721_v54, %v3433_v47  ;;  %v6004_v54 = vld [vmem:[%s6541_s7 + $0x6d8] sm:$0xf0]  ;;  %v2576_v27 = vadd.f32 %v7417_v17, %v7897_v55 }
 0x3a4   : > { %v5338_v45 = vor.u32 %v6004_v54, %v5337_v32  ;;  %v7900_v54 = vld [vmem:[#allocation44_spill] sm:$0xff] }
 0x3a5   : > { %v4014_v61 = vmul.f32 0.01, %v3722_v18  ;;  %vm3902_vm8 = vcmp.ge.f32.partialorder %v3722_v18, 0.0 }
 0x3a6   : > { %v3145_v23 = vpop.f32.mrf.mxu2 }
 0x3a7   : > { %v3146_v42 = vadd.f32 %v3145_v23, %v2857_v2  ;;  %v3434_v3 = vpop.f32.mrf.mxu3  ;;  %v4126_v28 = vsel %vm3902_vm8, %v3722_v18, %v4014_v61  ;;  %v2578_v23 = vadd.f32 %v7417_v17, %v7898_v50 }
 0x3a8   : > { %v2859_v7 = vpop.f32.mrf.mxu1 }
 0x3a9   : > { %v3435_v63 = vadd.f32 %v3434_v3, %v3146_v42  ;;  %v2860_v36 = vadd.f32 %v2859_v7, %v2571_v31  ;;  %v6005_v42 = vld [vmem:[%s6541_s7 + $0x6e4] sm:$0xf]  ;;  %v5343_v3 = vld [vmem:[%s6541_s7 + $0x6f4] sm:$0xf0]  ;;  %v6006_v7 = vld [vmem:[%s6541_s7 + $0x6ec] sm:$0xf] }
 0x3aa   : > { %v3726_v34 = vpop.f32.mrf.mxu0 }
 0x3ab   : > { %v3724_v16 = vadd.f32 %v3723_v56, %v3435_v63  ;;  %2898 = vmatmul.bf16.gmra.mxu1 %v5306_v38  ;;  %3187 = vmatmul.bf16.gmra.mxu2 %v5310_v35  ;;  %v5349_v38 = vld [vmem:[%s6541_s7 + $0x6e8] sm:$0xf]  ;;  %v6008_v35 = vld [vmem:[%s6541_s7 + $0x6f8] sm:$0xf0]  ;;  %v5357_v63 = vld [vmem:[%s6541_s7 + $0x6f0] sm:$0xf] }
 0x3ac   : > { %3476 = vmatmul.bf16.gmra.mxu3 %v5314_v8 }
 0x3ad   : > { %5769 = vmatmul.msk.bf16.gmra.mxu0 %vm2218_vm1, %v5318_v44  ;;  %vm3903_vm9 = vcmp.ge.f32.partialorder %v3724_v16, 0.0  ;;  %v4015_v52 = vmul.f32 0.01, %v3724_v16  ;;  %v5351_v44 = vld [vmem:[%s6541_s7 + $0x6fc] sm:$0xf0] }
 0x3ae   : > { %v3148_v37 = vpop.f32.mrf.mxu2 }
 0x3af   : > { %v4127_v0 = vsel %vm3903_vm9, %v3724_v16, %v4015_v52  ;;  %v3149_v29 = vadd.f32 %v3148_v37, %v2860_v36  ;;  %v3437_v62 = vpop.f32.mrf.mxu3  ;;  %v5346_v52 = vor.u32 %v6005_v42, %v5343_v3  ;;  %v5350_v36 = vor.u32 %v6008_v35, %v5349_v38 }
 0x3b0   : > { %v6270_v22 = vpack.c.bf16 %v4127_v0, %v4126_v28  ;;  %v2861_v21 = vpop.f32.mrf.mxu1  ;;  %v5354_v28 = vor.u32 %v6006_v7, %v5351_v44 }
 0x3b1   : > { %v3438_v48 = vadd.f32 %v3437_v62, %v3149_v29  ;;  %v2862_v25 = vadd.f32 %v2861_v21, %v2573_v53 }
 0x3b2   : > { %v3728_v46 = vpop.f32.mrf.mxu0  ;;  %6414 = vst [vmem:[%s7074_s27 + $0x108] sm:$0xff] %v6270_v22   ;;  %v7899_v22 = vld [vmem:[#allocation41_spill] sm:$0xff] }
 0x3b3   : > { %v3727_v14 = vadd.f32 %v3726_v34, %v3438_v48  ;;  %v6009_v34 = vld [vmem:[%s6541_s7 + $0x700] sm:$0xf0]  ;;  %v2581_v21 = vadd.f32 %v7417_v17, %v7899_v22 }
 0x3b4   : > { %v5358_v0 = vor.u32 %v6009_v34, %v5357_v63  ;;  %v7594_v63 = vld [vmem:[%s7789_s2] ss:$0 sm:$0xff] }
 0x3b5   : > { %v4016_v56 = vmul.f32 0.01, %v3727_v14  ;;  %vm3904_vm10 = vcmp.ge.f32.partialorder %v3727_v14, 0.0  ;;  %v7902_v34 = vld [vmem:[#allocation50_spill] sm:$0xff] }
 0x3b6   : > { %v3150_v13 = vpop.f32.mrf.mxu2 }
 0x3b7   : > { %v3151_v41 = vadd.f32 %v3150_v13, %v2862_v25  ;;  %v3439_v39 = vpop.f32.mrf.mxu3  ;;  %v4128_v19 = vsel %vm3904_vm10, %v3727_v14, %v4016_v56  ;;  %v2583_v13 = vadd.f32 %v7417_v17, %v7900_v54 }
 0x3b8   : > { %v2864_v26 = vpop.f32.mrf.mxu1 }
 0x3b9   : > { %v3440_v57 = vadd.f32 %v3439_v39, %v3151_v41  ;;  %v2865_v47 = vadd.f32 %v2864_v26, %v2576_v27  ;;  %v6010_v41 = vld [vmem:[%s6541_s7 + $0x70c] sm:$0xf]  ;;  %v5363_v39 = vld [vmem:[%s6541_s7 + $0x71c] sm:$0xf0]  ;;  %v6011_v26 = vld [vmem:[%s6541_s7 + $0x714] sm:$0xf] }
 0x3ba   : > { %v3731_v5 = vpop.f32.mrf.mxu0 }
 0x3bb   : > { %v3729_v12 = vadd.f32 %v3728_v46, %v3440_v57  ;;  %2903 = vmatmul.bf16.gmra.mxu1 %v5326_v15  ;;  %3192 = vmatmul.bf16.gmra.mxu2 %v5330_v30  ;;  %v5369_v15 = vld [vmem:[%s6541_s7 + $0x710] sm:$0xf]  ;;  %v6013_v30 = vld [vmem:[%s6541_s7 + $0x720] sm:$0xf0]  ;;  %v5377_v57 = vld [vmem:[%s6541_s7 + $0x718] sm:$0xf] }
 0x3bc   : > { %3481 = vmatmul.bf16.gmra.mxu3 %v5334_v40 }
 0x3bd   : > { %5770 = vmatmul.msk.bf16.gmra.mxu0 %vm2218_vm1, %v5338_v45  ;;  %vm3905_vm11 = vcmp.ge.f32.partialorder %v3729_v12, 0.0  ;;  %v4017_v4 = vmul.f32 0.01, %v3729_v12  ;;  %v5371_v45 = vld [vmem:[%s6541_s7 + $0x724] sm:$0xf0] }
 0x3be   : > { %v3153_v33 = vpop.f32.mrf.mxu2 }
 0x3bf   : > { %v4129_v6 = vsel %vm3905_vm11, %v3729_v12, %v4017_v4  ;;  %v3154_v9 = vadd.f32 %v3153_v33, %v2865_v47  ;;  %v3442_v49 = vpop.f32.mrf.mxu3  ;;  %v5366_v4 = vor.u32 %v6010_v41, %v5363_v39  ;;  %v5370_v47 = vor.u32 %v6013_v30, %v5369_v15 }
 0x3c0   : > { %v6275_v2 = vpack.c.bf16 %v4129_v6, %v4128_v19  ;;  %v2866_v60 = vpop.f32.mrf.mxu1  ;;  %v5374_v19 = vor.u32 %v6011_v26, %v5371_v45 }
 0x3c1   : > { %v3443_v18 = vadd.f32 %v3442_v49, %v3154_v9  ;;  %v2867_v8 = vadd.f32 %v2866_v60, %v2578_v23 }
 0x3c2   : > { %v3733_v1 = vpop.f32.mrf.mxu0  ;;  %6415 = vst [vmem:[%s7074_s27 + $0x110] sm:$0xff] %v6275_v2   ;;  %v7901_v2 = vld [vmem:[#allocation47_spill] sm:$0xff] }
 0x3c3   : > { %v3732_v31 = vadd.f32 %v3731_v5, %v3443_v18  ;;  %v6014_v5 = vld [vmem:[%s6541_s7 + $0x728] sm:$0xf0]  ;;  %v2586_v60 = vadd.f32 %v7417_v17, %v7901_v2 }
 0x3c4   : > { %v5378_v6 = vor.u32 %v6014_v5, %v5377_v57  ;;  %v7904_v5 = vld [vmem:[#allocation56_spill] sm:$0xff] }
 0x3c5   : > { %v4018_v46 = vmul.f32 0.01, %v3732_v31  ;;  %vm3906_vm12 = vcmp.ge.f32.partialorder %v3732_v31, 0.0 }
 0x3c6   : > { %v3155_v10 = vpop.f32.mrf.mxu2 }
 0x3c7   : > { %v3156_v61 = vadd.f32 %v3155_v10, %v2867_v8  ;;  %v3444_v16 = vpop.f32.mrf.mxu3  ;;  %v4130_v43 = vsel %vm3906_vm12, %v3732_v31, %v4018_v46  ;;  %v2588_v10 = vadd.f32 %v7594_v63, %v7902_v34 }
 0x3c8   : > { %v2869_v37 = vpop.f32.mrf.mxu1 }
 0x3c9   : > { %v3445_v29 = vadd.f32 %v3444_v16, %v3156_v61  ;;  %v2870_v48 = vadd.f32 %v2869_v37, %v2581_v21  ;;  %v6015_v61 = vld [vmem:[%s6541_s7 + $0x734] sm:$0xf]  ;;  %v5383_v16 = vld [vmem:[%s6541_s7 + $0x744] sm:$0xf0]  ;;  %v6016_v37 = vld [vmem:[%s6541_s7 + $0x73c] sm:$0xf] }
 0x3ca   : > { %v3736_v62 = vpop.f32.mrf.mxu0 }
 0x3cb   : > { %v3734_v51 = vadd.f32 %v3733_v1, %v3445_v29  ;;  %2908 = vmatmul.bf16.gmra.mxu1 %v5346_v52  ;;  %3197 = vmatmul.bf16.gmra.mxu2 %v5350_v36  ;;  %v5389_v52 = vld [vmem:[%s6541_s7 + $0x738] sm:$0xf]  ;;  %v6018_v36 = vld [vmem:[%s6541_s7 + $0x748] sm:$0xf0]  ;;  %v5397_v29 = vld [vmem:[%s6541_s7 + $0x740] sm:$0xf] }
 0x3cc   : > { %3486 = vmatmul.bf16.gmra.mxu3 %v5354_v28 }
 0x3cd   : > { %5771 = vmatmul.msk.bf16.gmra.mxu0 %vm2218_vm1, %v5358_v0  ;;  %vm3907_vm13 = vcmp.ge.f32.partialorder %v3734_v51, 0.0  ;;  %v4019_v53 = vmul.f32 0.01, %v3734_v51  ;;  %v5391_v0 = vld [vmem:[%s6541_s7 + $0x74c] sm:$0xf0] }
 0x3ce   : > { %v3158_v58 = vpop.f32.mrf.mxu2 }
 0x3cf   : > { %v4131_v20 = vsel %vm3907_vm13, %v3734_v51, %v4019_v53  ;;  %v3159_v24 = vadd.f32 %v3158_v58, %v2870_v48  ;;  %v3447_v59 = vpop.f32.mrf.mxu3  ;;  %v5386_v53 = vor.u32 %v6015_v61, %v5383_v16  ;;  %v5390_v48 = vor.u32 %v6018_v36, %v5389_v52 }
 0x3d0   : > { %v6280_v25 = vpack.c.bf16 %v4131_v20, %v4130_v43  ;;  %v2871_v11 = vpop.f32.mrf.mxu1  ;;  %v5394_v43 = vor.u32 %v6016_v37, %v5391_v0 }
 0x3d1   : > { %v3448_v14 = vadd.f32 %v3447_v59, %v3159_v24  ;;  %v2872_v40 = vadd.f32 %v2871_v11, %v2583_v13 }
 0x3d2   : > { %v3738_v32 = vpop.f32.mrf.mxu0  ;;  %6416 = vst [vmem:[%s7074_s27 + $0x118] sm:$0xff] %v6280_v25   ;;  %v7903_v25 = vld [vmem:[#allocation53_spill] sm:$0xff] }
 0x3d3   : > { %v3737_v27 = vadd.f32 %v3736_v62, %v3448_v14  ;;  %v6019_v62 = vld [vmem:[%s6541_s7 + $0x750] sm:$0xf0]  ;;  %v2591_v11 = vadd.f32 %v7594_v63, %v7903_v25 }
 0x3d4   : > { %v5398_v20 = vor.u32 %v6019_v62, %v5397_v29  ;;  %v7906_v62 = vld [vmem:[#allocation62_spill] sm:$0xff] }
 0x3d5   : > { %v4020_v1 = vmul.f32 0.01, %v3737_v27  ;;  %vm3908_vm14 = vcmp.ge.f32.partialorder %v3737_v27, 0.0 }
 0x3d6   : > { %v3160_v55 = vpop.f32.mrf.mxu2 }
 0x3d7   : > { %v3161_v56 = vadd.f32 %v3160_v55, %v2872_v40  ;;  %v3449_v12 = vpop.f32.mrf.mxu3  ;;  %v4132_v3 = vsel %vm3908_vm14, %v3737_v27, %v4020_v1  ;;  %v2593_v55 = vadd.f32 %v7594_v63, %v7904_v5 }
 0x3d8   : > { %v2874_v33 = vpop.f32.mrf.mxu1 }
 0x3d9   : > { %v3450_v9 = vadd.f32 %v3449_v12, %v3161_v56  ;;  %v2875_v18 = vadd.f32 %v2874_v33, %v2586_v60  ;;  %v6020_v56 = vld [vmem:[%s6541_s7 + $0x75c] sm:$0xf]  ;;  %v5403_v12 = vld [vmem:[%s6541_s7 + $0x76c] sm:$0xf0]  ;;  %v6021_v33 = vld [vmem:[%s6541_s7 + $0x764] sm:$0xf] }
 0x3da   : > { %v3741_v49 = vpop.f32.mrf.mxu0 }
 0x3db   : > { %v3739_v50 = vadd.f32 %v3738_v32, %v3450_v9  ;;  %2913 = vmatmul.bf16.gmra.mxu1 %v5366_v4  ;;  %3202 = vmatmul.bf16.gmra.mxu2 %v5370_v47  ;;  %v5409_v4 = vld [vmem:[%s6541_s7 + $0x760] sm:$0xf]  ;;  %v6023_v47 = vld [vmem:[%s6541_s7 + $0x770] sm:$0xf0]  ;;  %v5417_v9 = vld [vmem:[%s6541_s7 + $0x768] sm:$0xf] }
 0x3dc   : > { %3491 = vmatmul.bf16.gmra.mxu3 %v5374_v19 }
 0x3dd   : > { %5772 = vmatmul.msk.bf16.gmra.mxu0 %vm2218_vm1, %v5378_v6  ;;  %vm3909_vm15 = vcmp.ge.f32.partialorder %v3739_v50, 0.0  ;;  %v4021_v23 = vmul.f32 0.01, %v3739_v50  ;;  %v5411_v6 = vld [vmem:[%s6541_s7 + $0x774] sm:$0xf0] }
 0x3de   : > { %v3163_v42 = vpop.f32.mrf.mxu2 }
 0x3df   : > { %v4133_v17 = vsel %vm3909_vm15, %v3739_v50, %v4021_v23  ;;  %v3164_v38 = vadd.f32 %v3163_v42, %v2875_v18  ;;  %v3452_v35 = vpop.f32.mrf.mxu3  ;;  %v5406_v23 = vor.u32 %v6020_v56, %v5403_v12  ;;  %v5410_v18 = vor.u32 %v6023_v47, %v5409_v4 }
 0x3e0   : > { %v6285_v7 = vpack.c.bf16 %v4133_v17, %v4132_v3  ;;  %v2876_v8 = vpop.f32.mrf.mxu1  ;;  %v5414_v3 = vor.u32 %v6021_v33, %v5411_v6 }
 0x3e1   : > { %v3453_v31 = vadd.f32 %v3452_v35, %v3164_v38  ;;  %v2877_v28 = vadd.f32 %v2876_v8, %v2588_v10 }
 0x3e2   : > { %v3743_v44 = vpop.f32.mrf.mxu0  ;;  %6417 = vst [vmem:[%s7074_s27 + $0x120] sm:$0xff] %v6285_v7   ;;  %v7905_v7 = vld [vmem:[#allocation59_spill] sm:$0xff] }
 0x3e3   : > { %v3742_v21 = vadd.f32 %v3741_v49, %v3453_v31  ;;  %v6024_v49 = vld [vmem:[%s6541_s7 + $0x778] sm:$0xf0]  ;;  %v2596_v8 = vadd.f32 %v7594_v63, %v7905_v7 }
 0x3e4   : > { %v5418_v17 = vor.u32 %v6024_v49, %v5417_v9  ;;  %v7908_v49 = vld [vmem:[#allocation68_spill] sm:$0xff] }
 0x3e5   : > { %v4022_v32 = vmul.f32 0.01, %v3742_v21  ;;  %vm3910_vm0 = vcmp.ge.f32.partialorder %v3742_v21, 0.0 }
 0x3e6   : > { %v3165_v22 = vpop.f32.mrf.mxu2 }
 0x3e7   : > { %v3166_v46 = vadd.f32 %v3165_v22, %v2877_v28  ;;  %v3454_v51 = vpop.f32.mrf.mxu3  ;;  %v4134_v39 = vsel %vm3910_vm0, %v3742_v21, %v4022_v32  ;;  %v2598_v22 = vadd.f32 %v7594_v63, %v7906_v62 }
 0x3e8   : > { %v2879_v58 = vpop.f32.mrf.mxu1 }
 0x3e9   : > { %v3455_v24 = vadd.f32 %v3454_v51, %v3166_v46  ;;  %v2880_v14 = vadd.f32 %v2879_v58, %v2591_v11  ;;  %v6025_v46 = vld [vmem:[%s6541_s7 + $0x784] sm:$0xf]  ;;  %v5423_v51 = vld [vmem:[%s6541_s7 + $0x794] sm:$0xf0]  ;;  %v6026_v58 = vld [vmem:[%s6541_s7 + $0x78c] sm:$0xf] }
 0x3ea   : > { %v3746_v59 = vpop.f32.mrf.mxu0 }
 0x3eb   : > { %v3744_v54 = vadd.f32 %v3743_v44, %v3455_v24  ;;  %2918 = vmatmul.bf16.gmra.mxu1 %v5386_v53  ;;  %3207 = vmatmul.bf16.gmra.mxu2 %v5390_v48  ;;  %v5429_v53 = vld [vmem:[%s6541_s7 + $0x788] sm:$0xf]  ;;  %v6028_v48 = vld [vmem:[%s6541_s7 + $0x798] sm:$0xf0]  ;;  %v5437_v24 = vld [vmem:[%s6541_s7 + $0x790] sm:$0xf] }
 0x3ec   : > { %3496 = vmatmul.bf16.gmra.mxu3 %v5394_v43 }
 0x3ed   : > { %5773 = vmatmul.msk.bf16.gmra.mxu0 %vm2218_vm1, %v5398_v20  ;;  %vm3911_vm2 = vcmp.ge.f32.partialorder %v3744_v54, 0.0  ;;  %v4023_v13 = vmul.f32 0.01, %v3744_v54  ;;  %v5431_v20 = vld [vmem:[%s6541_s7 + $0x79c] sm:$0xf0] }
 0x3ee   : > { %v3168_v41 = vpop.f32.mrf.mxu2 }
 0x3ef   : > { %v4135_v15 = vsel %vm3911_vm2, %v3744_v54, %v4023_v13  ;;  %v3169_v30 = vadd.f32 %v3168_v41, %v2880_v14  ;;  %v3457_v26 = vpop.f32.mrf.mxu3  ;;  %v5426_v13 = vor.u32 %v6025_v46, %v5423_v51  ;;  %v5430_v14 = vor.u32 %v6028_v48, %v5429_v53 }
 0x3f0   : > { %v6290_v40 = vpack.c.bf16 %v4135_v15, %v4134_v39  ;;  %v2881_v45 = vpop.f32.mrf.mxu1  ;;  %v5434_v39 = vor.u32 %v6026_v58, %v5431_v20 }
 0x3f1   : > { %v3458_v27 = vadd.f32 %v3457_v26, %v3169_v30  ;;  %v2882_v19 = vadd.f32 %v2881_v45, %v2593_v55 }
 0x3f2   : > { %v3748_v57 = vpop.f32.mrf.mxu0  ;;  %6418 = vst [vmem:[%s7074_s27 + $0x128] sm:$0xff] %v6290_v40   ;;  %v7907_v40 = vld [vmem:[#allocation65_spill] sm:$0xff] }
 0x3f3   : > { %v3747_v60 = vadd.f32 %v3746_v59, %v3458_v27  ;;  %v6029_v59 = vld [vmem:[%s6541_s7 + $0x7a0] sm:$0xf0]  ;;  %v2601_v45 = vadd.f32 %v7594_v63, %v7907_v40 }
 0x3f4   : > { %v5438_v15 = vor.u32 %v6029_v59, %v5437_v24  ;;  %v7910_v59 = vld [vmem:[#allocation74_spill] sm:$0xff] }
 0x3f5   : > { %v4024_v44 = vmul.f32 0.01, %v3747_v60  ;;  %vm3912_vm3 = vcmp.ge.f32.partialorder %v3747_v60, 0.0 }
 0x3f6   : > { %v3170_v2 = vpop.f32.mrf.mxu2 }
 0x3f7   : > { %v3171_v1 = vadd.f32 %v3170_v2, %v2882_v19  ;;  %v3459_v50 = vpop.f32.mrf.mxu3  ;;  %v4136_v16 = vsel %vm3912_vm3, %v3747_v60, %v4024_v44  ;;  %v2603_v2 = vadd.f32 %v7594_v63, %v7908_v49 }
 0x3f8   : > { %v2884_v42 = vpop.f32.mrf.mxu1 }
 0x3f9   : > { %v3460_v38 = vadd.f32 %v3459_v50, %v3171_v1  ;;  %v2885_v31 = vadd.f32 %v2884_v42, %v2596_v8  ;;  %v6030_v1 = vld [vmem:[%s6541_s7 + $0x7ac] sm:$0xf]  ;;  %v5443_v50 = vld [vmem:[%s6541_s7 + $0x7bc] sm:$0xf0]  ;;  %v6031_v42 = vld [vmem:[%s6541_s7 + $0x7b4] sm:$0xf] }
 0x3fa   : > { %v3751_v35 = vpop.f32.mrf.mxu0 }
 0x3fb   : > { %v3749_v34 = vadd.f32 %v3748_v57, %v3460_v38  ;;  %2923 = vmatmul.bf16.gmra.mxu1 %v5406_v23  ;;  %3212 = vmatmul.bf16.gmra.mxu2 %v5410_v18  ;;  %v5449_v23 = vld [vmem:[%s6541_s7 + $0x7b0] sm:$0xf]  ;;  %v6033_v18 = vld [vmem:[%s6541_s7 + $0x7c0] sm:$0xf0]  ;;  %v5457_v38 = vld [vmem:[%s6541_s7 + $0x7b8] sm:$0xf] }
 0x3fc   : > { %3501 = vmatmul.bf16.gmra.mxu3 %v5414_v3 }
 0x3fd   : > { %5774 = vmatmul.msk.bf16.gmra.mxu0 %vm2218_vm1, %v5418_v17  ;;  %vm3913_vm4 = vcmp.ge.f32.partialorder %v3749_v34, 0.0  ;;  %v4025_v10 = vmul.f32 0.01, %v3749_v34  ;;  %v5451_v17 = vld [vmem:[%s6541_s7 + $0x7c4] sm:$0xf0] }
 0x3fe   : > { %v3173_v61 = vpop.f32.mrf.mxu2 }
 0x3ff   : > { %v4137_v52 = vsel %vm3913_vm4, %v3749_v34, %v4025_v10  ;;  %v3174_v36 = vadd.f32 %v3173_v61, %v2885_v31  ;;  %v3462_v37 = vpop.f32.mrf.mxu3  ;;  %v5446_v10 = vor.u32 %v6030_v1, %v5443_v50  ;;  %v5450_v31 = vor.u32 %v6033_v18, %v5449_v23 }
 0x400   : > { %v6295_v28 = vpack.c.bf16 %v4137_v52, %v4136_v16  ;;  %v2886_v0 = vpop.f32.mrf.mxu1  ;;  %v5454_v16 = vor.u32 %v6031_v42, %v5451_v17 }
 0x401   : > { %v3463_v21 = vadd.f32 %v3462_v37, %v3174_v36  ;;  %v2887_v43 = vadd.f32 %v2886_v0, %v2598_v22 }
 0x402   : > { %v3753_v29 = vpop.f32.mrf.mxu0  ;;  %6419 = vst [vmem:[%s7074_s27 + $0x130] sm:$0xff] %v6295_v28   ;;  %v7909_v28 = vld [vmem:[#allocation71_spill] sm:$0xff] }
 0x403   : > { %v3752_v11 = vadd.f32 %v3751_v35, %v3463_v21  ;;  %v6034_v35 = vld [vmem:[%s6541_s7 + $0x7c8] sm:$0xf0]  ;;  %v2606_v0 = vadd.f32 %v7594_v63, %v7909_v28 }
 0x404   : > { %v5458_v52 = vor.u32 %v6034_v35, %v5457_v38  ;;  %v7912_v35 = vld [vmem:[#allocation5_spill] sm:$0xff] }
 0x405   : > { %v4026_v57 = vmul.f32 0.01, %v3752_v11  ;;  %vm3914_vm5 = vcmp.ge.f32.partialorder %v3752_v11, 0.0 }
 0x406   : > { %v3175_v25 = vpop.f32.mrf.mxu2 }
 0x407   : > { %v3176_v32 = vadd.f32 %v3175_v25, %v2887_v43  ;;  %v3464_v54 = vpop.f32.mrf.mxu3  ;;  %v4138_v12 = vsel %vm3914_vm5, %v3752_v11, %v4026_v57  ;;  %v2608_v25 = vadd.f32 %v7594_v63, %v7910_v59 }
 0x408   : > { %v2889_v41 = vpop.f32.mrf.mxu1 }
 0x409   : > { %v3465_v30 = vadd.f32 %v3464_v54, %v3176_v32  ;;  %v2890_v27 = vadd.f32 %v2889_v41, %v2601_v45  ;;  %v6035_v32 = vld [vmem:[%s6541_s7 + $0x7d4] sm:$0xf]  ;;  %v5463_v54 = vld [vmem:[%s6541_s7 + $0x7e4] sm:$0xf0]  ;;  %v6036_v41 = vld [vmem:[%s6541_s7 + $0x7dc] sm:$0xf] }
 0x40a   : > { %v3756_v26 = vpop.f32.mrf.mxu0 }
 0x40b   : > { %v3754_v5 = vadd.f32 %v3753_v29, %v3465_v30  ;;  %2928 = vmatmul.bf16.gmra.mxu1 %v5426_v13  ;;  %3217 = vmatmul.bf16.gmra.mxu2 %v5430_v14  ;;  %v5469_v13 = vld [vmem:[%s6541_s7 + $0x7d8] sm:$0xf]  ;;  %v6038_v14 = vld [vmem:[%s6541_s7 + $0x7e8] sm:$0xf0]  ;;  %v5477_v30 = vld [vmem:[%s6541_s7 + $0x7e0] sm:$0xf] }
 0x40c   : > { %3506 = vmatmul.bf16.gmra.mxu3 %v5434_v39 }
 0x40d   : > { %5775 = vmatmul.msk.bf16.gmra.mxu0 %vm2218_vm1, %v5438_v15  ;;  %vm3915_vm6 = vcmp.ge.f32.partialorder %v3754_v5, 0.0  ;;  %v4027_v55 = vmul.f32 0.01, %v3754_v5  ;;  %v5471_v15 = vld [vmem:[%s6541_s7 + $0x7ec] sm:$0xf0] }
 0x40e   : > { %v3178_v56 = vpop.f32.mrf.mxu2 }
 0x40f   : > { %v4139_v4 = vsel %vm3915_vm6, %v3754_v5, %v4027_v55  ;;  %v3179_v47 = vadd.f32 %v3178_v56, %v2890_v27  ;;  %v3467_v33 = vpop.f32.mrf.mxu3  ;;  %v5466_v55 = vor.u32 %v6035_v32, %v5463_v54  ;;  %v5470_v27 = vor.u32 %v6038_v14, %v5469_v13 }
 0x410   : > { %v6300_v19 = vpack.c.bf16 %v4139_v4, %v4138_v12  ;;  %v2891_v6 = vpop.f32.mrf.mxu1  ;;  %v5474_v12 = vor.u32 %v6036_v41, %v5471_v15 }
 0x411   : > { %v3468_v60 = vadd.f32 %v3467_v33, %v3179_v47  ;;  %v2892_v3 = vadd.f32 %v2891_v6, %v2603_v2 }
 0x412   : > { %v3758_v9 = vpop.f32.mrf.mxu0  ;;  %6420 = vst [vmem:[%s7074_s27 + $0x138] sm:$0xff] %v6300_v19   ;;  %v7911_v19 = vld [vmem:[#allocation3_spill] sm:$0xff] }
 0x413   : > { %v3757_v8 = vadd.f32 %v3756_v26, %v3468_v60  ;;  %v6039_v26 = vld [vmem:[%s6541_s7 + $0x7f0] sm:$0xf0]  ;;  %v2611_v6 = vadd.f32 %v7594_v63, %v7911_v19 }
 0x414   : > { %v5478_v4 = vor.u32 %v6039_v26, %v5477_v30  ;;  %v7914_v26 = vld [vmem:[#allocation9_spill] sm:$0xff] }
 0x415   : > { %v4028_v29 = vmul.f32 0.01, %v3757_v8  ;;  %vm3916_vm7 = vcmp.ge.f32.partialorder %v3757_v8, 0.0 }
 0x416   : > { %v3180_v7 = vpop.f32.mrf.mxu2 }
 0x417   : > { %v3181_v44 = vadd.f32 %v3180_v7, %v2892_v3  ;;  %v3469_v34 = vpop.f32.mrf.mxu3  ;;  %v4140_v51 = vsel %vm3916_vm7, %v3757_v8, %v4028_v29  ;;  %v2613_v7 = vadd.f32 %v7594_v63, %v7912_v35 }
 0x418   : > { %v2894_v61 = vpop.f32.mrf.mxu1 }
 0x419   : > { %v3470_v36 = vadd.f32 %v3469_v34, %v3181_v44  ;;  %v2895_v21 = vadd.f32 %v2894_v61, %v2606_v0  ;;  %v6040_v44 = vld [vmem:[%s6541_s7 + $0x7fc] sm:$0xf]  ;;  %v5483_v34 = vld [vmem:[%s6541_s7 + $0x80c] sm:$0xf0]  ;;  %v6041_v61 = vld [vmem:[%s6541_s7 + $0x804] sm:$0xf] }
 0x41a   : > { %v3761_v37 = vpop.f32.mrf.mxu0 }
 0x41b   : > { %v3759_v62 = vadd.f32 %v3758_v9, %v3470_v36  ;;  %2933 = vmatmul.bf16.gmra.mxu1 %v5446_v10  ;;  %3222 = vmatmul.bf16.gmra.mxu2 %v5450_v31  ;;  %v5489_v10 = vld [vmem:[%s6541_s7 + $0x800] sm:$0xf]  ;;  %v6043_v31 = vld [vmem:[%s6541_s7 + $0x810] sm:$0xf0]  ;;  %v5497_v36 = vld [vmem:[%s6541_s7 + $0x808] sm:$0xf] }
 0x41c   : > { %3511 = vmatmul.bf16.gmra.mxu3 %v5454_v16 }
 0x41d   : > { %5776 = vmatmul.msk.bf16.gmra.mxu0 %vm2218_vm1, %v5458_v52  ;;  %vm3917_vm8 = vcmp.ge.f32.partialorder %v3759_v62, 0.0  ;;  %v4029_v22 = vmul.f32 0.01, %v3759_v62  ;;  %v5491_v52 = vld [vmem:[%s6541_s7 + $0x814] sm:$0xf0] }
 0x41e   : > { %v3183_v46 = vpop.f32.mrf.mxu2 }
 0x41f   : > { %v4141_v53 = vsel %vm3917_vm8, %v3759_v62, %v4029_v22  ;;  %v3184_v48 = vadd.f32 %v3183_v46, %v2895_v21  ;;  %v3472_v58 = vpop.f32.mrf.mxu3  ;;  %v5486_v22 = vor.u32 %v6040_v44, %v5483_v34  ;;  %v5490_v21 = vor.u32 %v6043_v31, %v5489_v10 }
 0x420   : > { %v6305_v43 = vpack.c.bf16 %v4141_v53, %v4140_v51  ;;  %v2896_v20 = vpop.f32.mrf.mxu1  ;;  %v5494_v51 = vor.u32 %v6041_v61, %v5491_v52 }
 0x421   : > { %v3473_v11 = vadd.f32 %v3472_v58, %v3184_v48  ;;  %v2897_v39 = vadd.f32 %v2896_v20, %v2608_v25 }
 0x422   : > { %v3763_v24 = vpop.f32.mrf.mxu0  ;;  %6421 = vst [vmem:[%s7074_s27 + $0x140] sm:$0xff] %v6305_v43   ;;  %v7913_v43 = vld [vmem:[#allocation7_spill] sm:$0xff] }
 0x423   : > { %v3762_v45 = vadd.f32 %v3761_v37, %v3473_v11  ;;  %v6044_v37 = vld [vmem:[%s6541_s7 + $0x818] sm:$0xf0]  ;;  %v2616_v20 = vadd.f32 %v7594_v63, %v7913_v43 }
 0x424   : > { %v5498_v53 = vor.u32 %v6044_v37, %v5497_v36  ;;  %v7916_v37 = vld [vmem:[#allocation13_spill] sm:$0xff] }
 0x425   : > { %v4030_v9 = vmul.f32 0.01, %v3762_v45  ;;  %vm3918_vm9 = vcmp.ge.f32.partialorder %v3762_v45, 0.0 }
 0x426   : > { %v3185_v40 = vpop.f32.mrf.mxu2 }
 0x427   : > { %v3186_v57 = vadd.f32 %v3185_v40, %v2897_v39  ;;  %v3474_v5 = vpop.f32.mrf.mxu3  ;;  %v4142_v50 = vsel %vm3918_vm9, %v3762_v45, %v4030_v9  ;;  %v2618_v40 = vadd.f32 %v7594_v63, %v7914_v26 }
 0x428   : > { %v2899_v56 = vpop.f32.mrf.mxu1 }
 0x429   : > { %v3475_v47 = vadd.f32 %v3474_v5, %v3186_v57  ;;  %v2900_v60 = vadd.f32 %v2899_v56, %v2611_v6  ;;  %v6045_v57 = vld [vmem:[%s6541_s7 + $0x824] sm:$0xf]  ;;  %v5503_v5 = vld [vmem:[%s6541_s7 + $0x834] sm:$0xf0]  ;;  %v6046_v56 = vld [vmem:[%s6541_s7 + $0x82c] sm:$0xf] }
 0x42a   : > { %v3766_v33 = vpop.f32.mrf.mxu0 }
 0x42b   : > { %v3764_v49 = vadd.f32 %v3763_v24, %v3475_v47  ;;  %2938 = vmatmul.bf16.gmra.mxu1 %v5466_v55  ;;  %3227 = vmatmul.bf16.gmra.mxu2 %v5470_v27  ;;  %v5509_v55 = vld [vmem:[%s6541_s7 + $0x828] sm:$0xf]  ;;  %v6048_v27 = vld [vmem:[%s6541_s7 + $0x838] sm:$0xf0]  ;;  %v5517_v47 = vld [vmem:[%s6541_s7 + $0x830] sm:$0xf] }
 0x42c   : > { %3516 = vmatmul.bf16.gmra.mxu3 %v5474_v12 }
 0x42d   : > { %5777 = vmatmul.msk.bf16.gmra.mxu0 %vm2218_vm1, %v5478_v4  ;;  %vm3919_vm10 = vcmp.ge.f32.partialorder %v3764_v49, 0.0  ;;  %v4031_v2 = vmul.f32 0.01, %v3764_v49  ;;  %v5511_v4 = vld [vmem:[%s6541_s7 + $0x83c] sm:$0xf0] }
 0x42e   : > { %v3188_v1 = vpop.f32.mrf.mxu2 }
 0x42f   : > { %v4143_v23 = vsel %vm3919_vm10, %v3764_v49, %v4031_v2  ;;  %v3189_v18 = vadd.f32 %v3188_v1, %v2900_v60  ;;  %v3477_v42 = vpop.f32.mrf.mxu3  ;;  %v5506_v2 = vor.u32 %v6045_v57, %v5503_v5  ;;  %v5510_v60 = vor.u32 %v6048_v27, %v5509_v55 }
 0x430   : > { %v6310_v3 = vpack.c.bf16 %v4143_v23, %v4142_v50  ;;  %v2901_v17 = vpop.f32.mrf.mxu1  ;;  %v5514_v50 = vor.u32 %v6046_v56, %v5511_v4 }
 0x431   : > { %v3478_v8 = vadd.f32 %v3477_v42, %v3189_v18  ;;  %v2902_v16 = vadd.f32 %v2901_v17, %v2613_v7 }
 0x432   : > { %v3768_v38 = vpop.f32.mrf.mxu0  ;;  %6422 = vst [vmem:[%s7074_s27 + $0x148] sm:$0xff] %v6310_v3   ;;  %v7915_v3 = vld [vmem:[#allocation11_spill] sm:$0xff] }
 0x433   : > { %v3767_v0 = vadd.f32 %v3766_v33, %v3478_v8  ;;  %v6049_v33 = vld [vmem:[%s6541_s7 + $0x840] sm:$0xf0]  ;;  %v2621_v17 = vadd.f32 %v7594_v63, %v7915_v3 }
 0x434   : > { %v5518_v23 = vor.u32 %v6049_v33, %v5517_v47  ;;  %v7918_v33 = vld [vmem:[#allocation17_spill] sm:$0xff] }
 0x435   : > { %v4032_v24 = vmul.f32 0.01, %v3767_v0  ;;  %vm3920_vm11 = vcmp.ge.f32.partialorder %v3767_v0, 0.0 }
 0x436   : > { %v3190_v28 = vpop.f32.mrf.mxu2 }
 0x437   : > { %v3191_v29 = vadd.f32 %v3190_v28, %v2902_v16  ;;  %v3479_v62 = vpop.f32.mrf.mxu3  ;;  %v4144_v54 = vsel %vm3920_vm11, %v3767_v0, %v4032_v24  ;;  %v2623_v28 = vadd.f32 %v7594_v63, %v7916_v37 }
 0x438   : > { %v2904_v46 = vpop.f32.mrf.mxu1 }
 0x439   : > { %v3480_v48 = vadd.f32 %v3479_v62, %v3191_v29  ;;  %v2905_v11 = vadd.f32 %v2904_v46, %v2616_v20  ;;  %v6050_v29 = vld [vmem:[%s6541_s7 + $0x84c] sm:$0xf]  ;;  %v5523_v62 = vld [vmem:[%s6541_s7 + $0x85c] sm:$0xf0]  ;;  %v6051_v46 = vld [vmem:[%s6541_s7 + $0x854] sm:$0xf] }
 0x43a   : > { %v3771_v58 = vpop.f32.mrf.mxu0 }
 0x43b   : > { %v3769_v59 = vadd.f32 %v3768_v38, %v3480_v48  ;;  %2943 = vmatmul.bf16.gmra.mxu1 %v5486_v22  ;;  %3232 = vmatmul.bf16.gmra.mxu2 %v5490_v21  ;;  %v5529_v22 = vld [vmem:[%s6541_s7 + $0x850] sm:$0xf]  ;;  %v6053_v21 = vld [vmem:[%s6541_s7 + $0x860] sm:$0xf0]  ;;  %v5537_v48 = vld [vmem:[%s6541_s7 + $0x858] sm:$0xf] }
 0x43c   : > { %3521 = vmatmul.bf16.gmra.mxu3 %v5494_v51 }
 0x43d   : > { %5778 = vmatmul.msk.bf16.gmra.mxu0 %vm2218_vm1, %v5498_v53  ;;  %vm3921_vm12 = vcmp.ge.f32.partialorder %v3769_v59, 0.0  ;;  %v4033_v25 = vmul.f32 0.01, %v3769_v59  ;;  %v5531_v53 = vld [vmem:[%s6541_s7 + $0x864] sm:$0xf0] }
 0x43e   : > { %v3193_v32 = vpop.f32.mrf.mxu2 }
 0x43f   : > { %v4145_v13 = vsel %vm3921_vm12, %v3769_v59, %v4033_v25  ;;  %v3194_v14 = vadd.f32 %v3193_v32, %v2905_v11  ;;  %v3482_v41 = vpop.f32.mrf.mxu3  ;;  %v5526_v25 = vor.u32 %v6050_v29, %v5523_v62  ;;  %v5530_v11 = vor.u32 %v6053_v21, %v5529_v22 }
 0x440   : > { %v6315_v39 = vpack.c.bf16 %v4145_v13, %v4144_v54  ;;  %v2906_v15 = vpop.f32.mrf.mxu1  ;;  %v5534_v54 = vor.u32 %v6051_v46, %v5531_v53 }
 0x441   : > { %v3483_v45 = vadd.f32 %v3482_v41, %v3194_v14  ;;  %v2907_v12 = vadd.f32 %v2906_v15, %v2618_v40 }
 0x442   : > { %v3773_v30 = vpop.f32.mrf.mxu0  ;;  %6423 = vst [vmem:[%s7074_s27 + $0x150] sm:$0xff] %v6315_v39   ;;  %v7917_v39 = vld [vmem:[#allocation15_spill] sm:$0xff] }
 0x443   : > { %v3772_v6 = vadd.f32 %v3771_v58, %v3483_v45  ;;  %v6054_v58 = vld [vmem:[%s6541_s7 + $0x868] sm:$0xf0]  ;;  %v2626_v15 = vadd.f32 %v7594_v63, %v7917_v39 }
 0x444   : > { %v5538_v13 = vor.u32 %v6054_v58, %v5537_v48  ;;  %v7920_v58 = vld [vmem:[#allocation21_spill] sm:$0xff] }
 0x445   : > { %v4034_v38 = vmul.f32 0.01, %v3772_v6  ;;  %vm3922_vm13 = vcmp.ge.f32.partialorder %v3772_v6, 0.0 }
 0x446   : > { %v3195_v19 = vpop.f32.mrf.mxu2 }
 0x447   : > { %v3196_v9 = vadd.f32 %v3195_v19, %v2907_v12  ;;  %v3484_v49 = vpop.f32.mrf.mxu3  ;;  %v4146_v34 = vsel %vm3922_vm13, %v3772_v6, %v4034_v38  ;;  %v2628_v19 = vadd.f32 %v7594_v63, %v7918_v33 }
 0x448   : > { %v2909_v1 = vpop.f32.mrf.mxu1 }
 0x449   : > { %v3485_v18 = vadd.f32 %v3484_v49, %v3196_v9  ;;  %v2910_v8 = vadd.f32 %v2909_v1, %v2621_v17  ;;  %v6055_v9 = vld [vmem:[%s6541_s7 + $0x874] sm:$0xf]  ;;  %v5543_v49 = vld [vmem:[%s6541_s7 + $0x884] sm:$0xf0]  ;;  %v6056_v1 = vld [vmem:[%s6541_s7 + $0x87c] sm:$0xf] }
 0x44a   : > { %v3776_v42 = vpop.f32.mrf.mxu0 }
 0x44b   : > { %v3774_v35 = vadd.f32 %v3773_v30, %v3485_v18  ;;  %2948 = vmatmul.bf16.gmra.mxu1 %v5506_v2  ;;  %3237 = vmatmul.bf16.gmra.mxu2 %v5510_v60  ;;  %v5549_v2 = vld [vmem:[%s6541_s7 + $0x878] sm:$0xf]  ;;  %v6058_v60 = vld [vmem:[%s6541_s7 + $0x888] sm:$0xf0]  ;;  %v5557_v18 = vld [vmem:[%s6541_s7 + $0x880] sm:$0xf] }
 0x44c   : > { %3526 = vmatmul.bf16.gmra.mxu3 %v5514_v50 }
 0x44d   : > { %5779 = vmatmul.msk.bf16.gmra.mxu0 %vm2218_vm1, %v5518_v23  ;;  %vm3923_vm14 = vcmp.ge.f32.partialorder %v3774_v35, 0.0  ;;  %v4035_v7 = vmul.f32 0.01, %v3774_v35  ;;  %v5551_v23 = vld [vmem:[%s6541_s7 + $0x88c] sm:$0xf0] }
 0x44e   : > { %v3198_v44 = vpop.f32.mrf.mxu2 }
 0x44f   : > { %v4147_v10 = vsel %vm3923_vm14, %v3774_v35, %v4035_v7  ;;  %v3199_v31 = vadd.f32 %v3198_v44, %v2910_v8  ;;  %v3487_v61 = vpop.f32.mrf.mxu3  ;;  %v5546_v7 = vor.u32 %v6055_v9, %v5543_v49  ;;  %v5550_v8 = vor.u32 %v6058_v60, %v5549_v2 }
 0x450   : > { %v6320_v16 = vpack.c.bf16 %v4147_v10, %v4146_v34  ;;  %v2911_v52 = vpop.f32.mrf.mxu1  ;;  %v5554_v34 = vor.u32 %v6056_v1, %v5551_v23 }
 0x451   : > { %v3488_v0 = vadd.f32 %v3487_v61, %v3199_v31  ;;  %v2912_v51 = vadd.f32 %v2911_v52, %v2623_v28 }
 0x452   : > { %v3778_v36 = vpop.f32.mrf.mxu0  ;;  %6424 = vst [vmem:[%s7074_s27 + $0x158] sm:$0xff] %v6320_v16   ;;  %v7919_v16 = vld [vmem:[#allocation19_spill] sm:$0xff] }
 0x453   : > { %v3777_v20 = vadd.f32 %v3776_v42, %v3488_v0  ;;  %v6059_v42 = vld [vmem:[%s6541_s7 + $0x890] sm:$0xf0]  ;;  %v2631_v52 = vadd.f32 %v7594_v63, %v7919_v16 }
 0x454   : > { %v5558_v10 = vor.u32 %v6059_v42, %v5557_v18  ;;  %v7922_v42 = vld [vmem:[#allocation27_spill] sm:$0xff] }
 0x455   : > { %v4036_v30 = vmul.f32 0.01, %v3777_v20  ;;  %vm3924_vm15 = vcmp.ge.f32.partialorder %v3777_v20, 0.0 }
 0x456   : > { %v3200_v43 = vpop.f32.mrf.mxu2 }
 0x457   : > { %v3201_v24 = vadd.f32 %v3200_v43, %v2912_v51  ;;  %v3489_v59 = vpop.f32.mrf.mxu3  ;;  %v4148_v5 = vsel %vm3924_vm15, %v3777_v20, %v4036_v30  ;;  %v2633_v43 = vadd.f32 %v7594_v63, %v7920_v58 }
 0x458   : > { %v2914_v32 = vpop.f32.mrf.mxu1 }
 0x459   : > { %v3490_v14 = vadd.f32 %v3489_v59, %v3201_v24  ;;  %v2915_v45 = vadd.f32 %v2914_v32, %v2626_v15  ;;  %v6060_v24 = vld [vmem:[%s6541_s7 + $0x89c] sm:$0xf]  ;;  %v5563_v59 = vld [vmem:[%s6541_s7 + $0x8ac] sm:$0xf0]  ;;  %v6061_v32 = vld [vmem:[%s6541_s7 + $0x8a4] sm:$0xf] }
 0x45a   : > { %v3781_v41 = vpop.f32.mrf.mxu0 }
 0x45b   : > { %v3779_v26 = vadd.f32 %v3778_v36, %v3490_v14  ;;  %2953 = vmatmul.bf16.gmra.mxu1 %v5526_v25  ;;  %3242 = vmatmul.bf16.gmra.mxu2 %v5530_v11  ;;  %v5569_v25 = vld [vmem:[%s6541_s7 + $0x8a0] sm:$0xf]  ;;  %v6063_v11 = vld [vmem:[%s6541_s7 + $0x8b0] sm:$0xf0]  ;;  %v5577_v14 = vld [vmem:[%s6541_s7 + $0x8a8] sm:$0xf] }
 0x45c   : > { %3531 = vmatmul.bf16.gmra.mxu3 %v5534_v54 }
 0x45d   : > { %5780 = vmatmul.msk.bf16.gmra.mxu0 %vm2218_vm1, %v5538_v13  ;;  %vm3925_vm0 = vcmp.ge.f32.partialorder %v3779_v26, 0.0  ;;  %v4037_v40 = vmul.f32 0.01, %v3779_v26  ;;  %v5571_v13 = vld [vmem:[%s6541_s7 + $0x8b4] sm:$0xf0] }
 0x45e   : > { %v3203_v57 = vpop.f32.mrf.mxu2 }
 0x45f   : > { %v4149_v55 = vsel %vm3925_vm0, %v3779_v26, %v4037_v40  ;;  %v3204_v27 = vadd.f32 %v3203_v57, %v2915_v45  ;;  %v3492_v56 = vpop.f32.mrf.mxu3  ;;  %v5566_v40 = vor.u32 %v6060_v24, %v5563_v59  ;;  %v5570_v45 = vor.u32 %v6063_v11, %v5569_v25 }
 0x460   : > { %v6325_v12 = vpack.c.bf16 %v4149_v55, %v4148_v5  ;;  %v2916_v4 = vpop.f32.mrf.mxu1  ;;  %v5574_v5 = vor.u32 %v6061_v32, %v5571_v13 }
 0x461   : > { %v3493_v6 = vadd.f32 %v3492_v56, %v3204_v27  ;;  %v2917_v50 = vadd.f32 %v2916_v4, %v2628_v19 }
 0x462   : > { %v3783_v47 = vpop.f32.mrf.mxu0  ;;  %6425 = vst [vmem:[%s7074_s27 + $0x160] sm:$0xff] %v6325_v12   ;;  %v7921_v12 = vld [vmem:[#allocation24_spill] sm:$0xff] }
 0x463   : > { %v3782_v17 = vadd.f32 %v3781_v41, %v3493_v6  ;;  %v6064_v41 = vld [vmem:[%s6541_s7 + $0x8b8] sm:$0xf0]  ;;  %v2636_v4 = vadd.f32 %v7594_v63, %v7921_v12 }
 0x464   : > { %v5578_v55 = vor.u32 %v6064_v41, %v5577_v14  ;;  %v7925_v14 = vld [vmem:[#allocation36_spill] sm:$0xff] }
 0x465   : > { %v4038_v36 = vmul.f32 0.01, %v3782_v17  ;;  %vm3926_vm2 = vcmp.ge.f32.partialorder %v3782_v17, 0.0  ;;  %v2646_v41 = vadd.f32 %v7594_v63, %v7925_v14 }
 0x466   : > { %v3205_v3 = vpop.f32.mrf.mxu2 }
 0x467   : > { %v3206_v38 = vadd.f32 %v3205_v3, %v2917_v50  ;;  %v3494_v35 = vpop.f32.mrf.mxu3  ;;  %v4150_v62 = vsel %vm3926_vm2, %v3782_v17, %v4038_v36  ;;  %v2638_v3 = vadd.f32 %v7594_v63, %v7922_v42 }
 0x468   : > { %v2919_v44 = vpop.f32.mrf.mxu1 }
 0x469   : > { %v3495_v31 = vadd.f32 %v3494_v35, %v3206_v38  ;;  %v2920_v0 = vadd.f32 %v2919_v44, %v2631_v52 }
 0x46a   : > { %v3786_v61 = vpop.f32.mrf.mxu0 }
 0x46b   : > { %v3784_v37 = vadd.f32 %v3783_v47, %v3495_v31  ;;  %2958 = vmatmul.bf16.gmra.mxu1 %v5546_v7  ;;  %3247 = vmatmul.bf16.gmra.mxu2 %v5550_v8 }
 0x46c   : > { %3536 = vmatmul.bf16.gmra.mxu3 %v5554_v34 }
 0x46d   : > { %5781 = vmatmul.msk.bf16.gmra.mxu0 %vm2218_vm1, %v5558_v10  ;;  %vm3927_vm3 = vcmp.ge.f32.partialorder %v3784_v37, 0.0  ;;  %v4039_v28 = vmul.f32 0.01, %v3784_v37 }
 0x46e   : > { %v3208_v29 = vpop.f32.mrf.mxu2 }
 0x46f   : > { %v4151_v22 = vsel %vm3927_vm3, %v3784_v37, %v4039_v28  ;;  %v3209_v21 = vadd.f32 %v3208_v29, %v2920_v0  ;;  %v3497_v46 = vpop.f32.mrf.mxu3 }
 0x470   : > { %v6330_v51 = vpack.c.bf16 %v4151_v22, %v4150_v62  ;;  %v2921_v53 = vpop.f32.mrf.mxu1 }
 0x471   : > { %v3498_v20 = vadd.f32 %v3497_v46, %v3209_v21  ;;  %v2922_v54 = vadd.f32 %v2921_v53, %v2633_v43 }
 0x472   : > { %v3788_v48 = vpop.f32.mrf.mxu0  ;;  %6426 = vst [vmem:[%s7074_s27 + $0x168] sm:$0xff] %v6330_v51  }
 0x473   : > { %v3787_v15 = vadd.f32 %v3786_v61, %v3498_v20  ;;  %v7923_v61 = vld [vmem:[#allocation30_spill] sm:$0xff] }
 0x474   : > { %v2641_v16 = vadd.f32 %v7594_v63, %v7923_v61 }
 0x475   : > { %v4040_v47 = vmul.f32 0.01, %v3787_v15  ;;  %vm3928_vm4 = vcmp.ge.f32.partialorder %v3787_v15, 0.0 }
 0x476   : > { %v3210_v39 = vpop.f32.mrf.mxu2 }
 0x477   : > { %v3211_v30 = vadd.f32 %v3210_v39, %v2922_v54  ;;  %v3499_v26 = vpop.f32.mrf.mxu3  ;;  %v4152_v49 = vsel %vm3928_vm4, %v3787_v15, %v4040_v47 }
 0x478   : > { %v2924_v57 = vpop.f32.mrf.mxu1 }
 0x479   : > { %v3500_v27 = vadd.f32 %v3499_v26, %v3211_v30  ;;  %v2925_v6 = vadd.f32 %v2924_v57, %v2636_v4  ;;  %v7926_v4 = vld [vmem:[#allocation39_spill] sm:$0xff] }
 0x47a   : > { %v3791_v56 = vpop.f32.mrf.mxu0  ;;  %v2648_v47 = vadd.f32 %v7594_v63, %v7926_v4 }
 0x47b   : > { %v3789_v33 = vadd.f32 %v3788_v48, %v3500_v27  ;;  %2963 = vmatmul.bf16.gmra.mxu1 %v5566_v40  ;;  %3252 = vmatmul.bf16.gmra.mxu2 %v5570_v45  ;;  %v7924_v48 = vld [vmem:[#allocation33_spill] sm:$0xff] }
 0x47c   : > { %3541 = vmatmul.bf16.gmra.mxu3 %v5574_v5  ;;  %v2643_v58 = vadd.f32 %v7594_v63, %v7924_v48 }
 0x47d   : > { %5782 = vmatmul.msk.bf16.gmra.mxu0 %vm2218_vm1, %v5578_v55  ;;  %vm3929_vm5 = vcmp.ge.f32.partialorder %v3789_v33, 0.0  ;;  %v4041_v19 = vmul.f32 0.01, %v3789_v33 }
 0x47e   : > { %v3213_v9 = vpop.f32.mrf.mxu2 }
 0x47f   : > { %v4153_v2 = vsel %vm3929_vm5, %v3789_v33, %v4041_v19  ;;  %v3214_v60 = vadd.f32 %v3213_v9, %v2925_v6  ;;  %v3502_v1 = vpop.f32.mrf.mxu3 }
 0x480   : > { %v6335_v50 = vpack.c.bf16 %v4153_v2, %v4152_v49  ;;  %v2926_v23 = vpop.f32.mrf.mxu1 }
 0x481   : > { %v3503_v17 = vadd.f32 %v3502_v1, %v3214_v60  ;;  %v2927_v38 = vadd.f32 %v2926_v23, %v2638_v3  ;;  %v7927_v23 = vld [vmem:[#allocation42_spill] sm:$0xff] }
 0x482   : > { %v3793_v18 = vpop.f32.mrf.mxu0  ;;  %6427 = vst [vmem:[%s7074_s27 + $0x170] sm:$0xff] %v6335_v50  }
 0x483   : > { %v3792_v7 = vadd.f32 %v3791_v56, %v3503_v17 }
 0x485   : > { %v4042_v52 = vmul.f32 0.01, %v3792_v7  ;;  %vm3930_vm1 = vcmp.ge.f32.partialorder %v3792_v7, 0.0 }
 0x486   : > { %v3215_v35 = vpop.f32.mrf.mxu2 }
 0x487   : > { %v3216_v8 = vadd.f32 %v3215_v35, %v2927_v38  ;;  %v3504_v44 = vpop.f32.mrf.mxu3  ;;  %v4154_v29 = vsel %vm3930_vm1, %v3792_v7, %v4042_v52 }
 0x488   : > { %v2929_v34 = vpop.f32.mrf.mxu1 }
 0x489   : > { %v3505_v10 = vadd.f32 %v3504_v44, %v3216_v8  ;;  %v2930_v28 = vadd.f32 %v2929_v34, %v2641_v16  ;;  %v7928_v16 = vld [vmem:[#allocation45_spill] sm:$0xff] }
 0x48a   : > { %v3796_v31 = vpop.f32.mrf.mxu0  ;;  %v2653_v52 = vadd.f32 %v7594_v63, %v7928_v16 }
 0x48b   : > { %v3794_v36 = vadd.f32 %v3793_v18, %v3505_v10  ;;  %v2651_v18 = vadd.f32 %v7594_v63, %v7927_v23 }
 0x48d   : > { %vm3931_vm6 = vcmp.ge.f32.partialorder %v3794_v36, 0.0  ;;  %v4043_v37 = vmul.f32 0.01, %v3794_v36 }
 0x48e   : > { %v3218_v0 = vpop.f32.mrf.mxu2 }
 0x48f   : > { %v4155_v62 = vsel %vm3931_vm6, %v3794_v36, %v4043_v37  ;;  %v3219_v22 = vadd.f32 %v3218_v0, %v2930_v28  ;;  %v3507_v21 = vpop.f32.mrf.mxu3 }
 0x490   : > { %v6340_v46 = vpack.c.bf16 %v4155_v62, %v4154_v29  ;;  %v2931_v51 = vpop.f32.mrf.mxu1 }
 0x491   : > { %v3508_v43 = vadd.f32 %v3507_v21, %v3219_v22  ;;  %v2932_v20 = vadd.f32 %v2931_v51, %v2643_v58  ;;  %v7929_v51 = vld [vmem:[#allocation48_spill] sm:$0xff] }
 0x492   : > { %v3798_v53 = vpop.f32.mrf.mxu0  ;;  %6428 = vst [vmem:[%s7074_s27 + $0x178] sm:$0xff] %v6340_v46  }
 0x493   : > { %v3797_v59 = vadd.f32 %v3796_v31, %v3508_v43 }
 0x495   : > { %v4044_v39 = vmul.f32 0.01, %v3797_v59  ;;  %vm3932_vm7 = vcmp.ge.f32.partialorder %v3797_v59, 0.0 }
 0x496   : > { %v3220_v24 = vpop.f32.mrf.mxu2 }
 0x497   : > { %v3221_v25 = vadd.f32 %v3220_v24, %v2932_v20  ;;  %v3509_v11 = vpop.f32.mrf.mxu3  ;;  %v4156_v45 = vsel %vm3932_vm7, %v3797_v59, %v4044_v39 }
 0x498   : > { %v2934_v32 = vpop.f32.mrf.mxu1 }
 0x499   : > { %v3510_v54 = vadd.f32 %v3509_v11, %v3221_v25  ;;  %v2935_v26 = vadd.f32 %v2934_v32, %v2646_v41  ;;  %v7759_v41 = vld [vmem:[%s7789_s2] ss:$0 sm:$0xff] }
 0x49a   : > { %v3801_v13 = vpop.f32.mrf.mxu0 }
 0x49b   : > { %v3799_v15 = vadd.f32 %v3798_v53, %v3510_v54  ;;  %v2656_v53 = vadd.f32 %v7594_v63, %v7929_v51  ;;  %v7930_v63 = vld [vmem:[#allocation51_spill] sm:$0xff] }
 0x49c   : > { %v2658_v39 = vadd.f32 %v7759_v41, %v7930_v63 }
 0x49d   : > { %vm3933_vm8 = vcmp.ge.f32.partialorder %v3799_v15, 0.0  ;;  %v4045_v30 = vmul.f32 0.01, %v3799_v15 }
 0x49e   : > { %v3223_v40 = vpop.f32.mrf.mxu2 }
 0x49f   : > { %v4157_v57 = vsel %vm3933_vm8, %v3799_v15, %v4045_v30  ;;  %v3224_v5 = vadd.f32 %v3223_v40, %v2935_v26  ;;  %v3512_v55 = vpop.f32.mrf.mxu3 }
 0x4a0   : > { %v6345_v27 = vpack.c.bf16 %v4157_v57, %v4156_v45  ;;  %v2936_v56 = vpop.f32.mrf.mxu1 }
 0x4a1   : > { %v3513_v33 = vadd.f32 %v3512_v55, %v3224_v5  ;;  %v2937_v19 = vadd.f32 %v2936_v56, %v2648_v47  ;;  %v7931_v56 = vld [vmem:[#allocation54_spill] sm:$0xff] }
 0x4a2   : > { %v3803_v12 = vpop.f32.mrf.mxu0  ;;  %6429 = vst [vmem:[%s7074_s27 + $0x180] sm:$0xff] %v6345_v27  }
 0x4a3   : > { %v3802_v9 = vadd.f32 %v3801_v13, %v3513_v33 }
 0x4a5   : > { %v4046_v42 = vmul.f32 0.01, %v3802_v9  ;;  %vm3934_vm9 = vcmp.ge.f32.partialorder %v3802_v9, 0.0 }
 0x4a6   : > { %v3225_v6 = vpop.f32.mrf.mxu2 }
 0x4a7   : > { %v3226_v49 = vadd.f32 %v3225_v6, %v2937_v19  ;;  %v3514_v2 = vpop.f32.mrf.mxu3  ;;  %v4158_v7 = vsel %vm3934_vm9, %v3802_v9, %v4046_v42 }
 0x4a8   : > { %v2939_v60 = vpop.f32.mrf.mxu1 }
 0x4a9   : > { %v3515_v1 = vadd.f32 %v3514_v2, %v3226_v49  ;;  %v2940_v38 = vadd.f32 %v2939_v60, %v2651_v18  ;;  %v7932_v18 = vld [vmem:[#allocation57_spill] sm:$0xff] }
 0x4aa   : > { %v3806_v50 = vpop.f32.mrf.mxu0  ;;  %v2663_v42 = vadd.f32 %v7759_v41, %v7932_v18 }
 0x4ab   : > { %v3804_v3 = vadd.f32 %v3803_v12, %v3515_v1  ;;  %v2661_v12 = vadd.f32 %v7759_v41, %v7931_v56  ;;  %v7936_v56 = vld [vmem:[#allocation69_spill] sm:$0xff] }
 0x4ad   : > { %vm3935_vm10 = vcmp.ge.f32.partialorder %v3804_v3, 0.0  ;;  %v4047_v17 = vmul.f32 0.01, %v3804_v3 }
 0x4ae   : > { %v3228_v35 = vpop.f32.mrf.mxu2 }
 0x4af   : > { %v4159_v8 = vsel %vm3935_vm10, %v3804_v3, %v4047_v17  ;;  %v3229_v44 = vadd.f32 %v3228_v35, %v2940_v38  ;;  %v3517_v34 = vpop.f32.mrf.mxu3 }
 0x4b0   : > { %v6350_v10 = vpack.c.bf16 %v4159_v8, %v4158_v7  ;;  %v2941_v31 = vpop.f32.mrf.mxu1 }
 0x4b1   : > { %v3518_v36 = vadd.f32 %v3517_v34, %v3229_v44  ;;  %v2942_v37 = vadd.f32 %v2941_v31, %v2653_v52  ;;  %v7933_v31 = vld [vmem:[#allocation60_spill] sm:$0xff] }
 0x4b2   : > { %v3808_v61 = vpop.f32.mrf.mxu0  ;;  %6430 = vst [vmem:[%s7074_s27 + $0x188] sm:$0xff] %v6350_v10  }
 0x4b3   : > { %v3807_v0 = vadd.f32 %v3806_v50, %v3518_v36 }
 0x4b5   : > { %v4048_v48 = vmul.f32 0.01, %v3807_v0  ;;  %vm3936_vm11 = vcmp.ge.f32.partialorder %v3807_v0, 0.0 }
 0x4b6   : > { %v3230_v28 = vpop.f32.mrf.mxu2 }
 0x4b7   : > { %v3231_v29 = vadd.f32 %v3230_v28, %v2942_v37  ;;  %v3519_v62 = vpop.f32.mrf.mxu3  ;;  %v4160_v59 = vsel %vm3936_vm11, %v3807_v0, %v4048_v48 }
 0x4b8   : > { %v2944_v22 = vpop.f32.mrf.mxu1 }
 0x4b9   : > { %v3520_v21 = vadd.f32 %v3519_v62, %v3231_v29  ;;  %v2945_v20 = vadd.f32 %v2944_v22, %v2656_v53  ;;  %v7934_v53 = vld [vmem:[#allocation63_spill] sm:$0xff] }
 0x4ba   : > { %v3811_v46 = vpop.f32.mrf.mxu0  ;;  %v2668_v48 = vadd.f32 %v7759_v41, %v7934_v53 }
 0x4bb   : > { %v3809_v58 = vadd.f32 %v3808_v61, %v3520_v21  ;;  %v2666_v61 = vadd.f32 %v7759_v41, %v7933_v31  ;;  %v7938_v31 = vld [vmem:[#allocation75_spill] sm:$0xff] }
 0x4bd   : > { %vm3937_vm12 = vcmp.ge.f32.partialorder %v3809_v58, 0.0  ;;  %v4049_v43 = vmul.f32 0.01, %v3809_v58 }
 0x4be   : > { %v3233_v24 = vpop.f32.mrf.mxu2 }
 0x4bf   : > { %v4161_v25 = vsel %vm3937_vm12, %v3809_v58, %v4049_v43  ;;  %v3234_v11 = vadd.f32 %v3233_v24, %v2945_v20  ;;  %v3522_v32 = vpop.f32.mrf.mxu3 }
 0x4c0   : > { %v6355_v54 = vpack.c.bf16 %v4161_v25, %v4160_v59  ;;  %v2946_v13 = vpop.f32.mrf.mxu1 }
 0x4c1   : > { %v3523_v15 = vadd.f32 %v3522_v32, %v3234_v11  ;;  %v2947_v30 = vadd.f32 %v2946_v13, %v2658_v39 }
 0x4c2   : > { %v3813_v14 = vpop.f32.mrf.mxu0  ;;  %6431 = vst [vmem:[%s7074_s27 + $0x190] sm:$0xff] %v6355_v54   ;;  %v7935_v54 = vld [vmem:[#allocation66_spill] sm:$0xff] }
 0x4c3   : > { %v3812_v40 = vadd.f32 %v3811_v46, %v3523_v15  ;;  %v2671_v13 = vadd.f32 %v7759_v41, %v7935_v54 }
 0x4c5   : > { %v4050_v4 = vmul.f32 0.01, %v3812_v40  ;;  %vm3938_vm13 = vcmp.ge.f32.partialorder %v3812_v40, 0.0 }
 0x4c6   : > { %v3235_v26 = vpop.f32.mrf.mxu2 }
 0x4c7   : > { %v3236_v45 = vadd.f32 %v3235_v26, %v2947_v30  ;;  %v3524_v57 = vpop.f32.mrf.mxu3  ;;  %v4162_v9 = vsel %vm3938_vm13, %v3812_v40, %v4050_v4 }
 0x4c8   : > { %v2949_v5 = vpop.f32.mrf.mxu1 }
 0x4c9   : > { %v3525_v55 = vadd.f32 %v3524_v57, %v3236_v45  ;;  %v2950_v19 = vadd.f32 %v2949_v5, %v2661_v12  ;;  %v2673_v12 = vadd.f32 %v7759_v41, %v7936_v56 }
 0x4ca   : > { %v3816_v27 = vpop.f32.mrf.mxu0 }
 0x4cb   : > { %v3814_v47 = vadd.f32 %v3813_v14, %v3525_v55 }
 0x4cd   : > { %vm3939_vm14 = vcmp.ge.f32.partialorder %v3814_v47, 0.0  ;;  %v4051_v33 = vmul.f32 0.01, %v3814_v47 }
 0x4ce   : > { %v3238_v6 = vpop.f32.mrf.mxu2 }
 0x4cf   : > { %v4163_v49 = vsel %vm3939_vm14, %v3814_v47, %v4051_v33  ;;  %v3239_v2 = vadd.f32 %v3238_v6, %v2950_v19  ;;  %v3527_v60 = vpop.f32.mrf.mxu3 }
 0x4d0   : > { %v6360_v1 = vpack.c.bf16 %v4163_v49, %v4162_v9  ;;  %v2951_v50 = vpop.f32.mrf.mxu1 }
 0x4d1   : > { %v3528_v3 = vadd.f32 %v3527_v60, %v3239_v2  ;;  %v2952_v17 = vadd.f32 %v2951_v50, %v2663_v42 }
 0x4d2   : > { %v3818_v23 = vpop.f32.mrf.mxu0  ;;  %6432 = vst [vmem:[%s7074_s27 + $0x198] sm:$0xff] %v6360_v1   ;;  %v7937_v1 = vld [vmem:[#allocation72_spill] sm:$0xff] }
 0x4d3   : > { %v3817_v35 = vadd.f32 %v3816_v27, %v3528_v3  ;;  %v2676_v50 = vadd.f32 %v7759_v41, %v7937_v1 }
 0x4d5   : > { %v4052_v16 = vmul.f32 0.01, %v3817_v35  ;;  %vm3940_vm15 = vcmp.ge.f32.partialorder %v3817_v35, 0.0 }
 0x4d6   : > { %v3240_v38 = vpop.f32.mrf.mxu2 }
 0x4d7   : > { %v3241_v7 = vadd.f32 %v3240_v38, %v2952_v17  ;;  %v3529_v8 = vpop.f32.mrf.mxu3  ;;  %v4164_v0 = vsel %vm3940_vm15, %v3817_v35, %v4052_v16 }
 0x4d8   : > { %v2954_v44 = vpop.f32.mrf.mxu1 }
 0x4d9   : > { %v3530_v34 = vadd.f32 %v3529_v8, %v3241_v7  ;;  %v2955_v37 = vadd.f32 %v2954_v44, %v2666_v61  ;;  %v2678_v61 = vadd.f32 %v7759_v41, %v7938_v31 }
 0x4da   : > { %v3821_v10 = vpop.f32.mrf.mxu0 }
 0x4db   : > { %v3819_v52 = vadd.f32 %v3818_v23, %v3530_v34 }
 0x4dd   : > { %vm3941_vm0 = vcmp.ge.f32.partialorder %v3819_v52, 0.0  ;;  %v4053_v36 = vmul.f32 0.01, %v3819_v52 }
 0x4de   : > { %v3243_v28 = vpop.f32.mrf.mxu2 }
 0x4df   : > { %v4165_v29 = vsel %vm3941_vm0, %v3819_v52, %v4053_v36  ;;  %v3244_v62 = vadd.f32 %v3243_v28, %v2955_v37  ;;  %v3532_v22 = vpop.f32.mrf.mxu3 }
 0x4e0   : > { %v6365_v21 = vpack.c.bf16 %v4165_v29, %v4164_v0  ;;  %v2956_v46 = vpop.f32.mrf.mxu1 }
 0x4e1   : > { %v3533_v58 = vadd.f32 %v3532_v22, %v3244_v62  ;;  %v2957_v43 = vadd.f32 %v2956_v46, %v2668_v48 }
 0x4e2   : > { %6433 = vst [vmem:[%s7074_s27 + $0x1a0] sm:$0xff] %v6365_v21   ;;  %v3823_v51 = vpop.f32.mrf.mxu0 }
 0x4e3   : > { %v3822_v24 = vadd.f32 %v3821_v10, %v3533_v58 }
 0x4e5   : > { %v4054_v14 = vmul.f32 0.01, %v3822_v24  ;;  %vm3942_vm2 = vcmp.ge.f32.partialorder %v3822_v24, 0.0 }
 0x4e6   : > { %v3245_v20 = vpop.f32.mrf.mxu2 }
 0x4e7   : > { %v3246_v59 = vadd.f32 %v3245_v20, %v2957_v43  ;;  %v3534_v25 = vpop.f32.mrf.mxu3  ;;  %v4166_v40 = vsel %vm3942_vm2, %v3822_v24, %v4054_v14 }
 0x4e8   : > { %v2959_v11 = vpop.f32.mrf.mxu1 }
 0x4e9   : > { %v3535_v32 = vadd.f32 %v3534_v25, %v3246_v59  ;;  %v2960_v30 = vadd.f32 %v2959_v11, %v2671_v13 }
 0x4ea   : > { %v3826_v39 = vpop.f32.mrf.mxu0 }
 0x4eb   : > { %v3824_v63 = vadd.f32 %v3823_v51, %v3535_v32 }
 0x4ed   : > { %vm3943_vm3 = vcmp.ge.f32.partialorder %v3824_v63, 0.0  ;;  %v4055_v15 = vmul.f32 0.01, %v3824_v63 }
 0x4ee   : > { %v3248_v26 = vpop.f32.mrf.mxu2 }
 0x4ef   : > { %v4167_v45 = vsel %vm3943_vm3, %v3824_v63, %v4055_v15  ;;  %v3249_v57 = vadd.f32 %v3248_v26, %v2960_v30  ;;  %v3537_v5 = vpop.f32.mrf.mxu3 }
 0x4f0   : > { %v6370_v55 = vpack.c.bf16 %v4167_v45, %v4166_v40  ;;  %v2961_v27 = vpop.f32.mrf.mxu1 }
 0x4f1   : > { %v3538_v4 = vadd.f32 %v3537_v5, %v3249_v57  ;;  %v2962_v47 = vadd.f32 %v2961_v27, %v2673_v12 }
 0x4f2   : > { %6434 = vst [vmem:[%s7074_s27 + $0x1a8] sm:$0xff] %v6370_v55   ;;  %v3828_v33 = vpop.f32.mrf.mxu0 }
 0x4f3   : > { %v3827_v6 = vadd.f32 %v3826_v39, %v3538_v4 }
 0x4f5   : > { %v4056_v23 = vmul.f32 0.01, %v3827_v6  ;;  %vm3944_vm4 = vcmp.ge.f32.partialorder %v3827_v6, 0.0 }
 0x4f6   : > { %v3250_v19 = vpop.f32.mrf.mxu2 }
 0x4f7   : > { %v3251_v9 = vadd.f32 %v3250_v19, %v2962_v47  ;;  %v3539_v49 = vpop.f32.mrf.mxu3  ;;  %v4168_v38 = vsel %vm3944_vm4, %v3827_v6, %v4056_v23 }
 0x4f8   : > { %v2964_v2 = vpop.f32.mrf.mxu1 }
 0x4f9   : > { %v3540_v60 = vadd.f32 %v3539_v49, %v3251_v9  ;;  %v2965_v3 = vadd.f32 %v2964_v2, %v2676_v50 }
 0x4fa   : > { %v3831_v34 = vpop.f32.mrf.mxu0 }
 0x4fb   : > { %v3829_v18 = vadd.f32 %v3828_v33, %v3540_v60 }
 0x4fd   : > { %vm3945_vm5 = vcmp.ge.f32.partialorder %v3829_v18, 0.0  ;;  %v4057_v42 = vmul.f32 0.01, %v3829_v18 }
 0x4fe   : > { %v3253_v17 = vpop.f32.mrf.mxu2 }
 0x4ff   : > { %v4169_v35 = vsel %vm3945_vm5, %v3829_v18, %v4057_v42  ;;  %v3254_v7 = vadd.f32 %v3253_v17, %v2965_v3  ;;  %v3542_v8 = vpop.f32.mrf.mxu3 }
 0x500   : > { %v6375_v44 = vpack.c.bf16 %v4169_v35, %v4168_v38  ;;  %v2966_v10 = vpop.f32.mrf.mxu1 }
 0x501   : > { %v3543_v16 = vadd.f32 %v3542_v8, %v3254_v7  ;;  %v2967_v52 = vadd.f32 %v2966_v10, %v2678_v61 }
 0x502   : > { %6435 = vst [vmem:[%s7074_s27 + $0x1b0] sm:$0xff] %v6375_v44   ;;  %v3833_v62 = vpop.f32.mrf.mxu0 }
 0x503   : > { %v3832_v37 = vadd.f32 %v3831_v34, %v3543_v16 }
 0x505   : > { %v4058_v22 = vmul.f32 0.01, %v3832_v37  ;;  %vm3946_vm1 = vcmp.ge.f32.partialorder %v3832_v37, 0.0 }
 0x506   : > { %v3255_v36 = vpop.f32.mrf.mxu2 }
 0x507   : > { %v3256_v28 = vadd.f32 %v3255_v36, %v2967_v52  ;;  %v3544_v0 = vpop.f32.mrf.mxu3  ;;  %v4170_v51 = vsel %vm3946_vm1, %v3832_v37, %v4058_v22 }
 0x509   : > { %v3545_v29 = vadd.f32 %v3544_v0, %v3256_v28 }
 0x50b   : > { %v3834_v21 = vadd.f32 %v3833_v62, %v3545_v29 }
 0x50d   : > { %vm3947_vm6 = vcmp.ge.f32.partialorder %v3834_v21, 0.0  ;;  %v4059_v46 = vmul.f32 0.01, %v3834_v21 }
 0x50f   : > { %v4171_v53 = vsel %vm3947_vm6, %v3834_v21, %v4059_v46 }
 0x510   : > { %v6380_v48 = vpack.c.bf16 %v4171_v53, %v4170_v51 }
 0x512   : > { %6436 = vst [vmem:[%s7074_s27 + $0x1b8] sm:$0xff] %v6380_v48  }
 0x513 PF: > { %s13_s12 = sadd.s32 1, %s6481_s12  }
 0x514   : > { %p10_p4 = scmp.ge.s32.totalorder %s13_s12, 4  }
 0x516   :  { %12 = sbr.rel (!%p10_p4) target bundleno = 1 (0x1), region = 62 }

// kernel: pilotnet_mdn_forward.8
= control target key start
LH: loop header
LB: loop body
LE: loop exit
PB: predicated region body
PF: predicated region fallthrough
CT: control target
= control target key end

     0   :  { %vm1422_vm0 = vcmask 1041408   ;;  %vm1364_vm1 = vcmask 31744   ;;  %s4967_s1 = inlined_call_operand.vmem [shape: bf16[900,128], index: 1, kind: input, shape index: {}]   ;;  %s4968_s2 = inlined_call_operand.vmem [shape: f32[1,128], index: 2, kind: input, shape index: {}]   ;;  %s4969_s0 = inlined_call_operand.vmem [shape: bf16[304,900], index: 0, kind: input, shape index: {}]   ;;  %s4970_s3 = inlined_call_operand.vmem [shape: bf16[304,128], index: 3, kind: output, shape index: {}]  }
   0x1   :  { %v3462_v0 = vld [vmem:[%s4967_s1 + $0x38] sm:$0xff]  ;;  %v3461_v4 = vld [vmem:[%s4967_s1 + $0x30] sm:$0xff]  ;;  %v3460_v8 = vld [vmem:[%s4967_s1 + $0x28] sm:$0xff] }
   0x2   :  { %v3470_v1 = vld [vmem:[%s4967_s1 + $0x78] sm:$0xff]  ;;  %1426 = vmatpush.bf16.msra.mxu0 %v3462_v0  ;;  %v3469_v5 = vld [vmem:[%s4967_s1 + $0x70] sm:$0xff]  ;;  %v3468_v9 = vld [vmem:[%s4967_s1 + $0x68] sm:$0xff] }
   0x3   :  { %v3478_v2 = vld [vmem:[%s4967_s1 + $0xb8] sm:$0xff]  ;;  %1530 = vmatpush.bf16.msra.mxu1 %v3470_v1  ;;  %v3477_v6 = vld [vmem:[%s4967_s1 + $0xb0] sm:$0xff]  ;;  %v3476_v10 = vld [vmem:[%s4967_s1 + $0xa8] sm:$0xff] }
   0x4   :  { %v3486_v3 = vld [vmem:[%s4967_s1 + $0xf8] sm:$0xff]  ;;  %1634 = vmatpush.bf16.msra.mxu2 %v3478_v2  ;;  %v3485_v7 = vld [vmem:[%s4967_s1 + $0xf0] sm:$0xff]  ;;  %v3484_v11 = vld [vmem:[%s4967_s1 + $0xe8] sm:$0xff] }
   0x5   :  { %1738 = vmatpush.bf16.msra.mxu3 %v3486_v3  ;;  %v3459_v12 = vld [vmem:[%s4967_s1 + $0x20] sm:$0xff]  ;;  %v3458_v16 = vld [vmem:[%s4967_s1 + $0x18] sm:$0xff]  ;;  %v3457_v20 = vld [vmem:[%s4967_s1 + $0x10] sm:$0xff] }
   0x6   :  { %1427 = vmatpush.bf16.msra.mxu0 %v3461_v4  ;;  %v3467_v13 = vld [vmem:[%s4967_s1 + $0x60] sm:$0xff]  ;;  %v3466_v17 = vld [vmem:[%s4967_s1 + $0x58] sm:$0xff]  ;;  %v3465_v21 = vld [vmem:[%s4967_s1 + $0x50] sm:$0xff] }
   0x7   :  { %1531 = vmatpush.bf16.msra.mxu1 %v3469_v5  ;;  %v3475_v14 = vld [vmem:[%s4967_s1 + $0xa0] sm:$0xff]  ;;  %v3474_v18 = vld [vmem:[%s4967_s1 + $0x98] sm:$0xff]  ;;  %v3473_v22 = vld [vmem:[%s4967_s1 + $0x90] sm:$0xff] }
   0x8   :  { %1635 = vmatpush.bf16.msra.mxu2 %v3477_v6  ;;  %v3483_v15 = vld [vmem:[%s4967_s1 + $0xe0] sm:$0xff]  ;;  %v3482_v19 = vld [vmem:[%s4967_s1 + $0xd8] sm:$0xff]  ;;  %v3481_v23 = vld [vmem:[%s4967_s1 + $0xd0] sm:$0xff] }
   0x9   :  { %1739 = vmatpush.bf16.msra.mxu3 %v3485_v7  ;;  %v279_v24 = vld [vmem:[%s4967_s1 + $0x1c0] sm:$0x3]  ;;  %v3456_v25 = vld [vmem:[%s4967_s1 + $0x8] sm:$0xff]  ;;  %v3303_v36 = vld [vmem:[%s4969_s0 + $0x4] sm:$0xf] }
   0xa   :  { %1428 = vmatpush.bf16.msra.mxu0 %v3460_v8  ;;  %v3464_v26 = vld [vmem:[%s4967_s1 + $0x48] sm:$0xff]  ;;  %v3455_v29 = vld [vmem:[%s4967_s1] sm:$0xff]  ;;  %v1250_v31 = vunpack.c.l.b16 %v279_v24  ;;  %v3510_v42 = vld [vmem:[%s4967_s1 + $0x1b8] sm:$0xff] }
   0xb   :  { %1532 = vmatpush.bf16.msra.mxu1 %v3468_v9  ;;  %v3472_v27 = vld [vmem:[%s4967_s1 + $0x88] sm:$0xff]  ;;  %v3463_v30 = vld [vmem:[%s4967_s1 + $0x40] sm:$0xff]  ;;  %v3494_v43 = vld [vmem:[%s4967_s1 + $0x138] sm:$0xff] }
   0xc   :  { %1636 = vmatpush.bf16.msra.mxu2 %v3476_v10  ;;  %v3480_v28 = vld [vmem:[%s4967_s1 + $0xc8] sm:$0xff]  ;;  %v3471_v32 = vld [vmem:[%s4967_s1 + $0x80] sm:$0xff]  ;;  %v1307_v44 = vpack.c.b16 %v1250_v31, %v1250_v31  ;;  %v3502_v49 = vld [vmem:[%s4967_s1 + $0x178] sm:$0xff] }
   0xd   :  { %1740 = vmatpush.bf16.msra.mxu3 %v3484_v11  ;;  %v3479_v33 = vld [vmem:[%s4967_s1 + $0xc0] sm:$0xff]  ;;  %v2462_v38 = vld [vmem:[%s4969_s0 + $0x8] sm:$0xf]  ;;  %v3304_v40 = vld [vmem:[%s4969_s0 + $0xc] sm:$0xf] }
   0xe   :  { %1429 = vmatpush.bf16.msra.mxu0 %v3459_v12  ;;  %v2454_v34 = vld [vmem:[%s4969_s0] sm:$0xf]  ;;  %v2456_v37 = vld [vmem:[%s4969_s0 + $0x20] sm:$0xf0]  ;;  %v3308_v39 = vld [vmem:[%s4969_s0 + $0x24] sm:$0xf0] }
   0xf   :  { %1533 = vmatpush.bf16.msra.mxu1 %v3467_v13  ;;  %v3307_v35 = vld [vmem:[%s4969_s0 + $0x1c] sm:$0xf0]  ;;  %v2464_v41 = vld [vmem:[%s4969_s0 + $0x28] sm:$0xf0]  ;;  %v2459_v46 = vor.u32 %v3303_v36, %v2456_v37  ;;  %v2463_v47 = vor.u32 %v3308_v39, %v2462_v38  ;;  %v1424_v50 = vsel %vm1422_vm0, %v1307_v44, 0  ;;  %v3509_v51 = vld [vmem:[%s4967_s1 + $0x1b0] sm:$0xff] }
  0x10   :  { %1637 = vmatpush.bf16.msra.mxu2 %v3475_v14  ;;  %v2455_v45 = vor.u32 %v3307_v35, %v2454_v34  ;;  %v2467_v48 = vor.u32 %v3304_v40, %v2464_v41  ;;  %v3493_v52 = vld [vmem:[%s4967_s1 + $0x130] sm:$0xff]  ;;  %v2486_v54 = vld [vmem:[%s4969_s0 + $0x40] sm:$0xf]  ;;  %v3311_v56 = vld [vmem:[%s4969_s0 + $0x44] sm:$0xf] }
  0x11   :  { %1741 = vmatpush.bf16.msra.mxu3 %v3483_v15  ;;  %v3501_v53 = vld [vmem:[%s4967_s1 + $0x170] sm:$0xff]  ;;  %v3315_v55 = vld [vmem:[%s4969_s0 + $0x5c] sm:$0xf0]  ;;  %v2488_v57 = vld [vmem:[%s4969_s0 + $0x60] sm:$0xf0] }
  0x12   :  { %1430 = vmatpush.bf16.msra.mxu0 %v3458_v16  ;;  %v2494_v58 = vld [vmem:[%s4969_s0 + $0x48] sm:$0xf]  ;;  %v3312_v60 = vld [vmem:[%s4969_s0 + $0x4c] sm:$0xf]  ;;  %v2487_v62 = vor.u32 %v3315_v55, %v2486_v54  ;;  %v2491_v63 = vor.u32 %v3311_v56, %v2488_v57  ;;  %v2518_v2 = vld [vmem:[%s4969_s0 + $0x80] sm:$0xf] }
  0x13   :  { %1534 = vmatpush.bf16.msra.mxu1 %v3466_v17  ;;  %v3316_v59 = vld [vmem:[%s4969_s0 + $0x64] sm:$0xf0]  ;;  %v2496_v61 = vld [vmem:[%s4969_s0 + $0x68] sm:$0xf0]  ;;  %v3323_v3 = vld [vmem:[%s4969_s0 + $0x9c] sm:$0xf0] }
  0x14   :  { %1638 = vmatpush.bf16.msra.mxu2 %v3474_v18  ;;  %v2495_v0 = vor.u32 %v3316_v59, %v2494_v58  ;;  %v2499_v1 = vor.u32 %v3312_v60, %v2496_v61  ;;  %v3319_v4 = vld [vmem:[%s4969_s0 + $0x84] sm:$0xf]  ;;  %v2526_v6 = vld [vmem:[%s4969_s0 + $0x88] sm:$0xf]  ;;  %v3320_v8 = vld [vmem:[%s4969_s0 + $0x8c] sm:$0xf]  ;;  %v2519_v10 = vor.u32 %v3323_v3, %v2518_v2 }
  0x15   :  { %1742 = vmatpush.bf16.msra.mxu3 %v3482_v19  ;;  %v2520_v5 = vld [vmem:[%s4969_s0 + $0xa0] sm:$0xf0]  ;;  %v3324_v7 = vld [vmem:[%s4969_s0 + $0xa4] sm:$0xf0]  ;;  %v2528_v9 = vld [vmem:[%s4969_s0 + $0xa8] sm:$0xf0] }
  0x16   :  { %1431 = vmatpush.bf16.msra.mxu0 %v3457_v20  ;;  %v2523_v11 = vor.u32 %v3319_v4, %v2520_v5  ;;  %v2527_v12 = vor.u32 %v3324_v7, %v2526_v6  ;;  %v2531_v13 = vor.u32 %v3320_v8, %v2528_v9  ;;  %v3508_v14 = vld [vmem:[%s4967_s1 + $0x1a8] sm:$0xff]  ;;  %v2550_v16 = vld [vmem:[%s4969_s0 + $0xc0] sm:$0xf]  ;;  %v3327_v18 = vld [vmem:[%s4969_s0 + $0xc4] sm:$0xf] }
  0x17   :  { %1535 = vmatpush.bf16.msra.mxu1 %v3465_v21  ;;  %v3492_v15 = vld [vmem:[%s4967_s1 + $0x128] sm:$0xff]  ;;  %v3331_v17 = vld [vmem:[%s4969_s0 + $0xdc] sm:$0xf0]  ;;  %v2552_v19 = vld [vmem:[%s4969_s0 + $0xe0] sm:$0xf0] }
  0x18   :  { %1639 = vmatpush.bf16.msra.mxu2 %v3473_v22  ;;  %v2558_v20 = vld [vmem:[%s4969_s0 + $0xc8] sm:$0xf]  ;;  %v3328_v22 = vld [vmem:[%s4969_s0 + $0xcc] sm:$0xf]  ;;  %v2551_v24 = vor.u32 %v3331_v17, %v2550_v16  ;;  %v3335_v31 = vld [vmem:[%s4969_s0 + $0x104] sm:$0xf] }
  0x19   :  { %1743 = vmatpush.bf16.msra.mxu3 %v3481_v23  ;;  %v3332_v21 = vld [vmem:[%s4969_s0 + $0xe4] sm:$0xf0]  ;;  %v2560_v23 = vld [vmem:[%s4969_s0 + $0xe8] sm:$0xf0]  ;;  %v2614_v41 = vld [vmem:[%s4969_s0 + $0x140] sm:$0xf] }
  0x1a   :  { %1432 = vmatpush.bf16.msra.mxu0 %v3456_v25  ;;  %v2555_v25 = vor.u32 %v3327_v18, %v2552_v19  ;;  %v3340_v34 = vld [vmem:[%s4969_s0 + $0x124] sm:$0xf0]  ;;  %v3336_v35 = vld [vmem:[%s4969_s0 + $0x10c] sm:$0xf]  ;;  %v2616_v44 = vld [vmem:[%s4969_s0 + $0x160] sm:$0xf0] }
  0x1b   :  { %1536 = vmatpush.bf16.msra.mxu1 %v3464_v26  ;;  %v2559_v26 = vor.u32 %v3332_v21, %v2558_v20  ;;  %v2592_v36 = vld [vmem:[%s4969_s0 + $0x128] sm:$0xf0]  ;;  %v3491_v54 = vld [vmem:[%s4967_s1 + $0x120] sm:$0xff]  ;;  %v2654_v60 = vld [vmem:[%s4969_s0 + $0x188] sm:$0xf] }
  0x1c   :  { %1640 = vmatpush.bf16.msra.mxu2 %v3472_v27  ;;  %v2563_v27 = vor.u32 %v3328_v22, %v2560_v23  ;;  %v2595_v40 = vor.u32 %v3336_v35, %v2592_v36  ;;  %v3499_v55 = vld [vmem:[%s4967_s1 + $0x160] sm:$0xff]  ;;  %v3356_v61 = vld [vmem:[%s4969_s0 + $0x1a4] sm:$0xf0]  ;;  %v3506_v19 = vld [vmem:[%s4967_s1 + $0x198] sm:$0xff] }
  0x1d   :  { %1744 = vmatpush.bf16.msra.mxu3 %v3480_v28  ;;  %v3500_v28 = vld [vmem:[%s4967_s1 + $0x168] sm:$0xff]  ;;  %v2646_v56 = vld [vmem:[%s4969_s0 + $0x180] sm:$0xf]  ;;  %v3351_v58 = vld [vmem:[%s4969_s0 + $0x184] sm:$0xf]  ;;  %v2655_v2 = vor.u32 %v3356_v61, %v2654_v60 }
  0x1e   :  { %1433 = vmatpush.bf16.msra.mxu0 %v3455_v29  ;;  %v2582_v29 = vld [vmem:[%s4969_s0 + $0x100] sm:$0xf]  ;;  %v2648_v59 = vld [vmem:[%s4969_s0 + $0x1a0] sm:$0xf0]  ;;  %v2686_v8 = vld [vmem:[%s4969_s0 + $0x1c8] sm:$0xf] }
  0x1f   :  { %1537 = vmatpush.bf16.msra.mxu1 %v3463_v30  ;;  %v3339_v30 = vld [vmem:[%s4969_s0 + $0x11c] sm:$0xf0]  ;;  %v3359_v6 = vld [vmem:[%s4969_s0 + $0x1c4] sm:$0xf]  ;;  %v3364_v9 = vld [vmem:[%s4969_s0 + $0x1e4] sm:$0xf0] }
  0x20   :  { %1641 = vmatpush.bf16.msra.mxu2 %v3471_v32  ;;  %v2584_v32 = vld [vmem:[%s4969_s0 + $0x120] sm:$0xf0]  ;;  %v2583_v37 = vor.u32 %v3339_v30, %v2582_v29  ;;  %v3355_v57 = vld [vmem:[%s4969_s0 + $0x19c] sm:$0xf0]  ;;  %v3490_v20 = vld [vmem:[%s4967_s1 + $0x118] sm:$0xff] }
  0x21   :  { %1745 = vmatpush.bf16.msra.mxu3 %v3479_v33  ;;  %1434 = vmatmul.bf16.vlgmr.msra.gmra.mxu0 %v2455_v45  ;;  %v2590_v33 = vld [vmem:[%s4969_s0 + $0x108] sm:$0xf]  ;;  %v2587_v38 = vor.u32 %v3335_v31, %v2584_v32  ;;  %v2678_v4 = vld [vmem:[%s4969_s0 + $0x1c0] sm:$0xf]  ;;  %v2680_v7 = vld [vmem:[%s4969_s0 + $0x1e0] sm:$0xf0] }
  0x22   :  { %1842 = vmatpush.bf16.msrb.mxu0 %v3494_v43  ;;  %1538 = vmatmul.bf16.vlgmr.msra.gmra.mxu1 %v2459_v46  ;;  %v2591_v39 = vor.u32 %v3340_v34, %v2590_v33  ;;  %v3343_v43 = vld [vmem:[%s4969_s0 + $0x144] sm:$0xf]  ;;  %v2622_v45 = vld [vmem:[%s4969_s0 + $0x148] sm:$0xf]  ;;  %v3363_v5 = vld [vmem:[%s4969_s0 + $0x1dc] sm:$0xf0] }
  0x23   :  { %1642 = vmatmul.bf16.vlgmr.msra.gmra.mxu2 %v2463_v47  ;;  %1946 = vmatpush.bf16.msrb.mxu1 %v3502_v49  ;;  %v3348_v46 = vld [vmem:[%s4969_s0 + $0x164] sm:$0xf0]  ;;  %v3344_v47 = vld [vmem:[%s4969_s0 + $0x14c] sm:$0xf]  ;;  %v2710_v16 = vld [vmem:[%s4969_s0 + $0x200] sm:$0xf] }
  0x24   :  { %2050 = vmatpush.bf16.msrb.mxu2 %v3510_v42  ;;  %1746 = vmatmul.bf16.vlgmr.msra.gmra.mxu3 %v2467_v48  ;;  %v3347_v42 = vld [vmem:[%s4969_s0 + $0x15c] sm:$0xf0]  ;;  %v2624_v48 = vld [vmem:[%s4969_s0 + $0x168] sm:$0xf0]  ;;  %v3367_v21 = vld [vmem:[%s4969_s0 + $0x204] sm:$0xf] }
  0x25   :  { %2161 = vmatpush.bf16.msrb.mxu3 %v1424_v50  ;;  %v2615_v49 = vor.u32 %v3347_v42, %v2614_v41  ;;  %v2619_v50 = vor.u32 %v3343_v43, %v2616_v44  ;;  %v3979_v17 = vld [vmem:[%s4968_s2] ss:$0 sm:$0xff]  ;;  %v2712_v22 = vld [vmem:[%s4969_s0 + $0x220] sm:$0xf0]  ;;  %v2718_v23 = vld [vmem:[%s4969_s0 + $0x208] sm:$0xf] }
  0x26   :  { %1843 = vmatpush.bf16.msrb.mxu0 %v3493_v52  ;;  %v2627_v52 = vor.u32 %v3344_v47, %v2624_v48  ;;  %v3371_v18 = vld [vmem:[%s4969_s0 + $0x21c] sm:$0xf0]  ;;  %v3498_v34 = vld [vmem:[%s4967_s1 + $0x158] sm:$0xff]  ;;  %v2744_v47 = vld [vmem:[%s4969_s0 + $0x260] sm:$0xf0] }
  0x27   :  { %1947 = vmatpush.bf16.msrb.mxu1 %v3501_v53  ;;  %v3507_v53 = vld [vmem:[%s4967_s1 + $0x1a0] sm:$0xff]  ;;  %v2750_v48 = vld [vmem:[%s4969_s0 + $0x248] sm:$0xf] }
  0x28   :  { %2051 = vmatpush.bf16.msrb.mxu2 %v3509_v51  ;;  %v2623_v51 = vor.u32 %v3348_v46, %v2622_v45  ;;  %v2742_v44 = vld [vmem:[%s4969_s0 + $0x240] sm:$0xf]  ;;  %v3375_v46 = vld [vmem:[%s4969_s0 + $0x244] sm:$0xf] }
  0x29   :  { %v3379_v45 = vld [vmem:[%s4969_s0 + $0x25c] sm:$0xf0] }
  0x2a   :  { %1844 = vmatpush.bf16.msrb.mxu0 %v3492_v15 }
  0x2b   :  { %1948 = vmatpush.bf16.msrb.mxu1 %v3500_v28  ;;  %v2715_v28 = vor.u32 %v3367_v21, %v2712_v22 }
  0x2c   :  { %2052 = vmatpush.bf16.msrb.mxu2 %v3508_v14  ;;  %v2687_v14 = vor.u32 %v3364_v9, %v2686_v8  ;;  %v2774_v8 = vld [vmem:[%s4969_s0 + $0x280] sm:$0xf] }
  0x2d   :  { %v3387_v9 = vld [vmem:[%s4969_s0 + $0x29c] sm:$0xf0] }
  0x2e   :  { %1845 = vmatpush.bf16.msrb.mxu0 %v3491_v54  ;;  %v2743_v54 = vor.u32 %v3379_v45, %v2742_v44  ;;  %v2808_v44 = vld [vmem:[%s4969_s0 + $0x2e0] sm:$0xf0]  ;;  %v2814_v45 = vld [vmem:[%s4969_s0 + $0x2c8] sm:$0xf] }
  0x2f   :  { %1949 = vmatpush.bf16.msrb.mxu1 %v3499_v55  ;;  %v2747_v55 = vor.u32 %v3375_v46, %v2744_v47  ;;  %v3396_v46 = vld [vmem:[%s4969_s0 + $0x2e4] sm:$0xf0]  ;;  %v3392_v47 = vld [vmem:[%s4969_s0 + $0x2cc] sm:$0xf] }
  0x30   :  { %2053 = vmatpush.bf16.msrb.mxu2 %v3507_v53 }
  0x31   :  { %1439 = vmatmul.bf16.gmra.mxu0 %v2487_v62  ;;  %v3352_v62 = vld [vmem:[%s4969_s0 + $0x18c] sm:$0xf] }
  0x32   :  { %1543 = vmatmul.bf16.gmra.mxu1 %v2491_v63  ;;  %v2656_v63 = vld [vmem:[%s4969_s0 + $0x1a8] sm:$0xf0]  ;;  %1846 = vmatpush.bf16.msrb.mxu0 %v3490_v20 }
  0x33   :  { %1647 = vmatmul.bf16.gmra.mxu2 %v2495_v0  ;;  %v2647_v0 = vor.u32 %v3355_v57, %v2646_v56  ;;  %v2659_v3 = vor.u32 %v3352_v62, %v2656_v63  ;;  %1950 = vmatpush.bf16.msrb.mxu1 %v3498_v34 }
  0x34   :  { %1751 = vmatmul.bf16.gmra.mxu3 %v2499_v1  ;;  %v2651_v1 = vor.u32 %v3351_v58, %v2648_v59  ;;  %2054 = vmatpush.bf16.msrb.mxu2 %v3506_v19  ;;  %v2775_v19 = vor.u32 %v3387_v9, %v2774_v8  ;;  %v3403_v8 = vld [vmem:[%s4969_s0 + $0x31c] sm:$0xf0]  ;;  %v3399_v9 = vld [vmem:[%s4969_s0 + $0x304] sm:$0xf] }
  0x41   :  { %1444 = vmatmul.bf16.gmra.mxu0 %v2519_v10  ;;  %v3360_v10 = vld [vmem:[%s4969_s0 + $0x1cc] sm:$0xf] }
  0x42   :  { %1548 = vmatmul.bf16.gmra.mxu1 %v2523_v11  ;;  %v2688_v11 = vld [vmem:[%s4969_s0 + $0x1e8] sm:$0xf0] }
  0x43   :  { %1652 = vmatmul.bf16.gmra.mxu2 %v2527_v12  ;;  %v2679_v12 = vor.u32 %v3363_v5, %v2678_v4  ;;  %v2691_v15 = vor.u32 %v3360_v10, %v2688_v11  ;;  %v3383_v10 = vld [vmem:[%s4969_s0 + $0x284] sm:$0xf] }
  0x44   :  { %1756 = vmatmul.bf16.gmra.mxu3 %v2531_v13  ;;  %v2683_v13 = vor.u32 %v3359_v6, %v2680_v7  ;;  %v2776_v11 = vld [vmem:[%s4969_s0 + $0x2a0] sm:$0xf0] }
  0x45   :  { %v2779_v20 = vor.u32 %v3383_v10, %v2776_v11  ;;  %v2840_v10 = vld [vmem:[%s4969_s0 + $0x320] sm:$0xf0]  ;;  %v2846_v11 = vld [vmem:[%s4969_s0 + $0x308] sm:$0xf] }
  0x51   :  { %1449 = vmatmul.bf16.gmra.mxu0 %v2551_v24  ;;  %v3372_v24 = vld [vmem:[%s4969_s0 + $0x224] sm:$0xf0] }
  0x52   :  { %1553 = vmatmul.bf16.gmra.mxu1 %v2555_v25  ;;  %v3368_v25 = vld [vmem:[%s4969_s0 + $0x20c] sm:$0xf]  ;;  %v2719_v31 = vor.u32 %v3372_v24, %v2718_v23 }
  0x53   :  { %1657 = vmatmul.bf16.gmra.mxu2 %v2559_v26  ;;  %v2720_v26 = vld [vmem:[%s4969_s0 + $0x228] sm:$0xf0] }
  0x54   :  { %1761 = vmatmul.bf16.gmra.mxu3 %v2563_v27  ;;  %v2711_v27 = vor.u32 %v3371_v18, %v2710_v16  ;;  %v2723_v32 = vor.u32 %v3368_v25, %v2720_v26 }
  0x61   :  { %1454 = vmatmul.bf16.gmra.mxu0 %v2583_v37 }
  0x62   :  { %1558 = vmatmul.bf16.gmra.mxu1 %v2587_v38 }
  0x63   :  { %1662 = vmatmul.bf16.gmra.mxu2 %v2591_v39 }
  0x64   :  { %1766 = vmatmul.bf16.gmra.mxu3 %v2595_v40 }
  0x71   :  { %1459 = vmatmul.bf16.gmra.mxu0 %v2615_v49  ;;  %v3380_v49 = vld [vmem:[%s4969_s0 + $0x264] sm:$0xf0] }
  0x72   :  { %1563 = vmatmul.bf16.gmra.mxu1 %v2619_v50  ;;  %v3376_v50 = vld [vmem:[%s4969_s0 + $0x24c] sm:$0xf]  ;;  %v2751_v59 = vor.u32 %v3380_v49, %v2750_v48 }
  0x73   :  { %1667 = vmatmul.bf16.gmra.mxu2 %v2623_v51  ;;  %v2752_v51 = vld [vmem:[%s4969_s0 + $0x268] sm:$0xf0] }
  0x74   :  { %1771 = vmatmul.bf16.gmra.mxu3 %v2627_v52  ;;  %v2755_v60 = vor.u32 %v3376_v50, %v2752_v51  ;;  %v2816_v48 = vld [vmem:[%s4969_s0 + $0x2e8] sm:$0xf0] }
  0x81   :  { %1464 = vmatmul.bf16.gmra.mxu0 %v2647_v0 }
  0x82   :  { %1568 = vmatmul.bf16.gmra.mxu1 %v2651_v1 }
  0x83   :  { %1672 = vmatmul.bf16.gmra.mxu2 %v2655_v2 }
  0x84   :  { %1776 = vmatmul.bf16.gmra.mxu3 %v2659_v3 }
  0x91   :  { %1469 = vmatmul.bf16.gmra.mxu0 %v2679_v12  ;;  %v2782_v12 = vld [vmem:[%s4969_s0 + $0x288] sm:$0xf] }
  0x92   :  { %1573 = vmatmul.bf16.gmra.mxu1 %v2683_v13  ;;  %v3388_v13 = vld [vmem:[%s4969_s0 + $0x2a4] sm:$0xf0] }
  0x93   :  { %1677 = vmatmul.bf16.gmra.mxu2 %v2687_v14  ;;  %v3384_v14 = vld [vmem:[%s4969_s0 + $0x28c] sm:$0xf]  ;;  %v2783_v24 = vor.u32 %v3388_v13, %v2782_v12  ;;  %v3404_v12 = vld [vmem:[%s4969_s0 + $0x324] sm:$0xf0] }
  0x94   :  { %1781 = vmatmul.bf16.gmra.mxu3 %v2691_v15  ;;  %v2784_v15 = vld [vmem:[%s4969_s0 + $0x2a8] sm:$0xf0] }
  0x95   :  { %v2787_v25 = vor.u32 %v3384_v14, %v2784_v15  ;;  %v3400_v13 = vld [vmem:[%s4969_s0 + $0x30c] sm:$0xf] }
  0x96   :  { %v2848_v14 = vld [vmem:[%s4969_s0 + $0x328] sm:$0xf0] }
  0x9e   :  { %v1435_v29 = vpop.f32.mrf.mxu0 }
  0x9f   :  { %v1539_v30 = vpop.f32.mrf.mxu1  ;;  %v1436_v33 = vadd.f32 %v3979_v17, %v1435_v29  ;;  %v3505_v29 = vld [vmem:[%s4967_s1 + $0x190] sm:$0xff] }
  0xa0   :  { %2055 = vmatpush.bf16.msrb.mxu2 %v3505_v29 }
  0xa1   :  { %v1540_v35 = vadd.f32 %v1539_v30, %v1436_v33  ;;  %1474 = vmatmul.bf16.gmra.mxu0 %v2711_v27  ;;  %v3489_v30 = vld [vmem:[%s4967_s1 + $0x110] sm:$0xff] }
  0xa2   :  { %1578 = vmatmul.bf16.gmra.mxu1 %v2715_v28  ;;  %1847 = vmatpush.bf16.msrb.mxu0 %v3489_v30 }
  0xa3   :  { %1682 = vmatmul.bf16.gmra.mxu2 %v2719_v31  ;;  %v3497_v31 = vld [vmem:[%s4967_s1 + $0x150] sm:$0xff] }
  0xa4   :  { %1786 = vmatmul.bf16.gmra.mxu3 %v2723_v32  ;;  %1951 = vmatpush.bf16.msrb.mxu1 %v3497_v31 }
  0xa6   :  { %v1643_v36 = vpop.f32.mrf.mxu2  ;;  %v1437_v39 = vpop.f32.mrf.mxu0 }
  0xa7   :  { %v1747_v37 = vpop.f32.mrf.mxu3  ;;  %v1644_v38 = vadd.f32 %v1643_v36, %v1540_v35  ;;  %v1541_v40 = vpop.f32.mrf.mxu1  ;;  %v1438_v41 = vadd.f32 %v3979_v17, %v1437_v39 }
  0xa9   :  { %v4013_v42 = vadd.f32 %v1747_v37, %v1644_v38  ;;  %v1542_v43 = vadd.f32 %v1541_v40, %v1438_v41  ;;  %v2806_v40 = vld [vmem:[%s4969_s0 + $0x2c0] sm:$0xf] }
  0xaa   :  { %v3395_v41 = vld [vmem:[%s4969_s0 + $0x2dc] sm:$0xf0] }
  0xab   :  { %v2807_v51 = vor.u32 %v3395_v41, %v2806_v40  ;;  %v3411_v40 = vld [vmem:[%s4969_s0 + $0x35c] sm:$0xf0]  ;;  %v3488_v41 = vld [vmem:[%s4967_s1 + $0x108] sm:$0xff] }
  0xac   :  { %1848 = vmatpush.bf16.msrb.mxu0 %v3488_v41 }
  0xae   :  { %v1645_v52 = vpop.f32.mrf.mxu2  ;;  %v1440_v57 = vpop.f32.mrf.mxu0 }
  0xaf   :  { %v1749_v53 = vpop.f32.mrf.mxu3  ;;  %v1646_v56 = vadd.f32 %v1645_v52, %v1542_v43  ;;  %v1544_v58 = vpop.f32.mrf.mxu1  ;;  %v1441_v61 = vadd.f32 %v3979_v17, %v1440_v57  ;;  %v3391_v43 = vld [vmem:[%s4969_s0 + $0x2c4] sm:$0xf]  ;;  %v2819_v57 = vor.u32 %v3392_v47, %v2816_v48  ;;  %v3412_v47 = vld [vmem:[%s4969_s0 + $0x364] sm:$0xf0]  ;;  %v3408_v48 = vld [vmem:[%s4969_s0 + $0x34c] sm:$0xf] }
  0xb0   :  { %v2811_v52 = vor.u32 %v3391_v43, %v2808_v44  ;;  %v3496_v43 = vld [vmem:[%s4967_s1 + $0x148] sm:$0xff]  ;;  %v3407_v44 = vld [vmem:[%s4969_s0 + $0x344] sm:$0xf] }
  0xb1   :  { %v4040_v62 = vadd.f32 %v1749_v53, %v1646_v56  ;;  %v1545_v63 = vadd.f32 %v1544_v58, %v1441_v61  ;;  %1479 = vmatmul.bf16.gmra.mxu0 %v2743_v54  ;;  %v2815_v56 = vor.u32 %v3396_v46, %v2814_v45  ;;  %v2872_v45 = vld [vmem:[%s4969_s0 + $0x360] sm:$0xf0]  ;;  %v2878_v46 = vld [vmem:[%s4969_s0 + $0x348] sm:$0xf]  ;;  %1952 = vmatpush.bf16.msrb.mxu1 %v3496_v43 }
  0xb2   :  { %1583 = vmatmul.bf16.gmra.mxu1 %v2747_v55 }
  0xb3   :  { %1687 = vmatmul.bf16.gmra.mxu2 %v2751_v59 }
  0xb4   :  { %1791 = vmatmul.bf16.gmra.mxu3 %v2755_v60 }
  0xb6   :  { %v1648_v0 = vpop.f32.mrf.mxu2  ;;  %v1442_v3 = vpop.f32.mrf.mxu0 }
  0xb7   :  { %v1752_v1 = vpop.f32.mrf.mxu3  ;;  %v1649_v2 = vadd.f32 %v1648_v0, %v1545_v63  ;;  %v1546_v4 = vpop.f32.mrf.mxu1  ;;  %v1443_v5 = vadd.f32 %v3979_v17, %v1442_v3 }
  0xb9   :  { %v4043_v6 = vadd.f32 %v1752_v1, %v1649_v2  ;;  %v1547_v7 = vadd.f32 %v1546_v4, %v1443_v5 }
  0xbe   :  { %v1650_v16 = vpop.f32.mrf.mxu2  ;;  %v1445_v22 = vpop.f32.mrf.mxu0 }
  0xbf   :  { %v1754_v18 = vpop.f32.mrf.mxu3  ;;  %v1651_v21 = vadd.f32 %v1650_v16, %v1547_v7  ;;  %v1549_v23 = vpop.f32.mrf.mxu1  ;;  %v1446_v26 = vadd.f32 %v3979_v17, %v1445_v22  ;;  %v2838_v7 = vld [vmem:[%s4969_s0 + $0x300] sm:$0xf] }
  0xc1   :  { %v4070_v27 = vadd.f32 %v1754_v18, %v1651_v21  ;;  %v1550_v28 = vadd.f32 %v1549_v23, %v1446_v26  ;;  %1484 = vmatmul.bf16.gmra.mxu0 %v2775_v19  ;;  %v2839_v18 = vor.u32 %v3403_v8, %v2838_v7  ;;  %v2843_v19 = vor.u32 %v3399_v9, %v2840_v10  ;;  %v2902_v10 = vld [vmem:[%s4969_s0 + $0x380] sm:$0xf] }
  0xc2   :  { %1588 = vmatmul.bf16.gmra.mxu1 %v2779_v20  ;;  %v2847_v23 = vor.u32 %v3404_v12, %v2846_v11  ;;  %v3419_v11 = vld [vmem:[%s4969_s0 + $0x39c] sm:$0xf0]  ;;  %v3415_v12 = vld [vmem:[%s4969_s0 + $0x384] sm:$0xf] }
  0xc3   :  { %1692 = vmatmul.bf16.gmra.mxu2 %v2783_v24  ;;  %v2851_v24 = vor.u32 %v3400_v13, %v2848_v14  ;;  %v2904_v13 = vld [vmem:[%s4969_s0 + $0x3a0] sm:$0xf0]  ;;  %v2910_v14 = vld [vmem:[%s4969_s0 + $0x388] sm:$0xf] }
  0xc4   :  { %1796 = vmatmul.bf16.gmra.mxu3 %v2787_v25 }
  0xc6   :  { %v1653_v32 = vpop.f32.mrf.mxu2  ;;  %v1447_v35 = vpop.f32.mrf.mxu0 }
  0xc7   :  { %v1757_v33 = vpop.f32.mrf.mxu3  ;;  %v1654_v34 = vadd.f32 %v1653_v32, %v1550_v28  ;;  %v1551_v36 = vpop.f32.mrf.mxu1  ;;  %v1448_v37 = vadd.f32 %v3979_v17, %v1447_v35 }
  0xc9   :  { %v4082_v38 = vadd.f32 %v1757_v33, %v1654_v34  ;;  %v1552_v39 = vadd.f32 %v1551_v36, %v1448_v37  ;;  %v2870_v36 = vld [vmem:[%s4969_s0 + $0x340] sm:$0xf]  ;;  %v3504_v37 = vld [vmem:[%s4967_s1 + $0x188] sm:$0xff] }
  0xca   :  { %2056 = vmatpush.bf16.msrb.mxu2 %v3504_v37 }
  0xce   :  { %v1655_v49 = vpop.f32.mrf.mxu2  ;;  %v1450_v54 = vpop.f32.mrf.mxu0 }
  0xcf   :  { %v1759_v50 = vpop.f32.mrf.mxu3  ;;  %v1656_v53 = vadd.f32 %v1655_v49, %v1552_v39  ;;  %v1554_v55 = vpop.f32.mrf.mxu1  ;;  %v1451_v58 = vadd.f32 %v3979_v17, %v1450_v54  ;;  %v2880_v49 = vld [vmem:[%s4969_s0 + $0x368] sm:$0xf0] }
  0xd1   :  { %v4109_v59 = vadd.f32 %v1759_v50, %v1656_v53  ;;  %v1555_v60 = vadd.f32 %v1554_v55, %v1451_v58  ;;  %1489 = vmatmul.bf16.gmra.mxu0 %v2807_v51  ;;  %v2875_v53 = vor.u32 %v3407_v44, %v2872_v45  ;;  %v2883_v58 = vor.u32 %v3408_v48, %v2880_v49  ;;  %v2934_v44 = vld [vmem:[%s4969_s0 + $0x3c0] sm:$0xf]  ;;  %v2936_v48 = vld [vmem:[%s4969_s0 + $0x3e0] sm:$0xf0]  ;;  %v2942_v49 = vld [vmem:[%s4969_s0 + $0x3c8] sm:$0xf] }
  0xd2   :  { %1593 = vmatmul.bf16.gmra.mxu1 %v2811_v52  ;;  %v2871_v52 = vor.u32 %v3411_v40, %v2870_v36  ;;  %v3427_v45 = vld [vmem:[%s4969_s0 + $0x3dc] sm:$0xf0] }
  0xd3   :  { %1697 = vmatmul.bf16.gmra.mxu2 %v2815_v56 }
  0xd4   :  { %1801 = vmatmul.bf16.gmra.mxu3 %v2819_v57  ;;  %v2879_v57 = vor.u32 %v3412_v47, %v2878_v46  ;;  %v3503_v46 = vld [vmem:[%s4967_s1 + $0x180] sm:$0xff] }
  0xd5   :  { %v3423_v47 = vld [vmem:[%s4969_s0 + $0x3c4] sm:$0xf]  ;;  %2057 = vmatpush.bf16.msrb.mxu2 %v3503_v46 }
  0xd6   :  { %v1658_v61 = vpop.f32.mrf.mxu2  ;;  %v1452_v1 = vpop.f32.mrf.mxu0 }
  0xd7   :  { %v1762_v63 = vpop.f32.mrf.mxu3  ;;  %v1659_v0 = vadd.f32 %v1658_v61, %v1555_v60  ;;  %v1556_v2 = vpop.f32.mrf.mxu1  ;;  %v1453_v3 = vadd.f32 %v3979_v17, %v1452_v1 }
  0xd9   :  { %v4112_v4 = vadd.f32 %v1762_v63, %v1659_v0  ;;  %v1557_v5 = vadd.f32 %v1556_v2, %v1453_v3 }
  0xde   :  { %v1660_v15 = vpop.f32.mrf.mxu2  ;;  %v1455_v21 = vpop.f32.mrf.mxu0 }
  0xdf   :  { %v1764_v16 = vpop.f32.mrf.mxu3  ;;  %v1661_v20 = vadd.f32 %v1660_v15, %v1557_v5  ;;  %v1559_v22 = vpop.f32.mrf.mxu1  ;;  %v1456_v25 = vadd.f32 %v3979_v17, %v1455_v21  ;;  %v3420_v15 = vld [vmem:[%s4969_s0 + $0x3a4] sm:$0xf0]  ;;  %v2903_v21 = vor.u32 %v3419_v11, %v2902_v10 }
  0xe1   :  { %v4139_v26 = vadd.f32 %v1764_v16, %v1661_v20  ;;  %v1560_v28 = vadd.f32 %v1559_v22, %v1456_v25  ;;  %1494 = vmatmul.bf16.gmra.mxu0 %v2839_v18  ;;  %v3416_v16 = vld [vmem:[%s4969_s0 + $0x38c] sm:$0xf]  ;;  %v2907_v22 = vor.u32 %v3415_v12, %v2904_v13 }
  0xe2   :  { %1598 = vmatmul.bf16.gmra.mxu1 %v2843_v19  ;;  %v2912_v18 = vld [vmem:[%s4969_s0 + $0x3a8] sm:$0xf0] }
  0xe3   :  { %1702 = vmatmul.bf16.gmra.mxu2 %v2847_v23 }
  0xe4   :  { %1806 = vmatmul.bf16.gmra.mxu3 %v2851_v24 }
  0xe6   :  { %v1663_v29 = vpop.f32.mrf.mxu2  ;;  %v1457_v32 = vpop.f32.mrf.mxu0 }
  0xe7   :  { %v1767_v30 = vpop.f32.mrf.mxu3  ;;  %v1664_v31 = vadd.f32 %v1663_v29, %v1560_v28  ;;  %v1561_v33 = vpop.f32.mrf.mxu1  ;;  %v1458_v34 = vadd.f32 %v3979_v17, %v1457_v32  ;;  %v2911_v28 = vor.u32 %v3420_v15, %v2910_v14  ;;  %v2915_v29 = vor.u32 %v3416_v16, %v2912_v18  ;;  %v2966_v18 = vld [vmem:[%s4969_s0 + $0x400] sm:$0xf] }
  0xe9   :  { %v4142_v35 = vadd.f32 %v1767_v30, %v1664_v31  ;;  %v1562_v39 = vadd.f32 %v1561_v33, %v1458_v34 }
  0xee   :  { %v1665_v50 = vpop.f32.mrf.mxu2  ;;  %v1460_v55 = vpop.f32.mrf.mxu0 }
  0xef   :  { %v1769_v51 = vpop.f32.mrf.mxu3  ;;  %v1666_v54 = vadd.f32 %v1665_v50, %v1562_v39  ;;  %v1564_v56 = vpop.f32.mrf.mxu1  ;;  %v1461_v60 = vadd.f32 %v3979_v17, %v1460_v55  ;;  %v3428_v50 = vld [vmem:[%s4969_s0 + $0x3e4] sm:$0xf0]  ;;  %v2935_v55 = vor.u32 %v3427_v45, %v2934_v44 }
  0xf1   :  { %v4178_v61 = vadd.f32 %v1769_v51, %v1666_v54  ;;  %v1565_v63 = vadd.f32 %v1564_v56, %v1461_v60  ;;  %1499 = vmatmul.bf16.gmra.mxu0 %v2871_v52  ;;  %v3424_v51 = vld [vmem:[%s4969_s0 + $0x3cc] sm:$0xf]  ;;  %v2939_v56 = vor.u32 %v3423_v47, %v2936_v48 }
  0xf2   :  { %1603 = vmatmul.bf16.gmra.mxu1 %v2875_v53  ;;  %v2944_v52 = vld [vmem:[%s4969_s0 + $0x3e8] sm:$0xf0] }
  0xf3   :  { %1707 = vmatmul.bf16.gmra.mxu2 %v2879_v57 }
  0xf4   :  { %1811 = vmatmul.bf16.gmra.mxu3 %v2883_v58 }
  0xf6   :  { %v1668_v0 = vpop.f32.mrf.mxu2  ;;  %v1462_v3 = vpop.f32.mrf.mxu0 }
  0xf7   :  { %v1772_v1 = vpop.f32.mrf.mxu3  ;;  %v1669_v2 = vadd.f32 %v1668_v0, %v1565_v63  ;;  %v1566_v5 = vpop.f32.mrf.mxu1  ;;  %v1463_v7 = vadd.f32 %v3979_v17, %v1462_v3  ;;  %v2943_v63 = vor.u32 %v3428_v50, %v2942_v49  ;;  %v2947_v0 = vor.u32 %v3424_v51, %v2944_v52  ;;  %v3487_v3 = vld [vmem:[%s4967_s1 + $0x100] sm:$0xff] }
  0xf8   :  { %1849 = vmatpush.bf16.msrb.mxu0 %v3487_v3 }
  0xf9   :  { %v4181_v8 = vadd.f32 %v1772_v1, %v1669_v2  ;;  %v1567_v9 = vadd.f32 %v1566_v5, %v1463_v7  ;;  %v3495_v7 = vld [vmem:[%s4967_s1 + $0x140] sm:$0xff] }
  0xfa   :  { %1953 = vmatpush.bf16.msrb.mxu1 %v3495_v7 }
  0xfe   :  { %v1670_v19 = vpop.f32.mrf.mxu2  ;;  %v1465_v24 = vpop.f32.mrf.mxu0 }
  0xff   :  { %v1774_v20 = vpop.f32.mrf.mxu3  ;;  %v1671_v23 = vadd.f32 %v1670_v19, %v1567_v9  ;;  %v1569_v25 = vpop.f32.mrf.mxu1  ;;  %v1466_v30 = vadd.f32 %v3979_v17, %v1465_v24  ;;  %v3435_v19 = vld [vmem:[%s4969_s0 + $0x41c] sm:$0xf0]  ;;  %v3432_v24 = vld [vmem:[%s4969_s0 + $0x40c] sm:$0xf] }
 0x101   :  { %v4208_v31 = vadd.f32 %v1774_v20, %v1671_v23  ;;  %v1570_v32 = vadd.f32 %v1569_v25, %v1466_v30  ;;  %1504 = vmatmul.bf16.gmra.mxu0 %v2903_v21  ;;  %v3431_v20 = vld [vmem:[%s4969_s0 + $0x404] sm:$0xf]  ;;  %v3436_v23 = vld [vmem:[%s4969_s0 + $0x424] sm:$0xf0]  ;;  %v2976_v25 = vld [vmem:[%s4969_s0 + $0x428] sm:$0xf0]  ;;  %v2967_v30 = vor.u32 %v3435_v19, %v2966_v18 }
 0x102   :  { %1608 = vmatmul.bf16.gmra.mxu1 %v2907_v22  ;;  %v2968_v21 = vld [vmem:[%s4969_s0 + $0x420] sm:$0xf0]  ;;  %v2974_v22 = vld [vmem:[%s4969_s0 + $0x408] sm:$0xf] }
 0x103   :  { %1712 = vmatmul.bf16.gmra.mxu2 %v2911_v28 }
 0x104   :  { %1816 = vmatmul.bf16.gmra.mxu3 %v2915_v29 }
 0x106   :  { %v1673_v33 = vpop.f32.mrf.mxu2  ;;  %v1467_v37 = vpop.f32.mrf.mxu0 }
 0x107   :  { %v1777_v34 = vpop.f32.mrf.mxu3  ;;  %v1674_v36 = vadd.f32 %v1673_v33, %v1570_v32  ;;  %v1571_v39 = vpop.f32.mrf.mxu1  ;;  %v1468_v40 = vadd.f32 %v3979_v17, %v1467_v37  ;;  %v2971_v32 = vor.u32 %v3431_v20, %v2968_v21  ;;  %v2975_v37 = vor.u32 %v3436_v23, %v2974_v22 }
 0x109   :  { %v4211_v41 = vadd.f32 %v1777_v34, %v1674_v36  ;;  %v1572_v43 = vadd.f32 %v1571_v39, %v1468_v40  ;;  %v2979_v39 = vor.u32 %v3432_v24, %v2976_v25 }
 0x10e   :  { %v1675_v53 = vpop.f32.mrf.mxu2  ;;  %v1470_v58 = vpop.f32.mrf.mxu0 }
 0x10f   :  { %v1779_v54 = vpop.f32.mrf.mxu3  ;;  %v1676_v57 = vadd.f32 %v1675_v53, %v1572_v43  ;;  %v1574_v60 = vpop.f32.mrf.mxu1  ;;  %v1471_v1 = vadd.f32 %v3979_v17, %v1470_v58  ;;  %v2998_v53 = vld [vmem:[%s4969_s0 + $0x440] sm:$0xf]  ;;  %v3444_v58 = vld [vmem:[%s4969_s0 + $0x464] sm:$0xf0] }
 0x111   :  { %v4241_v2 = vadd.f32 %v1779_v54, %v1676_v57  ;;  %v1575_v5 = vadd.f32 %v1574_v60, %v1471_v1  ;;  %1509 = vmatmul.bf16.gmra.mxu0 %v2935_v55  ;;  %v3443_v54 = vld [vmem:[%s4969_s0 + $0x45c] sm:$0xf0]  ;;  %v3439_v55 = vld [vmem:[%s4969_s0 + $0x444] sm:$0xf]  ;;  %v3006_v57 = vld [vmem:[%s4969_s0 + $0x448] sm:$0xf] }
 0x112   :  { %1613 = vmatmul.bf16.gmra.mxu1 %v2939_v56  ;;  %v3000_v56 = vld [vmem:[%s4969_s0 + $0x460] sm:$0xf0]  ;;  %v3440_v60 = vld [vmem:[%s4969_s0 + $0x44c] sm:$0xf]  ;;  %v2999_v3 = vor.u32 %v3443_v54, %v2998_v53 }
 0x113   :  { %1717 = vmatmul.bf16.gmra.mxu2 %v2943_v63  ;;  %v3008_v63 = vld [vmem:[%s4969_s0 + $0x468] sm:$0xf0] }
 0x114   :  { %1821 = vmatmul.bf16.gmra.mxu3 %v2947_v0 }
 0x116   :  { %v1678_v9 = vpop.f32.mrf.mxu2  ;;  %v1472_v12 = vpop.f32.mrf.mxu0 }
 0x117   :  { %v1782_v10 = vpop.f32.mrf.mxu3  ;;  %v1679_v11 = vadd.f32 %v1678_v9, %v1575_v5  ;;  %v1576_v13 = vpop.f32.mrf.mxu1  ;;  %v1473_v14 = vadd.f32 %v3979_v17, %v1472_v12  ;;  %v3003_v5 = vor.u32 %v3439_v55, %v3000_v56  ;;  %v3011_v12 = vor.u32 %v3440_v60, %v3008_v63 }
 0x119   :  { %v4250_v15 = vadd.f32 %v1782_v10, %v1679_v11  ;;  %v1577_v16 = vadd.f32 %v1576_v13, %v1473_v14  ;;  %v3007_v11 = vor.u32 %v3444_v58, %v3006_v57 }
 0x11e   :  { %v1680_v28 = vpop.f32.mrf.mxu2  ;;  %v1475_v34 = vpop.f32.mrf.mxu0 }
 0x11f   :  { %v1784_v29 = vpop.f32.mrf.mxu3  ;;  %v1681_v33 = vadd.f32 %v1680_v28, %v1577_v16  ;;  %v1579_v36 = vpop.f32.mrf.mxu1  ;;  %v1476_v40 = vadd.f32 %v3979_v17, %v1475_v34  ;;  %v3030_v28 = vld [vmem:[%s4969_s0 + $0x480] sm:$0xf]  ;;  %v3452_v34 = vld [vmem:[%s4969_s0 + $0x4a4] sm:$0xf0] }
 0x121   :  { %v4277_v43 = vadd.f32 %v1784_v29, %v1681_v33  ;;  %v1580_v44 = vadd.f32 %v1579_v36, %v1476_v40  ;;  %1514 = vmatmul.bf16.gmra.mxu0 %v2967_v30  ;;  %v3451_v29 = vld [vmem:[%s4969_s0 + $0x49c] sm:$0xf0]  ;;  %v3447_v30 = vld [vmem:[%s4969_s0 + $0x484] sm:$0xf]  ;;  %v3038_v33 = vld [vmem:[%s4969_s0 + $0x488] sm:$0xf] }
 0x122   :  { %1618 = vmatmul.bf16.gmra.mxu1 %v2971_v32  ;;  %v3032_v32 = vld [vmem:[%s4969_s0 + $0x4a0] sm:$0xf0]  ;;  %v3448_v36 = vld [vmem:[%s4969_s0 + $0x48c] sm:$0xf] }
 0x123   :  { %1722 = vmatmul.bf16.gmra.mxu2 %v2975_v37  ;;  %v3040_v37 = vld [vmem:[%s4969_s0 + $0x4a8] sm:$0xf0] }
 0x124   :  { %1826 = vmatmul.bf16.gmra.mxu3 %v2979_v39 }
 0x126   :  { %v1683_v45 = vpop.f32.mrf.mxu2  ;;  %v1477_v48 = vpop.f32.mrf.mxu0 }
 0x127   :  { %v1787_v46 = vpop.f32.mrf.mxu3  ;;  %v1684_v47 = vadd.f32 %v1683_v45, %v1580_v44  ;;  %v1581_v49 = vpop.f32.mrf.mxu1  ;;  %v1478_v50 = vadd.f32 %v3979_v17, %v1477_v48  ;;  %v3031_v44 = vor.u32 %v3451_v29, %v3030_v28  ;;  %v3035_v45 = vor.u32 %v3447_v30, %v3032_v32 }
 0x129   :  { %v4280_v51 = vadd.f32 %v1787_v46, %v1684_v47  ;;  %v1582_v52 = vadd.f32 %v1581_v49, %v1478_v50  ;;  %v3039_v49 = vor.u32 %v3452_v34, %v3038_v33  ;;  %v3043_v50 = vor.u32 %v3448_v36, %v3040_v37 }
 0x12e   :  { %v1685_v0 = vpop.f32.mrf.mxu2  ;;  %v1480_v9 = vpop.f32.mrf.mxu0 }
 0x12f   :  { %v1789_v1 = vpop.f32.mrf.mxu3  ;;  %v1686_v7 = vadd.f32 %v1685_v0, %v1582_v52  ;;  %v1584_v10 = vpop.f32.mrf.mxu1  ;;  %v1481_v13 = vadd.f32 %v3979_v17, %v1480_v9  ;;  %v2472_v9 = vld [vmem:[%s4969_s0 + $0x30] sm:$0xf0] }
 0x131   :  { %v4307_v14 = vadd.f32 %v1789_v1, %v1686_v7  ;;  %v1585_v16 = vadd.f32 %v1584_v10, %v1481_v13  ;;  %1519 = vmatmul.bf16.gmra.mxu0 %v2999_v3  ;;  %v2470_v3 = vld [vmem:[%s4969_s0 + $0x10] sm:$0xf]  ;;  %v3305_v7 = vld [vmem:[%s4969_s0 + $0x14] sm:$0xf]  ;;  %v2478_v10 = vld [vmem:[%s4969_s0 + $0x18] sm:$0xf] }
 0x132   :  { %1623 = vmatmul.bf16.gmra.mxu1 %v3003_v5  ;;  %v3309_v5 = vld [vmem:[%s4969_s0 + $0x2c] sm:$0xf0]  ;;  %v2480_v13 = vld [vmem:[%s4969_s0 + $0x38] sm:$0xf0] }
 0x133   :  { %1727 = vmatmul.bf16.gmra.mxu2 %v3007_v11  ;;  %v3310_v11 = vld [vmem:[%s4969_s0 + $0x34] sm:$0xf0] }
 0x134   :  { %1831 = vmatmul.bf16.gmra.mxu3 %v3011_v12  ;;  %v3306_v12 = vld [vmem:[%s4969_s0 + $0x1c] sm:$0xf] }
 0x135   :  { %v2483_v28 = vor.u32 %v3306_v12, %v2480_v13 }
 0x136   :  { %v1688_v18 = vpop.f32.mrf.mxu2  ;;  %v1482_v21 = vpop.f32.mrf.mxu0 }
 0x137   :  { %v1792_v19 = vpop.f32.mrf.mxu3  ;;  %v1689_v20 = vadd.f32 %v1688_v18, %v1585_v16  ;;  %v1586_v22 = vpop.f32.mrf.mxu1  ;;  %v1483_v23 = vadd.f32 %v3979_v17, %v1482_v21 }
 0x139   :  { %v4310_v24 = vadd.f32 %v1792_v19, %v1689_v20  ;;  %v1587_v25 = vadd.f32 %v1586_v22, %v1483_v23  ;;  %v2471_v19 = vor.u32 %v3309_v5, %v2470_v3  ;;  %v2475_v20 = vor.u32 %v3305_v7, %v2472_v9 }
 0x13e   :  { %v1690_v39 = vpop.f32.mrf.mxu2  ;;  %v1485_v47 = vpop.f32.mrf.mxu0 }
 0x13f   :  { %v1794_v40 = vpop.f32.mrf.mxu3  ;;  %v1691_v46 = vadd.f32 %v1690_v39, %v1587_v25  ;;  %v1589_v48 = vpop.f32.mrf.mxu1  ;;  %v1486_v52 = vadd.f32 %v3979_v17, %v1485_v47  ;;  %v2479_v25 = vor.u32 %v3310_v11, %v2478_v10  ;;  %v3317_v47 = vld [vmem:[%s4969_s0 + $0x6c] sm:$0xf0] }
 0x141   :  { %v4337_v53 = vadd.f32 %v1794_v40, %v1691_v46  ;;  %v1590_v54 = vadd.f32 %v1589_v48, %v1486_v52  ;;  %1524 = vmatmul.bf16.gmra.mxu0 %v3031_v44  ;;  %v2502_v46 = vld [vmem:[%s4969_s0 + $0x50] sm:$0xf]  ;;  %v3313_v48 = vld [vmem:[%s4969_s0 + $0x54] sm:$0xf]  ;;  %v3318_v52 = vld [vmem:[%s4969_s0 + $0x74] sm:$0xf0] }
 0x142   :  { %1628 = vmatmul.bf16.gmra.mxu1 %v3035_v45 }
 0x143   :  { %1732 = vmatmul.bf16.gmra.mxu2 %v3039_v49  ;;  %v2504_v49 = vld [vmem:[%s4969_s0 + $0x70] sm:$0xf0] }
 0x144   :  { %1836 = vmatmul.bf16.gmra.mxu3 %v3043_v50  ;;  %v2510_v50 = vld [vmem:[%s4969_s0 + $0x58] sm:$0xf] }
 0x145   :  { %v2511_v5 = vor.u32 %v3318_v52, %v2510_v50 }
 0x146   :  { %v1693_v55 = vpop.f32.mrf.mxu2  ;;  %v1487_v58 = vpop.f32.mrf.mxu0 }
 0x147   :  { %v1797_v56 = vpop.f32.mrf.mxu3  ;;  %v1694_v57 = vadd.f32 %v1693_v55, %v1590_v54  ;;  %v1591_v60 = vpop.f32.mrf.mxu1  ;;  %v1488_v63 = vadd.f32 %v3979_v17, %v1487_v58  ;;  %v3314_v54 = vld [vmem:[%s4969_s0 + $0x5c] sm:$0xf]  ;;  %v2503_v58 = vor.u32 %v3317_v47, %v2502_v46 }
 0x148   :  { %v2512_v55 = vld [vmem:[%s4969_s0 + $0x78] sm:$0xf0] }
 0x149   :  { %v4340_v0 = vadd.f32 %v1797_v56, %v1694_v57  ;;  %v1592_v1 = vadd.f32 %v1591_v60, %v1488_v63  ;;  %v2507_v60 = vor.u32 %v3313_v48, %v2504_v49  ;;  %v2515_v7 = vor.u32 %v3314_v54, %v2512_v55 }
 0x14e   :  { %v1695_v16 = vpop.f32.mrf.mxu2  ;;  %v1490_v22 = vpop.f32.mrf.mxu0 }
 0x14f   :  { %v1799_v18 = vpop.f32.mrf.mxu3  ;;  %v1696_v21 = vadd.f32 %v1695_v16, %v1592_v1  ;;  %v1594_v23 = vpop.f32.mrf.mxu1  ;;  %v1491_v29 = vadd.f32 %v3979_v17, %v1490_v22 }
 0x151   :  { %v4367_v30 = vadd.f32 %v1799_v18, %v1696_v21  ;;  %v1595_v32 = vadd.f32 %v1594_v23, %v1491_v29  ;;  %1850 = vmatmul.bf16.vlgmr.msrb.gmra.mxu0 %v2471_v19  ;;  %v2534_v23 = vld [vmem:[%s4969_s0 + $0x90] sm:$0xf]  ;;  %v2536_v29 = vld [vmem:[%s4969_s0 + $0xb0] sm:$0xf0] }
 0x152   :  { %1954 = vmatmul.bf16.vlgmr.msrb.gmra.mxu1 %v2475_v20 }
 0x153   :  { %2058 = vmatmul.bf16.vlgmr.msrb.gmra.mxu2 %v2479_v25  ;;  %v3325_v25 = vld [vmem:[%s4969_s0 + $0xac] sm:$0xf0] }
 0x154   :  { %3284 = vmatmul.msk.bf16.vlgmr.msrb.gmra.mxu3 %vm1364_vm1, %v2483_v28  ;;  %v3321_v28 = vld [vmem:[%s4969_s0 + $0x94] sm:$0xf] }
 0x156   :  { %v1698_v33 = vpop.f32.mrf.mxu2  ;;  %v1492_v37 = vpop.f32.mrf.mxu0 }
 0x157   :  { %v1802_v34 = vpop.f32.mrf.mxu3  ;;  %v1699_v36 = vadd.f32 %v1698_v33, %v1595_v32  ;;  %v1596_v39 = vpop.f32.mrf.mxu1  ;;  %v1493_v40 = vadd.f32 %v3979_v17, %v1492_v37  ;;  %v2542_v32 = vld [vmem:[%s4969_s0 + $0x98] sm:$0xf] }
 0x158   :  { %v3326_v33 = vld [vmem:[%s4969_s0 + $0xb4] sm:$0xf0] }
 0x159   :  { %v4371_v44 = vadd.f32 %v1802_v34, %v1699_v36  ;;  %v1597_v45 = vadd.f32 %v1596_v39, %v1493_v40  ;;  %v3322_v34 = vld [vmem:[%s4969_s0 + $0x9c] sm:$0xf]  ;;  %v2535_v40 = vor.u32 %v3325_v25, %v2534_v23  ;;  %v2543_v49 = vor.u32 %v3326_v33, %v2542_v32 }
 0x15a   :  { %v2544_v36 = vld [vmem:[%s4969_s0 + $0xb8] sm:$0xf0] }
 0x15b   :  { %v2547_v50 = vor.u32 %v3322_v34, %v2544_v36 }
 0x15e   :  { %v1700_v56 = vpop.f32.mrf.mxu2  ;;  %v1495_v1 = vpop.f32.mrf.mxu0 }
 0x15f   :  { %v1804_v57 = vpop.f32.mrf.mxu3  ;;  %v1701_v63 = vadd.f32 %v1700_v56, %v1597_v45  ;;  %v1599_v3 = vpop.f32.mrf.mxu1  ;;  %v1496_v9 = vadd.f32 %v3979_v17, %v1495_v1  ;;  %v2539_v45 = vor.u32 %v3321_v28, %v2536_v29 }
 0x161   :  { %v4398_v10 = vadd.f32 %v1804_v57, %v1701_v63  ;;  %v1600_v11 = vadd.f32 %v1599_v3, %v1496_v9  ;;  %1855 = vmatmul.bf16.gmra.mxu0 %v2503_v58  ;;  %v3333_v9 = vld [vmem:[%s4969_s0 + $0xec] sm:$0xf0] }
 0x162   :  { %1959 = vmatmul.bf16.gmra.mxu1 %v2507_v60 }
 0x163   :  { %2063 = vmatmul.bf16.gmra.mxu2 %v2511_v5 }
 0x164   :  { %3285 = vmatmul.msk.bf16.gmra.mxu3 %vm1364_vm1, %v2515_v7  ;;  %v2566_v7 = vld [vmem:[%s4969_s0 + $0xd0] sm:$0xf] }
 0x165   :  { %v2567_v23 = vor.u32 %v3333_v9, %v2566_v7 }
 0x166   :  { %v1703_v12 = vpop.f32.mrf.mxu2  ;;  %v1497_v18 = vpop.f32.mrf.mxu0 }
 0x167   :  { %v1807_v13 = vpop.f32.mrf.mxu3  ;;  %v1704_v16 = vadd.f32 %v1703_v12, %v1600_v11  ;;  %v1601_v19 = vpop.f32.mrf.mxu1  ;;  %v1498_v20 = vadd.f32 %v3979_v17, %v1497_v18  ;;  %v3329_v11 = vld [vmem:[%s4969_s0 + $0xd4] sm:$0xf]  ;;  %v3330_v18 = vld [vmem:[%s4969_s0 + $0xdc] sm:$0xf] }
 0x168   :  { %v2568_v12 = vld [vmem:[%s4969_s0 + $0xf0] sm:$0xf0] }
 0x169   :  { %v4402_v21 = vadd.f32 %v1807_v13, %v1704_v16  ;;  %v1602_v22 = vadd.f32 %v1601_v19, %v1498_v20  ;;  %v2574_v13 = vld [vmem:[%s4969_s0 + $0xd8] sm:$0xf]  ;;  %v2576_v19 = vld [vmem:[%s4969_s0 + $0xf8] sm:$0xf0]  ;;  %v2571_v25 = vor.u32 %v3329_v11, %v2568_v12 }
 0x16a   :  { %v3334_v16 = vld [vmem:[%s4969_s0 + $0xf4] sm:$0xf0]  ;;  %v2579_v34 = vor.u32 %v3330_v18, %v2576_v19 }
 0x16b   :  { %v2575_v33 = vor.u32 %v3334_v16, %v2574_v13 }
 0x16e   :  { %v1705_v37 = vpop.f32.mrf.mxu2  ;;  %v1500_v47 = vpop.f32.mrf.mxu0 }
 0x16f   :  { %v1809_v39 = vpop.f32.mrf.mxu3  ;;  %v1706_v46 = vadd.f32 %v1705_v37, %v1602_v22  ;;  %v1604_v48 = vpop.f32.mrf.mxu1  ;;  %v1501_v52 = vadd.f32 %v3979_v17, %v1500_v47 }
 0x171   :  { %v4429_v54 = vadd.f32 %v1809_v39, %v1706_v46  ;;  %v1605_v55 = vadd.f32 %v1604_v48, %v1501_v52  ;;  %1860 = vmatmul.bf16.gmra.mxu0 %v2535_v40 }
 0x172   :  { %1964 = vmatmul.bf16.gmra.mxu1 %v2539_v45 }
 0x173   :  { %2068 = vmatmul.bf16.gmra.mxu2 %v2543_v49 }
 0x174   :  { %3286 = vmatmul.msk.bf16.gmra.mxu3 %vm1364_vm1, %v2547_v50 }
 0x176   :  { %v1708_v56 = vpop.f32.mrf.mxu2  ;;  %v1502_v60 = vpop.f32.mrf.mxu0 }
 0x177   :  { %v1812_v57 = vpop.f32.mrf.mxu3  ;;  %v1709_v58 = vadd.f32 %v1708_v56, %v1605_v55  ;;  %v1606_v63 = vpop.f32.mrf.mxu1  ;;  %v1503_v1 = vadd.f32 %v3979_v17, %v1502_v60  ;;  %v2598_v55 = vld [vmem:[%s4969_s0 + $0x110] sm:$0xf]  ;;  %v3342_v60 = vld [vmem:[%s4969_s0 + $0x134] sm:$0xf0] }
 0x178   :  { %v3341_v56 = vld [vmem:[%s4969_s0 + $0x12c] sm:$0xf0] }
 0x179   :  { %v4433_v3 = vadd.f32 %v1812_v57, %v1709_v58  ;;  %v1607_v5 = vadd.f32 %v1606_v63, %v1503_v1  ;;  %v3337_v57 = vld [vmem:[%s4969_s0 + $0x114] sm:$0xf]  ;;  %v3338_v63 = vld [vmem:[%s4969_s0 + $0x11c] sm:$0xf]  ;;  %v2599_v9 = vor.u32 %v3341_v56, %v2598_v55 }
 0x17a   :  { %v2600_v58 = vld [vmem:[%s4969_s0 + $0x130] sm:$0xf0]  ;;  %v2608_v1 = vld [vmem:[%s4969_s0 + $0x138] sm:$0xf0] }
 0x17b   :  { %v2603_v11 = vor.u32 %v3337_v57, %v2600_v58  ;;  %v2611_v19 = vor.u32 %v3338_v63, %v2608_v1  ;;  %v3346_v55 = vld [vmem:[%s4969_s0 + $0x15c] sm:$0xf] }
 0x17c   :  { %v2640_v56 = vld [vmem:[%s4969_s0 + $0x178] sm:$0xf0] }
 0x17e   :  { %v1710_v20 = vpop.f32.mrf.mxu2  ;;  %v1505_v29 = vpop.f32.mrf.mxu0 }
 0x17f   :  { %v1814_v22 = vpop.f32.mrf.mxu3  ;;  %v1711_v28 = vadd.f32 %v1710_v20, %v1607_v5  ;;  %v1609_v32 = vpop.f32.mrf.mxu1  ;;  %v1506_v36 = vadd.f32 %v3979_v17, %v1505_v29  ;;  %v4493_v20 = vld [vmem:[%s4968_s2] ss:$0 sm:$0xff] }
 0x181   :  { %v4460_v37 = vadd.f32 %v1814_v22, %v1711_v28  ;;  %v1610_v39 = vadd.f32 %v1609_v32, %v1506_v36  ;;  %1865 = vmatmul.bf16.gmra.mxu0 %v2567_v23 }
 0x182   :  { %1969 = vmatmul.bf16.gmra.mxu1 %v2571_v25 }
 0x183   :  { %2073 = vmatmul.bf16.gmra.mxu2 %v2575_v33 }
 0x184   :  { %3287 = vmatmul.msk.bf16.gmra.mxu3 %vm1364_vm1, %v2579_v34 }
 0x186   :  { %v1713_v40 = vpop.f32.mrf.mxu2  ;;  %v1507_v47 = vpop.f32.mrf.mxu0 }
 0x187   :  { %v1817_v45 = vpop.f32.mrf.mxu3  ;;  %v1714_v46 = vadd.f32 %v1713_v40, %v1610_v39  ;;  %v1611_v48 = vpop.f32.mrf.mxu1  ;;  %v1508_v49 = vadd.f32 %v3979_v17, %v1507_v47  ;;  %v2606_v17 = vld [vmem:[%s4969_s0 + $0x118] sm:$0xf]  ;;  %v3345_v47 = vld [vmem:[%s4969_s0 + $0x154] sm:$0xf] }
 0x188   :  { %v2607_v18 = vor.u32 %v3342_v60, %v2606_v17 }
 0x189   :  { %v4464_v50 = vadd.f32 %v1817_v45, %v1714_v46  ;;  %v1612_v52 = vadd.f32 %v1611_v48, %v1508_v49  ;;  %v2630_v45 = vld [vmem:[%s4969_s0 + $0x150] sm:$0xf]  ;;  %v2632_v48 = vld [vmem:[%s4969_s0 + $0x170] sm:$0xf0]  ;;  %v2638_v49 = vld [vmem:[%s4969_s0 + $0x158] sm:$0xf] }
 0x18a   :  { %v3349_v46 = vld [vmem:[%s4969_s0 + $0x16c] sm:$0xf0]  ;;  %v2635_v60 = vor.u32 %v3345_v47, %v2632_v48  ;;  %v3354_v47 = vld [vmem:[%s4969_s0 + $0x19c] sm:$0xf] }
 0x18b   :  { %v2631_v17 = vor.u32 %v3349_v46, %v2630_v45  ;;  %v2670_v45 = vld [vmem:[%s4969_s0 + $0x198] sm:$0xf]  ;;  %v2672_v48 = vld [vmem:[%s4969_s0 + $0x1b8] sm:$0xf0] }
 0x18c   :  { %v3358_v46 = vld [vmem:[%s4969_s0 + $0x1b4] sm:$0xf0] }
 0x18e   :  { %v1715_v5 = vpop.f32.mrf.mxu2  ;;  %v1510_v13 = vpop.f32.mrf.mxu0 }
 0x18f   :  { %v1819_v7 = vpop.f32.mrf.mxu3  ;;  %v1716_v12 = vadd.f32 %v1715_v5, %v1612_v52  ;;  %v1614_v16 = vpop.f32.mrf.mxu1  ;;  %v1511_v22 = vadd.f32 %v4493_v20, %v1510_v13  ;;  %v3350_v52 = vld [vmem:[%s4969_s0 + $0x174] sm:$0xf0] }
 0x191   :  { %v4496_v23 = vadd.f32 %v1819_v7, %v1716_v12  ;;  %v1615_v25 = vadd.f32 %v1614_v16, %v1511_v22  ;;  %1870 = vmatmul.bf16.gmra.mxu0 %v2599_v9  ;;  %v2639_v7 = vor.u32 %v3350_v52, %v2638_v49  ;;  %v2643_v9 = vor.u32 %v3346_v55, %v2640_v56 }
 0x192   :  { %1974 = vmatmul.bf16.gmra.mxu1 %v2603_v11 }
 0x193   :  { %2078 = vmatmul.bf16.gmra.mxu2 %v2607_v18 }
 0x194   :  { %3288 = vmatmul.msk.bf16.gmra.mxu3 %vm1364_vm1, %v2611_v19 }
 0x196   :  { %v1718_v28 = vpop.f32.mrf.mxu2  ;;  %v1512_v33 = vpop.f32.mrf.mxu0 }
 0x197   :  { %v1822_v29 = vpop.f32.mrf.mxu3  ;;  %v1719_v32 = vadd.f32 %v1718_v28, %v1615_v25  ;;  %v1616_v34 = vpop.f32.mrf.mxu1  ;;  %v1513_v36 = vadd.f32 %v4493_v20, %v1512_v33  ;;  %v2662_v33 = vld [vmem:[%s4969_s0 + $0x190] sm:$0xf] }
 0x199   :  { %v4500_v39 = vadd.f32 %v1822_v29, %v1719_v32  ;;  %v1617_v40 = vadd.f32 %v1616_v34, %v1513_v36  ;;  %v3357_v34 = vld [vmem:[%s4969_s0 + $0x1ac] sm:$0xf0]  ;;  %v3353_v36 = vld [vmem:[%s4969_s0 + $0x194] sm:$0xf] }
 0x19a   :  { %v2663_v55 = vor.u32 %v3357_v34, %v2662_v33  ;;  %v3361_v33 = vld [vmem:[%s4969_s0 + $0x1d4] sm:$0xf] }
 0x19b   :  { %v2696_v34 = vld [vmem:[%s4969_s0 + $0x1f0] sm:$0xf0] }
 0x19e   :  { %v1720_v57 = vpop.f32.mrf.mxu2  ;;  %v1515_v1 = vpop.f32.mrf.mxu0 }
 0x19f   :  { %v1824_v58 = vpop.f32.mrf.mxu3  ;;  %v1721_v63 = vadd.f32 %v1720_v57, %v1617_v40  ;;  %v1619_v5 = vpop.f32.mrf.mxu1  ;;  %v1516_v11 = vadd.f32 %v4493_v20, %v1515_v1  ;;  %v2664_v40 = vld [vmem:[%s4969_s0 + $0x1b0] sm:$0xf0] }
 0x1a0   :  { %v2667_v56 = vor.u32 %v3353_v36, %v2664_v40  ;;  %v2702_v36 = vld [vmem:[%s4969_s0 + $0x1d8] sm:$0xf] }
 0x1a1   :  { %v4527_v12 = vadd.f32 %v1824_v58, %v1721_v63  ;;  %v1620_v13 = vadd.f32 %v1619_v5, %v1516_v11  ;;  %1875 = vmatmul.bf16.gmra.mxu0 %v2631_v17  ;;  %v2675_v63 = vor.u32 %v3354_v47, %v2672_v48  ;;  %v3366_v40 = vld [vmem:[%s4969_s0 + $0x1f4] sm:$0xf0] }
 0x1a2   :  { %1979 = vmatmul.bf16.gmra.mxu1 %v2635_v60  ;;  %v2671_v60 = vor.u32 %v3358_v46, %v2670_v45  ;;  %v3362_v45 = vld [vmem:[%s4969_s0 + $0x1dc] sm:$0xf] }
 0x1a3   :  { %2083 = vmatmul.bf16.gmra.mxu2 %v2639_v7  ;;  %v2704_v46 = vld [vmem:[%s4969_s0 + $0x1f8] sm:$0xf0] }
 0x1a4   :  { %3289 = vmatmul.msk.bf16.gmra.mxu3 %vm1364_vm1, %v2643_v9 }
 0x1a6   :  { %v1723_v16 = vpop.f32.mrf.mxu2  ;;  %v1517_v22 = vpop.f32.mrf.mxu0 }
 0x1a7   :  { %v1827_v18 = vpop.f32.mrf.mxu3  ;;  %v1724_v19 = vadd.f32 %v1723_v16, %v1620_v13  ;;  %v1621_v25 = vpop.f32.mrf.mxu1  ;;  %v1518_v28 = vadd.f32 %v4493_v20, %v1517_v22 }
 0x1a9   :  { %v4531_v29 = vadd.f32 %v1827_v18, %v1724_v19  ;;  %v1622_v32 = vadd.f32 %v1621_v25, %v1518_v28  ;;  %v2694_v28 = vld [vmem:[%s4969_s0 + $0x1d0] sm:$0xf] }
 0x1ae   :  { %v1725_v49 = vpop.f32.mrf.mxu2  ;;  %v1520_v58 = vpop.f32.mrf.mxu0 }
 0x1af   :  { %v1829_v52 = vpop.f32.mrf.mxu3  ;;  %v1726_v57 = vadd.f32 %v1725_v49, %v1622_v32  ;;  %v1624_v17 = vpop.f32.mrf.mxu1  ;;  %v1521_v1 = vadd.f32 %v4493_v20, %v1520_v58  ;;  %v3365_v32 = vld [vmem:[%s4969_s0 + $0x1ec] sm:$0xf0]  ;;  %v2703_v58 = vor.u32 %v3366_v40, %v2702_v36  ;;  %v3374_v36 = vld [vmem:[%s4969_s0 + $0x234] sm:$0xf0]  ;;  %v3370_v40 = vld [vmem:[%s4969_s0 + $0x21c] sm:$0xf] }
 0x1b0   :  { %v2695_v49 = vor.u32 %v3365_v32, %v2694_v28  ;;  %v2726_v28 = vld [vmem:[%s4969_s0 + $0x210] sm:$0xf] }
 0x1b1   :  { %v4558_v5 = vadd.f32 %v1829_v52, %v1726_v57  ;;  %v1625_v7 = vadd.f32 %v1624_v17, %v1521_v1  ;;  %1880 = vmatmul.bf16.gmra.mxu0 %v2663_v55  ;;  %v2699_v52 = vor.u32 %v3361_v33, %v2696_v34  ;;  %v2707_v17 = vor.u32 %v3362_v45, %v2704_v46  ;;  %v3373_v32 = vld [vmem:[%s4969_s0 + $0x22c] sm:$0xf0]  ;;  %v3369_v33 = vld [vmem:[%s4969_s0 + $0x214] sm:$0xf]  ;;  %v2736_v45 = vld [vmem:[%s4969_s0 + $0x238] sm:$0xf0] }
 0x1b2   :  { %1984 = vmatmul.bf16.gmra.mxu1 %v2667_v56  ;;  %v2728_v34 = vld [vmem:[%s4969_s0 + $0x230] sm:$0xf0] }
 0x1b3   :  { %2088 = vmatmul.bf16.gmra.mxu2 %v2671_v60 }
 0x1b4   :  { %3290 = vmatmul.msk.bf16.gmra.mxu3 %vm1364_vm1, %v2675_v63 }
 0x1b6   :  { %v1728_v9 = vpop.f32.mrf.mxu2  ;;  %v1522_v16 = vpop.f32.mrf.mxu0 }
 0x1b7   :  { %v1832_v11 = vpop.f32.mrf.mxu3  ;;  %v1729_v13 = vadd.f32 %v1728_v9, %v1625_v7  ;;  %v1626_v18 = vpop.f32.mrf.mxu1  ;;  %v1523_v19 = vadd.f32 %v4493_v20, %v1522_v16 }
 0x1b9   :  { %v4562_v22 = vadd.f32 %v1832_v11, %v1729_v13  ;;  %v1627_v25 = vadd.f32 %v1626_v18, %v1523_v19 }
 0x1be   :  { %v1730_v47 = vpop.f32.mrf.mxu2  ;;  %v1525_v56 = vpop.f32.mrf.mxu0 }
 0x1bf   :  { %v1834_v48 = vpop.f32.mrf.mxu3  ;;  %v1731_v55 = vadd.f32 %v1730_v47, %v1627_v25  ;;  %v1629_v57 = vpop.f32.mrf.mxu1  ;;  %v1526_v60 = vadd.f32 %v4493_v20, %v1525_v56 }
 0x1c1   :  { %v4589_v63 = vadd.f32 %v1834_v48, %v1731_v55  ;;  %v1630_v1 = vadd.f32 %v1629_v57, %v1526_v60  ;;  %1885 = vmatmul.bf16.gmra.mxu0 %v2695_v49  ;;  %v2727_v48 = vor.u32 %v3373_v32, %v2726_v28  ;;  %v2731_v49 = vor.u32 %v3369_v33, %v2728_v34  ;;  %v3381_v28 = vld [vmem:[%s4969_s0 + $0x26c] sm:$0xf0]  ;;  %v2760_v32 = vld [vmem:[%s4969_s0 + $0x270] sm:$0xf0]  ;;  %v3382_v33 = vld [vmem:[%s4969_s0 + $0x274] sm:$0xf0] }
 0x1c2   :  { %1989 = vmatmul.bf16.gmra.mxu1 %v2699_v52  ;;  %v3378_v34 = vld [vmem:[%s4969_s0 + $0x25c] sm:$0xf] }
 0x1c3   :  { %2093 = vmatmul.bf16.gmra.mxu2 %v2703_v58  ;;  %v2739_v58 = vor.u32 %v3370_v40, %v2736_v45 }
 0x1c4   :  { %3291 = vmatmul.msk.bf16.gmra.mxu3 %vm1364_vm1, %v2707_v17 }
 0x1c6   :  { %v1733_v7 = vpop.f32.mrf.mxu2  ;;  %v1527_v13 = vpop.f32.mrf.mxu0 }
 0x1c7   :  { %v1837_v9 = vpop.f32.mrf.mxu3  ;;  %v1734_v11 = vadd.f32 %v1733_v7, %v1630_v1  ;;  %v1631_v16 = vpop.f32.mrf.mxu1  ;;  %v1528_v18 = vadd.f32 %v4493_v20, %v1527_v13  ;;  %v2734_v20 = vld [vmem:[%s4969_s0 + $0x218] sm:$0xf] }
 0x1c8   :  { %v2735_v57 = vor.u32 %v3374_v36, %v2734_v20  ;;  %v2768_v20 = vld [vmem:[%s4969_s0 + $0x278] sm:$0xf0] }
 0x1c9   :  { %v4593_v19 = vadd.f32 %v1837_v9, %v1734_v11  ;;  %v1632_v25 = vadd.f32 %v1631_v16, %v1528_v18 }
 0x1ce   :  { %v1735_v46 = vpop.f32.mrf.mxu2  ;;  %v1851_v55 = vpop.f32.mrf.mxu0 }
 0x1cf   :  { %v1839_v47 = vpop.f32.mrf.mxu3  ;;  %v1736_v52 = vadd.f32 %v1735_v46, %v1632_v25  ;;  %v1955_v56 = vpop.f32.mrf.mxu1  ;;  %v1852_v60 = vadd.f32 %v1851_v55, %v4013_v42  ;;  %v2758_v25 = vld [vmem:[%s4969_s0 + $0x250] sm:$0xf]  ;;  %v3377_v42 = vld [vmem:[%s4969_s0 + $0x254] sm:$0xf] }
 0x1d1   :  { %v4619_v17 = vadd.f32 %v1839_v47, %v1736_v52  ;;  %1890 = vmatmul.bf16.gmra.mxu0 %v2727_v48  ;;  %v1956_v9 = vadd.f32 %v1955_v56, %v1852_v60  ;;  %v2759_v47 = vor.u32 %v3381_v28, %v2758_v25  ;;  %v2763_v48 = vor.u32 %v3377_v42, %v2760_v32 }
 0x1d2   :  { %1994 = vmatmul.bf16.gmra.mxu1 %v2731_v49 }
 0x1d3   :  { %2098 = vmatmul.bf16.gmra.mxu2 %v2735_v57  ;;  %v2771_v57 = vor.u32 %v3378_v34, %v2768_v20  ;;  %v3385_v34 = vld [vmem:[%s4969_s0 + $0x294] sm:$0xf] }
 0x1d4   :  { %3292 = vmatmul.msk.bf16.gmra.mxu3 %vm1364_vm1, %v2739_v58  ;;  %v2792_v20 = vld [vmem:[%s4969_s0 + $0x2b0] sm:$0xf0] }
 0x1d6   :  { %v2059_v1 = vpop.f32.mrf.mxu2  ;;  %v1853_v11 = vpop.f32.mrf.mxu0 }
 0x1d7   :  { %v2163_v7 = vpop.f32.mrf.mxu3  ;;  %v1957_v13 = vpop.f32.mrf.mxu1  ;;  %v2060_v16 = vadd.f32 %v2059_v1, %v1956_v9  ;;  %v1854_v18 = vadd.f32 %v1853_v11, %v4040_v62  ;;  %v2766_v62 = vld [vmem:[%s4969_s0 + $0x258] sm:$0xf] }
 0x1d8   :  { %v2767_v56 = vor.u32 %v3382_v33, %v2766_v62  ;;  %v3389_v33 = vld [vmem:[%s4969_s0 + $0x2ac] sm:$0xf0] }
 0x1d9   :  { %v2164_v36 = vadd.f32 %v2163_v7, %v2060_v16  ;;  %v1958_v40 = vadd.f32 %v1957_v13, %v1854_v18 }
 0x1db   :  { %v2296_v58 = vmul.f32 0.01, %v2164_v36  ;;  %vm2258_vm2 = vcmp.ge.f32.partialorder %v2164_v36, 0.0 }
 0x1dd   :  { %v2334_v7 = vsel %vm2258_vm2, %v2164_v36, %v2296_v58  ;;  %v3390_v36 = vld [vmem:[%s4969_s0 + $0x2b4] sm:$0xf0] }
 0x1de   :  { %v2061_v45 = vpop.f32.mrf.mxu2  ;;  %v1856_v52 = vpop.f32.mrf.mxu0 }
 0x1df   :  { %v2165_v46 = vpop.f32.mrf.mxu3  ;;  %v2062_v49 = vadd.f32 %v2061_v45, %v1958_v40  ;;  %v1960_v55 = vpop.f32.mrf.mxu1  ;;  %v1857_v9 = vadd.f32 %v1856_v52, %v4043_v6  ;;  %v2790_v6 = vld [vmem:[%s4969_s0 + $0x290] sm:$0xf]  ;;  %v3386_v40 = vld [vmem:[%s4969_s0 + $0x29c] sm:$0xf] }
 0x1e0   :  { %v2800_v45 = vld [vmem:[%s4969_s0 + $0x2b8] sm:$0xf0]  ;;  %v2791_v52 = vor.u32 %v3389_v33, %v2790_v6 }
 0x1e1   :  { %v2166_v60 = vadd.f32 %v2165_v46, %v2062_v49  ;;  %1895 = vmatmul.bf16.gmra.mxu0 %v2759_v47  ;;  %v1961_v25 = vadd.f32 %v1960_v55, %v1857_v9  ;;  %v2795_v55 = vor.u32 %v3385_v34, %v2792_v20  ;;  %v3397_v20 = vld [vmem:[%s4969_s0 + $0x2ec] sm:$0xf0] }
 0x1e2   :  { %1999 = vmatmul.bf16.gmra.mxu1 %v2763_v48 }
 0x1e3   :  { %vm2259_vm3 = vcmp.ge.f32.partialorder %v2166_v60, 0.0  ;;  %v2297_v1 = vmul.f32 0.01, %v2166_v60  ;;  %2103 = vmatmul.bf16.gmra.mxu2 %v2767_v56 }
 0x1e4   :  { %3293 = vmatmul.msk.bf16.gmra.mxu3 %vm1364_vm1, %v2771_v57 }
 0x1e5   :  { %v2335_v11 = vsel %vm2259_vm3, %v2166_v60, %v2297_v1  ;;  %v2803_v1 = vor.u32 %v3386_v40, %v2800_v45  ;;  %v3398_v40 = vld [vmem:[%s4969_s0 + $0x2f4] sm:$0xf0]  ;;  %v3394_v45 = vld [vmem:[%s4969_s0 + $0x2dc] sm:$0xf] }
 0x1e6   :  { %v3514_v13 = vpack.c.bf16 %v2335_v11, %v2334_v7  ;;  %v2064_v16 = vpop.f32.mrf.mxu2  ;;  %v1858_v28 = vpop.f32.mrf.mxu0 }
 0x1e7   :  { %v2168_v18 = vpop.f32.mrf.mxu3  ;;  %v1962_v42 = vpop.f32.mrf.mxu1  ;;  %v2065_v32 = vadd.f32 %v2064_v16, %v1961_v25  ;;  %v1859_v62 = vadd.f32 %v1858_v28, %v4070_v27  ;;  %v2798_v27 = vld [vmem:[%s4969_s0 + $0x298] sm:$0xf] }
 0x1e8   :  { %3515 = vst [vmem:[%s4970_s3] sm:$0xff] %v3514_v13   ;;  %v2799_v60 = vor.u32 %v3390_v36, %v2798_v27  ;;  %v3393_v27 = vld [vmem:[%s4969_s0 + $0x2d4] sm:$0xf] }
 0x1e9   :  { %v2169_v46 = vadd.f32 %v2168_v18, %v2065_v32  ;;  %v1963_v47 = vadd.f32 %v1962_v42, %v1859_v62  ;;  %v2824_v36 = vld [vmem:[%s4969_s0 + $0x2f0] sm:$0xf0] }
 0x1eb   :  { %v2298_v9 = vmul.f32 0.01, %v2169_v46  ;;  %vm2260_vm4 = vcmp.ge.f32.partialorder %v2169_v46, 0.0 }
 0x1ed   :  { %v2336_v16 = vsel %vm2260_vm4, %v2169_v46, %v2298_v9  ;;  %v2832_v46 = vld [vmem:[%s4969_s0 + $0x2f8] sm:$0xf0] }
 0x1ee   :  { %v2066_v48 = vpop.f32.mrf.mxu2  ;;  %v1861_v57 = vpop.f32.mrf.mxu0  ;;  %v2835_v9 = vor.u32 %v3394_v45, %v2832_v46  ;;  %v2864_v45 = vld [vmem:[%s4969_s0 + $0x338] sm:$0xf0] }
 0x1ef   :  { %v2170_v49 = vpop.f32.mrf.mxu3  ;;  %v2067_v56 = vadd.f32 %v2066_v48, %v1963_v47  ;;  %v1965_v58 = vpop.f32.mrf.mxu1  ;;  %v1862_v13 = vadd.f32 %v1861_v57, %v4082_v38  ;;  %v2822_v38 = vld [vmem:[%s4969_s0 + $0x2d0] sm:$0xf] }
 0x1f1   :  { %v2171_v7 = vadd.f32 %v2170_v49, %v2067_v56  ;;  %1900 = vmatmul.bf16.gmra.mxu0 %v2791_v52  ;;  %v1966_v32 = vadd.f32 %v1965_v58, %v1862_v13  ;;  %v2827_v56 = vor.u32 %v3393_v27, %v2824_v36  ;;  %v3401_v27 = vld [vmem:[%s4969_s0 + $0x314] sm:$0xf] }
 0x1f2   :  { %2004 = vmatmul.bf16.gmra.mxu1 %v2795_v55  ;;  %v2823_v55 = vor.u32 %v3397_v20, %v2822_v38  ;;  %v3405_v20 = vld [vmem:[%s4969_s0 + $0x32c] sm:$0xf0]  ;;  %v2856_v36 = vld [vmem:[%s4969_s0 + $0x330] sm:$0xf0] }
 0x1f3   :  { %vm2261_vm5 = vcmp.ge.f32.partialorder %v2171_v7, 0.0  ;;  %v2299_v11 = vmul.f32 0.01, %v2171_v7  ;;  %2108 = vmatmul.bf16.gmra.mxu2 %v2799_v60 }
 0x1f4   :  { %3294 = vmatmul.msk.bf16.gmra.mxu3 %vm1364_vm1, %v2803_v1 }
 0x1f5   :  { %v2337_v18 = vsel %vm2261_vm5, %v2171_v7, %v2299_v11 }
 0x1f6   :  { %v3519_v25 = vpack.c.bf16 %v2337_v18, %v2336_v16  ;;  %v2069_v28 = vpop.f32.mrf.mxu2  ;;  %v1863_v62 = vpop.f32.mrf.mxu0 }
 0x1f7   :  { %v2173_v42 = vpop.f32.mrf.mxu3  ;;  %v1967_v6 = vpop.f32.mrf.mxu1  ;;  %v2070_v33 = vadd.f32 %v2069_v28, %v1966_v32  ;;  %v1864_v34 = vadd.f32 %v1863_v62, %v4109_v59  ;;  %v2830_v59 = vld [vmem:[%s4969_s0 + $0x2d8] sm:$0xf] }
 0x1f8   :  { %3606 = vst [vmem:[%s4970_s3 + $0x8] sm:$0xff] %v3519_v25   ;;  %v2831_v1 = vor.u32 %v3398_v40, %v2830_v59  ;;  %v3406_v59 = vld [vmem:[%s4969_s0 + $0x334] sm:$0xf0]  ;;  %v3402_v40 = vld [vmem:[%s4969_s0 + $0x31c] sm:$0xf] }
 0x1f9   :  { %v2174_v47 = vadd.f32 %v2173_v42, %v2070_v33  ;;  %v1968_v48 = vadd.f32 %v1967_v6, %v1864_v34 }
 0x1fb   :  { %v2300_v7 = vmul.f32 0.01, %v2174_v47  ;;  %vm2262_vm6 = vcmp.ge.f32.partialorder %v2174_v47, 0.0 }
 0x1fd   :  { %v2338_v18 = vsel %vm2262_vm6, %v2174_v47, %v2300_v7 }
 0x1fe   :  { %v2071_v49 = vpop.f32.mrf.mxu2  ;;  %v1866_v58 = vpop.f32.mrf.mxu0 }
 0x1ff   :  { %v2175_v52 = vpop.f32.mrf.mxu3  ;;  %v2072_v57 = vadd.f32 %v2071_v49, %v1968_v48  ;;  %v1970_v60 = vpop.f32.mrf.mxu1  ;;  %v1867_v16 = vadd.f32 %v1866_v58, %v4112_v4  ;;  %v2854_v4 = vld [vmem:[%s4969_s0 + $0x310] sm:$0xf] }
 0x201   :  { %v2176_v11 = vadd.f32 %v2175_v52, %v2072_v57  ;;  %1905 = vmatmul.bf16.gmra.mxu0 %v2823_v55  ;;  %v1971_v62 = vadd.f32 %v1970_v60, %v1867_v16  ;;  %v2855_v52 = vor.u32 %v3405_v20, %v2854_v4  ;;  %v2859_v55 = vor.u32 %v3401_v27, %v2856_v36  ;;  %v3409_v4 = vld [vmem:[%s4969_s0 + $0x354] sm:$0xf]  ;;  %v3414_v27 = vld [vmem:[%s4969_s0 + $0x374] sm:$0xf0]  ;;  %v3410_v36 = vld [vmem:[%s4969_s0 + $0x35c] sm:$0xf] }
 0x202   :  { %2009 = vmatmul.bf16.gmra.mxu1 %v2827_v56  ;;  %v2888_v20 = vld [vmem:[%s4969_s0 + $0x370] sm:$0xf0] }
 0x203   :  { %vm2263_vm7 = vcmp.ge.f32.partialorder %v2176_v11, 0.0  ;;  %v2301_v13 = vmul.f32 0.01, %v2176_v11  ;;  %2113 = vmatmul.bf16.gmra.mxu2 %v2831_v1  ;;  %v2867_v1 = vor.u32 %v3402_v40, %v2864_v45 }
 0x204   :  { %3295 = vmatmul.msk.bf16.gmra.mxu3 %vm1364_vm1, %v2835_v9 }
 0x205   :  { %v2339_v25 = vsel %vm2263_vm7, %v2176_v11, %v2301_v13 }
 0x206   :  { %v3524_v28 = vpack.c.bf16 %v2339_v25, %v2338_v18  ;;  %v2074_v42 = vpop.f32.mrf.mxu2  ;;  %v1868_v6 = vpop.f32.mrf.mxu0 }
 0x207   :  { %v2178_v32 = vpop.f32.mrf.mxu3  ;;  %v1972_v33 = vpop.f32.mrf.mxu1  ;;  %v2075_v34 = vadd.f32 %v2074_v42, %v1971_v62  ;;  %v1869_v38 = vadd.f32 %v1868_v6, %v4139_v26  ;;  %v2862_v26 = vld [vmem:[%s4969_s0 + $0x318] sm:$0xf] }
 0x208   :  { %3607 = vst [vmem:[%s4970_s3 + $0x10] sm:$0xff] %v3524_v28   ;;  %v2863_v60 = vor.u32 %v3406_v59, %v2862_v26  ;;  %v2896_v26 = vld [vmem:[%s4969_s0 + $0x378] sm:$0xf0] }
 0x209   :  { %v2179_v46 = vadd.f32 %v2178_v32, %v2075_v34  ;;  %v1973_v47 = vadd.f32 %v1972_v33, %v1869_v38  ;;  %v3413_v38 = vld [vmem:[%s4969_s0 + $0x36c] sm:$0xf0] }
 0x20b   :  { %v2302_v9 = vmul.f32 0.01, %v2179_v46  ;;  %vm2264_vm8 = vcmp.ge.f32.partialorder %v2179_v46, 0.0 }
 0x20d   :  { %v2340_v16 = vsel %vm2264_vm8, %v2179_v46, %v2302_v9 }
 0x20e   :  { %v2076_v48 = vpop.f32.mrf.mxu2  ;;  %v1871_v57 = vpop.f32.mrf.mxu0 }
 0x20f   :  { %v2180_v49 = vpop.f32.mrf.mxu3  ;;  %v2077_v56 = vadd.f32 %v2076_v48, %v1973_v47  ;;  %v1975_v58 = vpop.f32.mrf.mxu1  ;;  %v1872_v13 = vadd.f32 %v1871_v57, %v4142_v35  ;;  %v2886_v35 = vld [vmem:[%s4969_s0 + $0x350] sm:$0xf]  ;;  %v2891_v48 = vor.u32 %v3409_v4, %v2888_v20  ;;  %v2899_v57 = vor.u32 %v3410_v36, %v2896_v26  ;;  %v2928_v4 = vld [vmem:[%s4969_s0 + $0x3b8] sm:$0xf0] }
 0x210   :  { %v2887_v47 = vor.u32 %v3413_v38, %v2886_v35  ;;  %v3422_v35 = vld [vmem:[%s4969_s0 + $0x3b4] sm:$0xf0]  ;;  %v3418_v38 = vld [vmem:[%s4969_s0 + $0x39c] sm:$0xf] }
 0x211   :  { %v2181_v7 = vadd.f32 %v2180_v49, %v2077_v56  ;;  %1910 = vmatmul.bf16.gmra.mxu0 %v2855_v52  ;;  %v1976_v32 = vadd.f32 %v1975_v58, %v1872_v13 }
 0x212   :  { %2014 = vmatmul.bf16.gmra.mxu1 %v2859_v55 }
 0x213   :  { %vm2265_vm9 = vcmp.ge.f32.partialorder %v2181_v7, 0.0  ;;  %v2303_v11 = vmul.f32 0.01, %v2181_v7  ;;  %2118 = vmatmul.bf16.gmra.mxu2 %v2863_v60 }
 0x214   :  { %3296 = vmatmul.msk.bf16.gmra.mxu3 %vm1364_vm1, %v2867_v1 }
 0x215   :  { %v2341_v18 = vsel %vm2265_vm9, %v2181_v7, %v2303_v11 }
 0x216   :  { %v3529_v25 = vpack.c.bf16 %v2341_v18, %v2340_v16  ;;  %v2079_v28 = vpop.f32.mrf.mxu2  ;;  %v1873_v62 = vpop.f32.mrf.mxu0 }
 0x217   :  { %v2183_v42 = vpop.f32.mrf.mxu3  ;;  %v1977_v6 = vpop.f32.mrf.mxu1  ;;  %v2080_v33 = vadd.f32 %v2079_v28, %v1976_v32  ;;  %v1874_v34 = vadd.f32 %v1873_v62, %v4178_v61  ;;  %v2894_v61 = vld [vmem:[%s4969_s0 + $0x358] sm:$0xf] }
 0x218   :  { %3608 = vst [vmem:[%s4970_s3 + $0x18] sm:$0xff] %v3529_v25   ;;  %v2895_v56 = vor.u32 %v3414_v27, %v2894_v61 }
 0x219   :  { %v2184_v59 = vadd.f32 %v2183_v42, %v2080_v33  ;;  %v1978_v40 = vadd.f32 %v1977_v6, %v1874_v34  ;;  %v3421_v6 = vld [vmem:[%s4969_s0 + $0x3ac] sm:$0xf0]  ;;  %v3417_v33 = vld [vmem:[%s4969_s0 + $0x394] sm:$0xf] }
 0x21a   :  { %v2920_v34 = vld [vmem:[%s4969_s0 + $0x3b0] sm:$0xf0] }
 0x21b   :  { %v2304_v58 = vmul.f32 0.01, %v2184_v59  ;;  %vm2266_vm10 = vcmp.ge.f32.partialorder %v2184_v59, 0.0 }
 0x21d   :  { %v2342_v7 = vsel %vm2266_vm10, %v2184_v59, %v2304_v58  ;;  %v2923_v59 = vor.u32 %v3417_v33, %v2920_v34 }
 0x21e   :  { %v2081_v45 = vpop.f32.mrf.mxu2  ;;  %v1876_v52 = vpop.f32.mrf.mxu0 }
 0x21f   :  { %v2185_v46 = vpop.f32.mrf.mxu3  ;;  %v2082_v49 = vadd.f32 %v2081_v45, %v1978_v40  ;;  %v1980_v55 = vpop.f32.mrf.mxu1  ;;  %v1877_v9 = vadd.f32 %v1876_v52, %v4181_v8  ;;  %v2918_v8 = vld [vmem:[%s4969_s0 + $0x390] sm:$0xf] }
 0x220   :  { %v2919_v26 = vor.u32 %v3421_v6, %v2918_v8  ;;  %v2960_v8 = vld [vmem:[%s4969_s0 + $0x3f8] sm:$0xf0] }
 0x221   :  { %v2186_v60 = vadd.f32 %v2185_v46, %v2082_v49  ;;  %1915 = vmatmul.bf16.gmra.mxu0 %v2887_v47  ;;  %v1981_v25 = vadd.f32 %v1980_v55, %v1877_v9 }
 0x222   :  { %2019 = vmatmul.bf16.gmra.mxu1 %v2891_v48  ;;  %v2931_v48 = vor.u32 %v3418_v38, %v2928_v4 }
 0x223   :  { %vm2267_vm11 = vcmp.ge.f32.partialorder %v2186_v60, 0.0  ;;  %v2305_v1 = vmul.f32 0.01, %v2186_v60  ;;  %2123 = vmatmul.bf16.gmra.mxu2 %v2895_v56 }
 0x224   :  { %3297 = vmatmul.msk.bf16.gmra.mxu3 %vm1364_vm1, %v2899_v57 }
 0x225   :  { %v2343_v11 = vsel %vm2267_vm11, %v2186_v60, %v2305_v1 }
 0x226   :  { %v3534_v13 = vpack.c.bf16 %v2343_v11, %v2342_v7  ;;  %v2084_v16 = vpop.f32.mrf.mxu2  ;;  %v1878_v28 = vpop.f32.mrf.mxu0 }
 0x227   :  { %v2188_v18 = vpop.f32.mrf.mxu3  ;;  %v1982_v42 = vpop.f32.mrf.mxu1  ;;  %v2085_v32 = vadd.f32 %v2084_v16, %v1981_v25  ;;  %v1879_v62 = vadd.f32 %v1878_v28, %v4208_v31  ;;  %v2926_v31 = vld [vmem:[%s4969_s0 + $0x398] sm:$0xf]  ;;  %v3429_v25 = vld [vmem:[%s4969_s0 + $0x3ec] sm:$0xf0]  ;;  %v3425_v28 = vld [vmem:[%s4969_s0 + $0x3d4] sm:$0xf] }
 0x228   :  { %3609 = vst [vmem:[%s4970_s3 + $0x20] sm:$0xff] %v3534_v13   ;;  %v2927_v47 = vor.u32 %v3422_v35, %v2926_v31 }
 0x229   :  { %v2189_v20 = vadd.f32 %v2188_v18, %v2085_v32  ;;  %v1983_v61 = vadd.f32 %v1982_v42, %v1879_v62  ;;  %v2952_v42 = vld [vmem:[%s4969_s0 + $0x3f0] sm:$0xf0]  ;;  %v3430_v32 = vld [vmem:[%s4969_s0 + $0x3f4] sm:$0xf0]  ;;  %v3426_v62 = vld [vmem:[%s4969_s0 + $0x3dc] sm:$0xf] }
 0x22a   :  { %v2955_v38 = vor.u32 %v3425_v28, %v2952_v42 }
 0x22b   :  { %v2306_v49 = vmul.f32 0.01, %v2189_v20  ;;  %vm2268_vm12 = vcmp.ge.f32.partialorder %v2189_v20, 0.0 }
 0x22d   :  { %v2344_v57 = vsel %vm2268_vm12, %v2189_v20, %v2306_v49 }
 0x22e   :  { %v2086_v27 = vpop.f32.mrf.mxu2  ;;  %v1881_v45 = vpop.f32.mrf.mxu0 }
 0x22f   :  { %v2190_v36 = vpop.f32.mrf.mxu3  ;;  %v2087_v40 = vadd.f32 %v2086_v27, %v1983_v61  ;;  %v1985_v46 = vpop.f32.mrf.mxu1  ;;  %v1882_v56 = vadd.f32 %v1881_v45, %v4211_v41  ;;  %v2950_v41 = vld [vmem:[%s4969_s0 + $0x3d0] sm:$0xf] }
 0x230   :  { %v2951_v35 = vor.u32 %v3429_v25, %v2950_v41 }
 0x231   :  { %v2191_v52 = vadd.f32 %v2190_v36, %v2087_v40  ;;  %1920 = vmatmul.bf16.gmra.mxu0 %v2919_v26  ;;  %v1986_v7 = vadd.f32 %v1985_v46, %v1882_v56  ;;  %v2963_v36 = vor.u32 %v3426_v62, %v2960_v8 }
 0x232   :  { %2024 = vmatmul.bf16.gmra.mxu1 %v2923_v59 }
 0x233   :  { %vm2269_vm13 = vcmp.ge.f32.partialorder %v2191_v52, 0.0  ;;  %v2307_v55 = vmul.f32 0.01, %v2191_v52  ;;  %2128 = vmatmul.bf16.gmra.mxu2 %v2927_v47 }
 0x234   :  { %3298 = vmatmul.msk.bf16.gmra.mxu3 %vm1364_vm1, %v2931_v48 }
 0x235   :  { %v2345_v58 = vsel %vm2269_vm13, %v2191_v52, %v2307_v55 }
 0x236   :  { %v3539_v60 = vpack.c.bf16 %v2345_v58, %v2344_v57  ;;  %v2089_v1 = vpop.f32.mrf.mxu2  ;;  %v1883_v11 = vpop.f32.mrf.mxu0 }
 0x237   :  { %v2193_v9 = vpop.f32.mrf.mxu3  ;;  %v1987_v13 = vpop.f32.mrf.mxu1  ;;  %v2090_v16 = vadd.f32 %v2089_v1, %v1986_v7  ;;  %v1884_v18 = vadd.f32 %v1883_v11, %v4241_v2  ;;  %v2958_v2 = vld [vmem:[%s4969_s0 + $0x3d8] sm:$0xf]  ;;  %v3437_v1 = vld [vmem:[%s4969_s0 + $0x42c] sm:$0xf0]  ;;  %v2984_v7 = vld [vmem:[%s4969_s0 + $0x430] sm:$0xf0] }
 0x238   :  { %3610 = vst [vmem:[%s4970_s3 + $0x28] sm:$0xff] %v3539_v60   ;;  %v2959_v27 = vor.u32 %v3430_v32, %v2958_v2  ;;  %v3438_v11 = vld [vmem:[%s4969_s0 + $0x434] sm:$0xf0] }
 0x239   :  { %v2194_v6 = vadd.f32 %v2193_v9, %v2090_v16  ;;  %v1988_v33 = vadd.f32 %v1987_v13, %v1884_v18  ;;  %v3433_v9 = vld [vmem:[%s4969_s0 + $0x414] sm:$0xf]  ;;  %v3434_v13 = vld [vmem:[%s4969_s0 + $0x41c] sm:$0xf] }
 0x23a   :  { %v2992_v16 = vld [vmem:[%s4969_s0 + $0x438] sm:$0xf0]  ;;  %v2987_v2 = vor.u32 %v3433_v9, %v2984_v7 }
 0x23b   :  { %v2308_v26 = vmul.f32 0.01, %v2194_v6  ;;  %vm2270_vm14 = vcmp.ge.f32.partialorder %v2194_v6, 0.0 }
 0x23d   :  { %v2346_v46 = vsel %vm2270_vm14, %v2194_v6, %v2308_v26 }
 0x23e   :  { %v2091_v34 = vpop.f32.mrf.mxu2  ;;  %v1886_v20 = vpop.f32.mrf.mxu0 }
 0x23f   :  { %v2195_v31 = vpop.f32.mrf.mxu3  ;;  %v2092_v4 = vadd.f32 %v2091_v34, %v1988_v33  ;;  %v1990_v61 = vpop.f32.mrf.mxu1  ;;  %v1887_v45 = vadd.f32 %v1886_v20, %v4250_v15  ;;  %v2982_v15 = vld [vmem:[%s4969_s0 + $0x410] sm:$0xf]  ;;  %v2995_v33 = vor.u32 %v3434_v13, %v2992_v16 }
 0x240   :  { %v2983_v42 = vor.u32 %v3437_v1, %v2982_v15 }
 0x241   :  { %v2196_v59 = vadd.f32 %v2195_v31, %v2092_v4  ;;  %1925 = vmatmul.bf16.gmra.mxu0 %v2951_v35  ;;  %v1991_v55 = vadd.f32 %v1990_v61, %v1887_v45 }
 0x242   :  { %2029 = vmatmul.bf16.gmra.mxu1 %v2955_v38 }
 0x243   :  { %vm2271_vm15 = vcmp.ge.f32.partialorder %v2196_v59, 0.0  ;;  %v2309_v40 = vmul.f32 0.01, %v2196_v59  ;;  %2133 = vmatmul.bf16.gmra.mxu2 %v2959_v27 }
 0x244   :  { %3299 = vmatmul.msk.bf16.gmra.mxu3 %vm1364_vm1, %v2963_v36 }
 0x245   :  { %v2347_v47 = vsel %vm2271_vm15, %v2196_v59, %v2309_v40 }
 0x246   :  { %v3544_v48 = vpack.c.bf16 %v2347_v47, %v2346_v46  ;;  %v2094_v49 = vpop.f32.mrf.mxu2  ;;  %v1888_v56 = vpop.f32.mrf.mxu0  ;;  %v3445_v47 = vld [vmem:[%s4969_s0 + $0x46c] sm:$0xf0] }
 0x247   :  { %v2198_v52 = vpop.f32.mrf.mxu3  ;;  %v1992_v57 = vpop.f32.mrf.mxu1  ;;  %v2095_v58 = vadd.f32 %v2094_v49, %v1991_v55  ;;  %v1889_v60 = vadd.f32 %v1888_v56, %v4277_v43  ;;  %v2990_v43 = vld [vmem:[%s4969_s0 + $0x418] sm:$0xf]  ;;  %v3016_v49 = vld [vmem:[%s4969_s0 + $0x470] sm:$0xf0]  ;;  %v3442_v55 = vld [vmem:[%s4969_s0 + $0x45c] sm:$0xf] }
 0x248   :  { %3611 = vst [vmem:[%s4970_s3 + $0x30] sm:$0xff] %v3544_v48   ;;  %v2991_v6 = vor.u32 %v3438_v11, %v2990_v43  ;;  %v3441_v48 = vld [vmem:[%s4969_s0 + $0x454] sm:$0xf]  ;;  %v3024_v56 = vld [vmem:[%s4969_s0 + $0x478] sm:$0xf0] }
 0x249   :  { %v2199_v18 = vadd.f32 %v2198_v52, %v2095_v58  ;;  %v1993_v41 = vadd.f32 %v1992_v57, %v1889_v60  ;;  %v3446_v52 = vld [vmem:[%s4969_s0 + $0x474] sm:$0xf0]  ;;  %v3019_v9 = vor.u32 %v3441_v48, %v3016_v49  ;;  %v3027_v16 = vor.u32 %v3442_v55, %v3024_v56 }
 0x24b   :  { %v2310_v34 = vmul.f32 0.01, %v2199_v18  ;;  %vm2272_vm0 = vcmp.ge.f32.partialorder %v2199_v18, 0.0 }
 0x24d   :  { %v2348_v4 = vsel %vm2272_vm0, %v2199_v18, %v2310_v34 }
 0x24e   :  { %v2096_v25 = vpop.f32.mrf.mxu2  ;;  %v1891_v62 = vpop.f32.mrf.mxu0 }
 0x24f   :  { %v2200_v28 = vpop.f32.mrf.mxu3  ;;  %v2097_v32 = vadd.f32 %v2096_v25, %v1993_v41  ;;  %v1995_v8 = vpop.f32.mrf.mxu1  ;;  %v1892_v38 = vadd.f32 %v1891_v62, %v4280_v51  ;;  %v3014_v51 = vld [vmem:[%s4969_s0 + $0x450] sm:$0xf] }
 0x250   :  { %v3015_v1 = vor.u32 %v3445_v47, %v3014_v51 }
 0x251   :  { %v2201_v31 = vadd.f32 %v2200_v28, %v2097_v32  ;;  %1930 = vmatmul.bf16.gmra.mxu0 %v2983_v42  ;;  %v1996_v26 = vadd.f32 %v1995_v8, %v1892_v38  ;;  %v3453_v38 = vld [vmem:[%s4969_s0 + $0x4ac] sm:$0xf0] }
 0x252   :  { %2034 = vmatmul.bf16.gmra.mxu1 %v2987_v2 }
 0x253   :  { %vm2273_vm2 = vcmp.ge.f32.partialorder %v2201_v31, 0.0  ;;  %v2311_v35 = vmul.f32 0.01, %v2201_v31  ;;  %2138 = vmatmul.bf16.gmra.mxu2 %v2991_v6 }
 0x254   :  { %3300 = vmatmul.msk.bf16.gmra.mxu3 %vm1364_vm1, %v2995_v33 }
 0x255   :  { %v2349_v20 = vsel %vm2273_vm2, %v2201_v31, %v2311_v35 }
 0x256   :  { %v3549_v61 = vpack.c.bf16 %v2349_v20, %v2348_v4  ;;  %v2099_v27 = vpop.f32.mrf.mxu2  ;;  %v1893_v59 = vpop.f32.mrf.mxu0  ;;  %v3449_v4 = vld [vmem:[%s4969_s0 + $0x494] sm:$0xf] }
 0x257   :  { %v2203_v36 = vpop.f32.mrf.mxu3  ;;  %v1997_v40 = vpop.f32.mrf.mxu1  ;;  %v2100_v45 = vadd.f32 %v2099_v27, %v1996_v26  ;;  %v1894_v46 = vadd.f32 %v1893_v59, %v4307_v14  ;;  %v3022_v14 = vld [vmem:[%s4969_s0 + $0x458] sm:$0xf]  ;;  %v3048_v20 = vld [vmem:[%s4969_s0 + $0x4b0] sm:$0xf0]  ;;  %v3450_v27 = vld [vmem:[%s4969_s0 + $0x49c] sm:$0xf] }
 0x258   :  { %3612 = vst [vmem:[%s4970_s3 + $0x38] sm:$0xff] %v3549_v61   ;;  %v3023_v13 = vor.u32 %v3446_v52, %v3022_v14  ;;  %v3454_v61 = vld [vmem:[%s4969_s0 + $0x4b4] sm:$0xf0]  ;;  %v3051_v51 = vor.u32 %v3449_v4, %v3048_v20 }
 0x259   :  { %v2204_v57 = vadd.f32 %v2203_v36, %v2100_v45  ;;  %v1998_v58 = vadd.f32 %v1997_v40, %v1894_v46  ;;  %v3056_v36 = vld [vmem:[%s4969_s0 + $0x4b8] sm:$0xf0] }
 0x25a   :  { %v3059_v52 = vor.u32 %v3450_v27, %v3056_v36 }
 0x25b   :  { %v2312_v18 = vmul.f32 0.01, %v2204_v57  ;;  %vm2274_vm3 = vcmp.ge.f32.partialorder %v2204_v57, 0.0 }
 0x25d   :  { %v2350_v42 = vsel %vm2274_vm3, %v2204_v57, %v2312_v18 }
 0x25e   :  { %v2101_v60 = vpop.f32.mrf.mxu2  ;;  %v1896_v43 = vpop.f32.mrf.mxu0 }
 0x25f   :  { %v2205_v15 = vpop.f32.mrf.mxu3  ;;  %v2102_v7 = vadd.f32 %v2101_v60, %v1998_v58  ;;  %v2000_v11 = vpop.f32.mrf.mxu1  ;;  %v1897_v28 = vadd.f32 %v1896_v43, %v4310_v24  ;;  %v3046_v24 = vld [vmem:[%s4969_s0 + $0x490] sm:$0xf] }
 0x260   :  { %v3047_v46 = vor.u32 %v3453_v38, %v3046_v24 }
 0x261   :  { %v2206_v41 = vadd.f32 %v2205_v15, %v2102_v7  ;;  %1935 = vmatmul.bf16.gmra.mxu0 %v3015_v1  ;;  %v2001_v6 = vadd.f32 %v2000_v11, %v1897_v28 }
 0x262   :  { %2039 = vmatmul.bf16.gmra.mxu1 %v3019_v9 }
 0x263   :  { %vm2275_vm4 = vcmp.ge.f32.partialorder %v2206_v41, 0.0  ;;  %v2313_v25 = vmul.f32 0.01, %v2206_v41  ;;  %2143 = vmatmul.bf16.gmra.mxu2 %v3023_v13 }
 0x264   :  { %3301 = vmatmul.msk.bf16.gmra.mxu3 %vm1364_vm1, %v3027_v16 }
 0x265   :  { %v2351_v2 = vsel %vm2275_vm4, %v2206_v41, %v2313_v25 }
 0x266   :  { %v3554_v32 = vpack.c.bf16 %v2351_v2, %v2350_v42  ;;  %v2104_v62 = vpop.f32.mrf.mxu2  ;;  %v1898_v33 = vpop.f32.mrf.mxu0 }
 0x267   :  { %v2208_v8 = vpop.f32.mrf.mxu3  ;;  %v2002_v34 = vpop.f32.mrf.mxu1  ;;  %v2105_v31 = vadd.f32 %v2104_v62, %v2001_v6  ;;  %v1899_v35 = vadd.f32 %v1898_v33, %v4337_v53  ;;  %v3054_v53 = vld [vmem:[%s4969_s0 + $0x498] sm:$0xf] }
 0x268   :  { %3613 = vst [vmem:[%s4970_s3 + $0x40] sm:$0xff] %v3554_v32   ;;  %v3055_v14 = vor.u32 %v3454_v61, %v3054_v53 }
 0x269   :  { %v2209_v26 = vadd.f32 %v2208_v8, %v2105_v31  ;;  %v2003_v59 = vadd.f32 %v2002_v34, %v1899_v35 }
 0x26b   :  { %v2314_v55 = vmul.f32 0.01, %v2209_v26  ;;  %vm2276_vm5 = vcmp.ge.f32.partialorder %v2209_v26, 0.0 }
 0x26d   :  { %v2352_v60 = vsel %vm2276_vm5, %v2209_v26, %v2314_v55 }
 0x26e   :  { %v2106_v40 = vpop.f32.mrf.mxu2  ;;  %v1901_v48 = vpop.f32.mrf.mxu0 }
 0x26f   :  { %v2210_v45 = vpop.f32.mrf.mxu3  ;;  %v2107_v47 = vadd.f32 %v2106_v40, %v2003_v59  ;;  %v2005_v49 = vpop.f32.mrf.mxu1  ;;  %v1902_v58 = vadd.f32 %v1901_v48, %v4340_v0 }
 0x271   :  { %v2211_v56 = vadd.f32 %v2210_v45, %v2107_v47  ;;  %1940 = vmatmul.bf16.gmra.mxu0 %v3047_v46  ;;  %v2006_v43 = vadd.f32 %v2005_v49, %v1902_v58 }
 0x272   :  { %2044 = vmatmul.bf16.gmra.mxu1 %v3051_v51 }
 0x273   :  { %vm2277_vm6 = vcmp.ge.f32.partialorder %v2211_v56, 0.0  ;;  %v2315_v57 = vmul.f32 0.01, %v2211_v56  ;;  %2148 = vmatmul.bf16.gmra.mxu2 %v3055_v14 }
 0x274   :  { %3302 = vmatmul.msk.bf16.gmra.mxu3 %vm1364_vm1, %v3059_v52 }
 0x275   :  { %v2353_v15 = vsel %vm2277_vm6, %v2211_v56, %v2315_v57 }
 0x276   :  { %v3559_v1 = vpack.c.bf16 %v2353_v15, %v2352_v60  ;;  %v2109_v9 = vpop.f32.mrf.mxu2  ;;  %v1903_v11 = vpop.f32.mrf.mxu0 }
 0x277   :  { %v2213_v7 = vpop.f32.mrf.mxu3  ;;  %v2007_v13 = vpop.f32.mrf.mxu1  ;;  %v2110_v16 = vadd.f32 %v2109_v9, %v2006_v43  ;;  %v1904_v18 = vadd.f32 %v1903_v11, %v4367_v30 }
 0x278   :  { %3614 = vst [vmem:[%s4970_s3 + $0x48] sm:$0xff] %v3559_v1  }
 0x279   :  { %v2214_v41 = vadd.f32 %v2213_v7, %v2110_v16  ;;  %v2008_v0 = vadd.f32 %v2007_v13, %v1904_v18 }
 0x27b   :  { %v2316_v62 = vmul.f32 0.01, %v2214_v41  ;;  %vm2278_vm1 = vcmp.ge.f32.partialorder %v2214_v41, 0.0 }
 0x27d   :  { %v2354_v34 = vsel %vm2278_vm1, %v2214_v41, %v2316_v62 }
 0x27e   :  { %v2111_v25 = vpop.f32.mrf.mxu2  ;;  %v1906_v2 = vpop.f32.mrf.mxu0 }
 0x27f   :  { %v2215_v28 = vpop.f32.mrf.mxu3  ;;  %v2112_v42 = vadd.f32 %v2111_v25, %v2008_v0  ;;  %v2010_v32 = vpop.f32.mrf.mxu1  ;;  %v1907_v33 = vadd.f32 %v1906_v2, %v4371_v44 }
 0x281   :  { %v2216_v8 = vadd.f32 %v2215_v28, %v2112_v42  ;;  %v2011_v30 = vadd.f32 %v2010_v32, %v1907_v33 }
 0x283   :  { %vm2279_vm7 = vcmp.ge.f32.partialorder %v2216_v8, 0.0  ;;  %v2317_v6 = vmul.f32 0.01, %v2216_v8 }
 0x285   :  { %v2355_v31 = vsel %vm2279_vm7, %v2216_v8, %v2317_v6 }
 0x286   :  { %v3564_v35 = vpack.c.bf16 %v2355_v31, %v2354_v34  ;;  %v2114_v24 = vpop.f32.mrf.mxu2  ;;  %v1908_v4 = vpop.f32.mrf.mxu0 }
 0x287   :  { %v2218_v38 = vpop.f32.mrf.mxu3  ;;  %v2012_v20 = vpop.f32.mrf.mxu1  ;;  %v2115_v53 = vadd.f32 %v2114_v24, %v2011_v30  ;;  %v1909_v61 = vadd.f32 %v1908_v4, %v4398_v10 }
 0x288   :  { %3615 = vst [vmem:[%s4970_s3 + $0x50] sm:$0xff] %v3564_v35  }
 0x289   :  { %v2219_v27 = vadd.f32 %v2218_v38, %v2115_v53  ;;  %v2013_v36 = vadd.f32 %v2012_v20, %v1909_v61 }
 0x28b   :  { %v2318_v46 = vmul.f32 0.01, %v2219_v27  ;;  %vm2280_vm8 = vcmp.ge.f32.partialorder %v2219_v27, 0.0 }
 0x28d   :  { %v2356_v49 = vsel %vm2280_vm8, %v2219_v27, %v2318_v46 }
 0x28e   :  { %v2116_v26 = vpop.f32.mrf.mxu2  ;;  %v1911_v40 = vpop.f32.mrf.mxu0 }
 0x28f   :  { %v2220_v59 = vpop.f32.mrf.mxu3  ;;  %v2117_v44 = vadd.f32 %v2116_v26, %v2013_v36  ;;  %v2015_v45 = vpop.f32.mrf.mxu1  ;;  %v1912_v48 = vadd.f32 %v1911_v40, %v4402_v21 }
 0x291   :  { %v2221_v51 = vadd.f32 %v2220_v59, %v2117_v44  ;;  %v2016_v10 = vadd.f32 %v2015_v45, %v1912_v48 }
 0x293   :  { %vm2281_vm9 = vcmp.ge.f32.partialorder %v2221_v51, 0.0  ;;  %v2319_v47 = vmul.f32 0.01, %v2221_v51 }
 0x295   :  { %v2357_v14 = vsel %vm2281_vm9, %v2221_v51, %v2319_v47 }
 0x296   :  { %v3569_v52 = vpack.c.bf16 %v2357_v14, %v2356_v49  ;;  %v2119_v55 = vpop.f32.mrf.mxu2  ;;  %v1913_v57 = vpop.f32.mrf.mxu0 }
 0x297   :  { %v2223_v56 = vpop.f32.mrf.mxu3  ;;  %v2017_v58 = vpop.f32.mrf.mxu1  ;;  %v2120_v60 = vadd.f32 %v2119_v55, %v2016_v10  ;;  %v1914_v15 = vadd.f32 %v1913_v57, %v4429_v54 }
 0x298   :  { %3616 = vst [vmem:[%s4970_s3 + $0x58] sm:$0xff] %v3569_v52  }
 0x299   :  { %v2224_v1 = vadd.f32 %v2223_v56, %v2120_v60  ;;  %v2018_v9 = vadd.f32 %v2017_v58, %v1914_v15 }
 0x29b   :  { %v2320_v16 = vmul.f32 0.01, %v2224_v1  ;;  %vm2282_vm10 = vcmp.ge.f32.partialorder %v2224_v1, 0.0 }
 0x29d   :  { %v2358_v25 = vsel %vm2282_vm10, %v2224_v1, %v2320_v16 }
 0x29e   :  { %v2121_v7 = vpop.f32.mrf.mxu2  ;;  %v1916_v11 = vpop.f32.mrf.mxu0 }
 0x29f   :  { %v2225_v43 = vpop.f32.mrf.mxu3  ;;  %v2122_v21 = vadd.f32 %v2121_v7, %v2018_v9  ;;  %v2020_v13 = vpop.f32.mrf.mxu1  ;;  %v1917_v0 = vadd.f32 %v1916_v11, %v4433_v3 }
 0x2a1   :  { %v2226_v18 = vadd.f32 %v2225_v43, %v2122_v21  ;;  %v2021_v54 = vadd.f32 %v2020_v13, %v1917_v0 }
 0x2a3   :  { %vm2283_vm11 = vcmp.ge.f32.partialorder %v2226_v18, 0.0  ;;  %v2321_v41 = vmul.f32 0.01, %v2226_v18 }
 0x2a5   :  { %v2359_v28 = vsel %vm2283_vm11, %v2226_v18, %v2321_v41 }
 0x2a6   :  { %v3574_v42 = vpack.c.bf16 %v2359_v28, %v2358_v25  ;;  %v2124_v2 = vpop.f32.mrf.mxu2  ;;  %v1918_v62 = vpop.f32.mrf.mxu0 }
 0x2a7   :  { %v2228_v32 = vpop.f32.mrf.mxu3  ;;  %v2022_v8 = vpop.f32.mrf.mxu1  ;;  %v2125_v6 = vadd.f32 %v2124_v2, %v2021_v54  ;;  %v1919_v33 = vadd.f32 %v1918_v62, %v4460_v37 }
 0x2a8   :  { %3617 = vst [vmem:[%s4970_s3 + $0x60] sm:$0xff] %v3574_v42  }
 0x2a9   :  { %v2229_v34 = vadd.f32 %v2228_v32, %v2125_v6  ;;  %v2023_v31 = vadd.f32 %v2022_v8, %v1919_v33 }
 0x2ab   :  { %v2322_v4 = vmul.f32 0.01, %v2229_v34  ;;  %vm2284_vm12 = vcmp.ge.f32.partialorder %v2229_v34, 0.0 }
 0x2ad   :  { %v2360_v27 = vsel %vm2284_vm12, %v2229_v34, %v2322_v4 }
 0x2ae   :  { %v2126_v35 = vpop.f32.mrf.mxu2  ;;  %v1921_v38 = vpop.f32.mrf.mxu0 }
 0x2af   :  { %v2230_v24 = vpop.f32.mrf.mxu3  ;;  %v2127_v3 = vadd.f32 %v2126_v35, %v2023_v31  ;;  %v2025_v30 = vpop.f32.mrf.mxu1  ;;  %v1922_v61 = vadd.f32 %v1921_v38, %v4464_v50 }
 0x2b1   :  { %v2231_v20 = vadd.f32 %v2230_v24, %v2127_v3  ;;  %v2026_v37 = vadd.f32 %v2025_v30, %v1922_v61 }
 0x2b3   :  { %vm2285_vm13 = vcmp.ge.f32.partialorder %v2231_v20, 0.0  ;;  %v2323_v53 = vmul.f32 0.01, %v2231_v20 }
 0x2b5   :  { %v2361_v36 = vsel %vm2285_vm13, %v2231_v20, %v2323_v53 }
 0x2b6   :  { %v3579_v26 = vpack.c.bf16 %v2361_v36, %v2360_v27  ;;  %v2129_v59 = vpop.f32.mrf.mxu2  ;;  %v1923_v40 = vpop.f32.mrf.mxu0 }
 0x2b7   :  { %v2233_v44 = vpop.f32.mrf.mxu3  ;;  %v2027_v45 = vpop.f32.mrf.mxu1  ;;  %v2130_v46 = vadd.f32 %v2129_v59, %v2026_v37  ;;  %v1924_v51 = vadd.f32 %v1923_v40, %v4496_v23 }
 0x2b8   :  { %3618 = vst [vmem:[%s4970_s3 + $0x68] sm:$0xff] %v3579_v26  }
 0x2b9   :  { %v2234_v47 = vadd.f32 %v2233_v44, %v2130_v46  ;;  %v2028_v48 = vadd.f32 %v2027_v45, %v1924_v51 }
 0x2bb   :  { %v2324_v56 = vmul.f32 0.01, %v2234_v47  ;;  %vm2286_vm14 = vcmp.ge.f32.partialorder %v2234_v47, 0.0 }
 0x2bd   :  { %v2362_v60 = vsel %vm2286_vm14, %v2234_v47, %v2324_v56 }
 0x2be   :  { %v2131_v49 = vpop.f32.mrf.mxu2  ;;  %v1926_v52 = vpop.f32.mrf.mxu0 }
 0x2bf   :  { %v2235_v14 = vpop.f32.mrf.mxu3  ;;  %v2132_v50 = vadd.f32 %v2131_v49, %v2028_v48  ;;  %v2030_v55 = vpop.f32.mrf.mxu1  ;;  %v1927_v58 = vadd.f32 %v1926_v52, %v4500_v39 }
 0x2c1   :  { %v2236_v10 = vadd.f32 %v2235_v14, %v2132_v50  ;;  %v2031_v23 = vadd.f32 %v2030_v55, %v1927_v58 }
 0x2c3   :  { %vm2287_vm15 = vcmp.ge.f32.partialorder %v2236_v10, 0.0  ;;  %v2325_v57 = vmul.f32 0.01, %v2236_v10 }
 0x2c5   :  { %v2363_v15 = vsel %vm2287_vm15, %v2236_v10, %v2325_v57 }
 0x2c6   :  { %v3584_v1 = vpack.c.bf16 %v2363_v15, %v2362_v60  ;;  %v2134_v9 = vpop.f32.mrf.mxu2  ;;  %v1928_v43 = vpop.f32.mrf.mxu0 }
 0x2c7   :  { %v2238_v7 = vpop.f32.mrf.mxu3  ;;  %v2032_v21 = vpop.f32.mrf.mxu1  ;;  %v2135_v11 = vadd.f32 %v2134_v9, %v2031_v23  ;;  %v1929_v13 = vadd.f32 %v1928_v43, %v4527_v12 }
 0x2c8   :  { %3619 = vst [vmem:[%s4970_s3 + $0x70] sm:$0xff] %v3584_v1  }
 0x2c9   :  { %v2239_v16 = vadd.f32 %v2238_v7, %v2135_v11  ;;  %v2033_v18 = vadd.f32 %v2032_v21, %v1929_v13 }
 0x2cb   :  { %v2326_v42 = vmul.f32 0.01, %v2239_v16  ;;  %vm2288_vm0 = vcmp.ge.f32.partialorder %v2239_v16, 0.0 }
 0x2cd   :  { %v2364_v62 = vsel %vm2288_vm0, %v2239_v16, %v2326_v42 }
 0x2ce   :  { %v2136_v41 = vpop.f32.mrf.mxu2  ;;  %v1931_v25 = vpop.f32.mrf.mxu0 }
 0x2cf   :  { %v2240_v0 = vpop.f32.mrf.mxu3  ;;  %v2137_v39 = vadd.f32 %v2136_v41, %v2033_v18  ;;  %v2035_v28 = vpop.f32.mrf.mxu1  ;;  %v1932_v54 = vadd.f32 %v1931_v25, %v4531_v29 }
 0x2d1   :  { %v2241_v2 = vadd.f32 %v2240_v0, %v2137_v39  ;;  %v2036_v12 = vadd.f32 %v2035_v28, %v1932_v54 }
 0x2d3   :  { %vm2289_vm2 = vcmp.ge.f32.partialorder %v2241_v2, 0.0  ;;  %v2327_v32 = vmul.f32 0.01, %v2241_v2 }
 0x2d5   :  { %v2365_v8 = vsel %vm2289_vm2, %v2241_v2, %v2327_v32 }
 0x2d6   :  { %v3589_v6 = vpack.c.bf16 %v2365_v8, %v2364_v62  ;;  %v2139_v33 = vpop.f32.mrf.mxu2  ;;  %v1933_v31 = vpop.f32.mrf.mxu0 }
 0x2d7   :  { %v2243_v34 = vpop.f32.mrf.mxu3  ;;  %v2037_v35 = vpop.f32.mrf.mxu1  ;;  %v2140_v24 = vadd.f32 %v2139_v33, %v2036_v12  ;;  %v1934_v3 = vadd.f32 %v1933_v31, %v4558_v5 }
 0x2d8   :  { %3620 = vst [vmem:[%s4970_s3 + $0x78] sm:$0xff] %v3589_v6  }
 0x2d9   :  { %v2244_v38 = vadd.f32 %v2243_v34, %v2140_v24  ;;  %v2038_v30 = vadd.f32 %v2037_v35, %v1934_v3 }
 0x2db   :  { %v2328_v27 = vmul.f32 0.01, %v2244_v38  ;;  %vm2290_vm3 = vcmp.ge.f32.partialorder %v2244_v38, 0.0 }
 0x2dd   :  { %v2366_v44 = vsel %vm2290_vm3, %v2244_v38, %v2328_v27 }
 0x2de   :  { %v2141_v4 = vpop.f32.mrf.mxu2  ;;  %v1936_v53 = vpop.f32.mrf.mxu0 }
 0x2df   :  { %v2245_v20 = vpop.f32.mrf.mxu3  ;;  %v2142_v29 = vadd.f32 %v2141_v4, %v2038_v30  ;;  %v2040_v61 = vpop.f32.mrf.mxu1  ;;  %v1937_v59 = vadd.f32 %v1936_v53, %v4562_v22 }
 0x2e1   :  { %v2246_v36 = vadd.f32 %v2245_v20, %v2142_v29  ;;  %v2041_v5 = vadd.f32 %v2040_v61, %v1937_v59 }
 0x2e3   :  { %vm2291_vm4 = vcmp.ge.f32.partialorder %v2246_v36, 0.0  ;;  %v2329_v26 = vmul.f32 0.01, %v2246_v36 }
 0x2e5   :  { %v2367_v37 = vsel %vm2291_vm4, %v2246_v36, %v2329_v26 }
 0x2e6   :  { %v3594_v40 = vpack.c.bf16 %v2367_v37, %v2366_v44  ;;  %v2144_v45 = vpop.f32.mrf.mxu2  ;;  %v1938_v51 = vpop.f32.mrf.mxu0 }
 0x2e7   :  { %v2248_v46 = vpop.f32.mrf.mxu3  ;;  %v2042_v47 = vpop.f32.mrf.mxu1  ;;  %v2145_v48 = vadd.f32 %v2144_v45, %v2041_v5  ;;  %v1939_v49 = vadd.f32 %v1938_v51, %v4589_v63 }
 0x2e8   :  { %3621 = vst [vmem:[%s4970_s3 + $0x80] sm:$0xff] %v3594_v40  }
 0x2e9   :  { %v2249_v14 = vadd.f32 %v2248_v46, %v2145_v48  ;;  %v2043_v50 = vadd.f32 %v2042_v47, %v1939_v49 }
 0x2eb   :  { %v2330_v10 = vmul.f32 0.01, %v2249_v14  ;;  %vm2292_vm5 = vcmp.ge.f32.partialorder %v2249_v14, 0.0 }
 0x2ed   :  { %v2368_v1 = vsel %vm2292_vm5, %v2249_v14, %v2330_v10 }
 0x2ee   :  { %v2146_v52 = vpop.f32.mrf.mxu2  ;;  %v1941_v56 = vpop.f32.mrf.mxu0 }
 0x2ef   :  { %v2250_v55 = vpop.f32.mrf.mxu3  ;;  %v2147_v22 = vadd.f32 %v2146_v52, %v2043_v50  ;;  %v2045_v58 = vpop.f32.mrf.mxu1  ;;  %v1942_v15 = vadd.f32 %v1941_v56, %v4593_v19 }
 0x2f1   :  { %v2251_v57 = vadd.f32 %v2250_v55, %v2147_v22  ;;  %v2046_v63 = vadd.f32 %v2045_v58, %v1942_v15 }
 0x2f3   :  { %vm2293_vm6 = vcmp.ge.f32.partialorder %v2251_v57, 0.0  ;;  %v2331_v60 = vmul.f32 0.01, %v2251_v57 }
 0x2f5   :  { %v2369_v9 = vsel %vm2293_vm6, %v2251_v57, %v2331_v60 }
 0x2f6   :  { %v3599_v7 = vpack.c.bf16 %v2369_v9, %v2368_v1  ;;  %v2149_v23 = vpop.f32.mrf.mxu2  ;;  %v1943_v21 = vpop.f32.mrf.mxu0 }
 0x2f7   :  { %v2253_v43 = vpop.f32.mrf.mxu3  ;;  %v2150_v11 = vadd.f32 %v2149_v23, %v2046_v63  ;;  %v1944_v13 = vadd.f32 %v1943_v21, %v4619_v17  ;;  %v2047_v16 = vpop.f32.mrf.mxu1 }
 0x2f8   :  { %3622 = vst [vmem:[%s4970_s3 + $0x88] sm:$0xff] %v3599_v7  }
 0x2f9   :  { %v2254_v18 = vadd.f32 %v2253_v43, %v2150_v11  ;;  %v2048_v41 = vadd.f32 %v2047_v16, %v1944_v13 }
 0x2fb   :  { %v2332_v25 = vmul.f32 0.01, %v2254_v18  ;;  %vm2294_vm1 = vcmp.ge.f32.partialorder %v2254_v18, 0.0 }
 0x2fd   :  { %v2370_v2 = vsel %vm2294_vm1, %v2254_v18, %v2332_v25 }
 0x2fe   :  { %v2151_v0 = vpop.f32.mrf.mxu2 }
 0x2ff   :  { %v2152_v39 = vadd.f32 %v2151_v0, %v2048_v41  ;;  %v2255_v19 = vpop.f32.mrf.mxu3 }
 0x301   :  { %v2256_v28 = vadd.f32 %v2255_v19, %v2152_v39 }
 0x303   :  { %vm2295_vm7 = vcmp.ge.f32.partialorder %v2256_v28, 0.0  ;;  %v2333_v42 = vmul.f32 0.01, %v2256_v28 }
 0x305   :  { %v2371_v32 = vsel %vm2295_vm7, %v2256_v28, %v2333_v42 }
 0x306   :  { %v3604_v54 = vpack.c.bf16 %v2371_v32, %v2370_v2 }
 0x308   :  { %3623 = vst [vmem:[%s4970_s3 + $0x90] sm:$0xff] %v3604_v54  }

// kernel: pilotnet_mdn_forward.9
= control target key start
LH: loop header
LB: loop body
LE: loop exit
PB: predicated region body
PF: predicated region fallthrough
CT: control target
= control target key end

     0   :  { %vm488_vm0 = vcmask 392192   ;;  %s1760_s1 = inlined_call_operand.vmem [shape: bf16[432,128], index: 1, kind: input, shape index: {}]   ;;  %s1761_s0 = inlined_call_operand.vmem [shape: bf16[176,432], index: 0, kind: input, shape index: {}]   ;;  %s1762_s2 = inlined_call_operand.vmem [shape: f32[1,128], index: 2, kind: input, shape index: {}]   ;;  %s1763_s3 = inlined_call_operand.vmem [shape: bf16[176,128], index: 3, kind: output, shape index: {}]  }
   0x1   :  { %v1238_v0 = vld [vmem:[%s1760_s1 + $0x38] sm:$0xff]  ;;  %v1237_v3 = vld [vmem:[%s1760_s1 + $0x30] sm:$0xff]  ;;  %v1236_v7 = vld [vmem:[%s1760_s1 + $0x28] sm:$0xff] }
   0x2   :  { %v1246_v1 = vld [vmem:[%s1760_s1 + $0x78] sm:$0xff]  ;;  %522 = vmatpush.bf16.msra.mxu0 %v1238_v0  ;;  %v1245_v4 = vld [vmem:[%s1760_s1 + $0x70] sm:$0xff]  ;;  %v1244_v8 = vld [vmem:[%s1760_s1 + $0x68] sm:$0xff] }
   0x3   :  { %v1254_v2 = vld [vmem:[%s1760_s1 + $0xb8] sm:$0xff]  ;;  %586 = vmatpush.bf16.msra.mxu1 %v1246_v1  ;;  %v1253_v5 = vld [vmem:[%s1760_s1 + $0xb0] sm:$0xff]  ;;  %v1252_v9 = vld [vmem:[%s1760_s1 + $0xa8] sm:$0xff] }
   0x4   :  { %650 = vmatpush.bf16.msra.mxu2 %v1254_v2  ;;  %v1257_v6 = vld [vmem:[%s1760_s1 + $0xd0] sm:$0xff]  ;;  %v1256_v10 = vld [vmem:[%s1760_s1 + $0xc8] sm:$0xff]  ;;  %v1235_v11 = vld [vmem:[%s1760_s1 + $0x20] sm:$0xff] }
   0x5   :  { %719 = vmatpush.bf16.msra.mxu3 %v1257_v6  ;;  %v1243_v12 = vld [vmem:[%s1760_s1 + $0x60] sm:$0xff]  ;;  %v1188_v15 = vld [vmem:[%s1761_s0 + $0xc] sm:$0xf]  ;;  %v904_v16 = vld [vmem:[%s1761_s0 + $0x18] sm:$0xf0] }
   0x6   :  { %523 = vmatpush.bf16.msra.mxu0 %v1237_v3  ;;  %v1251_v13 = vld [vmem:[%s1760_s1 + $0xa0] sm:$0xff]  ;;  %v1234_v17 = vld [vmem:[%s1760_s1 + $0x18] sm:$0xff]  ;;  %v907_v20 = vor.u32 %v1188_v15, %v904_v16  ;;  %v1233_v21 = vld [vmem:[%s1760_s1 + $0x10] sm:$0xff] }
   0x7   :  { %587 = vmatpush.bf16.msra.mxu1 %v1245_v4  ;;  %v1255_v14 = vld [vmem:[%s1760_s1 + $0xc0] sm:$0xff]  ;;  %v1242_v18 = vld [vmem:[%s1760_s1 + $0x58] sm:$0xff]  ;;  %v1241_v22 = vld [vmem:[%s1760_s1 + $0x50] sm:$0xff] }
   0x8   :  { %651 = vmatpush.bf16.msra.mxu2 %v1253_v5  ;;  %v1250_v19 = vld [vmem:[%s1760_s1 + $0x98] sm:$0xff]  ;;  %v1249_v23 = vld [vmem:[%s1760_s1 + $0x90] sm:$0xff]  ;;  %v1232_v24 = vld [vmem:[%s1760_s1 + $0x8] sm:$0xff] }
   0x9   :  { %720 = vmatpush.bf16.msra.mxu3 %v1256_v10  ;;  %v1240_v25 = vld [vmem:[%s1760_s1 + $0x48] sm:$0xff]  ;;  %v1231_v27 = vld [vmem:[%s1760_s1] sm:$0xff]  ;;  %v1189_v30 = vld [vmem:[%s1761_s0 + $0xc] sm:$0xf0] }
   0xa   :  { %524 = vmatpush.bf16.msra.mxu0 %v1236_v7  ;;  %v1248_v26 = vld [vmem:[%s1760_s1 + $0x88] sm:$0xff]  ;;  %v1239_v28 = vld [vmem:[%s1760_s1 + $0x40] sm:$0xff]  ;;  %v896_v32 = vld [vmem:[%s1761_s0 + $0x10] sm:$0xf0] }
   0xb   :  { %588 = vmatpush.bf16.msra.mxu1 %v1244_v8  ;;  %v894_v29 = vld [vmem:[%s1761_s0] sm:$0xf]  ;;  %v1187_v31 = vld [vmem:[%s1761_s0 + $0x4] sm:$0xf]  ;;  %v902_v34 = vld [vmem:[%s1761_s0 + $0x8] sm:$0xf] }
   0xc   :  { %652 = vmatpush.bf16.msra.mxu2 %v1252_v9  ;;  %v1247_v33 = vld [vmem:[%s1760_s1 + $0x80] sm:$0xff]  ;;  %v1190_v35 = vld [vmem:[%s1761_s0 + $0x14] sm:$0xf0]  ;;  %v1192_v36 = vld [vmem:[%s1761_s0 + $0x2c] sm:$0xf]  ;;  %v895_v38 = vor.u32 %v1189_v30, %v894_v29  ;;  %v899_v39 = vor.u32 %v1187_v31, %v896_v32 }
   0xd   :  { %721 = vmatpush.bf16.msra.mxu3 %v1255_v14  ;;  %v920_v37 = vld [vmem:[%s1761_s0 + $0x38] sm:$0xf0]  ;;  %v903_v40 = vor.u32 %v1190_v35, %v902_v34  ;;  %v910_v42 = vld [vmem:[%s1761_s0 + $0x20] sm:$0xf]  ;;  %v1193_v43 = vld [vmem:[%s1761_s0 + $0x2c] sm:$0xf0] }
   0xe   :  { %525 = vmatpush.bf16.msra.mxu0 %v1235_v11  ;;  %v923_v41 = vor.u32 %v1192_v36, %v920_v37  ;;  %v1191_v44 = vld [vmem:[%s1761_s0 + $0x24] sm:$0xf]  ;;  %v912_v45 = vld [vmem:[%s1761_s0 + $0x30] sm:$0xf0]  ;;  %v918_v46 = vld [vmem:[%s1761_s0 + $0x28] sm:$0xf]  ;;  %v911_v50 = vor.u32 %v1193_v43, %v910_v42 }
   0xf   :  { %589 = vmatpush.bf16.msra.mxu1 %v1243_v12  ;;  %v1194_v47 = vld [vmem:[%s1761_s0 + $0x34] sm:$0xf0]  ;;  %v1196_v48 = vld [vmem:[%s1761_s0 + $0x4c] sm:$0xf]  ;;  %v936_v49 = vld [vmem:[%s1761_s0 + $0x58] sm:$0xf0]  ;;  %v915_v51 = vor.u32 %v1191_v44, %v912_v45 }
  0x10   :  { %653 = vmatpush.bf16.msra.mxu2 %v1251_v13  ;;  %1176 = vmatmul.msk.bf16.vlgmr.msra.gmra.mxu3 %vm488_vm0, %v907_v20  ;;  %v919_v52 = vor.u32 %v1194_v47, %v918_v46  ;;  %v939_v53 = vor.u32 %v1196_v48, %v936_v49  ;;  %v926_v54 = vld [vmem:[%s1761_s0 + $0x40] sm:$0xf]  ;;  %v1197_v55 = vld [vmem:[%s1761_s0 + $0x4c] sm:$0xf0]  ;;  %v1195_v56 = vld [vmem:[%s1761_s0 + $0x44] sm:$0xf] }
  0x11   :  { %v928_v57 = vld [vmem:[%s1761_s0 + $0x50] sm:$0xf0]  ;;  %v934_v58 = vld [vmem:[%s1761_s0 + $0x48] sm:$0xf]  ;;  %v1198_v59 = vld [vmem:[%s1761_s0 + $0x54] sm:$0xf0]  ;;  %v927_v62 = vor.u32 %v1197_v55, %v926_v54 }
  0x12   :  { %526 = vmatpush.bf16.msra.mxu0 %v1234_v17  ;;  %v1200_v60 = vld [vmem:[%s1761_s0 + $0x6c] sm:$0xf]  ;;  %v952_v61 = vld [vmem:[%s1761_s0 + $0x78] sm:$0xf0]  ;;  %v931_v63 = vor.u32 %v1195_v56, %v928_v57  ;;  %v935_v0 = vor.u32 %v1198_v59, %v934_v58  ;;  %v942_v2 = vld [vmem:[%s1761_s0 + $0x60] sm:$0xf] }
  0x13   :  { %590 = vmatpush.bf16.msra.mxu1 %v1242_v18  ;;  %v955_v1 = vor.u32 %v1200_v60, %v952_v61  ;;  %v1201_v3 = vld [vmem:[%s1761_s0 + $0x6c] sm:$0xf0]  ;;  %v1199_v4 = vld [vmem:[%s1761_s0 + $0x64] sm:$0xf]  ;;  %v944_v5 = vld [vmem:[%s1761_s0 + $0x70] sm:$0xf0] }
  0x14   :  { %654 = vmatpush.bf16.msra.mxu2 %v1250_v19  ;;  %v950_v6 = vld [vmem:[%s1761_s0 + $0x68] sm:$0xf]  ;;  %v1202_v7 = vld [vmem:[%s1761_s0 + $0x74] sm:$0xf0]  ;;  %v1204_v8 = vld [vmem:[%s1761_s0 + $0x8c] sm:$0xf]  ;;  %v943_v10 = vor.u32 %v1201_v3, %v942_v2  ;;  %v947_v11 = vor.u32 %v1199_v4, %v944_v5 }
  0x15   :  { %v968_v9 = vld [vmem:[%s1761_s0 + $0x98] sm:$0xf0]  ;;  %v951_v12 = vor.u32 %v1202_v7, %v950_v6  ;;  %v958_v14 = vld [vmem:[%s1761_s0 + $0x80] sm:$0xf]  ;;  %v1205_v15 = vld [vmem:[%s1761_s0 + $0x8c] sm:$0xf0] }
  0x16   :  { %527 = vmatpush.bf16.msra.mxu0 %v1233_v21  ;;  %v971_v13 = vor.u32 %v1204_v8, %v968_v9  ;;  %v1203_v16 = vld [vmem:[%s1761_s0 + $0x84] sm:$0xf]  ;;  %v960_v17 = vld [vmem:[%s1761_s0 + $0x90] sm:$0xf0]  ;;  %v966_v18 = vld [vmem:[%s1761_s0 + $0x88] sm:$0xf] }
  0x17   :  { %591 = vmatpush.bf16.msra.mxu1 %v1241_v22  ;;  %v1206_v19 = vld [vmem:[%s1761_s0 + $0x94] sm:$0xf0]  ;;  %v1208_v20 = vld [vmem:[%s1761_s0 + $0xac] sm:$0xf]  ;;  %v984_v21 = vld [vmem:[%s1761_s0 + $0xb8] sm:$0xf0]  ;;  %v959_v22 = vor.u32 %v1205_v15, %v958_v14 }
  0x18   :  { %655 = vmatpush.bf16.msra.mxu2 %v1249_v23  ;;  %v963_v23 = vor.u32 %v1203_v16, %v960_v17  ;;  %v976_v29 = vld [vmem:[%s1761_s0 + $0xb0] sm:$0xf0]  ;;  %v982_v30 = vld [vmem:[%s1761_s0 + $0xa8] sm:$0xf]  ;;  %v1210_v31 = vld [vmem:[%s1761_s0 + $0xb4] sm:$0xf0] }
  0x19   :  { %v1212_v32 = vld [vmem:[%s1761_s0 + $0xcc] sm:$0xf]  ;;  %v983_v36 = vor.u32 %v1210_v31, %v982_v30  ;;  %v998_v42 = vld [vmem:[%s1761_s0 + $0xc8] sm:$0xf]  ;;  %v1214_v43 = vld [vmem:[%s1761_s0 + $0xd4] sm:$0xf0] }
  0x1a   :  { %528 = vmatpush.bf16.msra.mxu0 %v1232_v24  ;;  %v967_v24 = vor.u32 %v1206_v19, %v966_v18  ;;  %v1216_v44 = vld [vmem:[%s1761_s0 + $0xec] sm:$0xf]  ;;  %v1016_v45 = vld [vmem:[%s1761_s0 + $0xf8] sm:$0xf0]  ;;  %v999_v48 = vor.u32 %v1214_v43, %v998_v42  ;;  %v1014_v54 = vld [vmem:[%s1761_s0 + $0xe8] sm:$0xf] }
  0x1b   :  { %592 = vmatpush.bf16.msra.mxu1 %v1240_v25  ;;  %v987_v25 = vor.u32 %v1208_v20, %v984_v21  ;;  %v1019_v49 = vor.u32 %v1216_v44, %v1016_v45  ;;  %v1218_v55 = vld [vmem:[%s1761_s0 + $0xf4] sm:$0xf0]  ;;  %v1220_v56 = vld [vmem:[%s1761_s0 + $0x10c] sm:$0xf]  ;;  %v1032_v57 = vld [vmem:[%s1761_s0 + $0x118] sm:$0xf0] }
  0x1c   :  { %656 = vmatpush.bf16.msra.mxu2 %v1248_v26  ;;  %v974_v26 = vld [vmem:[%s1761_s0 + $0xa0] sm:$0xf]  ;;  %v1015_v60 = vor.u32 %v1218_v55, %v1014_v54  ;;  %v1035_v61 = vor.u32 %v1220_v56, %v1032_v57  ;;  %v1024_v2 = vld [vmem:[%s1761_s0 + $0x110] sm:$0xf0]  ;;  %v1030_v3 = vld [vmem:[%s1761_s0 + $0x108] sm:$0xf] }
  0x1d   :  { %v1222_v4 = vld [vmem:[%s1761_s0 + $0x114] sm:$0xf0]  ;;  %v1653_v5 = vld [vmem:[%s1762_s2] ss:$0 sm:$0xff]  ;;  %v1224_v6 = vld [vmem:[%s1761_s0 + $0x12c] sm:$0xf] }
  0x1e   :  { %529 = vmatpush.bf16.msra.mxu0 %v1231_v27  ;;  %v1209_v27 = vld [vmem:[%s1761_s0 + $0xac] sm:$0xf0]  ;;  %v1048_v7 = vld [vmem:[%s1761_s0 + $0x138] sm:$0xf0]  ;;  %v1228_v31 = vld [vmem:[%s1761_s0 + $0x14c] sm:$0xf] }
  0x1f   :  { %593 = vmatpush.bf16.msra.mxu1 %v1239_v28  ;;  %v1207_v28 = vld [vmem:[%s1761_s0 + $0xa4] sm:$0xf]  ;;  %v975_v34 = vor.u32 %v1209_v27, %v974_v26  ;;  %v1051_v14 = vor.u32 %v1224_v6, %v1048_v7  ;;  %v1040_v26 = vld [vmem:[%s1761_s0 + $0x130] sm:$0xf0]  ;;  %v1046_v27 = vld [vmem:[%s1761_s0 + $0x128] sm:$0xf] }
  0x20   :  { %657 = vmatpush.bf16.msra.mxu2 %v1247_v33  ;;  %1177 = vmatmul.msk.bf16.gmra.mxu3 %vm488_vm0, %v923_v41  ;;  %v1000_v33 = vld [vmem:[%s1761_s0 + $0xd8] sm:$0xf0]  ;;  %v979_v35 = vor.u32 %v1207_v28, %v976_v29  ;;  %v992_v41 = vld [vmem:[%s1761_s0 + $0xd0] sm:$0xf0]  ;;  %v1226_v28 = vld [vmem:[%s1761_s0 + $0x134] sm:$0xf0] }
  0x21   :  { %530 = vmatmul.bf16.vlgmr.msra.gmra.mxu0 %v895_v38  ;;  %v1003_v37 = vor.u32 %v1212_v32, %v1000_v33  ;;  %v990_v38 = vld [vmem:[%s1761_s0 + $0xc0] sm:$0xf]  ;;  %v1064_v32 = vld [vmem:[%s1761_s0 + $0x158] sm:$0xf0]  ;;  %v1229_v57 = vld [vmem:[%s1761_s0 + $0x14c] sm:$0xf0] }
  0x22   :  { %594 = vmatmul.bf16.vlgmr.msra.gmra.mxu1 %v899_v39  ;;  %v1213_v39 = vld [vmem:[%s1761_s0 + $0xcc] sm:$0xf0]  ;;  %v1054_v56 = vld [vmem:[%s1761_s0 + $0x140] sm:$0xf] }
  0x23   :  { %658 = vmatmul.bf16.vlgmr.msra.gmra.mxu2 %v903_v40  ;;  %v1211_v40 = vld [vmem:[%s1761_s0 + $0xc4] sm:$0xf]  ;;  %v991_v46 = vor.u32 %v1213_v39, %v990_v38  ;;  %v1047_v39 = vor.u32 %v1226_v28, %v1046_v27 }
  0x24   :  { %v995_v47 = vor.u32 %v1211_v40, %v992_v41  ;;  %v1067_v41 = vor.u32 %v1228_v31, %v1064_v32 }
  0x30   :  { %1178 = vmatmul.msk.bf16.gmra.mxu3 %vm488_vm0, %v939_v53  ;;  %v1008_v53 = vld [vmem:[%s1761_s0 + $0xf0] sm:$0xf0] }
  0x31   :  { %535 = vmatmul.bf16.gmra.mxu0 %v911_v50  ;;  %v1006_v50 = vld [vmem:[%s1761_s0 + $0xe0] sm:$0xf] }
  0x32   :  { %599 = vmatmul.bf16.gmra.mxu1 %v915_v51  ;;  %v1217_v51 = vld [vmem:[%s1761_s0 + $0xec] sm:$0xf0] }
  0x33   :  { %663 = vmatmul.bf16.gmra.mxu2 %v919_v52  ;;  %v1215_v52 = vld [vmem:[%s1761_s0 + $0xe4] sm:$0xf]  ;;  %v1007_v58 = vor.u32 %v1217_v51, %v1006_v50 }
  0x34   :  { %v1011_v59 = vor.u32 %v1215_v52, %v1008_v53 }
  0x40   :  { %1179 = vmatmul.msk.bf16.gmra.mxu3 %vm488_vm0, %v955_v1  ;;  %v1219_v1 = vld [vmem:[%s1761_s0 + $0x104] sm:$0xf] }
  0x41   :  { %540 = vmatmul.bf16.gmra.mxu0 %v927_v62  ;;  %v1027_v9 = vor.u32 %v1219_v1, %v1024_v2  ;;  %v1055_v1 = vor.u32 %v1229_v57, %v1054_v56 }
  0x42   :  { %604 = vmatmul.bf16.gmra.mxu1 %v931_v63  ;;  %v1022_v63 = vld [vmem:[%s1761_s0 + $0x100] sm:$0xf] }
  0x43   :  { %668 = vmatmul.bf16.gmra.mxu2 %v935_v0  ;;  %v1221_v0 = vld [vmem:[%s1761_s0 + $0x10c] sm:$0xf0] }
  0x44   :  { %v1023_v8 = vor.u32 %v1221_v0, %v1022_v63 }
  0x50   :  { %1180 = vmatmul.msk.bf16.gmra.mxu3 %vm488_vm0, %v971_v13 }
  0x51   :  { %545 = vmatmul.bf16.gmra.mxu0 %v943_v10 }
  0x52   :  { %609 = vmatmul.bf16.gmra.mxu1 %v947_v11 }
  0x53   :  { %673 = vmatmul.bf16.gmra.mxu2 %v951_v12  ;;  %v1031_v12 = vor.u32 %v1222_v4, %v1030_v3 }
  0x60   :  { %1181 = vmatmul.msk.bf16.gmra.mxu3 %vm488_vm0, %v987_v25  ;;  %v1223_v25 = vld [vmem:[%s1761_s0 + $0x124] sm:$0xf] }
  0x61   :  { %550 = vmatmul.bf16.gmra.mxu0 %v959_v22 }
  0x62   :  { %614 = vmatmul.bf16.gmra.mxu1 %v963_v23  ;;  %v1038_v23 = vld [vmem:[%s1761_s0 + $0x120] sm:$0xf] }
  0x63   :  { %678 = vmatmul.bf16.gmra.mxu2 %v967_v24  ;;  %v1225_v24 = vld [vmem:[%s1761_s0 + $0x12c] sm:$0xf0] }
  0x70   :  { %1182 = vmatmul.msk.bf16.gmra.mxu3 %vm488_vm0, %v1003_v37 }
  0x71   :  { %555 = vmatmul.bf16.gmra.mxu0 %v975_v34  ;;  %v1039_v34 = vor.u32 %v1225_v24, %v1038_v23 }
  0x72   :  { %619 = vmatmul.bf16.gmra.mxu1 %v979_v35  ;;  %v1043_v35 = vor.u32 %v1223_v25, %v1040_v26 }
  0x73   :  { %683 = vmatmul.bf16.gmra.mxu2 %v983_v36 }
  0x80   :  { %1183 = vmatmul.msk.bf16.gmra.mxu3 %vm488_vm0, %v1019_v49 }
  0x81   :  { %560 = vmatmul.bf16.gmra.mxu0 %v991_v46 }
  0x82   :  { %624 = vmatmul.bf16.gmra.mxu1 %v995_v47 }
  0x83   :  { %688 = vmatmul.bf16.gmra.mxu2 %v999_v48 }
  0x90   :  { %1184 = vmatmul.msk.bf16.gmra.mxu3 %vm488_vm0, %v1035_v61  ;;  %v1230_v61 = vld [vmem:[%s1761_s0 + $0x154] sm:$0xf0] }
  0x91   :  { %565 = vmatmul.bf16.gmra.mxu0 %v1007_v58  ;;  %v1227_v58 = vld [vmem:[%s1761_s0 + $0x144] sm:$0xf] }
  0x92   :  { %629 = vmatmul.bf16.gmra.mxu1 %v1011_v59  ;;  %v1056_v59 = vld [vmem:[%s1761_s0 + $0x150] sm:$0xf0] }
  0x93   :  { %693 = vmatmul.bf16.gmra.mxu2 %v1015_v60  ;;  %v723_v62 = vpop.f32.mrf.mxu3  ;;  %v1062_v60 = vld [vmem:[%s1761_s0 + $0x148] sm:$0xf]  ;;  %v1059_v2 = vor.u32 %v1227_v58, %v1056_v59 }
  0x94   :  { %v1063_v7 = vor.u32 %v1230_v61, %v1062_v60 }
  0x9b   :  { %v725_v13 = vpop.f32.mrf.mxu3 }
  0x9e   :  { %v531_v10 = vpop.f32.mrf.mxu0 }
  0x9f   :  { %v595_v11 = vpop.f32.mrf.mxu1  ;;  %v532_v15 = vadd.f32 %v1653_v5, %v531_v10 }
  0xa0   :  { %1185 = vmatmul.msk.bf16.gmra.mxu3 %vm488_vm0, %v1051_v14 }
  0xa1   :  { %570 = vmatmul.bf16.gmra.mxu0 %v1023_v8  ;;  %v596_v16 = vadd.f32 %v595_v11, %v532_v15 }
  0xa2   :  { %634 = vmatmul.bf16.gmra.mxu1 %v1027_v9 }
  0xa3   :  { %698 = vmatmul.bf16.gmra.mxu2 %v1031_v12  ;;  %v728_v20 = vpop.f32.mrf.mxu3 }
  0xa6   :  { %v659_v17 = vpop.f32.mrf.mxu2  ;;  %v533_v18 = vpop.f32.mrf.mxu0 }
  0xa7   :  { %v597_v19 = vpop.f32.mrf.mxu1  ;;  %v660_v21 = vadd.f32 %v659_v17, %v596_v16  ;;  %v534_v22 = vadd.f32 %v1653_v5, %v533_v18 }
  0xa9   :  { %v724_v29 = vadd.f32 %v723_v62, %v660_v21  ;;  %v598_v30 = vadd.f32 %v597_v19, %v534_v22 }
  0xab   :  { %v730_v40 = vpop.f32.mrf.mxu3  ;;  %v800_v42 = vmul.f32 0.01, %v724_v29  ;;  %vm778_vm1 = vcmp.ge.f32.partialorder %v724_v29, 0.0 }
  0xad   :  { %v822_v46 = vsel %vm778_vm1, %v724_v29, %v800_v42 }
  0xae   :  { %v661_v33 = vpop.f32.mrf.mxu2  ;;  %v536_v37 = vpop.f32.mrf.mxu0 }
  0xaf   :  { %v662_v36 = vadd.f32 %v661_v33, %v598_v30  ;;  %v600_v38 = vpop.f32.mrf.mxu1  ;;  %v537_v44 = vadd.f32 %v1653_v5, %v536_v37 }
  0xb0   :  { %1186 = vmatmul.msk.bf16.gmra.mxu3 %vm488_vm0, %v1067_v41 }
  0xb1   :  { %v726_v43 = vadd.f32 %v725_v13, %v662_v36  ;;  %575 = vmatmul.bf16.gmra.mxu0 %v1039_v34  ;;  %v601_v48 = vadd.f32 %v600_v38, %v537_v44 }
  0xb2   :  { %639 = vmatmul.bf16.gmra.mxu1 %v1043_v35 }
  0xb3   :  { %vm779_vm2 = vcmp.ge.f32.partialorder %v726_v43, 0.0  ;;  %v801_v45 = vmul.f32 0.01, %v726_v43  ;;  %703 = vmatmul.bf16.gmra.mxu2 %v1047_v39  ;;  %v733_v53 = vpop.f32.mrf.mxu3 }
  0xb5   :  { %v823_v47 = vsel %vm779_vm2, %v726_v43, %v801_v45 }
  0xb6   :  { %v1261_v49 = vpack.c.bf16 %v823_v47, %v822_v46  ;;  %v664_v50 = vpop.f32.mrf.mxu2  ;;  %v538_v51 = vpop.f32.mrf.mxu0 }
  0xb7   :  { %v602_v52 = vpop.f32.mrf.mxu1  ;;  %v665_v54 = vadd.f32 %v664_v50, %v601_v48  ;;  %v539_v55 = vadd.f32 %v1653_v5, %v538_v51 }
  0xb8   :  { %1262 = vst [vmem:[%s1763_s3] sm:$0xff] %v1261_v49  }
  0xb9   :  { %v729_v62 = vadd.f32 %v728_v20, %v665_v54  ;;  %v603_v63 = vadd.f32 %v602_v52, %v539_v55 }
  0xbb   :  { %v735_v8 = vpop.f32.mrf.mxu3  ;;  %v802_v9 = vmul.f32 0.01, %v729_v62  ;;  %vm780_vm3 = vcmp.ge.f32.partialorder %v729_v62, 0.0 }
  0xbd   :  { %v824_v13 = vsel %vm780_vm3, %v729_v62, %v802_v9 }
  0xbe   :  { %v666_v0 = vpop.f32.mrf.mxu2  ;;  %v541_v4 = vpop.f32.mrf.mxu0 }
  0xbf   :  { %v667_v3 = vadd.f32 %v666_v0, %v603_v63  ;;  %v605_v6 = vpop.f32.mrf.mxu1  ;;  %v542_v11 = vadd.f32 %v1653_v5, %v541_v4 }
  0xc1   :  { %v731_v10 = vadd.f32 %v730_v40, %v667_v3  ;;  %580 = vmatmul.bf16.gmra.mxu0 %v1055_v1  ;;  %v606_v15 = vadd.f32 %v605_v6, %v542_v11 }
  0xc2   :  { %644 = vmatmul.bf16.gmra.mxu1 %v1059_v2 }
  0xc3   :  { %vm781_vm4 = vcmp.ge.f32.partialorder %v731_v10, 0.0  ;;  %v803_v12 = vmul.f32 0.01, %v731_v10  ;;  %708 = vmatmul.bf16.gmra.mxu2 %v1063_v7  ;;  %v738_v20 = vpop.f32.mrf.mxu3 }
  0xc5   :  { %v825_v14 = vsel %vm781_vm4, %v731_v10, %v803_v12 }
  0xc6   :  { %v1266_v16 = vpack.c.bf16 %v825_v14, %v824_v13  ;;  %v669_v17 = vpop.f32.mrf.mxu2  ;;  %v543_v18 = vpop.f32.mrf.mxu0 }
  0xc7   :  { %v607_v19 = vpop.f32.mrf.mxu1  ;;  %v670_v21 = vadd.f32 %v669_v17, %v606_v15  ;;  %v544_v22 = vadd.f32 %v1653_v5, %v543_v18 }
  0xc8   :  { %1313 = vst [vmem:[%s1763_s3 + $0x8] sm:$0xff] %v1266_v16  }
  0xc9   :  { %v734_v23 = vadd.f32 %v733_v53, %v670_v21  ;;  %v608_v24 = vadd.f32 %v607_v19, %v544_v22 }
  0xcb   :  { %v740_v29 = vpop.f32.mrf.mxu3  ;;  %v804_v30 = vmul.f32 0.01, %v734_v23  ;;  %vm782_vm5 = vcmp.ge.f32.partialorder %v734_v23, 0.0 }
  0xcd   :  { %v826_v34 = vsel %vm782_vm5, %v734_v23, %v804_v30 }
  0xce   :  { %v671_v25 = vpop.f32.mrf.mxu2  ;;  %v546_v27 = vpop.f32.mrf.mxu0 }
  0xcf   :  { %v672_v26 = vadd.f32 %v671_v25, %v608_v24  ;;  %v610_v28 = vpop.f32.mrf.mxu1  ;;  %v547_v32 = vadd.f32 %v1653_v5, %v546_v27 }
  0xd1   :  { %v736_v31 = vadd.f32 %v735_v8, %v672_v26  ;;  %v611_v36 = vadd.f32 %v610_v28, %v547_v32 }
  0xd3   :  { %vm783_vm6 = vcmp.ge.f32.partialorder %v736_v31, 0.0  ;;  %v805_v33 = vmul.f32 0.01, %v736_v31  ;;  %v743_v41 = vpop.f32.mrf.mxu3 }
  0xd5   :  { %v827_v35 = vsel %vm783_vm6, %v736_v31, %v805_v33 }
  0xd6   :  { %v1271_v37 = vpack.c.bf16 %v827_v35, %v826_v34  ;;  %v674_v38 = vpop.f32.mrf.mxu2  ;;  %v548_v39 = vpop.f32.mrf.mxu0 }
  0xd7   :  { %v612_v40 = vpop.f32.mrf.mxu1  ;;  %v675_v42 = vadd.f32 %v674_v38, %v611_v36  ;;  %v549_v43 = vadd.f32 %v1653_v5, %v548_v39 }
  0xd8   :  { %1314 = vst [vmem:[%s1763_s3 + $0x10] sm:$0xff] %v1271_v37  }
  0xd9   :  { %v739_v44 = vadd.f32 %v738_v20, %v675_v42  ;;  %v613_v45 = vadd.f32 %v612_v40, %v549_v43 }
  0xdb   :  { %v745_v50 = vpop.f32.mrf.mxu3  ;;  %v806_v51 = vmul.f32 0.01, %v739_v44  ;;  %vm784_vm7 = vcmp.ge.f32.partialorder %v739_v44, 0.0 }
  0xdd   :  { %v828_v55 = vsel %vm784_vm7, %v739_v44, %v806_v51 }
  0xde   :  { %v676_v46 = vpop.f32.mrf.mxu2  ;;  %v551_v48 = vpop.f32.mrf.mxu0 }
  0xdf   :  { %v677_v47 = vadd.f32 %v676_v46, %v613_v45  ;;  %v615_v49 = vpop.f32.mrf.mxu1  ;;  %v552_v53 = vadd.f32 %v1653_v5, %v551_v48 }
  0xe1   :  { %v741_v52 = vadd.f32 %v740_v29, %v677_v47  ;;  %v616_v57 = vadd.f32 %v615_v49, %v552_v53 }
  0xe3   :  { %vm785_vm8 = vcmp.ge.f32.partialorder %v741_v52, 0.0  ;;  %v807_v54 = vmul.f32 0.01, %v741_v52  ;;  %v748_v62 = vpop.f32.mrf.mxu3 }
  0xe5   :  { %v829_v56 = vsel %vm785_vm8, %v741_v52, %v807_v54 }
  0xe6   :  { %v1276_v58 = vpack.c.bf16 %v829_v56, %v828_v55  ;;  %v679_v59 = vpop.f32.mrf.mxu2  ;;  %v553_v60 = vpop.f32.mrf.mxu0 }
  0xe7   :  { %v617_v61 = vpop.f32.mrf.mxu1  ;;  %v680_v63 = vadd.f32 %v679_v59, %v616_v57  ;;  %v554_v0 = vadd.f32 %v1653_v5, %v553_v60 }
  0xe8   :  { %1315 = vst [vmem:[%s1763_s3 + $0x18] sm:$0xff] %v1276_v58  }
  0xe9   :  { %v744_v1 = vadd.f32 %v743_v41, %v680_v63  ;;  %v618_v2 = vadd.f32 %v617_v61, %v554_v0 }
  0xeb   :  { %v750_v8 = vpop.f32.mrf.mxu3  ;;  %v808_v9 = vmul.f32 0.01, %v744_v1  ;;  %vm786_vm9 = vcmp.ge.f32.partialorder %v744_v1, 0.0 }
  0xed   :  { %v830_v13 = vsel %vm786_vm9, %v744_v1, %v808_v9 }
  0xee   :  { %v681_v3 = vpop.f32.mrf.mxu2  ;;  %v556_v6 = vpop.f32.mrf.mxu0 }
  0xef   :  { %v682_v4 = vadd.f32 %v681_v3, %v618_v2  ;;  %v620_v7 = vpop.f32.mrf.mxu1  ;;  %v557_v11 = vadd.f32 %v1653_v5, %v556_v6 }
  0xf1   :  { %v746_v10 = vadd.f32 %v745_v50, %v682_v4  ;;  %v621_v15 = vadd.f32 %v620_v7, %v557_v11 }
  0xf3   :  { %vm787_vm10 = vcmp.ge.f32.partialorder %v746_v10, 0.0  ;;  %v809_v12 = vmul.f32 0.01, %v746_v10  ;;  %v753_v20 = vpop.f32.mrf.mxu3 }
  0xf5   :  { %v831_v14 = vsel %vm787_vm10, %v746_v10, %v809_v12 }
  0xf6   :  { %v1281_v16 = vpack.c.bf16 %v831_v14, %v830_v13  ;;  %v684_v17 = vpop.f32.mrf.mxu2  ;;  %v558_v18 = vpop.f32.mrf.mxu0 }
  0xf7   :  { %v622_v19 = vpop.f32.mrf.mxu1  ;;  %v685_v21 = vadd.f32 %v684_v17, %v621_v15  ;;  %v559_v22 = vadd.f32 %v1653_v5, %v558_v18 }
  0xf8   :  { %1316 = vst [vmem:[%s1763_s3 + $0x20] sm:$0xff] %v1281_v16  }
  0xf9   :  { %v749_v23 = vadd.f32 %v748_v62, %v685_v21  ;;  %v623_v24 = vadd.f32 %v622_v19, %v559_v22 }
  0xfb   :  { %v755_v29 = vpop.f32.mrf.mxu3  ;;  %v810_v30 = vmul.f32 0.01, %v749_v23  ;;  %vm788_vm11 = vcmp.ge.f32.partialorder %v749_v23, 0.0 }
  0xfd   :  { %v832_v34 = vsel %vm788_vm11, %v749_v23, %v810_v30 }
  0xfe   :  { %v686_v25 = vpop.f32.mrf.mxu2  ;;  %v561_v27 = vpop.f32.mrf.mxu0 }
  0xff   :  { %v687_v26 = vadd.f32 %v686_v25, %v623_v24  ;;  %v625_v28 = vpop.f32.mrf.mxu1  ;;  %v562_v32 = vadd.f32 %v1653_v5, %v561_v27 }
 0x101   :  { %v751_v31 = vadd.f32 %v750_v8, %v687_v26  ;;  %v626_v36 = vadd.f32 %v625_v28, %v562_v32 }
 0x103   :  { %vm789_vm12 = vcmp.ge.f32.partialorder %v751_v31, 0.0  ;;  %v811_v33 = vmul.f32 0.01, %v751_v31  ;;  %v758_v43 = vpop.f32.mrf.mxu3 }
 0x105   :  { %v833_v35 = vsel %vm789_vm12, %v751_v31, %v811_v33 }
 0x106   :  { %v1286_v37 = vpack.c.bf16 %v833_v35, %v832_v34  ;;  %v689_v38 = vpop.f32.mrf.mxu2  ;;  %v563_v39 = vpop.f32.mrf.mxu0 }
 0x107   :  { %v627_v40 = vpop.f32.mrf.mxu1  ;;  %v690_v41 = vadd.f32 %v689_v38, %v626_v36  ;;  %v564_v42 = vadd.f32 %v1653_v5, %v563_v39 }
 0x108   :  { %1317 = vst [vmem:[%s1763_s3 + $0x28] sm:$0xff] %v1286_v37  }
 0x109   :  { %v754_v44 = vadd.f32 %v753_v20, %v690_v41  ;;  %v628_v45 = vadd.f32 %v627_v40, %v564_v42 }
 0x10b   :  { %v812_v50 = vmul.f32 0.01, %v754_v44  ;;  %vm790_vm13 = vcmp.ge.f32.partialorder %v754_v44, 0.0  ;;  %v760_v54 = vpop.f32.mrf.mxu3 }
 0x10d   :  { %v834_v55 = vsel %vm790_vm13, %v754_v44, %v812_v50 }
 0x10e   :  { %v691_v46 = vpop.f32.mrf.mxu2  ;;  %v566_v48 = vpop.f32.mrf.mxu0 }
 0x10f   :  { %v692_v47 = vadd.f32 %v691_v46, %v628_v45  ;;  %v630_v49 = vpop.f32.mrf.mxu1  ;;  %v567_v52 = vadd.f32 %v1653_v5, %v566_v48 }
 0x111   :  { %v756_v51 = vadd.f32 %v755_v29, %v692_v47  ;;  %v631_v57 = vadd.f32 %v630_v49, %v567_v52 }
 0x113   :  { %vm791_vm14 = vcmp.ge.f32.partialorder %v756_v51, 0.0  ;;  %v813_v53 = vmul.f32 0.01, %v756_v51  ;;  %v763_v3 = vpop.f32.mrf.mxu3 }
 0x115   :  { %v835_v56 = vsel %vm791_vm14, %v756_v51, %v813_v53 }
 0x116   :  { %v1291_v58 = vpack.c.bf16 %v835_v56, %v834_v55  ;;  %v694_v59 = vpop.f32.mrf.mxu2  ;;  %v568_v60 = vpop.f32.mrf.mxu0 }
 0x117   :  { %v632_v61 = vpop.f32.mrf.mxu1  ;;  %v695_v62 = vadd.f32 %v694_v59, %v631_v57  ;;  %v569_v63 = vadd.f32 %v1653_v5, %v568_v60 }
 0x118   :  { %1318 = vst [vmem:[%s1763_s3 + $0x30] sm:$0xff] %v1291_v58  }
 0x119   :  { %v759_v0 = vadd.f32 %v758_v43, %v695_v62  ;;  %v633_v1 = vadd.f32 %v632_v61, %v569_v63 }
 0x11b   :  { %v814_v8 = vmul.f32 0.01, %v759_v0  ;;  %vm792_vm15 = vcmp.ge.f32.partialorder %v759_v0, 0.0  ;;  %v765_v19 = vpop.f32.mrf.mxu3 }
 0x11d   :  { %v836_v12 = vsel %vm792_vm15, %v759_v0, %v814_v8 }
 0x11e   :  { %v696_v2 = vpop.f32.mrf.mxu2  ;;  %v571_v6 = vpop.f32.mrf.mxu0 }
 0x11f   :  { %v697_v4 = vadd.f32 %v696_v2, %v633_v1  ;;  %v635_v7 = vpop.f32.mrf.mxu1  ;;  %v572_v10 = vadd.f32 %v1653_v5, %v571_v6 }
 0x121   :  { %v761_v9 = vadd.f32 %v760_v54, %v697_v4  ;;  %v636_v14 = vadd.f32 %v635_v7, %v572_v10 }
 0x123   :  { %vm793_vm0 = vcmp.ge.f32.partialorder %v761_v9, 0.0  ;;  %v815_v11 = vmul.f32 0.01, %v761_v9  ;;  %v768_v31 = vpop.f32.mrf.mxu3 }
 0x125   :  { %v837_v13 = vsel %vm793_vm0, %v761_v9, %v815_v11 }
 0x126   :  { %v1296_v15 = vpack.c.bf16 %v837_v13, %v836_v12  ;;  %v699_v16 = vpop.f32.mrf.mxu2  ;;  %v573_v17 = vpop.f32.mrf.mxu0 }
 0x127   :  { %v637_v18 = vpop.f32.mrf.mxu1  ;;  %v700_v20 = vadd.f32 %v699_v16, %v636_v14  ;;  %v574_v21 = vadd.f32 %v1653_v5, %v573_v17 }
 0x128   :  { %1319 = vst [vmem:[%s1763_s3 + $0x38] sm:$0xff] %v1296_v15  }
 0x129   :  { %v764_v22 = vadd.f32 %v763_v3, %v700_v20  ;;  %v638_v23 = vadd.f32 %v637_v18, %v574_v21 }
 0x12b   :  { %v816_v28 = vmul.f32 0.01, %v764_v22  ;;  %vm794_vm1 = vcmp.ge.f32.partialorder %v764_v22, 0.0  ;;  %v770_v42 = vpop.f32.mrf.mxu3 }
 0x12d   :  { %v838_v33 = vsel %vm794_vm1, %v764_v22, %v816_v28 }
 0x12e   :  { %v701_v24 = vpop.f32.mrf.mxu2  ;;  %v576_v26 = vpop.f32.mrf.mxu0 }
 0x12f   :  { %v702_v25 = vadd.f32 %v701_v24, %v638_v23  ;;  %v640_v27 = vpop.f32.mrf.mxu1  ;;  %v577_v30 = vadd.f32 %v1653_v5, %v576_v26 }
 0x131   :  { %v766_v29 = vadd.f32 %v765_v19, %v702_v25  ;;  %v641_v35 = vadd.f32 %v640_v27, %v577_v30 }
 0x133   :  { %vm795_vm2 = vcmp.ge.f32.partialorder %v766_v29, 0.0  ;;  %v817_v32 = vmul.f32 0.01, %v766_v29  ;;  %v773_v57 = vpop.f32.mrf.mxu3 }
 0x135   :  { %v839_v34 = vsel %vm795_vm2, %v766_v29, %v817_v32 }
 0x136   :  { %v1301_v36 = vpack.c.bf16 %v839_v34, %v838_v33  ;;  %v704_v37 = vpop.f32.mrf.mxu2  ;;  %v578_v38 = vpop.f32.mrf.mxu0 }
 0x137   :  { %v642_v39 = vpop.f32.mrf.mxu1  ;;  %v705_v40 = vadd.f32 %v704_v37, %v641_v35  ;;  %v579_v41 = vadd.f32 %v1653_v5, %v578_v38 }
 0x138   :  { %1320 = vst [vmem:[%s1763_s3 + $0x40] sm:$0xff] %v1301_v36  }
 0x139   :  { %v769_v43 = vadd.f32 %v768_v31, %v705_v40  ;;  %v643_v44 = vadd.f32 %v642_v39, %v579_v41 }
 0x13b   :  { %v818_v48 = vmul.f32 0.01, %v769_v43  ;;  %vm796_vm3 = vcmp.ge.f32.partialorder %v769_v43, 0.0  ;;  %v775_v3 = vpop.f32.mrf.mxu3 }
 0x13d   :  { %v840_v53 = vsel %vm796_vm3, %v769_v43, %v818_v48 }
 0x13e   :  { %v706_v45 = vpop.f32.mrf.mxu2  ;;  %v581_v47 = vpop.f32.mrf.mxu0 }
 0x13f   :  { %v707_v46 = vadd.f32 %v706_v45, %v643_v44  ;;  %v582_v50 = vadd.f32 %v1653_v5, %v581_v47  ;;  %v645_v51 = vpop.f32.mrf.mxu1 }
 0x141   :  { %v771_v49 = vadd.f32 %v770_v42, %v707_v46  ;;  %v646_v55 = vadd.f32 %v645_v51, %v582_v50 }
 0x143   :  { %vm797_vm4 = vcmp.ge.f32.partialorder %v771_v49, 0.0  ;;  %v819_v52 = vmul.f32 0.01, %v771_v49 }
 0x145   :  { %v841_v54 = vsel %vm797_vm4, %v771_v49, %v819_v52 }
 0x146   :  { %v1306_v56 = vpack.c.bf16 %v841_v54, %v840_v53  ;;  %v709_v58 = vpop.f32.mrf.mxu2  ;;  %v583_v59 = vpop.f32.mrf.mxu0 }
 0x147   :  { %v710_v60 = vadd.f32 %v709_v58, %v646_v55  ;;  %v584_v61 = vadd.f32 %v1653_v5, %v583_v59  ;;  %v647_v62 = vpop.f32.mrf.mxu1 }
 0x148   :  { %1321 = vst [vmem:[%s1763_s3 + $0x48] sm:$0xff] %v1306_v56  }
 0x149   :  { %v774_v63 = vadd.f32 %v773_v57, %v710_v60  ;;  %v648_v0 = vadd.f32 %v647_v62, %v584_v61 }
 0x14b   :  { %v820_v4 = vmul.f32 0.01, %v774_v63  ;;  %vm798_vm5 = vcmp.ge.f32.partialorder %v774_v63, 0.0 }
 0x14d   :  { %v842_v8 = vsel %vm798_vm5, %v774_v63, %v820_v4 }
 0x14e   :  { %v711_v1 = vpop.f32.mrf.mxu2 }
 0x14f   :  { %v712_v2 = vadd.f32 %v711_v1, %v648_v0 }
 0x151   :  { %v776_v6 = vadd.f32 %v775_v3, %v712_v2 }
 0x153   :  { %vm799_vm6 = vcmp.ge.f32.partialorder %v776_v6, 0.0  ;;  %v821_v7 = vmul.f32 0.01, %v776_v6 }
 0x155   :  { %v843_v9 = vsel %vm799_vm6, %v776_v6, %v821_v7 }
 0x156   :  { %v1311_v10 = vpack.c.bf16 %v843_v9, %v842_v8 }
 0x158   :  { %1322 = vst [vmem:[%s1763_s3 + $0x50] sm:$0xff] %v1311_v10  }

// kernel: pilotnet_mdn_forward.10
= control target key start
LH: loop header
LB: loop body
LE: loop exit
PB: predicated region body
PF: predicated region fallthrough
CT: control target
= control target key end

     0   :  { %vm431_vm0 = vcmask 523264   ;;  %s1240_s1 = inlined_call_operand.vmem [shape: bf16[576,128], index: 1, kind: input, shape index: {}]   ;;  %s1241_s2 = inlined_call_operand.vmem [shape: f32[1,128], index: 2, kind: input, shape index: {}]   ;;  %s1242_s0 = inlined_call_operand.vmem [shape: bf16[64,576], index: 0, kind: input, shape index: {}]   ;;  %s1243_s3 = inlined_call_operand.vmem [shape: bf16[64,128], index: 3, kind: output, shape index: {}]  }
   0x1   :  { %v888_v0 = vld [vmem:[%s1240_s1 + $0x38] sm:$0xff]  ;;  %v887_v1 = vld [vmem:[%s1240_s1 + $0x30] sm:$0xff]  ;;  %v886_v4 = vld [vmem:[%s1240_s1 + $0x28] sm:$0xff] }
   0x2   :  { %940 = vmatpush.bf16.msra.mxu1 %v888_v0  ;;  %941 = vmatpush.bf16.msra.mxu2 %v888_v0  ;;  %v912_v2 = vld [vmem:[%s1240_s1 + $0xf8] sm:$0xff]  ;;  %v911_v3 = vld [vmem:[%s1240_s1 + $0xf0] sm:$0xff]  ;;  %v910_v5 = vld [vmem:[%s1240_s1 + $0xe8] sm:$0xff] }
   0x3   :  { %444 = vmatpush.bf16.msra.mxu0 %v888_v0  ;;  %531 = vmatpush.bf16.msra.mxu3 %v912_v2  ;;  %v885_v6 = vld [vmem:[%s1240_s1 + $0x20] sm:$0xff]  ;;  %v884_v8 = vld [vmem:[%s1240_s1 + $0x18] sm:$0xff]  ;;  %v883_v10 = vld [vmem:[%s1240_s1 + $0x10] sm:$0xff] }
   0x4   :  { %v909_v7 = vld [vmem:[%s1240_s1 + $0xe0] sm:$0xff]  ;;  %v908_v9 = vld [vmem:[%s1240_s1 + $0xd8] sm:$0xff]  ;;  %v907_v11 = vld [vmem:[%s1240_s1 + $0xd0] sm:$0xff] }
   0x5   :  { %v882_v12 = vld [vmem:[%s1240_s1 + $0x8] sm:$0xff]  ;;  %v881_v14 = vld [vmem:[%s1240_s1] sm:$0xff]  ;;  %v868_v16 = vld [vmem:[%s1242_s0 + $0x38] sm:$0xf0] }
   0x6   :  { %942 = vmatpush.bf16.msra.mxu1 %v887_v1  ;;  %943 = vmatpush.bf16.msra.mxu2 %v887_v1  ;;  %v906_v13 = vld [vmem:[%s1240_s1 + $0xc8] sm:$0xff]  ;;  %v695_v17 = vld [vmem:[%s1242_s0 + $0x78] sm:$0xf]  ;;  %v635_v21 = vld [vmem:[%s1242_s0] sm:$0xf] }
   0x7   :  { %445 = vmatpush.bf16.msra.mxu0 %v887_v1  ;;  %532 = vmatpush.bf16.msra.mxu3 %v911_v3  ;;  %v655_v15 = vld [vmem:[%s1242_s0 + $0x28] sm:$0xf]  ;;  %v878_v18 = vld [vmem:[%s1242_s0 + $0x88] sm:$0xf0]  ;;  %v904_v19 = vld [vmem:[%s1240_s1 + $0xb8] sm:$0xff] }
   0x8   :  { %v896_v20 = vld [vmem:[%s1240_s1 + $0x78] sm:$0xff]  ;;  %v905_v22 = vld [vmem:[%s1240_s1 + $0xc0] sm:$0xff]  ;;  %v656_v23 = vor.u32 %v868_v16, %v655_v15  ;;  %v696_v24 = vor.u32 %v878_v18, %v695_v17  ;;  %v863_v25 = vld [vmem:[%s1242_s0 + $0x10] sm:$0xf0] }
   0x9   :  { %v862_v26 = vld [vmem:[%s1242_s0 + $0xc] sm:$0xf]  ;;  %v645_v27 = vld [vmem:[%s1242_s0 + $0x1c] sm:$0xf0]  ;;  %v916_v28 = vld [vmem:[%s1240_s1 + $0x118] sm:$0xff]  ;;  %v636_v31 = vor.u32 %v863_v25, %v635_v21 }
   0xa   :  { %944 = vmatpush.bf16.msra.mxu1 %v886_v4  ;;  %945 = vmatpush.bf16.msra.mxu2 %v886_v4  ;;  %v903_v29 = vld [vmem:[%s1240_s1 + $0xb0] sm:$0xff]  ;;  %v648_v32 = vor.u32 %v862_v26, %v645_v27  ;;  %v902_v34 = vld [vmem:[%s1240_s1 + $0xa8] sm:$0xff]  ;;  %v901_v37 = vld [vmem:[%s1240_s1 + $0xa0] sm:$0xff] }
   0xb   :  { %446 = vmatpush.bf16.msra.mxu0 %v886_v4  ;;  %533 = vmatpush.bf16.msra.mxu3 %v910_v5  ;;  %v895_v30 = vld [vmem:[%s1240_s1 + $0x70] sm:$0xff]  ;;  %v894_v35 = vld [vmem:[%s1240_s1 + $0x68] sm:$0xff]  ;;  %v893_v38 = vld [vmem:[%s1240_s1 + $0x60] sm:$0xff] }
   0xc   :  { %v915_v33 = vld [vmem:[%s1240_s1 + $0x110] sm:$0xff]  ;;  %v914_v36 = vld [vmem:[%s1240_s1 + $0x108] sm:$0xff]  ;;  %v873_v40 = vld [vmem:[%s1242_s0 + $0x60] sm:$0xf0] }
   0xd   :  { %v675_v39 = vld [vmem:[%s1242_s0 + $0x50] sm:$0xf]  ;;  %v913_v41 = vld [vmem:[%s1240_s1 + $0x100] sm:$0xff]  ;;  %v900_v42 = vld [vmem:[%s1240_s1 + $0x98] sm:$0xff] }
   0xe   :  { %946 = vmatpush.bf16.msra.mxu1 %v885_v6  ;;  %947 = vmatpush.bf16.msra.mxu2 %v885_v6  ;;  %v892_v43 = vld [vmem:[%s1240_s1 + $0x58] sm:$0xff]  ;;  %v651_v44 = vld [vmem:[%s1242_s0 + $0x10] sm:$0xf]  ;;  %v676_v45 = vor.u32 %v873_v40, %v675_v39  ;;  %v865_v46 = vld [vmem:[%s1242_s0 + $0x20] sm:$0xf0] }
   0xf   :  { %447 = vmatpush.bf16.msra.mxu0 %v885_v6  ;;  %534 = vmatpush.bf16.msra.mxu3 %v909_v7  ;;  %v867_v47 = vld [vmem:[%s1242_s0 + $0x34] sm:$0xf]  ;;  %v665_v48 = vld [vmem:[%s1242_s0 + $0x44] sm:$0xf0]  ;;  %v652_v51 = vor.u32 %v865_v46, %v651_v44  ;;  %v897_v55 = vld [vmem:[%s1240_s1 + $0x80] sm:$0xff] }
  0x10   :  { %v899_v49 = vld [vmem:[%s1240_s1 + $0x90] sm:$0xff]  ;;  %v668_v52 = vor.u32 %v867_v47, %v665_v48  ;;  %v898_v53 = vld [vmem:[%s1240_s1 + $0x88] sm:$0xff]  ;;  %v889_v56 = vld [vmem:[%s1240_s1 + $0x40] sm:$0xff] }
  0x11   :  { %v891_v50 = vld [vmem:[%s1240_s1 + $0x50] sm:$0xff]  ;;  %v890_v54 = vld [vmem:[%s1240_s1 + $0x48] sm:$0xff]  ;;  %v864_v58 = vld [vmem:[%s1242_s0 + $0x18] sm:$0xf0] }
  0x12   :  { %948 = vmatpush.bf16.msra.mxu1 %v884_v8  ;;  %949 = vmatpush.bf16.msra.mxu2 %v884_v8  ;;  %v643_v57 = vld [vmem:[%s1242_s0 + $0x8] sm:$0xf]  ;;  %v861_v60 = vld [vmem:[%s1242_s0 + $0x4] sm:$0xf]  ;;  %v637_v61 = vld [vmem:[%s1242_s0 + $0x14] sm:$0xf0] }
  0x13   :  { %448 = vmatpush.bf16.msra.mxu0 %v884_v8  ;;  %535 = vmatpush.bf16.msra.mxu3 %v908_v9  ;;  %v644_v59 = vor.u32 %v864_v58, %v643_v57  ;;  %v671_v62 = vld [vmem:[%s1242_s0 + $0x38] sm:$0xf]  ;;  %v640_v63 = vor.u32 %v861_v60, %v637_v61  ;;  %v870_v0 = vld [vmem:[%s1242_s0 + $0x48] sm:$0xf0]  ;;  %v872_v1 = vld [vmem:[%s1242_s0 + $0x5c] sm:$0xf] }
  0x14   :  { %v685_v2 = vld [vmem:[%s1242_s0 + $0x6c] sm:$0xf0]  ;;  %v672_v3 = vor.u32 %v870_v0, %v671_v62  ;;  %v869_v6 = vld [vmem:[%s1242_s0 + $0x40] sm:$0xf0]  ;;  %v866_v8 = vld [vmem:[%s1242_s0 + $0x2c] sm:$0xf] }
  0x15   :  { %v688_v4 = vor.u32 %v872_v1, %v685_v2  ;;  %v663_v5 = vld [vmem:[%s1242_s0 + $0x30] sm:$0xf]  ;;  %v657_v9 = vld [vmem:[%s1242_s0 + $0x3c] sm:$0xf0]  ;;  %v683_v17 = vld [vmem:[%s1242_s0 + $0x58] sm:$0xf] }
  0x16   :  { %950 = vmatpush.bf16.msra.mxu1 %v883_v10  ;;  %951 = vmatpush.bf16.msra.mxu2 %v883_v10  ;;  %v664_v7 = vor.u32 %v869_v6, %v663_v5  ;;  %v874_v18 = vld [vmem:[%s1242_s0 + $0x68] sm:$0xf0]  ;;  %v677_v21 = vld [vmem:[%s1242_s0 + $0x64] sm:$0xf0]  ;;  %v703_v26 = vld [vmem:[%s1242_s0 + $0x80] sm:$0xf] }
  0x17   :  { %449 = vmatpush.bf16.msra.mxu0 %v883_v10  ;;  %536 = vmatpush.bf16.msra.mxu3 %v907_v11  ;;  %v691_v10 = vld [vmem:[%s1242_s0 + $0x60] sm:$0xf]  ;;  %v660_v11 = vor.u32 %v866_v8, %v657_v9  ;;  %v879_v27 = vld [vmem:[%s1242_s0 + $0x90] sm:$0xf0] }
  0x1a   :  { %952 = vmatpush.bf16.msra.mxu1 %v882_v12  ;;  %953 = vmatpush.bf16.msra.mxu2 %v882_v12 }
  0x1b   :  { %450 = vmatpush.bf16.msra.mxu0 %v882_v12  ;;  %537 = vmatpush.bf16.msra.mxu3 %v906_v13  ;;  %v875_v12 = vld [vmem:[%s1242_s0 + $0x70] sm:$0xf0]  ;;  %v877_v13 = vld [vmem:[%s1242_s0 + $0x84] sm:$0xf] }
  0x1c   :  { %v692_v15 = vor.u32 %v875_v12, %v691_v10 }
  0x1e   :  { %954 = vmatpush.bf16.msra.mxu1 %v881_v14  ;;  %955 = vmatpush.bf16.msra.mxu2 %v881_v14 }
  0x1f   :  { %451 = vmatpush.bf16.msra.mxu0 %v881_v14  ;;  %538 = vmatpush.bf16.msra.mxu3 %v905_v22  ;;  %v705_v14 = vld [vmem:[%s1242_s0 + $0x94] sm:$0xf0] }
  0x20   :  { %v708_v16 = vor.u32 %v877_v13, %v705_v14 }
  0x21   :  { %457 = vmatmul.bf16.vlgmr.msra.gmra.mxu1 %v656_v23  ;;  %467 = vmatmul.bf16.vlgmr.msra.gmra.mxu2 %v696_v24  ;;  %v711_v23 = vld [vmem:[%s1242_s0 + $0x88] sm:$0xf]  ;;  %v880_v24 = vld [vmem:[%s1242_s0 + $0x98] sm:$0xf0] }
  0x22   :  { %502 = vmatpush.bf16.msrb.mxu2 %v904_v19  ;;  %473 = vmatpush.bf16.msrb.mxu1 %v896_v20  ;;  %v684_v19 = vor.u32 %v874_v18, %v683_v17  ;;  %v871_v20 = vld [vmem:[%s1242_s0 + $0x54] sm:$0xf]  ;;  %v712_v25 = vor.u32 %v880_v24, %v711_v23 }
  0x23   :  { %564 = vmatpush.bf16.msrb.mxu0 %v916_v28  ;;  %539 = vmatmul.bf16.vlgmr.msra.gmra.mxu3 %v648_v32  ;;  %v680_v22 = vor.u32 %v871_v20, %v677_v21  ;;  %v704_v28 = vor.u32 %v879_v27, %v703_v26 }
  0x24   :  { %452 = vmatmul.bf16.vlgmr.msra.gmra.mxu0 %v636_v31 }
  0x26   :  { %503 = vmatpush.bf16.msrb.mxu2 %v903_v29  ;;  %474 = vmatpush.bf16.msrb.mxu1 %v895_v30  ;;  %v876_v29 = vld [vmem:[%s1242_s0 + $0x7c] sm:$0xf]  ;;  %v697_v30 = vld [vmem:[%s1242_s0 + $0x8c] sm:$0xf0] }
  0x27   :  { %565 = vmatpush.bf16.msrb.mxu0 %v915_v33  ;;  %v700_v31 = vor.u32 %v876_v29, %v697_v30 }
  0x2a   :  { %504 = vmatpush.bf16.msrb.mxu2 %v902_v34  ;;  %475 = vmatpush.bf16.msrb.mxu1 %v894_v35 }
  0x2b   :  { %566 = vmatpush.bf16.msrb.mxu0 %v914_v36 }
  0x2e   :  { %505 = vmatpush.bf16.msrb.mxu2 %v901_v37  ;;  %476 = vmatpush.bf16.msrb.mxu1 %v893_v38 }
  0x2f   :  { %567 = vmatpush.bf16.msrb.mxu0 %v913_v41 }
  0x31   :  { %462 = vmatmul.bf16.gmra.mxu1 %v676_v45 }
  0x32   :  { %506 = vmatpush.bf16.msrb.mxu2 %v900_v42  ;;  %477 = vmatpush.bf16.msrb.mxu1 %v892_v43  ;;  %v1216_v42 = vld [vmem:[%s1241_s2] ss:$0 sm:$0xff] }
  0x33   :  { %544 = vmatmul.bf16.gmra.mxu3 %v668_v52 }
  0x34   :  { %857 = vmatmul.msk.bf16.vlgmr.msrb.gmra.mxu0 %vm431_vm0, %v652_v51 }
  0x36   :  { %507 = vmatpush.bf16.msrb.mxu2 %v899_v49  ;;  %478 = vmatpush.bf16.msrb.mxu1 %v891_v50 }
  0x3a   :  { %508 = vmatpush.bf16.msrb.mxu2 %v898_v53  ;;  %479 = vmatpush.bf16.msrb.mxu1 %v890_v54 }
  0x3e   :  { %509 = vmatpush.bf16.msrb.mxu2 %v897_v55  ;;  %480 = vmatpush.bf16.msrb.mxu1 %v889_v56 }
  0x41   :  { %510 = vmatmul.bf16.vlgmr.msrb.gmra.mxu2 %v644_v59  ;;  %481 = vmatmul.bf16.vlgmr.msrb.gmra.mxu1 %v640_v63 }
  0x43   :  { %549 = vmatmul.bf16.gmra.mxu3 %v688_v4 }
  0x44   :  { %858 = vmatmul.msk.bf16.gmra.mxu0 %vm431_vm0, %v672_v3 }
  0x51   :  { %515 = vmatmul.bf16.gmra.mxu2 %v664_v7  ;;  %486 = vmatmul.bf16.gmra.mxu1 %v660_v11 }
  0x53   :  { %554 = vmatmul.bf16.gmra.mxu3 %v708_v16 }
  0x54   :  { %859 = vmatmul.msk.bf16.gmra.mxu0 %vm431_vm0, %v692_v15 }
  0x61   :  { %520 = vmatmul.bf16.gmra.mxu2 %v684_v19  ;;  %491 = vmatmul.bf16.gmra.mxu1 %v680_v22 }
  0x64   :  { %860 = vmatmul.msk.bf16.gmra.mxu0 %vm431_vm0, %v712_v25 }
  0x71   :  { %525 = vmatmul.bf16.gmra.mxu2 %v704_v28  ;;  %496 = vmatmul.bf16.gmra.mxu1 %v700_v31 }
  0x9e   :  { %v458_v32 = vpop.f32.mrf.mxu1 }
  0x9f   :  { %v459_v60 = vadd.f32 %v1216_v42, %v458_v32 }
  0xa1   :  { %v453_v33 = vpop.f32.mrf.mxu0 }
  0xa2   :  { %v454_v43 = vadd.f32 %v1216_v42, %v453_v33 }
  0xa4   :  { %v1209_v37 = vpop.f32.mrf.mxu2 }
  0xa6   :  { %v460_v34 = vpop.f32.mrf.mxu1  ;;  %v540_v38 = vpop.f32.mrf.mxu3 }
  0xa7   :  { %v461_v8 = vadd.f32 %v1216_v42, %v460_v34 }
  0xa9   :  { %v455_v35 = vpop.f32.mrf.mxu0 }
  0xaa   :  { %v456_v50 = vadd.f32 %v1216_v42, %v455_v35 }
  0xac   :  { %v1211_v41 = vpop.f32.mrf.mxu2 }
  0xae   :  { %v463_v36 = vpop.f32.mrf.mxu1  ;;  %v542_v46 = vpop.f32.mrf.mxu3 }
  0xaf   :  { %v464_v17 = vadd.f32 %v1216_v42, %v463_v36 }
  0xb1   :  { %v569_v40 = vpop.f32.mrf.mxu0 }
  0xb6   :  { %v465_v39 = vpop.f32.mrf.mxu1  ;;  %v545_v55 = vpop.f32.mrf.mxu3 }
  0xb7   :  { %v466_v30 = vadd.f32 %v1216_v42, %v465_v39 }
  0xb9   :  { %v571_v48 = vpop.f32.mrf.mxu0 }
  0xbe   :  { %v482_v44 = vpop.f32.mrf.mxu1  ;;  %v547_v7 = vpop.f32.mrf.mxu3 }
  0xbf   :  { %v483_v45 = vadd.f32 %v482_v44, %v454_v43  ;;  %v469_v44 = vadd.f32 %v1216_v42, %v1209_v37 }
  0xc1   :  { %v574_v58 = vpop.f32.mrf.mxu0 }
  0xc4   :  { %v511_v47 = vpop.f32.mrf.mxu2 }
  0xc5   :  { %v512_v49 = vadd.f32 %v511_v47, %v483_v45 }
  0xc6   :  { %v484_v52 = vpop.f32.mrf.mxu1  ;;  %v550_v18 = vpop.f32.mrf.mxu3 }
  0xc7   :  { %v541_v51 = vadd.f32 %v540_v38, %v512_v49  ;;  %v485_v53 = vadd.f32 %v484_v52, %v456_v50 }
  0xc9   :  { %v570_v56 = vadd.f32 %v569_v40, %v541_v51  ;;  %v576_v9 = vpop.f32.mrf.mxu0 }
  0xcb   :  { %v597_v61 = vmul.f32 0.01, %v570_v56  ;;  %vm589_vm1 = vcmp.ge.f32.partialorder %v570_v56, 0.0 }
  0xcc   :  { %v513_v54 = vpop.f32.mrf.mxu2 }
  0xcd   :  { %v514_v57 = vadd.f32 %v513_v54, %v485_v53  ;;  %v605_v3 = vsel %vm589_vm1, %v570_v56, %v597_v61  ;;  %v471_v56 = vadd.f32 %v1216_v42, %v1211_v41 }
  0xce   :  { %v487_v63 = vpop.f32.mrf.mxu1  ;;  %v552_v33 = vpop.f32.mrf.mxu3 }
  0xcf   :  { %v543_v59 = vadd.f32 %v542_v46, %v514_v57  ;;  %v488_v0 = vadd.f32 %v487_v63, %v459_v60 }
  0xd1   :  { %v572_v62 = vadd.f32 %v571_v48, %v543_v59  ;;  %v579_v22 = vpop.f32.mrf.mxu0 }
  0xd3   :  { %vm590_vm2 = vcmp.ge.f32.partialorder %v572_v62, 0.0  ;;  %v598_v1 = vmul.f32 0.01, %v572_v62 }
  0xd4   :  { %v516_v2 = vpop.f32.mrf.mxu2 }
  0xd5   :  { %v606_v4 = vsel %vm590_vm2, %v572_v62, %v598_v1  ;;  %v517_v5 = vadd.f32 %v516_v2, %v488_v0 }
  0xd6   :  { %v920_v6 = vpack.c.bf16 %v606_v4, %v605_v3  ;;  %v489_v11 = vpop.f32.mrf.mxu1  ;;  %v555_v49 = vpop.f32.mrf.mxu3 }
  0xd7   :  { %v546_v10 = vadd.f32 %v545_v55, %v517_v5  ;;  %v490_v12 = vadd.f32 %v489_v11, %v461_v8 }
  0xd8   :  { %921 = vst [vmem:[%s1243_s3] sm:$0xff] %v920_v6  }
  0xd9   :  { %v575_v14 = vadd.f32 %v574_v58, %v546_v10  ;;  %v581_v35 = vpop.f32.mrf.mxu0 }
  0xdb   :  { %v599_v19 = vmul.f32 0.01, %v575_v14  ;;  %vm591_vm3 = vcmp.ge.f32.partialorder %v575_v14, 0.0 }
  0xdc   :  { %v518_v13 = vpop.f32.mrf.mxu2 }
  0xdd   :  { %v519_v15 = vadd.f32 %v518_v13, %v490_v12  ;;  %v607_v26 = vsel %vm591_vm3, %v575_v14, %v599_v19 }
  0xde   :  { %v492_v21 = vpop.f32.mrf.mxu1  ;;  %v557_v62 = vpop.f32.mrf.mxu3 }
  0xdf   :  { %v548_v16 = vadd.f32 %v547_v7, %v519_v15  ;;  %v493_v23 = vadd.f32 %v492_v21, %v464_v17 }
  0xe1   :  { %v577_v20 = vadd.f32 %v576_v9, %v548_v16  ;;  %v584_v55 = vpop.f32.mrf.mxu0 }
  0xe3   :  { %vm592_vm4 = vcmp.ge.f32.partialorder %v577_v20, 0.0  ;;  %v600_v24 = vmul.f32 0.01, %v577_v20 }
  0xe4   :  { %v521_v25 = vpop.f32.mrf.mxu2 }
  0xe5   :  { %v608_v27 = vsel %vm592_vm4, %v577_v20, %v600_v24  ;;  %v522_v28 = vadd.f32 %v521_v25, %v493_v23 }
  0xe6   :  { %v925_v29 = vpack.c.bf16 %v608_v27, %v607_v26  ;;  %v494_v32 = vpop.f32.mrf.mxu1 }
  0xe7   :  { %v551_v31 = vadd.f32 %v550_v18, %v522_v28  ;;  %v495_v34 = vadd.f32 %v494_v32, %v466_v30 }
  0xe8   :  { %937 = vst [vmem:[%s1243_s3 + $0x8] sm:$0xff] %v925_v29  }
  0xe9   :  { %v580_v38 = vadd.f32 %v579_v22, %v551_v31  ;;  %v586_v0 = vpop.f32.mrf.mxu0 }
  0xeb   :  { %v601_v45 = vmul.f32 0.01, %v580_v38  ;;  %vm593_vm5 = vcmp.ge.f32.partialorder %v580_v38, 0.0 }
  0xec   :  { %v523_v36 = vpop.f32.mrf.mxu2 }
  0xed   :  { %v524_v40 = vadd.f32 %v523_v36, %v495_v34  ;;  %v609_v51 = vsel %vm593_vm5, %v580_v38, %v601_v45 }
  0xee   :  { %v497_v47 = vpop.f32.mrf.mxu1 }
  0xef   :  { %v553_v43 = vadd.f32 %v552_v33, %v524_v40  ;;  %v498_v39 = vadd.f32 %v497_v47, %v469_v44 }
  0xf1   :  { %v582_v46 = vadd.f32 %v581_v35, %v553_v43 }
  0xf3   :  { %vm594_vm6 = vcmp.ge.f32.partialorder %v582_v46, 0.0  ;;  %v602_v48 = vmul.f32 0.01, %v582_v46 }
  0xf4   :  { %v526_v50 = vpop.f32.mrf.mxu2 }
  0xf5   :  { %v610_v52 = vsel %vm594_vm6, %v582_v46, %v602_v48  ;;  %v527_v53 = vadd.f32 %v526_v50, %v498_v39 }
  0xf6   :  { %v930_v54 = vpack.c.bf16 %v610_v52, %v609_v51  ;;  %v499_v57 = vpop.f32.mrf.mxu1 }
  0xf7   :  { %v556_v37 = vadd.f32 %v555_v49, %v527_v53  ;;  %v500_v58 = vadd.f32 %v499_v57, %v471_v56 }
  0xf8   :  { %938 = vst [vmem:[%s1243_s3 + $0x10] sm:$0xff] %v930_v54  }
  0xf9   :  { %v585_v60 = vadd.f32 %v584_v55, %v556_v37 }
  0xfb   :  { %v603_v1 = vmul.f32 0.01, %v585_v60  ;;  %vm595_vm7 = vcmp.ge.f32.partialorder %v585_v60, 0.0 }
  0xfc   :  { %v528_v59 = vpop.f32.mrf.mxu2 }
  0xfd   :  { %v529_v61 = vadd.f32 %v528_v59, %v500_v58  ;;  %v611_v4 = vsel %vm595_vm7, %v585_v60, %v603_v1 }
  0xff   :  { %v558_v63 = vadd.f32 %v557_v62, %v529_v61 }
 0x101   :  { %v587_v2 = vadd.f32 %v586_v0, %v558_v63 }
 0x103   :  { %vm596_vm8 = vcmp.ge.f32.partialorder %v587_v2, 0.0  ;;  %v604_v3 = vmul.f32 0.01, %v587_v2 }
 0x105   :  { %v612_v41 = vsel %vm596_vm8, %v587_v2, %v604_v3 }
 0x106   :  { %v935_v42 = vpack.c.bf16 %v612_v41, %v611_v4 }
 0x108   :  { %939 = vst [vmem:[%s1243_s3 + $0x18] sm:$0xff] %v935_v42  }

// kernel: pilotnet_mdn_forward.11
= control target key start
LH: loop header
LB: loop body
LE: loop exit
PB: predicated region body
PF: predicated region fallthrough
CT: control target
= control target key end

     0   :  { %s3077_s1 = inlined_call_operand.vmem [shape: bf16[1664,128], index: 1, kind: input, shape index: {}]   ;;  %s3078_s2 = inlined_call_operand.vmem [shape: f32[1,128], index: 2, kind: input, shape index: {}]   ;;  %s3079_s0 = inlined_call_operand.vmem [shape: bf16[16,1664], index: 0, kind: input, shape index: {}]   ;;  %s3080_s4 = inlined_call_operand.vmem [shape: f32[1,128], index: 4, kind: input, shape index: {}]   ;;  %s3081_s3 = inlined_call_operand.vmem [shape: bf16[128,128], index: 3, kind: input, shape index: {}]   ;;  %s3082_s5 = inlined_call_operand.vmem [shape: bf16[128,128], index: 5, kind: input, shape index: {}]   ;;  %s3083_s6 = inlined_call_operand.vmem [shape: f32[1,128], index: 6, kind: input, shape index: {}]   ;;  %s3084_s7 = inlined_call_operand.vmem [shape: bf16[128,384], index: 7, kind: input, shape index: {}]   ;;  %s3085_s8 = inlined_call_operand.vmem [shape: f32[1,384], index: 8, kind: input, shape index: {}]   ;;  %s3086_s11 = inlined_call_operand.vmem [shape: f32[16,128], index: 11, kind: output, shape index: {2}]   ;;  %s3087_s10 = inlined_call_operand.vmem [shape: f32[16,128], index: 10, kind: output, shape index: {1}]   ;;  %s3088_s9 = inlined_call_operand.vmem [shape: f32[16,128], index: 9, kind: output, shape index: {0}]  }
   0x1   :  { %v2245_v0 = vld [vmem:[%s3077_s1 + $0x38] sm:$0xff]  ;;  %v2244_v4 = vld [vmem:[%s3077_s1 + $0x30] sm:$0xff]  ;;  %v2243_v8 = vld [vmem:[%s3077_s1 + $0x28] sm:$0xff] }
   0x2   :  { %v2261_v1 = vld [vmem:[%s3077_s1 + $0xb8] sm:$0xff]  ;;  %951 = vmatpush.bf16.msra.mxu0 %v2245_v0  ;;  %v2260_v5 = vld [vmem:[%s3077_s1 + $0xb0] sm:$0xff]  ;;  %v2259_v9 = vld [vmem:[%s3077_s1 + $0xa8] sm:$0xff] }
   0x3   :  { %v2253_v2 = vld [vmem:[%s3077_s1 + $0x78] sm:$0xff]  ;;  %979 = vmatpush.bf16.msra.mxu2 %v2261_v1  ;;  %v2252_v6 = vld [vmem:[%s3077_s1 + $0x70] sm:$0xff]  ;;  %v2251_v10 = vld [vmem:[%s3077_s1 + $0x68] sm:$0xff] }
   0x4   :  { %v2269_v3 = vld [vmem:[%s3077_s1 + $0xf8] sm:$0xff]  ;;  %965 = vmatpush.bf16.msra.mxu1 %v2253_v2  ;;  %v2268_v7 = vld [vmem:[%s3077_s1 + $0xf0] sm:$0xff]  ;;  %v2267_v11 = vld [vmem:[%s3077_s1 + $0xe8] sm:$0xff] }
   0x5   :  { %993 = vmatpush.bf16.msra.mxu3 %v2269_v3  ;;  %v2242_v12 = vld [vmem:[%s3077_s1 + $0x20] sm:$0xff]  ;;  %v2241_v16 = vld [vmem:[%s3077_s1 + $0x18] sm:$0xff]  ;;  %v2240_v20 = vld [vmem:[%s3077_s1 + $0x10] sm:$0xff] }
   0x6   :  { %952 = vmatpush.bf16.msra.mxu0 %v2244_v4  ;;  %v2258_v13 = vld [vmem:[%s3077_s1 + $0xa0] sm:$0xff]  ;;  %v2257_v17 = vld [vmem:[%s3077_s1 + $0x98] sm:$0xff]  ;;  %v2256_v21 = vld [vmem:[%s3077_s1 + $0x90] sm:$0xff] }
   0x7   :  { %980 = vmatpush.bf16.msra.mxu2 %v2260_v5  ;;  %v2250_v14 = vld [vmem:[%s3077_s1 + $0x60] sm:$0xff]  ;;  %v2249_v18 = vld [vmem:[%s3077_s1 + $0x58] sm:$0xff]  ;;  %v2248_v22 = vld [vmem:[%s3077_s1 + $0x50] sm:$0xff] }
   0x8   :  { %966 = vmatpush.bf16.msra.mxu1 %v2252_v6  ;;  %v2266_v15 = vld [vmem:[%s3077_s1 + $0xe0] sm:$0xff]  ;;  %v2265_v19 = vld [vmem:[%s3077_s1 + $0xd8] sm:$0xff]  ;;  %v2264_v23 = vld [vmem:[%s3077_s1 + $0xd0] sm:$0xff] }
   0x9   :  { %994 = vmatpush.bf16.msra.mxu3 %v2268_v7  ;;  %v2239_v24 = vld [vmem:[%s3077_s1 + $0x8] sm:$0xff]  ;;  %v2238_v28 = vld [vmem:[%s3077_s1] sm:$0xff]  ;;  %v2277_v30 = vld [vmem:[%s3077_s1 + $0x138] sm:$0xff] }
   0xa   :  { %953 = vmatpush.bf16.msra.mxu0 %v2243_v8  ;;  %v2255_v25 = vld [vmem:[%s3077_s1 + $0x88] sm:$0xff]  ;;  %v2254_v29 = vld [vmem:[%s3077_s1 + $0x80] sm:$0xff]  ;;  %v2293_v31 = vld [vmem:[%s3077_s1 + $0x1b8] sm:$0xff] }
   0xb   :  { %981 = vmatpush.bf16.msra.mxu2 %v2259_v9  ;;  %v2247_v26 = vld [vmem:[%s3077_s1 + $0x48] sm:$0xff]  ;;  %v2246_v32 = vld [vmem:[%s3077_s1 + $0x40] sm:$0xff]  ;;  %v2231_v35 = vld [vmem:[%s3079_s0 + $0x30] sm:$0xf0] }
   0xc   :  { %967 = vmatpush.bf16.msra.mxu1 %v2251_v10  ;;  %v2263_v27 = vld [vmem:[%s3077_s1 + $0xc8] sm:$0xff]  ;;  %v2262_v33 = vld [vmem:[%s3077_s1 + $0xc0] sm:$0xff]  ;;  %v2232_v37 = vld [vmem:[%s3079_s0 + $0x38] sm:$0xf0] }
   0xd   :  { %995 = vmatpush.bf16.msra.mxu3 %v2267_v11  ;;  %v1599_v34 = vld [vmem:[%s3079_s0] sm:$0xf]  ;;  %v1607_v36 = vld [vmem:[%s3079_s0 + $0x8] sm:$0xf]  ;;  %v2285_v38 = vld [vmem:[%s3077_s1 + $0x178] sm:$0xff] }
   0xe   :  { %954 = vmatpush.bf16.msra.mxu0 %v2242_v12  ;;  %v2301_v39 = vld [vmem:[%s3077_s1 + $0x1f8] sm:$0xff]  ;;  %v2225_v40 = vld [vmem:[%s3079_s0 + $0x4] sm:$0xf]  ;;  %v2226_v42 = vld [vmem:[%s3079_s0 + $0xc] sm:$0xf]  ;;  %v1600_v44 = vor.u32 %v2231_v35, %v1599_v34  ;;  %v1608_v45 = vor.u32 %v2232_v37, %v1607_v36 }
   0xf   :  { %982 = vmatpush.bf16.msra.mxu2 %v2258_v13  ;;  %v1601_v41 = vld [vmem:[%s3079_s0 + $0x34] sm:$0xf0]  ;;  %v1609_v43 = vld [vmem:[%s3079_s0 + $0x3c] sm:$0xf0]  ;;  %v2276_v46 = vld [vmem:[%s3077_s1 + $0x130] sm:$0xff] }
  0x10   :  { %968 = vmatpush.bf16.msra.mxu1 %v2250_v14  ;;  %v2292_v47 = vld [vmem:[%s3077_s1 + $0x1b0] sm:$0xff]  ;;  %v1604_v48 = vor.u32 %v2225_v40, %v1601_v41  ;;  %v1612_v49 = vor.u32 %v2226_v42, %v1609_v43  ;;  %v2275_v52 = vld [vmem:[%s3077_s1 + $0x128] sm:$0xff]  ;;  %v2274_v56 = vld [vmem:[%s3077_s1 + $0x120] sm:$0xff] }
  0x11   :  { %996 = vmatpush.bf16.msra.mxu3 %v2266_v15  ;;  %v2284_v50 = vld [vmem:[%s3077_s1 + $0x170] sm:$0xff]  ;;  %v2291_v53 = vld [vmem:[%s3077_s1 + $0x1a8] sm:$0xff]  ;;  %v2290_v57 = vld [vmem:[%s3077_s1 + $0x1a0] sm:$0xff] }
  0x12   :  { %955 = vmatpush.bf16.msra.mxu0 %v2241_v16  ;;  %v2300_v51 = vld [vmem:[%s3077_s1 + $0x1f0] sm:$0xff]  ;;  %v2283_v54 = vld [vmem:[%s3077_s1 + $0x168] sm:$0xff]  ;;  %v2282_v58 = vld [vmem:[%s3077_s1 + $0x160] sm:$0xff] }
  0x13   :  { %983 = vmatpush.bf16.msra.mxu2 %v2257_v17  ;;  %v2299_v55 = vld [vmem:[%s3077_s1 + $0x1e8] sm:$0xff]  ;;  %v2298_v59 = vld [vmem:[%s3077_s1 + $0x1e0] sm:$0xff]  ;;  %v2273_v60 = vld [vmem:[%s3077_s1 + $0x118] sm:$0xff] }
  0x14   :  { %969 = vmatpush.bf16.msra.mxu1 %v2249_v18  ;;  %v2289_v61 = vld [vmem:[%s3077_s1 + $0x198] sm:$0xff]  ;;  %v2272_v0 = vld [vmem:[%s3077_s1 + $0x110] sm:$0xff]  ;;  %v2271_v4 = vld [vmem:[%s3077_s1 + $0x108] sm:$0xff] }
  0x15   :  { %997 = vmatpush.bf16.msra.mxu3 %v2265_v19  ;;  %v2281_v62 = vld [vmem:[%s3077_s1 + $0x158] sm:$0xff]  ;;  %v2288_v1 = vld [vmem:[%s3077_s1 + $0x190] sm:$0xff]  ;;  %v2287_v5 = vld [vmem:[%s3077_s1 + $0x188] sm:$0xff] }
  0x16   :  { %956 = vmatpush.bf16.msra.mxu0 %v2240_v20  ;;  %v2297_v63 = vld [vmem:[%s3077_s1 + $0x1d8] sm:$0xff]  ;;  %v2280_v2 = vld [vmem:[%s3077_s1 + $0x150] sm:$0xff]  ;;  %v2279_v6 = vld [vmem:[%s3077_s1 + $0x148] sm:$0xff] }
  0x17   :  { %984 = vmatpush.bf16.msra.mxu2 %v2256_v21  ;;  %v2296_v3 = vld [vmem:[%s3077_s1 + $0x1d0] sm:$0xff]  ;;  %v2295_v7 = vld [vmem:[%s3077_s1 + $0x1c8] sm:$0xff]  ;;  %v2270_v8 = vld [vmem:[%s3077_s1 + $0x100] sm:$0xff] }
  0x18   :  { %970 = vmatpush.bf16.msra.mxu1 %v2248_v22  ;;  %v2286_v9 = vld [vmem:[%s3077_s1 + $0x180] sm:$0xff]  ;;  %v2309_v10 = vld [vmem:[%s3077_s1 + $0x238] sm:$0xff]  ;;  %v1615_v12 = vld [vmem:[%s3079_s0 + $0x10] sm:$0xf] }
  0x19   :  { %998 = vmatpush.bf16.msra.mxu3 %v2264_v23  ;;  %v2325_v11 = vld [vmem:[%s3077_s1 + $0x2b8] sm:$0xff]  ;;  %v2233_v13 = vld [vmem:[%s3079_s0 + $0x40] sm:$0xf0]  ;;  %v2234_v15 = vld [vmem:[%s3079_s0 + $0x48] sm:$0xf0] }
  0x1a   :  { %957 = vmatpush.bf16.msra.mxu0 %v2239_v24  ;;  %v1623_v14 = vld [vmem:[%s3079_s0 + $0x18] sm:$0xf]  ;;  %v2278_v16 = vld [vmem:[%s3077_s1 + $0x140] sm:$0xff]  ;;  %v2227_v18 = vld [vmem:[%s3079_s0 + $0x14] sm:$0xf]  ;;  %v1616_v22 = vor.u32 %v2233_v13, %v1615_v12 }
  0x1b   :  { %985 = vmatpush.bf16.msra.mxu2 %v2255_v25  ;;  %v2294_v17 = vld [vmem:[%s3077_s1 + $0x1c0] sm:$0xff]  ;;  %v1617_v19 = vld [vmem:[%s3079_s0 + $0x44] sm:$0xf0]  ;;  %v2228_v20 = vld [vmem:[%s3079_s0 + $0x1c] sm:$0xf]  ;;  %v1624_v23 = vor.u32 %v2234_v15, %v1623_v14 }
  0x1c   :  { %971 = vmatpush.bf16.msra.mxu1 %v2247_v26  ;;  %v1625_v21 = vld [vmem:[%s3079_s0 + $0x4c] sm:$0xf0]  ;;  %v2317_v24 = vld [vmem:[%s3077_s1 + $0x278] sm:$0xff]  ;;  %v1620_v26 = vor.u32 %v2227_v18, %v1617_v19  ;;  %v2315_v34 = vld [vmem:[%s3077_s1 + $0x268] sm:$0xff] }
  0x1d   :  { %999 = vmatpush.bf16.msra.mxu3 %v2263_v27  ;;  %v2333_v25 = vld [vmem:[%s3077_s1 + $0x2f8] sm:$0xff]  ;;  %v1628_v27 = vor.u32 %v2228_v20, %v1625_v21  ;;  %v2331_v35 = vld [vmem:[%s3077_s1 + $0x2e8] sm:$0xff]  ;;  %v2306_v36 = vld [vmem:[%s3077_s1 + $0x220] sm:$0xff] }
  0x1e   :  { %958 = vmatpush.bf16.msra.mxu0 %v2238_v28  ;;  %v2308_v28 = vld [vmem:[%s3077_s1 + $0x230] sm:$0xff]  ;;  %v2322_v37 = vld [vmem:[%s3077_s1 + $0x2a0] sm:$0xff]  ;;  %v2305_v40 = vld [vmem:[%s3077_s1 + $0x218] sm:$0xff] }
  0x1f   :  { %986 = vmatpush.bf16.msra.mxu2 %v2254_v29  ;;  %v2324_v29 = vld [vmem:[%s3077_s1 + $0x2b0] sm:$0xff]  ;;  %v2321_v41 = vld [vmem:[%s3077_s1 + $0x298] sm:$0xff]  ;;  %v2237_v13 = vld [vmem:[%s3079_s0 + $0x60] sm:$0xf0] }
  0x20   :  { %972 = vmatpush.bf16.msra.mxu1 %v2246_v32  ;;  %v2307_v32 = vld [vmem:[%s3077_s1 + $0x228] sm:$0xff]  ;;  %v2313_v42 = vld [vmem:[%s3077_s1 + $0x258] sm:$0xff]  ;;  %v1647_v12 = vld [vmem:[%s3079_s0 + $0x30] sm:$0xf] }
  0x21   :  { %1000 = vmatpush.bf16.msra.mxu3 %v2262_v33  ;;  %959 = vmatmul.bf16.vlgmr.msra.gmra.mxu0 %v1600_v44  ;;  %v2323_v33 = vld [vmem:[%s3077_s1 + $0x2a8] sm:$0xff]  ;;  %v2329_v43 = vld [vmem:[%s3077_s1 + $0x2d8] sm:$0xff]  ;;  %v2304_v44 = vld [vmem:[%s3077_s1 + $0x210] sm:$0xff]  ;;  %v1648_v14 = vor.u32 %v2237_v13, %v1647_v12 }
  0x22   :  { %1007 = vmatpush.bf16.msrb.mxu0 %v2277_v30  ;;  %987 = vmatmul.bf16.vlgmr.msra.gmra.mxu2 %v1608_v45  ;;  %v2316_v30 = vld [vmem:[%s3077_s1 + $0x270] sm:$0xff] }
  0x23   :  { %1035 = vmatpush.bf16.msrb.mxu2 %v2293_v31  ;;  %973 = vmatmul.bf16.vlgmr.msra.gmra.mxu1 %v1604_v48  ;;  %v2332_v31 = vld [vmem:[%s3077_s1 + $0x2f0] sm:$0xff]  ;;  %v2303_v48 = vld [vmem:[%s3077_s1 + $0x208] sm:$0xff] }
  0x24   :  { %1021 = vmatpush.bf16.msrb.mxu1 %v2285_v38  ;;  %1001 = vmatmul.bf16.vlgmr.msra.gmra.mxu3 %v1612_v49  ;;  %v2314_v38 = vld [vmem:[%s3077_s1 + $0x260] sm:$0xff]  ;;  %v2320_v45 = vld [vmem:[%s3077_s1 + $0x290] sm:$0xff]  ;;  %v2319_v49 = vld [vmem:[%s3077_s1 + $0x288] sm:$0xff] }
  0x25   :  { %1049 = vmatpush.bf16.msrb.mxu3 %v2301_v39  ;;  %v2330_v39 = vld [vmem:[%s3077_s1 + $0x2e0] sm:$0xff]  ;;  %v2348_v20 = vld [vmem:[%s3081_s3 + $0x30] sm:$0xff] }
  0x26   :  { %1008 = vmatpush.bf16.msrb.mxu0 %v2276_v46  ;;  %v2312_v46 = vld [vmem:[%s3077_s1 + $0x250] sm:$0xff] }
  0x27   :  { %1036 = vmatpush.bf16.msrb.mxu2 %v2292_v47  ;;  %v2328_v47 = vld [vmem:[%s3077_s1 + $0x2d0] sm:$0xff] }
  0x28   :  { %1022 = vmatpush.bf16.msrb.mxu1 %v2284_v50  ;;  %v2311_v50 = vld [vmem:[%s3077_s1 + $0x248] sm:$0xff] }
  0x29   :  { %1050 = vmatpush.bf16.msrb.mxu3 %v2300_v51  ;;  %v2327_v51 = vld [vmem:[%s3077_s1 + $0x2c8] sm:$0xff] }
  0x2a   :  { %1009 = vmatpush.bf16.msrb.mxu0 %v2275_v52  ;;  %v2302_v52 = vld [vmem:[%s3077_s1 + $0x200] sm:$0xff] }
  0x2b   :  { %1037 = vmatpush.bf16.msrb.mxu2 %v2291_v53  ;;  %v2318_v53 = vld [vmem:[%s3077_s1 + $0x280] sm:$0xff] }
  0x2c   :  { %1023 = vmatpush.bf16.msrb.mxu1 %v2283_v54  ;;  %v2341_v54 = vld [vmem:[%s3077_s1 + $0x338] sm:$0xff] }
  0x2d   :  { %1051 = vmatpush.bf16.msrb.mxu3 %v2299_v55  ;;  %v1631_v55 = vld [vmem:[%s3079_s0 + $0x20] sm:$0xf] }
  0x2e   :  { %1010 = vmatpush.bf16.msrb.mxu0 %v2274_v56  ;;  %v2235_v56 = vld [vmem:[%s3079_s0 + $0x50] sm:$0xf0] }
  0x2f   :  { %1038 = vmatpush.bf16.msrb.mxu2 %v2290_v57  ;;  %v1639_v57 = vld [vmem:[%s3079_s0 + $0x28] sm:$0xf] }
  0x30   :  { %1024 = vmatpush.bf16.msrb.mxu1 %v2282_v58  ;;  %v2236_v58 = vld [vmem:[%s3079_s0 + $0x58] sm:$0xf0] }
  0x31   :  { %1052 = vmatpush.bf16.msrb.mxu3 %v2298_v59  ;;  %v2310_v59 = vld [vmem:[%s3077_s1 + $0x240] sm:$0xff] }
  0x32   :  { %1011 = vmatpush.bf16.msrb.mxu0 %v2273_v60  ;;  %v2326_v60 = vld [vmem:[%s3077_s1 + $0x2c0] sm:$0xff] }
  0x33   :  { %1039 = vmatpush.bf16.msrb.mxu2 %v2289_v61  ;;  %v2229_v61 = vld [vmem:[%s3079_s0 + $0x24] sm:$0xf] }
  0x34   :  { %1025 = vmatpush.bf16.msrb.mxu1 %v2281_v62  ;;  %v1633_v62 = vld [vmem:[%s3079_s0 + $0x54] sm:$0xf0] }
  0x35   :  { %1053 = vmatpush.bf16.msrb.mxu3 %v2297_v63  ;;  %v2230_v63 = vld [vmem:[%s3079_s0 + $0x2c] sm:$0xf] }
  0x36   :  { %1012 = vmatpush.bf16.msrb.mxu0 %v2272_v0  ;;  %v1641_v0 = vld [vmem:[%s3079_s0 + $0x5c] sm:$0xf0] }
  0x37   :  { %1040 = vmatpush.bf16.msrb.mxu2 %v2288_v1  ;;  %v1632_v1 = vor.u32 %v2235_v56, %v1631_v55 }
  0x38   :  { %1026 = vmatpush.bf16.msrb.mxu1 %v2280_v2  ;;  %v1640_v2 = vor.u32 %v2236_v58, %v1639_v57  ;;  %v2355_v58 = vld [vmem:[%s3082_s5 + $0x28] sm:$0xff] }
  0x39   :  { %1054 = vmatpush.bf16.msrb.mxu3 %v2296_v3  ;;  %v1636_v3 = vor.u32 %v2229_v61, %v1633_v62 }
  0x3a   :  { %1013 = vmatpush.bf16.msrb.mxu0 %v2271_v4  ;;  %v1644_v4 = vor.u32 %v2230_v63, %v1641_v0  ;;  %v2354_v0 = vld [vmem:[%s3082_s5 + $0x20] sm:$0xff] }
  0x3b   :  { %1041 = vmatpush.bf16.msrb.mxu2 %v2287_v5  ;;  %v2340_v5 = vld [vmem:[%s3077_s1 + $0x330] sm:$0xff] }
  0x3c   :  { %1027 = vmatpush.bf16.msrb.mxu1 %v2279_v6  ;;  %v2339_v6 = vld [vmem:[%s3077_s1 + $0x328] sm:$0xff] }
  0x3d   :  { %1055 = vmatpush.bf16.msrb.mxu3 %v2295_v7  ;;  %v2338_v7 = vld [vmem:[%s3077_s1 + $0x320] sm:$0xff] }
  0x3e   :  { %1014 = vmatpush.bf16.msrb.mxu0 %v2270_v8  ;;  %v2337_v8 = vld [vmem:[%s3077_s1 + $0x318] sm:$0xff] }
  0x3f   :  { %1042 = vmatpush.bf16.msrb.mxu2 %v2286_v9  ;;  %v2336_v9 = vld [vmem:[%s3077_s1 + $0x310] sm:$0xff] }
  0x40   :  { %1028 = vmatpush.bf16.msrb.mxu1 %v2278_v16 }
  0x41   :  { %1056 = vmatpush.bf16.msrb.mxu3 %v2294_v17  ;;  %1015 = vmatmul.bf16.vlgmr.msrb.gmra.mxu0 %v1616_v22  ;;  %v2349_v17 = vld [vmem:[%s3081_s3 + $0x38] sm:$0xff]  ;;  %v2347_v22 = vld [vmem:[%s3081_s3 + $0x28] sm:$0xff] }
  0x42   :  { %1063 = vmatpush.bf16.msra.mxu0 %v2309_v10  ;;  %1043 = vmatmul.bf16.vlgmr.msrb.gmra.mxu2 %v1624_v23  ;;  %v2335_v10 = vld [vmem:[%s3077_s1 + $0x308] sm:$0xff]  ;;  %v2382_v23 = vld [vmem:[%s3078_s2] ss:$0 sm:$0xff] }
  0x43   :  { %1091 = vmatpush.bf16.msra.mxu2 %v2325_v11  ;;  %1029 = vmatmul.bf16.vlgmr.msrb.gmra.mxu1 %v1620_v26  ;;  %v2334_v11 = vld [vmem:[%s3077_s1 + $0x300] sm:$0xff] }
  0x44   :  { %1077 = vmatpush.bf16.msra.mxu1 %v2317_v24  ;;  %1057 = vmatmul.bf16.vlgmr.msrb.gmra.mxu3 %v1628_v27 }
  0x45   :  { %1105 = vmatpush.bf16.msra.mxu3 %v2333_v25  ;;  %v2346_v25 = vld [vmem:[%s3081_s3 + $0x20] sm:$0xff] }
  0x46   :  { %1064 = vmatpush.bf16.msra.mxu0 %v2308_v28 }
  0x47   :  { %1092 = vmatpush.bf16.msra.mxu2 %v2324_v29 }
  0x48   :  { %1078 = vmatpush.bf16.msra.mxu1 %v2316_v30 }
  0x49   :  { %1106 = vmatpush.bf16.msra.mxu3 %v2332_v31  ;;  %v2345_v31 = vld [vmem:[%s3081_s3 + $0x18] sm:$0xff] }
  0x4a   :  { %1065 = vmatpush.bf16.msra.mxu0 %v2307_v32 }
  0x4b   :  { %1093 = vmatpush.bf16.msra.mxu2 %v2323_v33 }
  0x4c   :  { %1079 = vmatpush.bf16.msra.mxu1 %v2315_v34 }
  0x4d   :  { %1107 = vmatpush.bf16.msra.mxu3 %v2331_v35  ;;  %v2344_v35 = vld [vmem:[%s3081_s3 + $0x10] sm:$0xff] }
  0x4e   :  { %1066 = vmatpush.bf16.msra.mxu0 %v2306_v36 }
  0x4f   :  { %1094 = vmatpush.bf16.msra.mxu2 %v2322_v37 }
  0x50   :  { %1080 = vmatpush.bf16.msra.mxu1 %v2314_v38 }
  0x51   :  { %1108 = vmatpush.bf16.msra.mxu3 %v2330_v39 }
  0x52   :  { %1067 = vmatpush.bf16.msra.mxu0 %v2305_v40  ;;  %v2343_v40 = vld [vmem:[%s3081_s3 + $0x8] sm:$0xff] }
  0x53   :  { %1095 = vmatpush.bf16.msra.mxu2 %v2321_v41 }
  0x54   :  { %1081 = vmatpush.bf16.msra.mxu1 %v2313_v42 }
  0x55   :  { %1109 = vmatpush.bf16.msra.mxu3 %v2329_v43 }
  0x56   :  { %1068 = vmatpush.bf16.msra.mxu0 %v2304_v44  ;;  %v2342_v44 = vld [vmem:[%s3081_s3] sm:$0xff] }
  0x57   :  { %1096 = vmatpush.bf16.msra.mxu2 %v2320_v45 }
  0x58   :  { %1082 = vmatpush.bf16.msra.mxu1 %v2312_v46 }
  0x59   :  { %1110 = vmatpush.bf16.msra.mxu3 %v2328_v47 }
  0x5a   :  { %1069 = vmatpush.bf16.msra.mxu0 %v2303_v48 }
  0x5b   :  { %1097 = vmatpush.bf16.msra.mxu2 %v2319_v49 }
  0x5c   :  { %1083 = vmatpush.bf16.msra.mxu1 %v2311_v50  ;;  %v2357_v50 = vld [vmem:[%s3082_s5 + $0x38] sm:$0xff] }
  0x5d   :  { %1111 = vmatpush.bf16.msra.mxu3 %v2327_v51 }
  0x5e   :  { %1070 = vmatpush.bf16.msra.mxu0 %v2302_v52 }
  0x5f   :  { %1098 = vmatpush.bf16.msra.mxu2 %v2318_v53  ;;  %v2356_v53 = vld [vmem:[%s3082_s5 + $0x30] sm:$0xff] }
  0x60   :  { %1084 = vmatpush.bf16.msra.mxu1 %v2310_v59 }
  0x61   :  { %1112 = vmatpush.bf16.msra.mxu3 %v2326_v60  ;;  %1071 = vmatmul.bf16.vlgmr.msra.gmra.mxu0 %v1632_v1 }
  0x62   :  { %1119 = vmatpush.bf16.msrb.mxu0 %v2341_v54  ;;  %1099 = vmatmul.bf16.vlgmr.msra.gmra.mxu2 %v1640_v2 }
  0x63   :  { %1085 = vmatmul.bf16.vlgmr.msra.gmra.mxu1 %v1636_v3  ;;  %1297 = vmatpush.bf16.msrb.mxu2 %v2357_v50 }
  0x64   :  { %1113 = vmatmul.bf16.vlgmr.msra.gmra.mxu3 %v1644_v4  ;;  %1208 = vmatpush.bf16.msrb.mxu1 %v2349_v17 }
  0x66   :  { %1120 = vmatpush.bf16.msrb.mxu0 %v2340_v5 }
  0x67   :  { %1298 = vmatpush.bf16.msrb.mxu2 %v2356_v53  ;;  %v2383_v53 = vld [vmem:[%s3080_s4] ss:$0 sm:$0xff] }
  0x68   :  { %1209 = vmatpush.bf16.msrb.mxu1 %v2348_v20 }
  0x6a   :  { %1121 = vmatpush.bf16.msrb.mxu0 %v2339_v6 }
  0x6b   :  { %1299 = vmatpush.bf16.msrb.mxu2 %v2355_v58 }
  0x6c   :  { %1210 = vmatpush.bf16.msrb.mxu1 %v2347_v22  ;;  %v2352_v22 = vld [vmem:[%s3082_s5 + $0x10] sm:$0xff] }
  0x6e   :  { %1122 = vmatpush.bf16.msrb.mxu0 %v2338_v7 }
  0x6f   :  { %1300 = vmatpush.bf16.msrb.mxu2 %v2354_v0  ;;  %v2370_v0 = vld [vmem:[%s3084_s7 + $0x64] sm:$0xf] }
  0x70   :  { %1211 = vmatpush.bf16.msrb.mxu1 %v2346_v25  ;;  %v2215_v25 = vld [vmem:[%s3084_s7 + $0xa8] sm:$0xf] }
  0x72   :  { %1123 = vmatpush.bf16.msrb.mxu0 %v2337_v8 }
  0x74   :  { %1212 = vmatpush.bf16.msrb.mxu1 %v2345_v31  ;;  %v2381_v31 = vld [vmem:[%s3084_s7 + $0xb8] sm:$0xf0] }
  0x76   :  { %1124 = vmatpush.bf16.msrb.mxu0 %v2336_v9 }
  0x78   :  { %1213 = vmatpush.bf16.msrb.mxu1 %v2344_v35  ;;  %v2377_v35 = vld [vmem:[%s3084_s7 + $0x98] sm:$0xf0] }
  0x7a   :  { %1125 = vmatpush.bf16.msrb.mxu0 %v2335_v10 }
  0x7c   :  { %1214 = vmatpush.bf16.msrb.mxu1 %v2343_v40  ;;  %v2378_v40 = vld [vmem:[%s3084_s7 + $0xa0] sm:$0xf0] }
  0x7e   :  { %1126 = vmatpush.bf16.msrb.mxu0 %v2334_v11 }
  0x80   :  { %1215 = vmatpush.bf16.msrb.mxu1 %v2342_v44  ;;  %v2374_v44 = vld [vmem:[%s3084_s7 + $0x80] sm:$0xf0] }
  0x81   :  { %1127 = vmatmul.bf16.vlgmr.msrb.gmra.mxu0 %v1648_v14 }
  0x9e   :  { %v960_v15 = vpop.f32.mrf.mxu0 }
  0x9f   :  { %v961_v27 = vadd.f32 %v2382_v23, %v960_v15 }
  0xa0   :  { %v974_v16 = vpop.f32.mrf.mxu1 }
  0xa1   :  { %v975_v30 = vadd.f32 %v974_v16, %v961_v27  ;;  %v2379_v27 = vld [vmem:[%s3084_s7 + $0xac] sm:$0xf] }
  0xa5   :  { %v988_v18 = vpop.f32.mrf.mxu2 }
  0xa6   :  { %v962_v19 = vpop.f32.mrf.mxu0  ;;  %v989_v33 = vadd.f32 %v988_v18, %v975_v30  ;;  %v2223_v30 = vld [vmem:[%s3084_s7 + $0xb0] sm:$0xf] }
  0xa7   :  { %v1002_v21 = vpop.f32.mrf.mxu3  ;;  %v963_v34 = vadd.f32 %v2382_v23, %v962_v19  ;;  %v2351_v23 = vld [vmem:[%s3082_s5 + $0x8] sm:$0xff] }
  0xa8   :  { %v976_v24 = vpop.f32.mrf.mxu1  ;;  %v1003_v38 = vadd.f32 %v1002_v21, %v989_v33  ;;  %v2353_v21 = vld [vmem:[%s3082_s5 + $0x18] sm:$0xff]  ;;  %v2224_v33 = vor.u32 %v2381_v31, %v2223_v30  ;;  %v2151_v30 = vld [vmem:[%s3084_s7 + $0x20] sm:$0xf]  ;;  %v2363_v31 = vld [vmem:[%s3084_s7 + $0x28] sm:$0xf0] }
  0xa9   :  { %v977_v39 = vadd.f32 %v976_v24, %v963_v34  ;;  %1301 = vmatpush.bf16.msrb.mxu2 %v2353_v21  ;;  %v2350_v24 = vld [vmem:[%s3082_s5] sm:$0xff]  ;;  %v2203_v34 = vld [vmem:[%s3084_s7 + $0x90] sm:$0xf]  ;;  %v2163_v21 = vld [vmem:[%s3084_s7 + $0x38] sm:$0xf] }
  0xaa   :  { %1510 = vmatpush.bf16.msra.mxu1 %v2224_v33  ;;  %v2152_v33 = vor.u32 %v2363_v31, %v2151_v30 }
  0xad   :  { %v990_v26 = vpop.f32.mrf.mxu2  ;;  %1302 = vmatpush.bf16.msrb.mxu2 %v2352_v22  ;;  %v2366_v22 = vld [vmem:[%s3084_s7 + $0x40] sm:$0xf0] }
  0xae   :  { %v991_v42 = vadd.f32 %v990_v26, %v977_v39  ;;  %v2380_v26 = vld [vmem:[%s3084_s7 + $0xb0] sm:$0xf0]  ;;  %v2211_v39 = vld [vmem:[%s3084_s7 + $0x98] sm:$0xf] }
  0xaf   :  { %v1004_v29 = vpop.f32.mrf.mxu3 }
  0xb0   :  { %v1005_v48 = vadd.f32 %v1004_v29, %v991_v42  ;;  %v2217_v29 = vld [vmem:[%s3084_s7 + $0xb4] sm:$0xf0]  ;;  %v2212_v42 = vor.u32 %v2378_v40, %v2211_v39  ;;  %v2139_v39 = vld [vmem:[%s3084_s7 + $0x8] sm:$0xf]  ;;  %v2360_v40 = vld [vmem:[%s3084_s7 + $0x10] sm:$0xf0] }
  0xb1   :  { %1303 = vmatpush.bf16.msrb.mxu2 %v2351_v23 }
  0xb2   :  { %1511 = vmatpush.bf16.msra.mxu1 %v2212_v42  ;;  %v2140_v42 = vor.u32 %v2360_v40, %v2139_v39 }
  0xb5   :  { %1304 = vmatpush.bf16.msrb.mxu2 %v2350_v24  ;;  %v2164_v24 = vor.u32 %v2366_v22, %v2163_v21 }
  0xbe   :  { %v1016_v28 = vpop.f32.mrf.mxu0 }
  0xbf   :  { %v1017_v43 = vadd.f32 %v1016_v28, %v1003_v38  ;;  %v2216_v28 = vor.u32 %v2380_v26, %v2215_v25  ;;  %v2205_v38 = vld [vmem:[%s3084_s7 + $0x9c] sm:$0xf0]  ;;  %v2143_v25 = vld [vmem:[%s3084_s7 + $0x18] sm:$0xf]  ;;  %v2362_v26 = vld [vmem:[%s3084_s7 + $0x20] sm:$0xf0] }
  0xc0   :  { %v1030_v32 = vpop.f32.mrf.mxu1 }
  0xc1   :  { %v1031_v49 = vadd.f32 %v1030_v32, %v1017_v43  ;;  %v2220_v32 = vor.u32 %v2379_v27, %v2217_v29  ;;  %1482 = vmatpush.bf16.msrb.mxu3 %v2216_v28  ;;  %v2191_v43 = vld [vmem:[%s3084_s7 + $0x78] sm:$0xf]  ;;  %v2361_v27 = vld [vmem:[%s3084_s7 + $0x1c] sm:$0xf]  ;;  %v2144_v28 = vor.u32 %v2362_v26, %v2143_v25  ;;  %v2145_v29 = vld [vmem:[%s3084_s7 + $0x24] sm:$0xf0] }
  0xc3   :  { %1496 = vmatpush.bf16.msra.mxu0 %v2220_v32  ;;  %v2148_v32 = vor.u32 %v2361_v27, %v2145_v29 }
  0xc5   :  { %v1044_v36 = vpop.f32.mrf.mxu2 }
  0xc6   :  { %v1018_v37 = vpop.f32.mrf.mxu0  ;;  %v1045_v54 = vadd.f32 %v1044_v36, %v1031_v49  ;;  %v2376_v36 = vld [vmem:[%s3084_s7 + $0x94] sm:$0xf]  ;;  %v2192_v49 = vor.u32 %v2374_v44, %v2191_v43  ;;  %v2384_v44 = vld [vmem:[%s3083_s6] ss:$0 sm:$0xff] }
  0xc7   :  { %v1058_v41 = vpop.f32.mrf.mxu3  ;;  %v1019_v51 = vadd.f32 %v1018_v37, %v1005_v48  ;;  %v2204_v37 = vor.u32 %v2377_v35, %v2203_v34  ;;  %v2375_v48 = vld [vmem:[%s3084_s7 + $0x88] sm:$0xf0]  ;;  %v2131_v34 = vld [vmem:[%s3084_s7] sm:$0xf] }
  0xc8   :  { %v1032_v45 = vpop.f32.mrf.mxu1  ;;  %v1059_v59 = vadd.f32 %v1058_v41, %v1045_v54  ;;  %v2208_v41 = vor.u32 %v2376_v36, %v2205_v38  ;;  %v2359_v35 = vld [vmem:[%s3084_s7 + $0x8] sm:$0xf0]  ;;  %v2358_v36 = vld [vmem:[%s3084_s7 + $0x4] sm:$0xf]  ;;  %v2133_v38 = vld [vmem:[%s3084_s7 + $0xc] sm:$0xf0] }
  0xc9   :  { %v1033_v56 = vadd.f32 %v1032_v45, %v1019_v51  ;;  %v2373_v45 = vld [vmem:[%s3084_s7 + $0x7c] sm:$0xf]  ;;  %1483 = vmatpush.bf16.msrb.mxu3 %v2204_v37  ;;  %v2132_v37 = vor.u32 %v2359_v35, %v2131_v34 }
  0xca   :  { %1497 = vmatpush.bf16.msra.mxu0 %v2208_v41  ;;  %v2136_v41 = vor.u32 %v2358_v36, %v2133_v38 }
  0xcd   :  { %v1046_v46 = vpop.f32.mrf.mxu2  ;;  %1484 = vmatpush.bf16.msrb.mxu3 %v2192_v49 }
  0xce   :  { %v1047_v60 = vadd.f32 %v1046_v46, %v1033_v56  ;;  %v2193_v46 = vld [vmem:[%s3084_s7 + $0x84] sm:$0xf0] }
  0xcf   :  { %v1060_v52 = vpop.f32.mrf.mxu3  ;;  %v2196_v50 = vor.u32 %v2373_v45, %v2193_v46 }
  0xd0   :  { %v1061_v1 = vadd.f32 %v1060_v52, %v1047_v60 }
  0xd1   :  { %1498 = vmatpush.bf16.msra.mxu0 %v2196_v50 }
  0xde   :  { %v1072_v47 = vpop.f32.mrf.mxu0 }
  0xdf   :  { %v1073_v62 = vadd.f32 %v1072_v47, %v1059_v59  ;;  %v2199_v47 = vld [vmem:[%s3084_s7 + $0x80] sm:$0xf] }
  0xe0   :  { %v1086_v55 = vpop.f32.mrf.mxu1  ;;  %v2200_v51 = vor.u32 %v2375_v48, %v2199_v47 }
  0xe1   :  { %v1087_v2 = vadd.f32 %v1086_v55, %v1073_v62  ;;  %v2179_v62 = vld [vmem:[%s3084_s7 + $0x60] sm:$0xf] }
  0xe2   :  { %1512 = vmatpush.bf16.msra.mxu1 %v2200_v51  ;;  %v1346_v51 = vld [vmem:[%s3085_s8] sm:$0x7] }
  0xe5   :  { %v1100_v57 = vpop.f32.mrf.mxu2 }
  0xe6   :  { %v1074_v61 = vpop.f32.mrf.mxu0  ;;  %v1101_v5 = vadd.f32 %v1100_v57, %v1087_v2  ;;  %v2181_v2 = vld [vmem:[%s3084_s7 + $0x6c] sm:$0xf0] }
  0xe7   :  { %v1114_v63 = vpop.f32.mrf.mxu3  ;;  %v1075_v3 = vadd.f32 %v1074_v61, %v1061_v1 }
  0xe8   :  { %v1088_v4 = vpop.f32.mrf.mxu1  ;;  %v1115_v9 = vadd.f32 %v1114_v63, %v1101_v5  ;;  %v2371_v63 = vld [vmem:[%s3084_s7 + $0x68] sm:$0xf0]  ;;  %v2184_v5 = vor.u32 %v2370_v0, %v2181_v2 }
  0xe9   :  { %v1089_v8 = vadd.f32 %v1088_v4, %v1075_v3  ;;  %v2180_v1 = vor.u32 %v2371_v63, %v2179_v62  ;;  %v2187_v3 = vld [vmem:[%s3084_s7 + $0x68] sm:$0xf]  ;;  %v2372_v4 = vld [vmem:[%s3084_s7 + $0x70] sm:$0xf0] }
  0xea   :  { %1499 = vmatpush.bf16.msra.mxu0 %v2184_v5 }
  0xeb   :  { %1485 = vmatpush.bf16.msrb.mxu3 %v2180_v1 }
  0xed   :  { %v1102_v6 = vpop.f32.mrf.mxu2 }
  0xee   :  { %v1103_v10 = vadd.f32 %v1102_v6, %v1089_v8  ;;  %v2188_v6 = vor.u32 %v2372_v4, %v2187_v3  ;;  %v2368_v8 = vld [vmem:[%s3084_s7 + $0x50] sm:$0xf0] }
  0xef   :  { %v1116_v11 = vpop.f32.mrf.mxu3 }
  0xf0   :  { %v1117_v13 = vadd.f32 %v1116_v11, %v1103_v10  ;;  %1513 = vmatpush.bf16.msra.mxu1 %v2188_v6  ;;  %v2169_v11 = vld [vmem:[%s3084_s7 + $0x54] sm:$0xf0] }
  0xfe   :  { %v1128_v7 = vpop.f32.mrf.mxu0 }
  0xff   :  { %v1129_v12 = vadd.f32 %v1128_v7, %v1115_v9  ;;  %v2167_v7 = vld [vmem:[%s3084_s7 + $0x48] sm:$0xf]  ;;  %v2367_v9 = vld [vmem:[%s3084_s7 + $0x4c] sm:$0xf] }
 0x100   :  { %v2168_v10 = vor.u32 %v2368_v8, %v2167_v7 }
 0x101   :  { %v1135_v15 = vmul.f32 0.01, %v1129_v12  ;;  %vm1133_vm0 = vcmp.ge.f32.partialorder %v1129_v12, 0.0 }
 0x102   :  { %1486 = vmatpush.bf16.msrb.mxu3 %v2168_v10 }
 0x103   :  { %v1137_v18 = vsel %vm1133_vm0, %v1129_v12, %v1135_v15  ;;  %v2175_v12 = vld [vmem:[%s3084_s7 + $0x50] sm:$0xf] }
 0x106   :  { %v1130_v14 = vpop.f32.mrf.mxu0 }
 0x107   :  { %v1131_v16 = vadd.f32 %v1130_v14, %v1117_v13  ;;  %v2369_v13 = vld [vmem:[%s3084_s7 + $0x58] sm:$0xf0]  ;;  %v2172_v14 = vor.u32 %v2367_v9, %v2169_v11 }
 0x108   :  { %v2176_v15 = vor.u32 %v2369_v13, %v2175_v12 }
 0x109   :  { %vm1134_vm1 = vcmp.ge.f32.partialorder %v1131_v16, 0.0  ;;  %v1136_v17 = vmul.f32 0.01, %v1131_v16  ;;  %1500 = vmatpush.bf16.msra.mxu0 %v2172_v14 }
 0x10a   :  { %1514 = vmatpush.bf16.msra.mxu1 %v2176_v15 }
 0x10b   :  { %v1138_v19 = vsel %vm1134_vm1, %v1131_v16, %v1136_v17  ;;  %v2155_v16 = vld [vmem:[%s3084_s7 + $0x30] sm:$0xf]  ;;  %v2365_v17 = vld [vmem:[%s3084_s7 + $0x38] sm:$0xf0] }
 0x10c   :  { %v1139_v20 = vpack.c.bf16 %v1138_v19, %v1137_v18  ;;  %v2364_v18 = vld [vmem:[%s3084_s7 + $0x34] sm:$0xf]  ;;  %v2156_v19 = vor.u32 %v2365_v17, %v2155_v16 }
 0x10e   :  { %1216 = vmatmul.bf16.vlgmr.msrb.gmra.mxu1 %v1139_v20  ;;  %v2157_v20 = vld [vmem:[%s3084_s7 + $0x3c] sm:$0xf0]  ;;  %1487 = vmatpush.bf16.msrb.mxu3 %v2156_v19 }
 0x10f   :  { %v2160_v23 = vor.u32 %v2364_v18, %v2157_v20  ;;  %1515 = vmatpush.bf16.msra.mxu1 %v2164_v24 }
 0x111   :  { %1501 = vmatpush.bf16.msra.mxu0 %v2160_v23 }
 0x112   :  { %1488 = vmatpush.bf16.msrb.mxu3 %v2144_v28 }
 0x113   :  { %1516 = vmatpush.bf16.msra.mxu1 %v2152_v33 }
 0x115   :  { %1502 = vmatpush.bf16.msra.mxu0 %v2148_v32 }
 0x116   :  { %1489 = vmatpush.bf16.msrb.mxu3 %v2132_v37 }
 0x117   :  { %1517 = vmatpush.bf16.msra.mxu1 %v2140_v42 }
 0x119   :  { %1503 = vmatpush.bf16.msra.mxu0 %v2136_v41 }
 0x18b   :  { %v1217_v52 = vpop.f32.mrf.mxu1 }
 0x18c   :  { %v1218_v54 = vadd.f32 %v2383_v53, %v1217_v52  ;;  %v1349_v52 = vperm.slane %v1346_v51, 1 }
 0x18e   :  { %v1224_v56 = vmul.f32 0.01, %v1218_v54  ;;  %vm1222_vm2 = vcmp.ge.f32.partialorder %v1218_v54, 0.0 }
 0x190   :  { %v1226_v59 = vsel %vm1222_vm2, %v1218_v54, %v1224_v56  ;;  %v1524_v54 = vlaneseq }
 0x193   :  { %v1219_v55 = vpop.f32.mrf.mxu1 }
 0x194   :  { %v1220_v57 = vadd.f32 %v2383_v53, %v1219_v55  ;;  %v1350_v53 = vperm.slane %v1346_v51, 2 }
 0x196   :  { %vm1223_vm3 = vcmp.ge.f32.partialorder %v1220_v57, 0.0  ;;  %v1225_v58 = vmul.f32 0.01, %v1220_v57 }
 0x198   :  { %v1227_v60 = vsel %vm1223_vm3, %v1220_v57, %v1225_v58 }
 0x199   :  { %v1228_v61 = vpack.c.bf16 %v1227_v60, %v1226_v59  ;;  %v1525_v59 = vand.u32 127, %v1524_v54 }
 0x19b   :  { %1305 = vmatmul.bf16.vlgmr.msrb.gmra.mxu2 %v1228_v61  ;;  %v1348_v61 = vperm.slane %v1346_v51, 0  ;;  %vm1526_vm4 = vcmp.lt.s32.totalorder %v1525_v59, 3 }
 0x21e   :  { %v1306_v43 = vpop.f32.mrf.mxu2 }
 0x21f   :  { %v1307_v45 = vadd.f32 %v2384_v44, %v1306_v43 }
 0x221   :  { %2385 = vtanh.f32 %v1307_v45 }
 0x226   :  { %v1308_v46 = vpop.f32.mrf.mxu2 }
 0x227   :  { %v1309_v47 = vadd.f32 %v2384_v44, %v1308_v46  ;;  %v2386_v48 = vpop.eup %2385 }
 0x229   :  { %2387 = vtanh.f32 %v1309_v47 }
 0x22f   :  { %v2388_v49 = vpop.eup %2387 }
 0x230   :  { %v1313_v50 = vpack.c.bf16 %v2388_v49, %v2386_v48 }
 0x232   :  { %1490 = vmatmul.bf16.vlgmr.msrb.gmra.mxu3 %v1313_v50  ;;  %1504 = vmatmul.bf16.vlgmr.msra.gmra.mxu0 %v1313_v50 }
 0x233   :  { %1518 = vmatmul.bf16.vlgmr.msra.gmra.mxu1 %v1313_v50 }
 0x2af   :  { %v1505_v55 = vpop.f32.mrf.mxu0 }
 0x2b0   :  { %v1506_v56 = vadd.f32 %v1505_v55, %v1349_v52  ;;  %v1519_v57 = vpop.f32.mrf.mxu1 }
 0x2b1   :  { %v1520_v58 = vadd.f32 %v1519_v57, %v1350_v53 }
 0x2b2   :  { %v1577_v60 = vmul.f32 1.442695, %v1506_v56 }
 0x2b3   :  { %1583 = vst [vmem:[%s3086_s11] sm:$0xff] %v1520_v58 }
 0x2b4   :  { %2389 = vpow2.f32 %v1577_v60 }
 0x2b5   :  { %v1491_v62 = vpop.f32.mrf.mxu3 }
 0x2b6   :  { %v1492_v63 = vadd.f32 %v1491_v62, %v1348_v61 }
 0x2b7   :  { %v1507_v0 = vpop.f32.mrf.mxu0 }
 0x2b8   :  { %v1508_v1 = vadd.f32 %v1507_v0, %v1349_v52  ;;  %v1521_v2 = vpop.f32.mrf.mxu1  ;;  %v1527_v3 = vsel %vm1526_vm4, %v1492_v63, -1e+30 }
 0x2b9   :  { %v1522_v4 = vadd.f32 %v1521_v2, %v1350_v53  ;;  %1529 = vmax.xlane.f32.xlu0 %v1527_v3 }
 0x2ba   :  { %v2390_v5 = vpop.eup %2389  ;;  %v1579_v6 = vmul.f32 1.442695, %v1508_v1 }
 0x2bb   :  { %1581 = vst [vmem:[%s3087_s10] sm:$0xff] %v2390_v5 }
 0x2bc   :  { %2391 = vpow2.f32 %v1579_v6  ;;  %1584 = vst [vmem:[%s3086_s11 + $0x8] sm:$0xff] %v1522_v4 }
 0x2bd   :  { %v1493_v7 = vpop.f32.mrf.mxu3 }
 0x2be   :  { %v1494_v8 = vadd.f32 %v1493_v7, %v1348_v61 }
 0x2c0   :  { %v1528_v9 = vsel %vm1526_vm4, %v1494_v8, -1e+30 }
 0x2c1   :  { %1531 = vmax.xlane.f32.xlu0 %v1528_v9 }
 0x2c2   :  { %v2392_v10 = vpop.eup %2391 }
 0x2c3   :  { %1582 = vst [vmem:[%s3087_s10 + $0x8] sm:$0xff] %v2392_v10 }
 0x32c   :  { %v1530_v11 = vpop.xlane.xlu0 %1529 }
 0x32d   :  { %v1533_v12 = vsub.f32 %v1527_v3, %v1530_v11 }
 0x32f   :  { %v1535_v13 = vmul.f32 1.442695, %v1533_v12 }
 0x331   :  { %2393 = vpow2.f32 %v1535_v13 }
 0x334   :  { %v1532_v14 = vpop.xlane.xlu0 %1531 }
 0x335   :  { %v1534_v15 = vsub.f32 %v1528_v9, %v1532_v14 }
 0x337   :  { %v2394_v16 = vpop.eup %2393  ;;  %v1537_v17 = vmul.f32 1.442695, %v1534_v15 }
 0x338   :  { %v1539_v18 = vsel %vm1526_vm4, %v2394_v16, 0.0 }
 0x339   :  { %2395 = vpow2.f32 %v1537_v17  ;;  %1541 = vadd.xlane.f32.xlu1 %v1539_v18 }
 0x33f   :  { %v2396_v19 = vpop.eup %2395 }
 0x340   :  { %v1540_v20 = vsel %vm1526_vm4, %v2396_v19, 0.0 }
 0x341   :  { %1543 = vadd.xlane.f32.xlu1 %v1540_v20 }
 0x3ac   :  { %v1542_v21 = vpop.xlane.xlu1 %1541 }
 0x3ad   :  { %2397 = vrcp.f32 %v1542_v21  ;;  %v1556_v26 = vand.u32 2147483648, %v1542_v21  ;;  %v1554_v28 = vand.u32 2147483647, %v1542_v21  ;;  %vm1550_vm6 = vweird.f32 %v1542_v21 }
 0x3af   :  { %v1557_v31 = vor.u32 1.1754944e-38, %v1556_v26  ;;  %vm1555_vm8 = vcmp.eq.f32.partialorder %v1554_v28, 8.507059e+37 }
 0x3b3   :  { %v2398_v22 = vpop.eup %2397 }
 0x3b4   :  { %v1546_v23 = vmul.f32 %v2398_v22, %v1542_v21  ;;  %v1544_v24 = vpop.xlane.xlu1 %1543  ;;  %vm1551_vm5 = vweird.f32 %v2398_v22 }
 0x3b5   :  { %2399 = vrcp.f32 %v1544_v24  ;;  %vm1552_vm7 = vmor %vm1550_vm6, %vm1551_vm5  ;;  %v1571_v37 = vand.u32 2147483648, %v1544_v24  ;;  %v1569_v39 = vand.u32 2147483647, %v1544_v24  ;;  %vm1565_vm10 = vweird.f32 %v1544_v24 }
 0x3b6   :  { %v1547_v25 = vsub.f32 1.0, %v1546_v23 }
 0x3b7   :  { %v1572_v41 = vor.u32 1.1754944e-38, %v1571_v37  ;;  %vm1570_vm12 = vcmp.eq.f32.partialorder %v1569_v39, 8.507059e+37 }
 0x3b8   :  { %v1548_v27 = vmul.f32 %v2398_v22, %v1547_v25 }
 0x3ba   :  { %v1549_v29 = vadd.f32 %v2398_v22, %v1548_v27 }
 0x3bb   :  { %v2400_v30 = vpop.eup %2399 }
 0x3bc   :  { %v1553_v32 = vsel %vm1552_vm7, %v2398_v22, %v1549_v29  ;;  %v1561_v33 = vmul.f32 %v2400_v30, %v1544_v24  ;;  %vm1566_vm9 = vweird.f32 %v2400_v30 }
 0x3bd   :  { %v1558_v34 = vsel %vm1555_vm8, %v1557_v31, %v1553_v32  ;;  %vm1567_vm11 = vmor %vm1565_vm10, %vm1566_vm9 }
 0x3be   :  { %v1559_v35 = vmul.f32 %v1558_v34, %v1539_v18  ;;  %v1562_v36 = vsub.f32 1.0, %v1561_v33 }
 0x3c0   :  { %1575 = vst [vmem:[%s3088_s9] sm:$0xff] %v1559_v35  ;;  %v1563_v38 = vmul.f32 %v2400_v30, %v1562_v36 }
 0x3c2   :  { %v1564_v40 = vadd.f32 %v2400_v30, %v1563_v38 }
 0x3c4   :  { %v1568_v42 = vsel %vm1567_vm11, %v2400_v30, %v1564_v40 }
 0x3c5   :  { %v1573_v43 = vsel %vm1570_vm12, %v1572_v41, %v1568_v42 }
 0x3c6   :  { %v1574_v44 = vmul.f32 %v1573_v43, %v1540_v20 }
 0x3c8   :  { %1576 = vst [vmem:[%s3088_s9 + $0x8] sm:$0xff] %v1574_v44 }

</bundles_post_ra>
